<compile_context>
chip_gen: v5e
topology: v5e:2x2
jax: 0.10.0
libtpu: 0.0.40
codegen_flags: <defaults>
</compile_context>

<pallas_src>
import functools

import jax
import jax.numpy as jnp
from jax import lax
from jax.experimental import pallas as pl
from jax.experimental.pallas import tpu as pltpu

BN_EPS = 1e-5  # nn.BatchNorm1d default


# ----------------------------------------------------------------------------- kernels
def _attn_kernel(*refs, n_heads, d_k, d_v, scale, has_prev, emit_attn, compute_dtype):
    """One B-tile of: pre-norm (prev layer's BN, fused scale/shift) -> MHA -> residual.

    Emits the un-normalized residual output y, per-tile BN partial stats, and either
    the attention scores (intermediate layers, fed as `prev` downstream) or the
    attention weights (last layer).
    """
    if has_prev:
        (prev_ref, x_ref, psc_ref, psh_ref,
         wq_ref, wk_ref, wv_ref, bq_ref, bk_ref, bv_ref,
         wo_ref, bo_ref, y_ref, stats_ref, emit_ref) = refs
    else:
        prev_ref = None
        (x_ref, psc_ref, psh_ref,
         wq_ref, wk_ref, wv_ref, bq_ref, bk_ref, bv_ref,
         wo_ref, bo_ref, y_ref, stats_ref, emit_ref) = refs

    x = x_ref[...].astype(jnp.float32)                 # [bt, L, D]
    bt, L, D = x.shape
    H = n_heads

    # Fused BatchNorm of the previous layer (identity scale/shift for layer 0).
    xn = x * psc_ref[...] + psh_ref[...]               # [1, D] broadcasts over (bt, L)
    xc = xn.reshape(bt * L, D).astype(compute_dtype)

    # Q/K/V: three separate matmuls keep every output lane-aligned at offset 0
    # (H*d_k is not a multiple of 128 here).  bf16 operands, f32 accumulation.
    q = jnp.dot(xc, wq_ref[...], preferred_element_type=jnp.float32) + bq_ref[...]
    k = jnp.dot(xc, wk_ref[...], preferred_element_type=jnp.float32) + bk_ref[...]
    v = jnp.dot(xc, wv_ref[...], preferred_element_type=jnp.float32) + bv_ref[...]

    # [bt*L, H*d] -> [bt*H, L, d] so the attention einsums carry a single batch dim
    # (the known-good Mosaic batched-dot path).  A 'blhd,bmhd->bhlm' two-batch-dim
    # dot_general would remove these relayouts if/when supported.
    qh = q.reshape(bt, L, H, d_k).transpose(0, 2, 1, 3).reshape(bt * H, L, d_k)
    kh = k.reshape(bt, L, H, d_k).transpose(0, 2, 1, 3).reshape(bt * H, L, d_k)
    vh = v.reshape(bt, L, H, d_v).transpose(0, 2, 1, 3).reshape(bt * H, L, d_v)

    s = jnp.einsum('bid,bjd->bij',
                   qh.astype(compute_dtype), kh.astype(compute_dtype),
                   preferred_element_type=jnp.float32) * scale         # [bt*H, L, L]
    if has_prev:                                       # residual attention
        s = s + prev_ref[...].astype(jnp.float32)

    m = jnp.max(s, axis=-1, keepdims=True)
    e = jnp.exp(s - m)
    a = e / jnp.sum(e, axis=-1, keepdims=True)         # exact softmax (attn_dropout=0)

    o = jnp.einsum('bij,bjd->bid',
                   a.astype(compute_dtype), vh.astype(compute_dtype),
                   preferred_element_type=jnp.float32)                 # [bt*H, L, dv]
    o = o.reshape(bt, H, L, d_v).transpose(0, 2, 1, 3).reshape(bt * L, H * d_v)

    src2 = (jnp.dot(o.astype(compute_dtype), wo_ref[...],
                    preferred_element_type=jnp.float32) + bo_ref[...]).reshape(bt, L, D)
    y = xn + src2                                      # residual with the normalized input
    y_ref[...] = y.astype(y_ref.dtype)

    # Per-tile BatchNorm partial statistics (reduced across tiles outside the kernel).
    ym = y.reshape(bt * L, D)
    stats_ref[...] = jnp.concatenate(
        [jnp.sum(ym, axis=0, keepdims=True),
         jnp.sum(ym * ym, axis=0, keepdims=True)], axis=0)[None]

    emit_ref[...] = (a if emit_attn else s).astype(emit_ref.dtype)


def _ff_kernel(y_ref, sc_ref, sh_ref, w1_ref, b1_ref, w2_ref, b2_ref,
               z_ref, stats_ref, *, approx_gelu, compute_dtype):
    """One B-tile of: fused BN1 (scale/shift) -> Linear -> GELU -> Linear -> residual."""
    y = y_ref[...].astype(jnp.float32)                 # [bt, L, D]
    bt, L, D = y.shape

    yn = y * sc_ref[...] + sh_ref[...]                 # fused BatchNorm (single pass)
    h = jnp.dot(yn.reshape(bt * L, D).astype(compute_dtype), w1_ref[...],
                preferred_element_type=jnp.float32) + b1_ref[...]
    h = jax.nn.gelu(h, approximate=approx_gelu)        # tanh form -> EUP slot
    ff = (jnp.dot(h.astype(compute_dtype), w2_ref[...],
                  preferred_element_type=jnp.float32) + b2_ref[...]).reshape(bt, L, D)
    z = yn + ff
    z_ref[...] = z.astype(z_ref.dtype)

    zm = z.reshape(bt * L, D)
    stats_ref[...] = jnp.concatenate(
        [jnp.sum(zm, axis=0, keepdims=True),
         jnp.sum(zm * zm, axis=0, keepdims=True)], axis=0)[None]


def _norm_kernel(z_ref, sc_ref, sh_ref, out_ref):
    """Final fused BatchNorm (scale/shift) of the last layer."""
    out_ref[...] = (z_ref[...].astype(jnp.float32) * sc_ref[...]
                    + sh_ref[...]).astype(out_ref.dtype)


# ----------------------------------------------------------------------------- host glue
def _bn_affine(partial_stats, gamma, beta, count):
    """[n_tiles, 2, D] partial sums -> fused BN scale/shift (training-mode batch stats)."""
    tot = jnp.sum(partial_stats, axis=0)               # [2, D]
    mean = tot[0] / count
    var = jnp.maximum(tot[1] / count - mean * mean, 0.0)   # biased variance (torch train)
    sc = gamma.reshape(-1) * lax.rsqrt(var + BN_EPS)
    sh = beta.reshape(-1) - mean * sc
    return sc.reshape(1, -1), sh.reshape(1, -1)


def _tile_bytes(bt, L, D, H, d_k, d_v, d_ff):
    act = bt * L * D * 4
    sco = bt * H * L * L * 4
    qkv = 3 * bt * L * H * d_k * 4
    ffh = bt * L * d_ff * 4
    io = 2 * (2 * act + 2 * sco)                       # double-buffered in/out tiles
    inter = 4 * sco + 2 * qkv + 2 * act + 2 * ffh      # live intermediates (attn pass dominates)
    return io + inter


def _weight_bytes(D, H, d_k, d_v, d_ff):
    mm = (3 * D * H * d_k + H * d_v * D + 2 * D * d_ff) * 2   # bf16 matmul weights
    vec = (3 * H * d_k + d_ff + 5 * D) * 4                    # biases + scale/shift vectors
    return mm + vec


def _choose_block_b(B, L, D, H, d_k, d_v, d_ff, budget=40 * 2 ** 20):
    best = 1
    for cand in range(1, B + 1):
        if B % cand == 0 and _tile_bytes(cand, L, D, H, d_k, d_v, d_ff) <= budget:
            best = cand
    if best == B and B % 2 == 0:                       # keep >=2 tiles for pipelining / megacore
        best = B // 2
    return best


def _vmem_limit_bytes(bt, L, D, H, d_k, d_v, d_ff):
    need = _tile_bytes(bt, L, D, H, d_k, d_v, d_ff) + _weight_bytes(D, H, d_k, d_v, d_ff)
    return int(min(max(need + need // 2, 32 * 2 ** 20), 64 * 2 ** 20))


def _resident_spec(arr):
    n = arr.ndim

    def idx(i):
        return (0,) * n

    return pl.BlockSpec(arr.shape, idx)


# ----------------------------------------------------------------------------- forward
def gatei_encoder_forward(x, layer_params, *, n_heads, d_model,
                          block_b=None, compute_dtype=jnp.bfloat16, approx_gelu=True):
    """x: [bs, n_vars, d_model, patch_num] -> (z [bs, n_vars, d_model, patch_num], attn)."""
    bs, n_vars, D, patch_num = x.shape
    assert D == d_model
    B, L = bs * n_vars, patch_num
    H = n_heads
    n_layers = len(layer_params)
    d_k = d_v = d_model // n_heads
    scale = float(d_k ** -0.5)
    d_ff = layer_params[0]['w1'].shape[1]

    if block_b is None:
        block_b = _choose_block_b(B, L, D, H, d_k, d_v, d_ff)
    assert B % block_b == 0, "block_b must divide bs * n_vars"
    n_bt = B // block_b

    cparams = pltpu.CompilerParams(
        dimension_semantics=("parallel",),
        vmem_limit_bytes=_vmem_limit_bytes(block_b, L, D, H, d_k, d_v, d_ff))

    act_spec = pl.BlockSpec((block_b, L, D), lambda i: (i, 0, 0))
    sco_spec = pl.BlockSpec((block_b * H, L, L), lambda i: (i, 0, 0))
    stat_spec = pl.BlockSpec((1, 2, D), lambda i: (i, 0, 0))

    u = jnp.transpose(x, (0, 1, 3, 2)).reshape(B, L, D).astype(jnp.float32)

    # Pre-cast matmul weights to the MXU compute dtype once (halves their VMEM footprint).
    layers = []
    for p in layer_params:
        q = dict(p)
        for name in ('wq', 'wk', 'wv', 'wo', 'w1', 'w2'):
            q[name + '_c'] = p[name].astype(compute_dtype)
        layers.append(q)

    def attention_call(z_in, prev, p, pre_sc, pre_sh, emit_attn):
        has_prev = prev is not None
        kernel = functools.partial(
            _attn_kernel, n_heads=H, d_k=d_k, d_v=d_v, scale=scale,
            has_prev=has_prev, emit_attn=emit_attn, compute_dtype=compute_dtype)
        inputs, in_specs = [], []
        if has_prev:
            inputs.append(prev)
            in_specs.append(sco_spec)
        weights = (p['wq_c'], p['wk_c'], p['wv_c'], p['bq'], p['bk'], p['bv'],
                   p['wo_c'], p['bo'])
        inputs += [z_in, pre_sc, pre_sh, *weights]
        in_specs += [act_spec, _resident_spec(pre_sc), _resident_spec(pre_sh),
                     *[_resident_spec(w) for w in weights]]
        out_shape = (
            jax.ShapeDtypeStruct((B, L, D), jnp.float32),        # y = src + attn_out
            jax.ShapeDtypeStruct((n_bt, 2, D), jnp.float32),     # partial BN stats
            jax.ShapeDtypeStruct((B * H, L, L), jnp.float32),    # scores (mid) / attn (last)
        )
        return pl.pallas_call(
            kernel, out_shape=out_shape, grid=(n_bt,),
            in_specs=in_specs, out_specs=(act_spec, stat_spec, sco_spec),
            compiler_params=cparams)(*inputs)

    def ff_call(y, sc1, sh1, p):
        kernel = functools.partial(_ff_kernel, approx_gelu=approx_gelu,
                                   compute_dtype=compute_dtype)
        weights = (p['w1_c'], p['b1'], p['w2_c'], p['b2'])
        out_shape = (
            jax.ShapeDtypeStruct((B, L, D), jnp.float32),
            jax.ShapeDtypeStruct((n_bt, 2, D), jnp.float32),
        )
        return pl.pallas_call(
            kernel, out_shape=out_shape, grid=(n_bt,),
            in_specs=[act_spec, _resident_spec(sc1), _resident_spec(sh1),
                      *[_resident_spec(w) for w in weights]],
            out_specs=(act_spec, stat_spec),
            compiler_params=cparams)(y, sc1, sh1, *weights)

    def norm_call(z, sc, sh):
        return pl.pallas_call(
            _norm_kernel,
            out_shape=jax.ShapeDtypeStruct((B, L, D), jnp.float32),
            grid=(n_bt,),
            in_specs=[act_spec, _resident_spec(sc), _resident_spec(sh)],
            out_specs=act_spec,
            compiler_params=cparams)(z, sc, sh)

    count = float(B * L)
    pre_sc = jnp.ones((1, D), jnp.float32)    # layer-0 "pre-norm" is identity
    pre_sh = jnp.zeros((1, D), jnp.float32)
    z, prev, attn = u, None, None

    for li, p in enumerate(layers):
        emit_attn = (li == n_layers - 1)
        y, stats1, emitted = attention_call(z, prev, p, pre_sc, pre_sh, emit_attn)
        if emit_attn:
            attn = emitted
        else:
            prev = emitted                                   # residual-attention carry
        sc1, sh1 = _bn_affine(stats1, p['g1'], p['be1'], count)
        z, stats2 = ff_call(y, sc1, sh1, p)
        pre_sc, pre_sh = _bn_affine(stats2, p['g2'], p['be2'], count)

    out = norm_call(z, pre_sc, pre_sh)

    z_out = jnp.transpose(out.reshape(bs, n_vars, L, D), (0, 1, 3, 2))
    attn = attn.reshape(B, H, L, L)
    return z_out, attn


# ----------------------------------------------------------------------------- params
def init_layer_params(key, d_model, n_heads, d_ff):
    d_k = d_v = d_model // n_heads

    def lin(k, fan_in, fan_out):
        kw, kb = jax.random.split(k)
        w = jax.random.normal(kw, (fan_in, fan_out), jnp.float32) * 0.02
        b = jax.random.normal(kb, (1, fan_out), jnp.float32) * 0.02
        return w, b

    ks = jax.random.split(key, 6)
    wq, bq = lin(ks[0], d_model, n_heads * d_k)
    wk, bk = lin(ks[1], d_model, n_heads * d_k)
    wv, bv = lin(ks[2], d_model, n_heads * d_v)
    wo, bo = lin(ks[3], n_heads * d_v, d_model)
    w1, b1 = lin(ks[4], d_model, d_ff)
    w2, b2 = lin(ks[5], d_ff, d_model)
    # BatchNorm affine params (torch default init: weight=1, bias=0)
    g1 = jnp.ones((1, d_model), jnp.float32)
    be1 = jnp.zeros((1, d_model), jnp.float32)
    g2 = jnp.ones((1, d_model), jnp.float32)
    be2 = jnp.zeros((1, d_model), jnp.float32)
    return dict(wq=wq, bq=bq, wk=wk, bk=bk, wv=wv, bv=bv, wo=wo, bo=bo,
                g1=g1, be1=be1, w1=w1, b1=b1, w2=w2, b2=b2, g2=g2, be2=be2)


if __name__ == "__main__":
    # Small, module-consistent shapes.
    bs, n_vars = 2, 4            # batch, channels (c_in)
    d_model, patch_num = 32, 8   # hidden dim, number of patches (= q_len)
    n_heads, d_ff = 4, 64
    n_layers = 2
    # NOTE: W_pos / relative_bias_table / relative_index are created in __init__
    # but never used in the forward pass, so they are intentionally omitted.

    key = jax.random.PRNGKey(0)
    kx, kp = jax.random.split(key)
    x = jax.random.normal(kx, (bs, n_vars, d_model, patch_num), jnp.float32)
    layer_keys = jax.random.split(kp, n_layers)
    layer_params = [init_layer_params(k, d_model, n_heads, d_ff) for k in layer_keys]

    fwd = jax.jit(functools.partial(gatei_encoder_forward,
                                    n_heads=n_heads, d_model=d_model))
    z, attn = fwd(x, layer_params)
    jax.block_until_ready((z, attn))

    assert z.shape == (bs, n_vars, d_model, patch_num)
    assert attn.shape == (bs * n_vars, n_heads, patch_num, patch_num)
    assert bool(jnp.all(jnp.isfinite(z))) and bool(jnp.all(jnp.isfinite(attn)))
    print("KERNEL_OK")
</pallas_src>

<mosaic_0001>
module attributes {stable_mosaic.version = 11 : i64} {
  func.func @_attn_kernel(%arg0: i32, %arg1: memref<4x8x32xf32, #tpu.memory_space<vmem>>, %arg2: memref<1x32xf32, #tpu.memory_space<vmem>>, %arg3: memref<1x32xf32, #tpu.memory_space<vmem>>, %arg4: memref<32x32xbf16, #tpu.memory_space<vmem>>, %arg5: memref<32x32xbf16, #tpu.memory_space<vmem>>, %arg6: memref<32x32xbf16, #tpu.memory_space<vmem>>, %arg7: memref<1x32xf32, #tpu.memory_space<vmem>>, %arg8: memref<1x32xf32, #tpu.memory_space<vmem>>, %arg9: memref<1x32xf32, #tpu.memory_space<vmem>>, %arg10: memref<32x32xbf16, #tpu.memory_space<vmem>>, %arg11: memref<1x32xf32, #tpu.memory_space<vmem>>, %arg12: memref<4x8x32xf32, #tpu.memory_space<vmem>>, %arg13: memref<1x2x32xf32, #tpu.memory_space<vmem>>, %arg14: memref<16x8x8xf32, #tpu.memory_space<vmem>>) attributes {dimension_semantics = [#tpu.dimension_semantics<parallel>], iteration_bounds = array<i64: 2>, scalar_prefetch = 0 : i64, scratch_operands = 0 : i64, tpu.core_type = #tpu.core_type<tc>, window_params = [{transform_indices = @transform_0, window_bounds = array<i64: 4, 8, 32>}, {pipeline_mode = #tpu.pipeline_mode<synchronous>, transform_indices = @transform_1, window_bounds = array<i64: 1, 32>}, {pipeline_mode = #tpu.pipeline_mode<synchronous>, transform_indices = @transform_2, window_bounds = array<i64: 1, 32>}, {pipeline_mode = #tpu.pipeline_mode<synchronous>, transform_indices = @transform_3, window_bounds = array<i64: 32, 32>}, {pipeline_mode = #tpu.pipeline_mode<synchronous>, transform_indices = @transform_4, window_bounds = array<i64: 32, 32>}, {pipeline_mode = #tpu.pipeline_mode<synchronous>, transform_indices = @transform_5, window_bounds = array<i64: 32, 32>}, {pipeline_mode = #tpu.pipeline_mode<synchronous>, transform_indices = @transform_6, window_bounds = array<i64: 1, 32>}, {pipeline_mode = #tpu.pipeline_mode<synchronous>, transform_indices = @transform_7, window_bounds = array<i64: 1, 32>}, {pipeline_mode = #tpu.pipeline_mode<synchronous>, transform_indices = @transform_8, window_bounds = array<i64: 1, 32>}, {pipeline_mode = #tpu.pipeline_mode<synchronous>, transform_indices = @transform_9, window_bounds = array<i64: 32, 32>}, {pipeline_mode = #tpu.pipeline_mode<synchronous>, transform_indices = @transform_10, window_bounds = array<i64: 1, 32>}, {transform_indices = @transform_11, window_bounds = array<i64: 4, 8, 32>}, {transform_indices = @transform_12, window_bounds = array<i64: 1, 2, 32>}, {transform_indices = @transform_13, window_bounds = array<i64: 16, 8, 8>}]} {
    %c0 = arith.constant 0 : index
    %c0_0 = arith.constant 0 : index
    %c0_1 = arith.constant 0 : index
    %0 = vector.load %arg1[%c0, %c0_0, %c0_1] : memref<4x8x32xf32, #tpu.memory_space<vmem>>, vector<4x8x32xf32>
    %c0_2 = arith.constant 0 : index
    %c0_3 = arith.constant 0 : index
    %1 = vector.load %arg2[%c0_2, %c0_3] : memref<1x32xf32, #tpu.memory_space<vmem>>, vector<1x32xf32>
    %2 = vector.shape_cast %1 : vector<1x32xf32> to vector<1x1x32xf32>
    %3 = vector.broadcast %2 : vector<1x1x32xf32> to vector<4x8x32xf32>
    %4 = arith.mulf %0, %3 : vector<4x8x32xf32>
    %c0_4 = arith.constant 0 : index
    %c0_5 = arith.constant 0 : index
    %5 = vector.load %arg3[%c0_4, %c0_5] : memref<1x32xf32, #tpu.memory_space<vmem>>, vector<1x32xf32>
    %6 = vector.shape_cast %5 : vector<1x32xf32> to vector<1x1x32xf32>
    %7 = vector.broadcast %6 : vector<1x1x32xf32> to vector<4x8x32xf32>
    %8 = arith.addf %4, %7 : vector<4x8x32xf32>
    %9 = vector.shape_cast %8 : vector<4x8x32xf32> to vector<32x32xf32>
    %10 = arith.truncf %9 : vector<32x32xf32> to vector<32x32xbf16>
    %c0_6 = arith.constant 0 : index
    %c0_7 = arith.constant 0 : index
    %11 = vector.load %arg4[%c0_6, %c0_7] : memref<32x32xbf16, #tpu.memory_space<vmem>>, vector<32x32xbf16>
    %cst = arith.constant dense<0.000000e+00> : vector<32x32xf32>
    %12 = tpu.matmul %10, %11, %cst {dimension_numbers = #tpu.dot_dimension_numbers<[1], [0], [0], [1], [0, 0, 1, 1], [], []>} : vector<32x32xbf16>, vector<32x32xbf16>, vector<32x32xf32> -> vector<32x32xf32>
    %c0_8 = arith.constant 0 : index
    %c0_9 = arith.constant 0 : index
    %13 = vector.load %arg7[%c0_8, %c0_9] : memref<1x32xf32, #tpu.memory_space<vmem>>, vector<1x32xf32>
    %14 = vector.broadcast %13 : vector<1x32xf32> to vector<32x32xf32>
    %15 = arith.addf %12, %14 : vector<32x32xf32>
    %c0_10 = arith.constant 0 : index
    %c0_11 = arith.constant 0 : index
    %16 = vector.load %arg5[%c0_10, %c0_11] : memref<32x32xbf16, #tpu.memory_space<vmem>>, vector<32x32xbf16>
    %cst_12 = arith.constant dense<0.000000e+00> : vector<32x32xf32>
    %17 = tpu.matmul %10, %16, %cst_12 {dimension_numbers = #tpu.dot_dimension_numbers<[1], [0], [0], [1], [0, 0, 1, 1], [], []>} : vector<32x32xbf16>, vector<32x32xbf16>, vector<32x32xf32> -> vector<32x32xf32>
    %c0_13 = arith.constant 0 : index
    %c0_14 = arith.constant 0 : index
    %18 = vector.load %arg8[%c0_13, %c0_14] : memref<1x32xf32, #tpu.memory_space<vmem>>, vector<1x32xf32>
    %19 = vector.broadcast %18 : vector<1x32xf32> to vector<32x32xf32>
    %20 = arith.addf %17, %19 : vector<32x32xf32>
    %c0_15 = arith.constant 0 : index
    %c0_16 = arith.constant 0 : index
    %21 = vector.load %arg6[%c0_15, %c0_16] : memref<32x32xbf16, #tpu.memory_space<vmem>>, vector<32x32xbf16>
    %cst_17 = arith.constant dense<0.000000e+00> : vector<32x32xf32>
    %22 = tpu.matmul %10, %21, %cst_17 {dimension_numbers = #tpu.dot_dimension_numbers<[1], [0], [0], [1], [0, 0, 1, 1], [], []>} : vector<32x32xbf16>, vector<32x32xbf16>, vector<32x32xf32> -> vector<32x32xf32>
    %c0_18 = arith.constant 0 : index
    %c0_19 = arith.constant 0 : index
    %23 = vector.load %arg9[%c0_18, %c0_19] : memref<1x32xf32, #tpu.memory_space<vmem>>, vector<1x32xf32>
    %24 = vector.broadcast %23 : vector<1x32xf32> to vector<32x32xf32>
    %25 = arith.addf %22, %24 : vector<32x32xf32>
    %26 = vector.shape_cast %15 : vector<32x32xf32> to vector<4x8x4x8xf32>
    %27 = tpu.transpose %26, [0, 2, 1, 3] : vector<4x8x4x8xf32> -> vector<4x4x8x8xf32>
    %28 = vector.shape_cast %27 : vector<4x4x8x8xf32> to vector<16x8x8xf32>
    %29 = vector.shape_cast %20 : vector<32x32xf32> to vector<4x8x4x8xf32>
    %30 = tpu.transpose %29, [0, 2, 1, 3] : vector<4x8x4x8xf32> -> vector<4x4x8x8xf32>
    %31 = vector.shape_cast %30 : vector<4x4x8x8xf32> to vector<16x8x8xf32>
    %32 = vector.shape_cast %25 : vector<32x32xf32> to vector<4x8x4x8xf32>
    %33 = tpu.transpose %32, [0, 2, 1, 3] : vector<4x8x4x8xf32> -> vector<4x4x8x8xf32>
    %34 = vector.shape_cast %33 : vector<4x4x8x8xf32> to vector<16x8x8xf32>
    %35 = arith.truncf %28 : vector<16x8x8xf32> to vector<16x8x8xbf16>
    %36 = arith.truncf %31 : vector<16x8x8xf32> to vector<16x8x8xbf16>
    "tpu.trace_start"() <{level = 10 : i32, message = "bid,bjd->bij"}> : () -> ()
    %cst_20 = arith.constant dense<0.000000e+00> : vector<16x8x8xf32>
    %37 = tpu.matmul %35, %36, %cst_20 {dimension_numbers = #tpu.dot_dimension_numbers<[2], [2], [1], [1], [0, 0, 0, 1, 1, 1], [0], [0]>} : vector<16x8x8xbf16>, vector<16x8x8xbf16>, vector<16x8x8xf32> -> vector<16x8x8xf32>
    "tpu.trace_stop"() : () -> ()
    %cst_21 = arith.constant 0.353553385 : f32
    %38 = vector.broadcast %cst_21 : f32 to vector<16x8x8xf32>
    %39 = arith.mulf %37, %38 : vector<16x8x8xf32>
    %cst_22 = arith.constant dense<0xFF800000> : vector<16x8xf32>
    %40 = vector.multi_reduction <maximumf>, %39, %cst_22 [2] : vector<16x8x8xf32> to vector<16x8xf32>
    %41 = vector.shape_cast %40 : vector<16x8xf32> to vector<16x8x1xf32>
    %42 = vector.broadcast %41 : vector<16x8x1xf32> to vector<16x8x8xf32>
    %43 = arith.subf %39, %42 : vector<16x8x8xf32>
    %44 = math.exp %43 : vector<16x8x8xf32>
    %cst_23 = arith.constant dense<0.000000e+00> : vector<16x8xf32>
    %45 = vector.multi_reduction <add>, %44, %cst_23 [2] : vector<16x8x8xf32> to vector<16x8xf32>
    %46 = vector.shape_cast %45 : vector<16x8xf32> to vector<16x8x1xf32>
    %47 = vector.broadcast %46 : vector<16x8x1xf32> to vector<16x8x8xf32>
    %48 = arith.divf %44, %47 : vector<16x8x8xf32>
    %49 = arith.truncf %48 : vector<16x8x8xf32> to vector<16x8x8xbf16>
    %50 = arith.truncf %34 : vector<16x8x8xf32> to vector<16x8x8xbf16>
    "tpu.trace_start"() <{level = 10 : i32, message = "bij,bjd->bid"}> : () -> ()
    %cst_24 = arith.constant dense<0.000000e+00> : vector<16x8x8xf32>
    %51 = tpu.matmul %49, %50, %cst_24 {dimension_numbers = #tpu.dot_dimension_numbers<[2], [1], [1], [2], [0, 0, 0, 1, 1, 2], [0], [0]>} : vector<16x8x8xbf16>, vector<16x8x8xbf16>, vector<16x8x8xf32> -> vector<16x8x8xf32>
    "tpu.trace_stop"() : () -> ()
    %52 = vector.shape_cast %51 : vector<16x8x8xf32> to vector<4x4x8x8xf32>
    %53 = tpu.transpose %52, [0, 2, 1, 3] : vector<4x4x8x8xf32> -> vector<4x8x4x8xf32>
    %54 = vector.shape_cast %53 : vector<4x8x4x8xf32> to vector<32x32xf32>
    %55 = arith.truncf %54 : vector<32x32xf32> to vector<32x32xbf16>
    %c0_25 = arith.constant 0 : index
    %c0_26 = arith.constant 0 : index
    %56 = vector.load %arg10[%c0_25, %c0_26] : memref<32x32xbf16, #tpu.memory_space<vmem>>, vector<32x32xbf16>
    %cst_27 = arith.constant dense<0.000000e+00> : vector<32x32xf32>
    %57 = tpu.matmul %55, %56, %cst_27 {dimension_numbers = #tpu.dot_dimension_numbers<[1], [0], [0], [1], [0, 0, 1, 1], [], []>} : vector<32x32xbf16>, vector<32x32xbf16>, vector<32x32xf32> -> vector<32x32xf32>
    %c0_28 = arith.constant 0 : index
    %c0_29 = arith.constant 0 : index
    %58 = vector.load %arg11[%c0_28, %c0_29] : memref<1x32xf32, #tpu.memory_space<vmem>>, vector<1x32xf32>
    %59 = vector.broadcast %58 : vector<1x32xf32> to vector<32x32xf32>
    %60 = arith.addf %57, %59 : vector<32x32xf32>
    %61 = vector.shape_cast %60 : vector<32x32xf32> to vector<4x8x32xf32>
    %62 = arith.addf %8, %61 : vector<4x8x32xf32>
    %c0_30 = arith.constant 0 : index
    %c0_31 = arith.constant 0 : index
    %c0_32 = arith.constant 0 : index
    %63 = vector.load %arg12[%c0_30, %c0_31, %c0_32] : memref<4x8x32xf32, #tpu.memory_space<vmem>>, vector<4x8x32xf32>
    tpu.vector_store %arg12[%c0_30, %c0_31, %c0_32], %62 {strides = array<i32>} : memref<4x8x32xf32, #tpu.memory_space<vmem>>, vector<4x8x32xf32>,
    %64 = vector.shape_cast %62 : vector<4x8x32xf32> to vector<32x32xf32>
    %cst_33 = arith.constant dense<0.000000e+00> : vector<32xf32>
    %65 = vector.multi_reduction <add>, %64, %cst_33 [0] : vector<32x32xf32> to vector<32xf32>
    %66 = vector.shape_cast %65 : vector<32xf32> to vector<1x32xf32>
    %67 = arith.mulf %64, %64 : vector<32x32xf32>
    %cst_34 = arith.constant dense<0.000000e+00> : vector<32xf32>
    %68 = vector.multi_reduction <add>, %67, %cst_34 [0] : vector<32x32xf32> to vector<32xf32>
    %69 = vector.shape_cast %68 : vector<32xf32> to vector<1x32xf32>
    %70 = tpu.concatenate %66, %69 in 0 : vector<1x32xf32>, vector<1x32xf32> -> vector<2x32xf32>
    %71 = vector.shape_cast %70 : vector<2x32xf32> to vector<1x2x32xf32>
    %c0_35 = arith.constant 0 : index
    %c0_36 = arith.constant 0 : index
    %c0_37 = arith.constant 0 : index
    %72 = vector.load %arg13[%c0_35, %c0_36, %c0_37] : memref<1x2x32xf32, #tpu.memory_space<vmem>>, vector<1x2x32xf32>
    tpu.vector_store %arg13[%c0_35, %c0_36, %c0_37], %71 {strides = array<i32>} : memref<1x2x32xf32, #tpu.memory_space<vmem>>, vector<1x2x32xf32>,
    %c0_38 = arith.constant 0 : index
    %c0_39 = arith.constant 0 : index
    %c0_40 = arith.constant 0 : index
    %73 = vector.load %arg14[%c0_38, %c0_39, %c0_40] : memref<16x8x8xf32, #tpu.memory_space<vmem>>, vector<16x8x8xf32>
    tpu.vector_store %arg14[%c0_38, %c0_39, %c0_40], %39 {strides = array<i32>} : memref<16x8x8xf32, #tpu.memory_space<vmem>>, vector<16x8x8xf32>,
    return
  }
  func.func @transform_0(%arg0: i32) -> (i32, i32, i32) {
    %c0_i32 = arith.constant 0 : i32
    %c0_i32_0 = arith.constant 0 : i32
    %c0_i32_1 = arith.constant 0 : i32
    return %arg0, %c0_i32, %c0_i32_0 : i32, i32, i32
  }
  func.func @transform_1(%arg0: i32) -> (i32, i32) {
    %c0_i32 = arith.constant 0 : i32
    %c0_i32_0 = arith.constant 0 : i32
    %c0_i32_1 = arith.constant 0 : i32
    return %c0_i32, %c0_i32_0 : i32, i32
  }
  func.func @transform_2(%arg0: i32) -> (i32, i32) {
    %c0_i32 = arith.constant 0 : i32
    %c0_i32_0 = arith.constant 0 : i32
    %c0_i32_1 = arith.constant 0 : i32
    return %c0_i32, %c0_i32_0 : i32, i32
  }
  func.func @transform_3(%arg0: i32) -> (i32, i32) {
    %c0_i32 = arith.constant 0 : i32
    %c0_i32_0 = arith.constant 0 : i32
    %c0_i32_1 = arith.constant 0 : i32
    return %c0_i32, %c0_i32_0 : i32, i32
  }
  func.func @transform_4(%arg0: i32) -> (i32, i32) {
    %c0_i32 = arith.constant 0 : i32
    %c0_i32_0 = arith.constant 0 : i32
    %c0_i32_1 = arith.constant 0 : i32
    return %c0_i32, %c0_i32_0 : i32, i32
  }
  func.func @transform_5(%arg0: i32) -> (i32, i32) {
    %c0_i32 = arith.constant 0 : i32
    %c0_i32_0 = arith.constant 0 : i32
    %c0_i32_1 = arith.constant 0 : i32
    return %c0_i32, %c0_i32_0 : i32, i32
  }
  func.func @transform_6(%arg0: i32) -> (i32, i32) {
    %c0_i32 = arith.constant 0 : i32
    %c0_i32_0 = arith.constant 0 : i32
    %c0_i32_1 = arith.constant 0 : i32
    return %c0_i32, %c0_i32_0 : i32, i32
  }
  func.func @transform_7(%arg0: i32) -> (i32, i32) {
    %c0_i32 = arith.constant 0 : i32
    %c0_i32_0 = arith.constant 0 : i32
    %c0_i32_1 = arith.constant 0 : i32
    return %c0_i32, %c0_i32_0 : i32, i32
  }
  func.func @transform_8(%arg0: i32) -> (i32, i32) {
    %c0_i32 = arith.constant 0 : i32
    %c0_i32_0 = arith.constant 0 : i32
    %c0_i32_1 = arith.constant 0 : i32
    return %c0_i32, %c0_i32_0 : i32, i32
  }
  func.func @transform_9(%arg0: i32) -> (i32, i32) {
    %c0_i32 = arith.constant 0 : i32
    %c0_i32_0 = arith.constant 0 : i32
    %c0_i32_1 = arith.constant 0 : i32
    return %c0_i32, %c0_i32_0 : i32, i32
  }
  func.func @transform_10(%arg0: i32) -> (i32, i32) {
    %c0_i32 = arith.constant 0 : i32
    %c0_i32_0 = arith.constant 0 : i32
    %c0_i32_1 = arith.constant 0 : i32
    return %c0_i32, %c0_i32_0 : i32, i32
  }
  func.func @transform_11(%arg0: i32) -> (i32, i32, i32) {
    %c0_i32 = arith.constant 0 : i32
    %c0_i32_0 = arith.constant 0 : i32
    %c0_i32_1 = arith.constant 0 : i32
    return %arg0, %c0_i32, %c0_i32_0 : i32, i32, i32
  }
  func.func @transform_12(%arg0: i32) -> (i32, i32, i32) {
    %c0_i32 = arith.constant 0 : i32
    %c0_i32_0 = arith.constant 0 : i32
    %c0_i32_1 = arith.constant 0 : i32
    return %arg0, %c0_i32, %c0_i32_0 : i32, i32, i32
  }
  func.func @transform_13(%arg0: i32) -> (i32, i32, i32) {
    %c0_i32 = arith.constant 0 : i32
    %c0_i32_0 = arith.constant 0 : i32
    %c0_i32_1 = arith.constant 0 : i32
    return %arg0, %c0_i32, %c0_i32_0 : i32, i32, i32
  }
}

module attributes {stable_mosaic.version = 11 : i64} {
  func.func @_ff_kernel(%arg0: i32, %arg1: memref<4x8x32xf32, #tpu.memory_space<vmem>>, %arg2: memref<1x32xf32, #tpu.memory_space<vmem>>, %arg3: memref<1x32xf32, #tpu.memory_space<vmem>>, %arg4: memref<32x64xbf16, #tpu.memory_space<vmem>>, %arg5: memref<1x64xf32, #tpu.memory_space<vmem>>, %arg6: memref<64x32xbf16, #tpu.memory_space<vmem>>, %arg7: memref<1x32xf32, #tpu.memory_space<vmem>>, %arg8: memref<4x8x32xf32, #tpu.memory_space<vmem>>, %arg9: memref<1x2x32xf32, #tpu.memory_space<vmem>>) attributes {dimension_semantics = [#tpu.dimension_semantics<parallel>], iteration_bounds = array<i64: 2>, scalar_prefetch = 0 : i64, scratch_operands = 0 : i64, tpu.core_type = #tpu.core_type<tc>, window_params = [{transform_indices = @transform_0, window_bounds = array<i64: 4, 8, 32>}, {pipeline_mode = #tpu.pipeline_mode<synchronous>, transform_indices = @transform_1, window_bounds = array<i64: 1, 32>}, {pipeline_mode = #tpu.pipeline_mode<synchronous>, transform_indices = @transform_2, window_bounds = array<i64: 1, 32>}, {pipeline_mode = #tpu.pipeline_mode<synchronous>, transform_indices = @transform_3, window_bounds = array<i64: 32, 64>}, {pipeline_mode = #tpu.pipeline_mode<synchronous>, transform_indices = @transform_4, window_bounds = array<i64: 1, 64>}, {pipeline_mode = #tpu.pipeline_mode<synchronous>, transform_indices = @transform_5, window_bounds = array<i64: 64, 32>}, {pipeline_mode = #tpu.pipeline_mode<synchronous>, transform_indices = @transform_6, window_bounds = array<i64: 1, 32>}, {transform_indices = @transform_7, window_bounds = array<i64: 4, 8, 32>}, {transform_indices = @transform_8, window_bounds = array<i64: 1, 2, 32>}]} {
    %c0 = arith.constant 0 : index
    %c0_0 = arith.constant 0 : index
    %c0_1 = arith.constant 0 : index
    %0 = vector.load %arg1[%c0, %c0_0, %c0_1] : memref<4x8x32xf32, #tpu.memory_space<vmem>>, vector<4x8x32xf32>
    %c0_2 = arith.constant 0 : index
    %c0_3 = arith.constant 0 : index
    %1 = vector.load %arg2[%c0_2, %c0_3] : memref<1x32xf32, #tpu.memory_space<vmem>>, vector<1x32xf32>
    %2 = vector.shape_cast %1 : vector<1x32xf32> to vector<1x1x32xf32>
    %3 = vector.broadcast %2 : vector<1x1x32xf32> to vector<4x8x32xf32>
    %4 = arith.mulf %0, %3 : vector<4x8x32xf32>
    %c0_4 = arith.constant 0 : index
    %c0_5 = arith.constant 0 : index
    %5 = vector.load %arg3[%c0_4, %c0_5] : memref<1x32xf32, #tpu.memory_space<vmem>>, vector<1x32xf32>
    %6 = vector.shape_cast %5 : vector<1x32xf32> to vector<1x1x32xf32>
    %7 = vector.broadcast %6 : vector<1x1x32xf32> to vector<4x8x32xf32>
    %8 = arith.addf %4, %7 : vector<4x8x32xf32>
    %9 = vector.shape_cast %8 : vector<4x8x32xf32> to vector<32x32xf32>
    %10 = arith.truncf %9 : vector<32x32xf32> to vector<32x32xbf16>
    %c0_6 = arith.constant 0 : index
    %c0_7 = arith.constant 0 : index
    %11 = vector.load %arg4[%c0_6, %c0_7] : memref<32x64xbf16, #tpu.memory_space<vmem>>, vector<32x64xbf16>
    %cst = arith.constant dense<0.000000e+00> : vector<32x64xf32>
    %12 = tpu.matmul %10, %11, %cst {dimension_numbers = #tpu.dot_dimension_numbers<[1], [0], [0], [1], [0, 0, 1, 1], [], []>} : vector<32x32xbf16>, vector<32x64xbf16>, vector<32x64xf32> -> vector<32x64xf32>
    %c0_8 = arith.constant 0 : index
    %c0_9 = arith.constant 0 : index
    %13 = vector.load %arg5[%c0_8, %c0_9] : memref<1x64xf32, #tpu.memory_space<vmem>>, vector<1x64xf32>
    %14 = vector.broadcast %13 : vector<1x64xf32> to vector<32x64xf32>
    %15 = arith.addf %12, %14 : vector<32x64xf32>
    %16 = arith.mulf %15, %15 : vector<32x64xf32>
    %17 = arith.mulf %15, %16 : vector<32x64xf32>
    %cst_10 = arith.constant 4.471500e-02 : f32
    %18 = vector.broadcast %cst_10 : f32 to vector<32x64xf32>
    %19 = arith.mulf %18, %17 : vector<32x64xf32>
    %20 = arith.addf %15, %19 : vector<32x64xf32>
    %cst_11 = arith.constant 0.797884583 : f32
    %21 = vector.broadcast %cst_11 : f32 to vector<32x64xf32>
    %22 = arith.mulf %21, %20 : vector<32x64xf32>
    %23 = math.tanh %22 : vector<32x64xf32>
    %cst_12 = arith.constant 1.000000e+00 : f32
    %24 = vector.broadcast %cst_12 : f32 to vector<32x64xf32>
    %25 = arith.addf %24, %23 : vector<32x64xf32>
    %cst_13 = arith.constant 5.000000e-01 : f32
    %26 = vector.broadcast %cst_13 : f32 to vector<32x64xf32>
    %27 = arith.mulf %26, %25 : vector<32x64xf32>
    %28 = arith.mulf %15, %27 : vector<32x64xf32>
    %29 = arith.truncf %28 : vector<32x64xf32> to vector<32x64xbf16>
    %c0_14 = arith.constant 0 : index
    %c0_15 = arith.constant 0 : index
    %30 = vector.load %arg6[%c0_14, %c0_15] : memref<64x32xbf16, #tpu.memory_space<vmem>>, vector<64x32xbf16>
    %cst_16 = arith.constant dense<0.000000e+00> : vector<32x32xf32>
    %31 = tpu.matmul %29, %30, %cst_16 {dimension_numbers = #tpu.dot_dimension_numbers<[1], [0], [0], [1], [0, 0, 1, 1], [], []>} : vector<32x64xbf16>, vector<64x32xbf16>, vector<32x32xf32> -> vector<32x32xf32>
    %c0_17 = arith.constant 0 : index
    %c0_18 = arith.constant 0 : index
    %32 = vector.load %arg7[%c0_17, %c0_18] : memref<1x32xf32, #tpu.memory_space<vmem>>, vector<1x32xf32>
    %33 = vector.broadcast %32 : vector<1x32xf32> to vector<32x32xf32>
    %34 = arith.addf %31, %33 : vector<32x32xf32>
    %35 = vector.shape_cast %34 : vector<32x32xf32> to vector<4x8x32xf32>
    %36 = arith.addf %8, %35 : vector<4x8x32xf32>
    %c0_19 = arith.constant 0 : index
    %c0_20 = arith.constant 0 : index
    %c0_21 = arith.constant 0 : index
    %37 = vector.load %arg8[%c0_19, %c0_20, %c0_21] : memref<4x8x32xf32, #tpu.memory_space<vmem>>, vector<4x8x32xf32>
    tpu.vector_store %arg8[%c0_19, %c0_20, %c0_21], %36 {strides = array<i32>} : memref<4x8x32xf32, #tpu.memory_space<vmem>>, vector<4x8x32xf32>,
    %38 = vector.shape_cast %36 : vector<4x8x32xf32> to vector<32x32xf32>
    %cst_22 = arith.constant dense<0.000000e+00> : vector<32xf32>
    %39 = vector.multi_reduction <add>, %38, %cst_22 [0] : vector<32x32xf32> to vector<32xf32>
    %40 = vector.shape_cast %39 : vector<32xf32> to vector<1x32xf32>
    %41 = arith.mulf %38, %38 : vector<32x32xf32>
    %cst_23 = arith.constant dense<0.000000e+00> : vector<32xf32>
    %42 = vector.multi_reduction <add>, %41, %cst_23 [0] : vector<32x32xf32> to vector<32xf32>
    %43 = vector.shape_cast %42 : vector<32xf32> to vector<1x32xf32>
    %44 = tpu.concatenate %40, %43 in 0 : vector<1x32xf32>, vector<1x32xf32> -> vector<2x32xf32>
    %45 = vector.shape_cast %44 : vector<2x32xf32> to vector<1x2x32xf32>
    %c0_24 = arith.constant 0 : index
    %c0_25 = arith.constant 0 : index
    %c0_26 = arith.constant 0 : index
    %46 = vector.load %arg9[%c0_24, %c0_25, %c0_26] : memref<1x2x32xf32, #tpu.memory_space<vmem>>, vector<1x2x32xf32>
    tpu.vector_store %arg9[%c0_24, %c0_25, %c0_26], %45 {strides = array<i32>} : memref<1x2x32xf32, #tpu.memory_space<vmem>>, vector<1x2x32xf32>,
    return
  }
  func.func @transform_0(%arg0: i32) -> (i32, i32, i32) {
    %c0_i32 = arith.constant 0 : i32
    %c0_i32_0 = arith.constant 0 : i32
    %c0_i32_1 = arith.constant 0 : i32
    return %arg0, %c0_i32, %c0_i32_0 : i32, i32, i32
  }
  func.func @transform_1(%arg0: i32) -> (i32, i32) {
    %c0_i32 = arith.constant 0 : i32
    %c0_i32_0 = arith.constant 0 : i32
    %c0_i32_1 = arith.constant 0 : i32
    return %c0_i32, %c0_i32_0 : i32, i32
  }
  func.func @transform_2(%arg0: i32) -> (i32, i32) {
    %c0_i32 = arith.constant 0 : i32
    %c0_i32_0 = arith.constant 0 : i32
    %c0_i32_1 = arith.constant 0 : i32
    return %c0_i32, %c0_i32_0 : i32, i32
  }
  func.func @transform_3(%arg0: i32) -> (i32, i32) {
    %c0_i32 = arith.constant 0 : i32
    %c0_i32_0 = arith.constant 0 : i32
    %c0_i32_1 = arith.constant 0 : i32
    return %c0_i32, %c0_i32_0 : i32, i32
  }
  func.func @transform_4(%arg0: i32) -> (i32, i32) {
    %c0_i32 = arith.constant 0 : i32
    %c0_i32_0 = arith.constant 0 : i32
    %c0_i32_1 = arith.constant 0 : i32
    return %c0_i32, %c0_i32_0 : i32, i32
  }
  func.func @transform_5(%arg0: i32) -> (i32, i32) {
    %c0_i32 = arith.constant 0 : i32
    %c0_i32_0 = arith.constant 0 : i32
    %c0_i32_1 = arith.constant 0 : i32
    return %c0_i32, %c0_i32_0 : i32, i32
  }
  func.func @transform_6(%arg0: i32) -> (i32, i32) {
    %c0_i32 = arith.constant 0 : i32
    %c0_i32_0 = arith.constant 0 : i32
    %c0_i32_1 = arith.constant 0 : i32
    return %c0_i32, %c0_i32_0 : i32, i32
  }
  func.func @transform_7(%arg0: i32) -> (i32, i32, i32) {
    %c0_i32 = arith.constant 0 : i32
    %c0_i32_0 = arith.constant 0 : i32
    %c0_i32_1 = arith.constant 0 : i32
    return %arg0, %c0_i32, %c0_i32_0 : i32, i32, i32
  }
  func.func @transform_8(%arg0: i32) -> (i32, i32, i32) {
    %c0_i32 = arith.constant 0 : i32
    %c0_i32_0 = arith.constant 0 : i32
    %c0_i32_1 = arith.constant 0 : i32
    return %arg0, %c0_i32, %c0_i32_0 : i32, i32, i32
  }
}

module attributes {stable_mosaic.version = 11 : i64} {
  func.func @_attn_kernel(%arg0: i32, %arg1: memref<16x8x8xf32, #tpu.memory_space<vmem>>, %arg2: memref<4x8x32xf32, #tpu.memory_space<vmem>>, %arg3: memref<1x32xf32, #tpu.memory_space<vmem>>, %arg4: memref<1x32xf32, #tpu.memory_space<vmem>>, %arg5: memref<32x32xbf16, #tpu.memory_space<vmem>>, %arg6: memref<32x32xbf16, #tpu.memory_space<vmem>>, %arg7: memref<32x32xbf16, #tpu.memory_space<vmem>>, %arg8: memref<1x32xf32, #tpu.memory_space<vmem>>, %arg9: memref<1x32xf32, #tpu.memory_space<vmem>>, %arg10: memref<1x32xf32, #tpu.memory_space<vmem>>, %arg11: memref<32x32xbf16, #tpu.memory_space<vmem>>, %arg12: memref<1x32xf32, #tpu.memory_space<vmem>>, %arg13: memref<4x8x32xf32, #tpu.memory_space<vmem>>, %arg14: memref<1x2x32xf32, #tpu.memory_space<vmem>>, %arg15: memref<16x8x8xf32, #tpu.memory_space<vmem>>) attributes {dimension_semantics = [#tpu.dimension_semantics<parallel>], iteration_bounds = array<i64: 2>, scalar_prefetch = 0 : i64, scratch_operands = 0 : i64, tpu.core_type = #tpu.core_type<tc>, window_params = [{transform_indices = @transform_0, window_bounds = array<i64: 16, 8, 8>}, {transform_indices = @transform_1, window_bounds = array<i64: 4, 8, 32>}, {pipeline_mode = #tpu.pipeline_mode<synchronous>, transform_indices = @transform_2, window_bounds = array<i64: 1, 32>}, {pipeline_mode = #tpu.pipeline_mode<synchronous>, transform_indices = @transform_3, window_bounds = array<i64: 1, 32>}, {pipeline_mode = #tpu.pipeline_mode<synchronous>, transform_indices = @transform_4, window_bounds = array<i64: 32, 32>}, {pipeline_mode = #tpu.pipeline_mode<synchronous>, transform_indices = @transform_5, window_bounds = array<i64: 32, 32>}, {pipeline_mode = #tpu.pipeline_mode<synchronous>, transform_indices = @transform_6, window_bounds = array<i64: 32, 32>}, {pipeline_mode = #tpu.pipeline_mode<synchronous>, transform_indices = @transform_7, window_bounds = array<i64: 1, 32>}, {pipeline_mode = #tpu.pipeline_mode<synchronous>, transform_indices = @transform_8, window_bounds = array<i64: 1, 32>}, {pipeline_mode = #tpu.pipeline_mode<synchronous>, transform_indices = @transform_9, window_bounds = array<i64: 1, 32>}, {pipeline_mode = #tpu.pipeline_mode<synchronous>, transform_indices = @transform_10, window_bounds = array<i64: 32, 32>}, {pipeline_mode = #tpu.pipeline_mode<synchronous>, transform_indices = @transform_11, window_bounds = array<i64: 1, 32>}, {transform_indices = @transform_12, window_bounds = array<i64: 4, 8, 32>}, {transform_indices = @transform_13, window_bounds = array<i64: 1, 2, 32>}, {transform_indices = @transform_14, window_bounds = array<i64: 16, 8, 8>}]} {
    %c0 = arith.constant 0 : index
    %c0_0 = arith.constant 0 : index
    %c0_1 = arith.constant 0 : index
    %0 = vector.load %arg2[%c0, %c0_0, %c0_1] : memref<4x8x32xf32, #tpu.memory_space<vmem>>, vector<4x8x32xf32>
    %c0_2 = arith.constant 0 : index
    %c0_3 = arith.constant 0 : index
    %1 = vector.load %arg3[%c0_2, %c0_3] : memref<1x32xf32, #tpu.memory_space<vmem>>, vector<1x32xf32>
    %2 = vector.shape_cast %1 : vector<1x32xf32> to vector<1x1x32xf32>
    %3 = vector.broadcast %2 : vector<1x1x32xf32> to vector<4x8x32xf32>
    %4 = arith.mulf %0, %3 : vector<4x8x32xf32>
    %c0_4 = arith.constant 0 : index
    %c0_5 = arith.constant 0 : index
    %5 = vector.load %arg4[%c0_4, %c0_5] : memref<1x32xf32, #tpu.memory_space<vmem>>, vector<1x32xf32>
    %6 = vector.shape_cast %5 : vector<1x32xf32> to vector<1x1x32xf32>
    %7 = vector.broadcast %6 : vector<1x1x32xf32> to vector<4x8x32xf32>
    %8 = arith.addf %4, %7 : vector<4x8x32xf32>
    %9 = vector.shape_cast %8 : vector<4x8x32xf32> to vector<32x32xf32>
    %10 = arith.truncf %9 : vector<32x32xf32> to vector<32x32xbf16>
    %c0_6 = arith.constant 0 : index
    %c0_7 = arith.constant 0 : index
    %11 = vector.load %arg5[%c0_6, %c0_7] : memref<32x32xbf16, #tpu.memory_space<vmem>>, vector<32x32xbf16>
    %cst = arith.constant dense<0.000000e+00> : vector<32x32xf32>
    %12 = tpu.matmul %10, %11, %cst {dimension_numbers = #tpu.dot_dimension_numbers<[1], [0], [0], [1], [0, 0, 1, 1], [], []>} : vector<32x32xbf16>, vector<32x32xbf16>, vector<32x32xf32> -> vector<32x32xf32>
    %c0_8 = arith.constant 0 : index
    %c0_9 = arith.constant 0 : index
    %13 = vector.load %arg8[%c0_8, %c0_9] : memref<1x32xf32, #tpu.memory_space<vmem>>, vector<1x32xf32>
    %14 = vector.broadcast %13 : vector<1x32xf32> to vector<32x32xf32>
    %15 = arith.addf %12, %14 : vector<32x32xf32>
    %c0_10 = arith.constant 0 : index
    %c0_11 = arith.constant 0 : index
    %16 = vector.load %arg6[%c0_10, %c0_11] : memref<32x32xbf16, #tpu.memory_space<vmem>>, vector<32x32xbf16>
    %cst_12 = arith.constant dense<0.000000e+00> : vector<32x32xf32>
    %17 = tpu.matmul %10, %16, %cst_12 {dimension_numbers = #tpu.dot_dimension_numbers<[1], [0], [0], [1], [0, 0, 1, 1], [], []>} : vector<32x32xbf16>, vector<32x32xbf16>, vector<32x32xf32> -> vector<32x32xf32>
    %c0_13 = arith.constant 0 : index
    %c0_14 = arith.constant 0 : index
    %18 = vector.load %arg9[%c0_13, %c0_14] : memref<1x32xf32, #tpu.memory_space<vmem>>, vector<1x32xf32>
    %19 = vector.broadcast %18 : vector<1x32xf32> to vector<32x32xf32>
    %20 = arith.addf %17, %19 : vector<32x32xf32>
    %c0_15 = arith.constant 0 : index
    %c0_16 = arith.constant 0 : index
    %21 = vector.load %arg7[%c0_15, %c0_16] : memref<32x32xbf16, #tpu.memory_space<vmem>>, vector<32x32xbf16>
    %cst_17 = arith.constant dense<0.000000e+00> : vector<32x32xf32>
    %22 = tpu.matmul %10, %21, %cst_17 {dimension_numbers = #tpu.dot_dimension_numbers<[1], [0], [0], [1], [0, 0, 1, 1], [], []>} : vector<32x32xbf16>, vector<32x32xbf16>, vector<32x32xf32> -> vector<32x32xf32>
    %c0_18 = arith.constant 0 : index
    %c0_19 = arith.constant 0 : index
    %23 = vector.load %arg10[%c0_18, %c0_19] : memref<1x32xf32, #tpu.memory_space<vmem>>, vector<1x32xf32>
    %24 = vector.broadcast %23 : vector<1x32xf32> to vector<32x32xf32>
    %25 = arith.addf %22, %24 : vector<32x32xf32>
    %26 = vector.shape_cast %15 : vector<32x32xf32> to vector<4x8x4x8xf32>
    %27 = tpu.transpose %26, [0, 2, 1, 3] : vector<4x8x4x8xf32> -> vector<4x4x8x8xf32>
    %28 = vector.shape_cast %27 : vector<4x4x8x8xf32> to vector<16x8x8xf32>
    %29 = vector.shape_cast %20 : vector<32x32xf32> to vector<4x8x4x8xf32>
    %30 = tpu.transpose %29, [0, 2, 1, 3] : vector<4x8x4x8xf32> -> vector<4x4x8x8xf32>
    %31 = vector.shape_cast %30 : vector<4x4x8x8xf32> to vector<16x8x8xf32>
    %32 = vector.shape_cast %25 : vector<32x32xf32> to vector<4x8x4x8xf32>
    %33 = tpu.transpose %32, [0, 2, 1, 3] : vector<4x8x4x8xf32> -> vector<4x4x8x8xf32>
    %34 = vector.shape_cast %33 : vector<4x4x8x8xf32> to vector<16x8x8xf32>
    %35 = arith.truncf %28 : vector<16x8x8xf32> to vector<16x8x8xbf16>
    %36 = arith.truncf %31 : vector<16x8x8xf32> to vector<16x8x8xbf16>
    "tpu.trace_start"() <{level = 10 : i32, message = "bid,bjd->bij"}> : () -> ()
    %cst_20 = arith.constant dense<0.000000e+00> : vector<16x8x8xf32>
    %37 = tpu.matmul %35, %36, %cst_20 {dimension_numbers = #tpu.dot_dimension_numbers<[2], [2], [1], [1], [0, 0, 0, 1, 1, 1], [0], [0]>} : vector<16x8x8xbf16>, vector<16x8x8xbf16>, vector<16x8x8xf32> -> vector<16x8x8xf32>
    "tpu.trace_stop"() : () -> ()
    %cst_21 = arith.constant 0.353553385 : f32
    %38 = vector.broadcast %cst_21 : f32 to vector<16x8x8xf32>
    %39 = arith.mulf %37, %38 : vector<16x8x8xf32>
    %c0_22 = arith.constant 0 : index
    %c0_23 = arith.constant 0 : index
    %c0_24 = arith.constant 0 : index
    %40 = vector.load %arg1[%c0_22, %c0_23, %c0_24] : memref<16x8x8xf32, #tpu.memory_space<vmem>>, vector<16x8x8xf32>
    %41 = arith.addf %39, %40 : vector<16x8x8xf32>
    %cst_25 = arith.constant dense<0xFF800000> : vector<16x8xf32>
    %42 = vector.multi_reduction <maximumf>, %41, %cst_25 [2] : vector<16x8x8xf32> to vector<16x8xf32>
    %43 = vector.shape_cast %42 : vector<16x8xf32> to vector<16x8x1xf32>
    %44 = vector.broadcast %43 : vector<16x8x1xf32> to vector<16x8x8xf32>
    %45 = arith.subf %41, %44 : vector<16x8x8xf32>
    %46 = math.exp %45 : vector<16x8x8xf32>
    %cst_26 = arith.constant dense<0.000000e+00> : vector<16x8xf32>
    %47 = vector.multi_reduction <add>, %46, %cst_26 [2] : vector<16x8x8xf32> to vector<16x8xf32>
    %48 = vector.shape_cast %47 : vector<16x8xf32> to vector<16x8x1xf32>
    %49 = vector.broadcast %48 : vector<16x8x1xf32> to vector<16x8x8xf32>
    %50 = arith.divf %46, %49 : vector<16x8x8xf32>
    %51 = arith.truncf %50 : vector<16x8x8xf32> to vector<16x8x8xbf16>
    %52 = arith.truncf %34 : vector<16x8x8xf32> to vector<16x8x8xbf16>
    "tpu.trace_start"() <{level = 10 : i32, message = "bij,bjd->bid"}> : () -> ()
    %cst_27 = arith.constant dense<0.000000e+00> : vector<16x8x8xf32>
    %53 = tpu.matmul %51, %52, %cst_27 {dimension_numbers = #tpu.dot_dimension_numbers<[2], [1], [1], [2], [0, 0, 0, 1, 1, 2], [0], [0]>} : vector<16x8x8xbf16>, vector<16x8x8xbf16>, vector<16x8x8xf32> -> vector<16x8x8xf32>
    "tpu.trace_stop"() : () -> ()
    %54 = vector.shape_cast %53 : vector<16x8x8xf32> to vector<4x4x8x8xf32>
    %55 = tpu.transpose %54, [0, 2, 1, 3] : vector<4x4x8x8xf32> -> vector<4x8x4x8xf32>
    %56 = vector.shape_cast %55 : vector<4x8x4x8xf32> to vector<32x32xf32>
    %57 = arith.truncf %56 : vector<32x32xf32> to vector<32x32xbf16>
    %c0_28 = arith.constant 0 : index
    %c0_29 = arith.constant 0 : index
    %58 = vector.load %arg11[%c0_28, %c0_29] : memref<32x32xbf16, #tpu.memory_space<vmem>>, vector<32x32xbf16>
    %cst_30 = arith.constant dense<0.000000e+00> : vector<32x32xf32>
    %59 = tpu.matmul %57, %58, %cst_30 {dimension_numbers = #tpu.dot_dimension_numbers<[1], [0], [0], [1], [0, 0, 1, 1], [], []>} : vector<32x32xbf16>, vector<32x32xbf16>, vector<32x32xf32> -> vector<32x32xf32>
    %c0_31 = arith.constant 0 : index
    %c0_32 = arith.constant 0 : index
    %60 = vector.load %arg12[%c0_31, %c0_32] : memref<1x32xf32, #tpu.memory_space<vmem>>, vector<1x32xf32>
    %61 = vector.broadcast %60 : vector<1x32xf32> to vector<32x32xf32>
    %62 = arith.addf %59, %61 : vector<32x32xf32>
    %63 = vector.shape_cast %62 : vector<32x32xf32> to vector<4x8x32xf32>
    %64 = arith.addf %8, %63 : vector<4x8x32xf32>
    %c0_33 = arith.constant 0 : index
    %c0_34 = arith.constant 0 : index
    %c0_35 = arith.constant 0 : index
    %65 = vector.load %arg13[%c0_33, %c0_34, %c0_35] : memref<4x8x32xf32, #tpu.memory_space<vmem>>, vector<4x8x32xf32>
    tpu.vector_store %arg13[%c0_33, %c0_34, %c0_35], %64 {strides = array<i32>} : memref<4x8x32xf32, #tpu.memory_space<vmem>>, vector<4x8x32xf32>,
    %66 = vector.shape_cast %64 : vector<4x8x32xf32> to vector<32x32xf32>
    %cst_36 = arith.constant dense<0.000000e+00> : vector<32xf32>
    %67 = vector.multi_reduction <add>, %66, %cst_36 [0] : vector<32x32xf32> to vector<32xf32>
    %68 = vector.shape_cast %67 : vector<32xf32> to vector<1x32xf32>
    %69 = arith.mulf %66, %66 : vector<32x32xf32>
    %cst_37 = arith.constant dense<0.000000e+00> : vector<32xf32>
    %70 = vector.multi_reduction <add>, %69, %cst_37 [0] : vector<32x32xf32> to vector<32xf32>
    %71 = vector.shape_cast %70 : vector<32xf32> to vector<1x32xf32>
    %72 = tpu.concatenate %68, %71 in 0 : vector<1x32xf32>, vector<1x32xf32> -> vector<2x32xf32>
    %73 = vector.shape_cast %72 : vector<2x32xf32> to vector<1x2x32xf32>
    %c0_38 = arith.constant 0 : index
    %c0_39 = arith.constant 0 : index
    %c0_40 = arith.constant 0 : index
    %74 = vector.load %arg14[%c0_38, %c0_39, %c0_40] : memref<1x2x32xf32, #tpu.memory_space<vmem>>, vector<1x2x32xf32>
    tpu.vector_store %arg14[%c0_38, %c0_39, %c0_40], %73 {strides = array<i32>} : memref<1x2x32xf32, #tpu.memory_space<vmem>>, vector<1x2x32xf32>,
    %c0_41 = arith.constant 0 : index
    %c0_42 = arith.constant 0 : index
    %c0_43 = arith.constant 0 : index
    %75 = vector.load %arg15[%c0_41, %c0_42, %c0_43] : memref<16x8x8xf32, #tpu.memory_space<vmem>>, vector<16x8x8xf32>
    tpu.vector_store %arg15[%c0_41, %c0_42, %c0_43], %50 {strides = array<i32>} : memref<16x8x8xf32, #tpu.memory_space<vmem>>, vector<16x8x8xf32>,
    return
  }
  func.func @transform_0(%arg0: i32) -> (i32, i32, i32) {
    %c0_i32 = arith.constant 0 : i32
    %c0_i32_0 = arith.constant 0 : i32
    %c0_i32_1 = arith.constant 0 : i32
    return %arg0, %c0_i32, %c0_i32_0 : i32, i32, i32
  }
  func.func @transform_1(%arg0: i32) -> (i32, i32, i32) {
    %c0_i32 = arith.constant 0 : i32
    %c0_i32_0 = arith.constant 0 : i32
    %c0_i32_1 = arith.constant 0 : i32
    return %arg0, %c0_i32, %c0_i32_0 : i32, i32, i32
  }
  func.func @transform_2(%arg0: i32) -> (i32, i32) {
    %c0_i32 = arith.constant 0 : i32
    %c0_i32_0 = arith.constant 0 : i32
    %c0_i32_1 = arith.constant 0 : i32
    return %c0_i32, %c0_i32_0 : i32, i32
  }
  func.func @transform_3(%arg0: i32) -> (i32, i32) {
    %c0_i32 = arith.constant 0 : i32
    %c0_i32_0 = arith.constant 0 : i32
    %c0_i32_1 = arith.constant 0 : i32
    return %c0_i32, %c0_i32_0 : i32, i32
  }
  func.func @transform_4(%arg0: i32) -> (i32, i32) {
    %c0_i32 = arith.constant 0 : i32
    %c0_i32_0 = arith.constant 0 : i32
    %c0_i32_1 = arith.constant 0 : i32
    return %c0_i32, %c0_i32_0 : i32, i32
  }
  func.func @transform_5(%arg0: i32) -> (i32, i32) {
    %c0_i32 = arith.constant 0 : i32
    %c0_i32_0 = arith.constant 0 : i32
    %c0_i32_1 = arith.constant 0 : i32
    return %c0_i32, %c0_i32_0 : i32, i32
  }
  func.func @transform_6(%arg0: i32) -> (i32, i32) {
    %c0_i32 = arith.constant 0 : i32
    %c0_i32_0 = arith.constant 0 : i32
    %c0_i32_1 = arith.constant 0 : i32
    return %c0_i32, %c0_i32_0 : i32, i32
  }
  func.func @transform_7(%arg0: i32) -> (i32, i32) {
    %c0_i32 = arith.constant 0 : i32
    %c0_i32_0 = arith.constant 0 : i32
    %c0_i32_1 = arith.constant 0 : i32
    return %c0_i32, %c0_i32_0 : i32, i32
  }
  func.func @transform_8(%arg0: i32) -> (i32, i32) {
    %c0_i32 = arith.constant 0 : i32
    %c0_i32_0 = arith.constant 0 : i32
    %c0_i32_1 = arith.constant 0 : i32
    return %c0_i32, %c0_i32_0 : i32, i32
  }
  func.func @transform_9(%arg0: i32) -> (i32, i32) {
    %c0_i32 = arith.constant 0 : i32
    %c0_i32_0 = arith.constant 0 : i32
    %c0_i32_1 = arith.constant 0 : i32
    return %c0_i32, %c0_i32_0 : i32, i32
  }
  func.func @transform_10(%arg0: i32) -> (i32, i32) {
    %c0_i32 = arith.constant 0 : i32
    %c0_i32_0 = arith.constant 0 : i32
    %c0_i32_1 = arith.constant 0 : i32
    return %c0_i32, %c0_i32_0 : i32, i32
  }
  func.func @transform_11(%arg0: i32) -> (i32, i32) {
    %c0_i32 = arith.constant 0 : i32
    %c0_i32_0 = arith.constant 0 : i32
    %c0_i32_1 = arith.constant 0 : i32
    return %c0_i32, %c0_i32_0 : i32, i32
  }
  func.func @transform_12(%arg0: i32) -> (i32, i32, i32) {
    %c0_i32 = arith.constant 0 : i32
    %c0_i32_0 = arith.constant 0 : i32
    %c0_i32_1 = arith.constant 0 : i32
    return %arg0, %c0_i32, %c0_i32_0 : i32, i32, i32
  }
  func.func @transform_13(%arg0: i32) -> (i32, i32, i32) {
    %c0_i32 = arith.constant 0 : i32
    %c0_i32_0 = arith.constant 0 : i32
    %c0_i32_1 = arith.constant 0 : i32
    return %arg0, %c0_i32, %c0_i32_0 : i32, i32, i32
  }
  func.func @transform_14(%arg0: i32) -> (i32, i32, i32) {
    %c0_i32 = arith.constant 0 : i32
    %c0_i32_0 = arith.constant 0 : i32
    %c0_i32_1 = arith.constant 0 : i32
    return %arg0, %c0_i32, %c0_i32_0 : i32, i32, i32
  }
}

module attributes {stable_mosaic.version = 11 : i64} {
  func.func @_norm_kernel(%arg0: i32, %arg1: memref<4x8x32xf32, #tpu.memory_space<vmem>>, %arg2: memref<1x32xf32, #tpu.memory_space<vmem>>, %arg3: memref<1x32xf32, #tpu.memory_space<vmem>>, %arg4: memref<4x8x32xf32, #tpu.memory_space<vmem>>) attributes {dimension_semantics = [#tpu.dimension_semantics<parallel>], iteration_bounds = array<i64: 2>, scalar_prefetch = 0 : i64, scratch_operands = 0 : i64, tpu.core_type = #tpu.core_type<tc>, window_params = [{transform_indices = @transform_0, window_bounds = array<i64: 4, 8, 32>}, {pipeline_mode = #tpu.pipeline_mode<synchronous>, transform_indices = @transform_1, window_bounds = array<i64: 1, 32>}, {pipeline_mode = #tpu.pipeline_mode<synchronous>, transform_indices = @transform_2, window_bounds = array<i64: 1, 32>}, {transform_indices = @transform_3, window_bounds = array<i64: 4, 8, 32>}]} {
    %c0 = arith.constant 0 : index
    %c0_0 = arith.constant 0 : index
    %c0_1 = arith.constant 0 : index
    %0 = vector.load %arg1[%c0, %c0_0, %c0_1] : memref<4x8x32xf32, #tpu.memory_space<vmem>>, vector<4x8x32xf32>
    %c0_2 = arith.constant 0 : index
    %c0_3 = arith.constant 0 : index
    %1 = vector.load %arg2[%c0_2, %c0_3] : memref<1x32xf32, #tpu.memory_space<vmem>>, vector<1x32xf32>
    %2 = vector.shape_cast %1 : vector<1x32xf32> to vector<1x1x32xf32>
    %3 = vector.broadcast %2 : vector<1x1x32xf32> to vector<4x8x32xf32>
    %4 = arith.mulf %0, %3 : vector<4x8x32xf32>
    %c0_4 = arith.constant 0 : index
    %c0_5 = arith.constant 0 : index
    %5 = vector.load %arg3[%c0_4, %c0_5] : memref<1x32xf32, #tpu.memory_space<vmem>>, vector<1x32xf32>
    %6 = vector.shape_cast %5 : vector<1x32xf32> to vector<1x1x32xf32>
    %7 = vector.broadcast %6 : vector<1x1x32xf32> to vector<4x8x32xf32>
    %8 = arith.addf %4, %7 : vector<4x8x32xf32>
    %c0_6 = arith.constant 0 : index
    %c0_7 = arith.constant 0 : index
    %c0_8 = arith.constant 0 : index
    %9 = vector.load %arg4[%c0_6, %c0_7, %c0_8] : memref<4x8x32xf32, #tpu.memory_space<vmem>>, vector<4x8x32xf32>
    tpu.vector_store %arg4[%c0_6, %c0_7, %c0_8], %8 {strides = array<i32>} : memref<4x8x32xf32, #tpu.memory_space<vmem>>, vector<4x8x32xf32>,
    return
  }
  func.func @transform_0(%arg0: i32) -> (i32, i32, i32) {
    %c0_i32 = arith.constant 0 : i32
    %c0_i32_0 = arith.constant 0 : i32
    %c0_i32_1 = arith.constant 0 : i32
    return %arg0, %c0_i32, %c0_i32_0 : i32, i32, i32
  }
  func.func @transform_1(%arg0: i32) -> (i32, i32) {
    %c0_i32 = arith.constant 0 : i32
    %c0_i32_0 = arith.constant 0 : i32
    %c0_i32_1 = arith.constant 0 : i32
    return %c0_i32, %c0_i32_0 : i32, i32
  }
  func.func @transform_2(%arg0: i32) -> (i32, i32) {
    %c0_i32 = arith.constant 0 : i32
    %c0_i32_0 = arith.constant 0 : i32
    %c0_i32_1 = arith.constant 0 : i32
    return %c0_i32, %c0_i32_0 : i32, i32
  }
  func.func @transform_3(%arg0: i32) -> (i32, i32, i32) {
    %c0_i32 = arith.constant 0 : i32
    %c0_i32_0 = arith.constant 0 : i32
    %c0_i32_1 = arith.constant 0 : i32
    return %arg0, %c0_i32, %c0_i32_0 : i32, i32, i32
  }
}

</mosaic_0001>

<bundles_post_ra>
// kernel: gatei_encoder_forward.6
= control target key start
LH: loop header
LB: loop body
LE: loop exit
PB: predicated region body
PF: predicated region fallthrough
CT: control target
= control target key end

     0   :  { %s743_s27 = smov 0   ;;  %s835_s0 = inlined_call_operand.vmem [shape: f32[8,8,32], index: 0, kind: input, shape index: {}]   ;;  %s836_s1 = inlined_call_operand.vmem [shape: f32[1,32], index: 1, kind: input, shape index: {}]   ;;  %s837_s2 = inlined_call_operand.vmem [shape: f32[1,32], index: 2, kind: input, shape index: {}]   ;;  %s838_s3 = inlined_call_operand.vmem [shape: bf16[32,64], index: 3, kind: input, shape index: {}]   ;;  %s839_s4 = inlined_call_operand.vmem [shape: f32[1,64], index: 4, kind: input, shape index: {}]   ;;  %s840_s5 = inlined_call_operand.vmem [shape: bf16[64,32], index: 5, kind: input, shape index: {}]   ;;  %s841_s6 = inlined_call_operand.vmem [shape: f32[1,32], index: 6, kind: input, shape index: {}]   ;;  %s842_s7 = inlined_call_operand.vmem [shape: f32[8,8,32], index: 7, kind: output, shape index: {0}]   ;;  %s843_s8 = inlined_call_operand.vmem [shape: f32[2,2,32], index: 8, kind: output, shape index: {1}]  }
   0x1 LB: > { %s749_s28 = sadd.s32 4294967295, %s696_s27   ;;  %p622_p0 = scmp.ge.s32.totalorder %s696_s27, 1  ;;  %s696_s27 = sphi %s743_s27, %s19_s27  }
   0x2   : > { %p266_p1 = scmp.lt.s32.totalorder %s696_s27, 3 }
   0x4   : > { %p267_p2 = pnand %p622_p0, %p266_p1 }
   0x5   : > { %s623_s9 = sshll.u32 (!%p267_p2), %s749_s28, 2  ;;  %p316_p4 = scmp.lt.s32.totalorder (!%p267_p2), %s749_s28, 1 }
   0x6   : > { %270 = sbr.rel (%p267_p2) target bundleno = 352 (0x160), region = 48  ;;  %p305_p3 = scmp.lt.s32.totalorder (!%p267_p2), %s623_s9, 7 }
   0xb   : > { %v659_v0 = vld [vmem:[%s838_s3 + $0x8] sm:$0xff]  ;;  %v658_v1 = vld [vmem:[%s838_s3] sm:$0xff]  ;;  %s845_s9 = smov (!%p305_p3, %s623_s9), 7  ;;  %vm363_vm0 = vcmask 261120   ;;  %v663_v18 = vld [vmem:[%s840_s5 + $0x18] sm:$0xff]  ;;  %vm463_vm1 = vcmask 523264  }
   0xc   : > { %376 = vmatpush.bf16.msra.mxu0 %v659_v0  ;;  %664 = vmatpush.bf16.msra.mxu3 %v659_v0  ;;  %v678_v2 = vld [vmem:[%s836_s1] ss:$0 sm:$0xff]  ;;  %s624_s14 = sshll.u32 %s845_s9, 3  ;;  %v662_v19 = vld [vmem:[%s840_s5 + $0x10] sm:$0xff]  ;;  %v661_v20 = vld [vmem:[%s840_s5 + $0x8] sm:$0xff]  ;;  %s847_s28 = smov (!%p316_p4, %s749_s28), 1 }
   0xd   : > { %s308_s17 = scalar_lea.vmem %s835_s0, %s624_s14  ;;  %v679_v3 = vld [vmem:[%s837_s2] ss:$0 sm:$0xff]  ;;  %474 = vmatpush.bf16.msra.mxu1 %v663_v18  ;;  %666 = vmatpush.bf16.msra.mxu2 %v663_v18  ;;  %s314_s16 = scalar_lea.vmem %s842_s7, %s624_s14  ;;  %vm527_vm2 = vcmask 1040384   ;;  %vm529_vm3 = vcmask 254976  }
   0xe   : > { %v321_v4 = vld [vmem:[%s308_s17] sm:$0xff]  ;;  %v322_v5 = vld [vmem:[%s308_s17 + $0x8] sm:$0xff]  ;;  %v323_v6 = vld [vmem:[%s308_s17 + $0x10] sm:$0xff]  ;;  %s627_s9 = sshll.u32 %s847_s28, 1 }
   0xf   : > { %v329_v7 = vmul.f32 %v678_v2, %v321_v4  ;;  %v330_v8 = vmul.f32 %v678_v2, %v322_v5  ;;  %v324_v9 = vld [vmem:[%s308_s17 + $0x18] sm:$0xff]  ;;  %v331_v10 = vmul.f32 %v678_v2, %v323_v6  ;;  %v680_v21 = vld [vmem:[%s839_s4] ss:$0 sm:$0xff]  ;;  %s319_s18 = scalar_lea.vmem %s843_s8, %s627_s9 }
  0x10   : > { %377 = vmatpush.bf16.msra.mxu0 %v658_v1  ;;  %665 = vmatpush.bf16.msra.mxu3 %v658_v1  ;;  %v332_v11 = vmul.f32 %v678_v2, %v324_v9  ;;  %v660_v22 = vld [vmem:[%s840_s5] sm:$0xff] }
  0x11   : > { %v774_v12 = vadd.f32 %v679_v3, %v329_v7  ;;  %v776_v13 = vadd.f32 %v679_v3, %v330_v8  ;;  %v778_v14 = vadd.f32 %v679_v3, %v331_v10  ;;  %475 = vmatpush.bf16.msra.mxu1 %v662_v19  ;;  %667 = vmatpush.bf16.msra.mxu2 %v662_v19  ;;  %v681_v5 = vld [vmem:[%s841_s6] ss:$0 sm:$0xff] }
  0x12   : > { %v780_v15 = vadd.f32 %v679_v3, %v332_v11 }
  0x13   : > { %v341_v16 = vpack.c.bf16 %v776_v13, %v774_v12 }
  0x14   : > { %v342_v17 = vpack.c.bf16 %v780_v15, %v778_v14 }
  0x15   : > { %636 = vmatmul.msk.bf16.vlgmr.msra.gmra.mxu0 %vm363_vm0, %v341_v16  ;;  %476 = vmatpush.bf16.msra.mxu1 %v661_v20 }
  0x16   : > { %637 = vmatmul.msk.bf16.vlgmr.msra.gmra.mxu3 %vm363_vm0, %v342_v17  ;;  %668 = vmatpush.bf16.msra.mxu2 %v661_v20 }
  0x19   : > { %477 = vmatpush.bf16.msra.mxu1 %v660_v22 }
  0x1a   : > { %669 = vmatpush.bf16.msra.mxu2 %v660_v22 }
  0x92   : > { %v379_v23 = vpop.f32.mrf.mxu0 }
  0x93   : > { %v380_v24 = vadd.f32 %v680_v21, %v379_v23 }
  0x95   : > { %v389_v25 = vmul.f32 %v380_v24, %v380_v24 }
  0x97   : > { %v393_v26 = vmul.f32 %v389_v25, %v380_v24 }
  0x99   : > { %v397_v27 = vmul.f32 0.044715, %v393_v26  ;;  %v384_v28 = vpop.f32.mrf.mxu3 }
  0x9a   : > { %v385_v29 = vadd.f32 %v680_v21, %v384_v28  ;;  %v381_v30 = vpop.f32.mrf.mxu0 }
  0x9b   : > { %v401_v31 = vadd.f32 %v397_v27, %v380_v24  ;;  %v382_v32 = vadd.f32 %v680_v21, %v381_v30 }
  0x9c   : > { %v391_v33 = vmul.f32 %v385_v29, %v385_v29 }
  0x9d   : > { %v405_v34 = vmul.f32 0.7978846, %v401_v31  ;;  %v390_v35 = vmul.f32 %v382_v32, %v382_v32 }
  0x9e   : > { %v395_v36 = vmul.f32 %v391_v33, %v385_v29 }
  0x9f   : > { %v394_v37 = vmul.f32 %v390_v35, %v382_v32  ;;  %682 = vtanh.f32 %v405_v34 }
  0xa0   : > { %v399_v38 = vmul.f32 0.044715, %v395_v36 }
  0xa1   : > { %v398_v39 = vmul.f32 0.044715, %v394_v37  ;;  %v386_v40 = vpop.f32.mrf.mxu3 }
  0xa2   : > { %v403_v41 = vadd.f32 %v399_v38, %v385_v29  ;;  %v387_v42 = vadd.f32 %v680_v21, %v386_v40 }
  0xa3   : > { %v402_v43 = vadd.f32 %v398_v39, %v382_v32 }
  0xa4   : > { %v407_v44 = vmul.f32 0.7978846, %v403_v41  ;;  %v392_v45 = vmul.f32 %v387_v42, %v387_v42 }
  0xa5   : > { %v406_v46 = vmul.f32 0.7978846, %v402_v43  ;;  %v683_v48 = vpop.eup %682 }
  0xa6   : > { %v396_v47 = vmul.f32 %v392_v45, %v387_v42  ;;  %v413_v51 = vadd.f32 1.0, %v683_v48 }
  0xa7   : > { %684 = vtanh.f32 %v406_v46 }
  0xa8   : > { %686 = vtanh.f32 %v407_v44  ;;  %v400_v49 = vmul.f32 0.044715, %v396_v47  ;;  %v417_v56 = vmul.f32 0.5, %v413_v51 }
  0xaa   : > { %v404_v50 = vadd.f32 %v400_v49, %v387_v42  ;;  %v421_v59 = vmul.f32 %v417_v56, %v380_v24 }
  0xac   : > { %v408_v52 = vmul.f32 0.7978846, %v404_v50 }
  0xad   : > { %v685_v53 = vpop.eup %684 }
  0xae   : > { %v687_v54 = vpop.eup %686  ;;  %688 = vtanh.f32 %v408_v52  ;;  %v414_v55 = vadd.f32 1.0, %v685_v53 }
  0xaf   : > { %v415_v58 = vadd.f32 1.0, %v687_v54 }
  0xb0   : > { %v418_v57 = vmul.f32 0.5, %v414_v55 }
  0xb1   : > { %v419_v0 = vmul.f32 0.5, %v415_v58 }
  0xb2   : > { %v422_v60 = vmul.f32 %v418_v57, %v382_v32 }
  0xb3   : > { %v423_v2 = vmul.f32 %v419_v0, %v385_v29 }
  0xb4   : > { %v689_v61 = vpop.eup %688  ;;  %v425_v62 = vpack.c.bf16 %v422_v60, %v421_v59 }
  0xb5   : > { %v416_v63 = vadd.f32 1.0, %v689_v61 }
  0xb6   : > { %654 = vmatmul.msk.bf16.vlgmr.msra.gmra.mxu1 %vm463_vm1, %v425_v62 }
  0xb7   : > { %v420_v1 = vmul.f32 0.5, %v416_v63 }
  0xb9   : > { %v424_v3 = vmul.f32 %v420_v1, %v387_v42 }
  0xbb   : > { %v426_v4 = vpack.c.bf16 %v424_v3, %v423_v2 }
  0xbd   : > { %655 = vmatmul.msk.bf16.vlgmr.msra.gmra.mxu2 %vm463_vm1, %v426_v4 }
 0x133   : > { %v479_v6 = vpop.f32.mrf.mxu1 }
 0x134   : > { %v480_v7 = vadd.f32 %v681_v5, %v479_v6 }
 0x136   : > { %v489_v8 = vadd.f32 %v480_v7, %v774_v12 }
 0x138   : > { %493 = vst.msk [vmem:[%s314_s16] sm:$0xff] %vm363_vm0, %v489_v8  ;;  %v510_v20 = vmul.f32 %v489_v8, %v489_v8  ;;  %v497_v23 = vsel %vm363_vm0, %v489_v8, 0.0 }
 0x13a   : > { %v514_v27 = vsel %vm363_vm0, %v510_v20, 0.0 }
 0x13b   : > { %v481_v9 = vpop.f32.mrf.mxu1 }
 0x13c   : > { %v482_v10 = vadd.f32 %v681_v5, %v481_v9 }
 0x13e   : > { %v490_v11 = vadd.f32 %v482_v10, %v776_v13 }
 0x140   : > { %494 = vst.msk [vmem:[%s314_s16 + $0x8] sm:$0xff] %vm363_vm0, %v490_v11  ;;  %v484_v16 = vpop.f32.mrf.mxu2  ;;  %v511_v19 = vmul.f32 %v490_v11, %v490_v11  ;;  %v498_v21 = vsel %vm363_vm0, %v490_v11, 0.0 }
 0x141   : > { %v485_v17 = vadd.f32 %v681_v5, %v484_v16  ;;  %v499_v26 = vadd.f32 %v498_v21, %v497_v23 }
 0x142   : > { %v515_v24 = vsel %vm363_vm0, %v511_v19, 0.0 }
 0x143   : > { %v491_v18 = vadd.f32 %v485_v17, %v778_v14  ;;  %v516_v29 = vadd.f32 %v515_v24, %v514_v27 }
 0x145   : > { %495 = vst.msk [vmem:[%s314_s16 + $0x10] sm:$0xff] %vm363_vm0, %v491_v18  ;;  %v512_v22 = vmul.f32 %v491_v18, %v491_v18  ;;  %v500_v13 = vsel %vm363_vm0, %v491_v18, 0.0 }
 0x146   : > { %v501_v30 = vadd.f32 %v500_v13, %v499_v26 }
 0x147   : > { %v517_v14 = vsel %vm363_vm0, %v512_v22, 0.0 }
 0x148   : > { %v486_v12 = vpop.f32.mrf.mxu2  ;;  %v518_v33 = vadd.f32 %v517_v14, %v516_v29 }
 0x149   : > { %v487_v25 = vadd.f32 %v681_v5, %v486_v12 }
 0x14b   : > { %v492_v28 = vadd.f32 %v487_v25, %v780_v15 }
 0x14d   : > { %496 = vst.msk [vmem:[%s314_s16 + $0x18] sm:$0xff] %vm363_vm0, %v492_v28  ;;  %v502_v31 = vsel %vm363_vm0, %v492_v28, 0.0  ;;  %v513_v32 = vmul.f32 %v492_v28, %v492_v28 }
 0x14e   : > { %v503_v34 = vadd.f32 %v502_v31, %v501_v30 }
 0x14f   : > { %v519_v35 = vsel %vm363_vm0, %v513_v32, 0.0 }
 0x150   : > { %v504_v36 = vrot.slane %v503_v34, 4  ;;  %v520_v37 = vadd.f32 %v519_v35, %v518_v33 }
 0x152   : > { %v505_v38 = vadd.f32 %v504_v36, %v503_v34  ;;  %v521_v39 = vrot.slane %v520_v37, 4 }
 0x154   : > { %v506_v40 = vrot.slane %v505_v38, 2  ;;  %v522_v41 = vadd.f32 %v521_v39, %v520_v37 }
 0x156   : > { %v507_v15 = vadd.f32 %v506_v40, %v505_v38  ;;  %v523_v42 = vrot.slane %v522_v41, 2 }
 0x158   : > { %v508_v43 = vrot.slane %v507_v15, 1  ;;  %v524_v44 = vadd.f32 %v523_v42, %v522_v41 }
 0x15a   : > { %v525_v45 = vrot.slane %v524_v44, 1  ;;  %v509_v46 = vadd.f32 %v508_v43, %v507_v15 }
 0x15c   : > { %v526_v47 = vadd.f32 %v525_v45, %v524_v44 }
 0x15e   : > { %v528_v48 = vsel %vm527_vm2, %v509_v46, %v526_v47 }
 0x15f   : > { %530 = vst.msk [vmem:[%s319_s18] sm:$0x3] %vm529_vm3, %v528_v48 }
 0x160 PF: > { %s19_s27 = sadd.s32 1, %s696_s27  }
 0x161   : > { %p16_p5 = scmp.ge.s32.totalorder %s19_s27, 4  }
 0x163   :  { %18 = sbr.rel (!%p16_p5) target bundleno = 1 (0x1), region = 90 }

// kernel: gatei_encoder_forward.9
= control target key start
LH: loop header
LB: loop body
LE: loop exit
PB: predicated region body
PF: predicated region fallthrough
CT: control target
= control target key end

     0   :  { %8 = vsyncpa [#allocation3], 0  ;;  %s511_s0 = inlined_call_operand.vmem [shape: f32[8,8,32], index: 0, kind: input, shape index: {}]   ;;  %s512_s1 = inlined_call_operand.vmem [shape: f32[1,32], index: 1, kind: input, shape index: {}]   ;;  %s513_s2 = inlined_call_operand.vmem [shape: f32[1,32], index: 2, kind: input, shape index: {}]   ;;  %s514_s3 = inlined_call_operand.hbm [shape: f32[8,8,32], index: 3, kind: output, shape index: {}]  }
   0x1   :  { %10 = vsyncpa [#allocation3 + $0x1], 0  ;;  %s417_s12 = smov 0   ;;  %s419_s13 = smov 0  }
   0x2   :  { %s421_s14 = smov 0   ;;  %s423_s15 = smov 0  }
   0x3 LB: > { %s438_s16 = sadd.s32 4294967295, %s393_s15   ;;  %s275_s17 = sadd.s32 4294967294, %s393_s15   ;;  %s393_s15 = sphi %s423_s15, %s520_s15   ;;  %s389_s14 = sphi %s421_s14, %s519_s14   ;;  %s385_s13 = sphi %s419_s13, %s518_s13   ;;  %s381_s12 = sphi %s417_s12, %s517_s12  }
   0x4   : > { %s442_s18 = sadd.s32 1, %s393_s15   ;;  %s91_s19 = sadd.s32 1, %s389_s14 }
   0x5   : > { %s88_s20 = ssub.s32 %s393_s15, %s442_s18  ;;  %p101_p0 = scmp.ne.s32.totalorder %s389_s14, %s385_s13 }
   0x6   : > { %p89_p1 = scmp.eq.s32.totalorder %s88_s20, 0  ;;  %p102_p2 = scmp.eq.s32.totalorder %s438_s16, 1 }
   0x7   : > { %p107_p3 = scmp.ne.s32.totalorder %s385_s13, %s381_s12  ;;  %p108_p4 = scmp.eq.s32.totalorder %s275_s17, 1 }
   0x8   : > { %s453_s21 = scalar_select %p89_p1, %s389_s14, %s91_s19  }
   0x9   : > { %p455_p5 = por %p102_p2, %p101_p0  ;;  %p459_p6 = por %p108_p4, %p107_p3 }
   0xa   : > { %p278_p7 = scmp.ge.s32.totalorder %s393_s15, 1  ;;  %p141_p8 = scmp.lt.s32.totalorder %s393_s15, 3 }
   0xc   : > { %p142_p9 = pnand %p278_p7, %p141_p8 }
   0xd   : > { %s162_s24 = sand.u32 (!%p142_p9), 1, %s385_s13   ;;  %s280_s25 = sshll.u32 (!%p142_p9), %s438_s16, 2 }
   0xe   : > { %145 = sbr.rel (%p142_p9) target bundleno = 34 (0x22), region = 32  ;;  %p166_p10 = scmp.lt.s32.totalorder (!%p142_p9), %s280_s25, 7 }
   0xf   : > { %s279_s26 = sshll.u32 (!%p142_p9), %s162_s24, 5  ;;  %s287_s29 = sshll.u32 (!%p142_p9), %s438_s16, 5 }
  0x10   : > { %s209_s11 = scalar_lea.hbm (!%p142_p9), %s514_s3, %s287_s29  ;;  %s164_s16 = scalar_lea.vmem (!%p142_p9), [#allocation2], %s279_s26 }
  0x11   : > { %s210_s17 = sshll.u32 (!%p142_p9), %s164_s16, 4  ;;  %s212_s19 = sshll.u32 (!%p142_p9), %s209_s11, 4  ;;  %s211_s17 = int_to_ptr.vmem [resolvable:$true] %s210_s17  ;;  %s213_s19 = int_to_ptr.hbm [resolvable:$true] %s212_s19 }
  0x12   : > { %s198_s20 = scalar_lea.sflag (!%p142_p9), [#allocation3], %s162_s24  ;;  %s351_s29 = scalar_lea.hbm (!%p142_p9), %s514_s3, 64 }
  0x13   : > { %s522_s25 = smov (!%p166_p10, %s280_s25), 7  ;;  %v329_v0 = vld [vmem:[%s512_s1] ss:$0 sm:$0xff]  ;;  %vm192_vm0 = vcmask 261120  }
  0x14   : > { %s281_s30 = sshll.u32 %s522_s25, 3  ;;  %v330_v1 = vld [vmem:[%s513_s2] ss:$0 sm:$0xff]  ;;  %s345_s25 = sshra.s32 %s213_s19, 4  ;;  %s346_s25 = int_to_ptr.hbm [resolvable:$true] %s345_s25 }
  0x15   : > { %s169_s6 = scalar_lea.vmem %s511_s0, %s281_s30  ;;  %s347_s27 = scalar_lea.hbm %s346_s25, 32 }
  0x16   : > { %v172_v2 = vld [vmem:[%s169_s6] sm:$0xff]  ;;  %v173_v3 = vld [vmem:[%s169_s6 + $0x8] sm:$0xff]  ;;  %v174_v4 = vld [vmem:[%s169_s6 + $0x10] sm:$0xff]  ;;  %p348_p11 = scmp.ne.s32.totalorder %s346_s25, %s347_s27  ;;  %p352_p0 = scmp.lt.s32.totalorder %s346_s25, %s514_s3 }
  0x17   : > { %v180_v5 = vmul.f32 %v329_v0, %v172_v2  ;;  %v181_v6 = vmul.f32 %v329_v0, %v173_v3  ;;  %v182_v7 = vmul.f32 %v329_v0, %v174_v4  ;;  %v175_v8 = vld [vmem:[%s169_s6 + $0x18] sm:$0xff]  ;;  %p353_p1 = scmp.lt.s32.totalorder %s351_s29, %s347_s27 }
  0x18   : > { %v183_v9 = vmul.f32 %v329_v0, %v175_v8  ;;  %p349_p12 = pnand %p348_p11, %p455_p5 }
  0x19   : > { %v188_v10 = vadd.f32 %v330_v1, %v180_v5  ;;  %v189_v11 = vadd.f32 %v330_v1, %v181_v6  ;;  %v190_v12 = vadd.f32 %v330_v1, %v182_v7  ;;  %p354_p2 = por %p353_p1, %p352_p0 }
  0x1a   : > { %v191_v13 = vadd.f32 %v330_v1, %v183_v9  ;;  %p350_p13 = pneg %p349_p12 }
  0x1b   : > { %193 = vst.msk [vmem:[%s164_s16] sm:$0xff] %vm192_vm0, %v188_v10 }
  0x1c   : > { %194 = vst.msk [vmem:[%s164_s16 + $0x8] sm:$0xff] %vm192_vm0, %v189_v11  ;;  %p355_p3 = pnand %p354_p2, %p350_p13 }
  0x1d   : > { %195 = vst.msk [vmem:[%s164_s16 + $0x10] sm:$0xff] %vm192_vm0, %v190_v12 }
  0x1e   : > { %196 = vst.msk [vmem:[%s164_s16 + $0x18] sm:$0xff] %vm192_vm0, %v191_v13 }
  0x1f   : > { %358 = shalt.err (!%p355_p3)
}
  0x20   : > { %s395_s24 = smov 128   ;;  %s396_s5 = smov 8  }
  0x21   : > { %288 = dma.vmem_to_hbm [thread:$0]  (%p455_p5), %s211_s17, 512, %s213_s19, %s198_s20, %s395_s24, %s395_s24, %s396_s5  }
  0x22 PF: > { %p294_p4 = scmp.ge.s32.totalorder %s393_s15, 2  ;;  %s227_s6 = sand.u32 1, %s381_s12  }
  0x23   : > { %s228_s7 = scalar_lea.sflag [#allocation3], %s227_s6 }
  0x24   : > { %p291_p7 = pnand %p294_p4, %p459_p6 }
  0x26   : > { %p292_p8 = pneg %p291_p7 }
  0x28   : > { %376 = dma.done.wait (%p292_p8), %s228_s7, 512  }
  0x29   : > { %378 = vsyncadd (%p292_p8), %s228_s7, 4294966784  ;;  %p13_p9 = scmp.ge.s32.totalorder %s442_s18, 4   ;;  %s517_s12 = smov %s385_s13 }
  0x2a   : > { %s518_s13 = smov %s389_s14  ;;  %s519_s14 = smov %s453_s21 }
  0x2b   : > { %s520_s15 = smov %s442_s18  ;;  %15 = sbr.rel (!%p13_p9) target bundleno = 3 (0x3), region = 67 }
  0x30   :  { %234 = vsyncpa [#allocation3], 1 }
  0x31   :  { %236 = vsyncpa [#allocation3 + $0x1], 1 }

// kernel: gatei_encoder_forward.5
= control target key start
LH: loop header
LB: loop body
LE: loop exit
PB: predicated region body
PF: predicated region fallthrough
CT: control target
= control target key end

     0   :  { %s6025_s0 = inlined_call_operand.hbm [shape: f32[8,8,32], index: 0, kind: input, shape index: {}]   ;;  %s6026_s1 = inlined_call_operand.vmem [shape: f32[1,32], index: 1, kind: input, shape index: {}]   ;;  %s6027_s2 = inlined_call_operand.vmem [shape: f32[1,32], index: 2, kind: input, shape index: {}]   ;;  %s6028_s3 = inlined_call_operand.vmem [shape: bf16[32,32], index: 3, kind: input, shape index: {}]   ;;  %s6029_s4 = inlined_call_operand.vmem [shape: bf16[32,32], index: 4, kind: input, shape index: {}]   ;;  %s6030_s5 = inlined_call_operand.vmem [shape: bf16[32,32], index: 5, kind: input, shape index: {}]   ;;  %s6031_s6 = inlined_call_operand.vmem [shape: f32[1,32], index: 6, kind: input, shape index: {}]   ;;  %s6032_s7 = inlined_call_operand.vmem [shape: f32[1,32], index: 7, kind: input, shape index: {}]   ;;  %s6033_s8 = inlined_call_operand.vmem [shape: f32[1,32], index: 8, kind: input, shape index: {}]   ;;  %s6034_s9 = inlined_call_operand.vmem [shape: bf16[32,32], index: 9, kind: input, shape index: {}]   ;;  %s6035_s10 = inlined_call_operand.vmem [shape: f32[1,32], index: 10, kind: input, shape index: {}]   ;;  %s6036_s11 = inlined_call_operand.vmem [shape: f32[8,8,32], index: 11, kind: output, shape index: {0}]   ;;  %s6037_s12 = inlined_call_operand.vmem [shape: f32[2,2,32], index: 12, kind: output, shape index: {1}]   ;;  %s6038_s13 = inlined_call_operand.vmem [shape: f32[32,8,8], index: 13, kind: output, shape index: {2}]  }
   0x1   :  { %6042 = sst [smem:[#allocation8_spill]] %s6037_s12 }
   0x2   :  { %19 = vsyncpa [#allocation3], 0 }
   0x3   :  { %21 = vsyncpa [#allocation3 + $0x1], 0  ;;  %s4315_s25 = smov 0   ;;  %s4317_s26 = smov 0  }
   0x4   :  { %s4319_s27 = smov 0   ;;  %s4321_s28 = smov 0  }
   0x5 LB: > { %6043 = sst [smem:[#allocation5_spill]] %s4229_s27  ;;  %s4334_s29 = sadd.s32 4294967295, %s4233_s28   ;;  %s4233_s28 = sphi %s4321_s28, %s6066_s28   ;;  %s4229_s27 = sphi %s4319_s27, %s6068_s27   ;;  %s4225_s26 = sphi %s4317_s26, %s6070_s26   ;;  %s4221_s25 = sphi %s4315_s25, %s6069_s25  }
   0x6   : > { %s4337_s30 = sadd.s32 1, %s4233_s28   ;;  %s34_s15 = sadd.s32 1, %s4229_s27 }
   0x7   : > { %6044 = sst [smem:[#allocation6_spill]] %s4337_s30  ;;  %s31_s14 = ssub.s32 %s4233_s28, %s4337_s30 }
   0x8   : > { %p32_p0 = scmp.eq.s32.totalorder %s31_s14, 0  ;;  %p41_p1 = scmp.ne.s32.totalorder %s4229_s27, %s4225_s26 }
   0x9   : > { %p42_p2 = scmp.eq.s32.totalorder %s4233_s28, 0  ;;  %p47_p3 = scmp.ne.s32.totalorder %s4225_s26, %s4221_s25 }
   0xa   : > { %s4347_s16 = scalar_select %p32_p0, %s4229_s27, %s34_s15  }
   0xb   : > { %p4349_p4 = por %p42_p2, %p41_p1  ;;  %p48_p5 = scmp.eq.s32.totalorder %s4334_s29, 0 }
   0xc   : > { %6045 = sst [smem:[#allocation7_spill]] %s4347_s16  ;;  %p3995_p6 = scmp.lt.s32.totalorder %s4233_s28, 2 }
   0xd   : > { %p4355_p7 = por %p48_p5, %p47_p3  ;;  %s389_s19 = sand.u32 1, %s4229_s27  }
   0xe   : > { %s3894_s20 = sshll.u32 %s389_s19, 5  ;;  %s3978_s21 = sshll.u32 %s4233_s28, 5 }
   0xf   : > { %s398_s24 = scalar_lea.hbm %s6025_s0, %s3978_s21  ;;  %s393_s25 = scalar_lea.vmem [#allocation2], %s3894_s20 }
  0x10   : > { %s401_s14 = sshll.u32 %s393_s25, 4  ;;  %s399_s15 = sshll.u32 %s398_s24, 4  ;;  %s402_s14 = int_to_ptr.vmem [resolvable:$true] %s401_s14  ;;  %s400_s15 = int_to_ptr.hbm [resolvable:$true] %s399_s15 }
  0x11   : > { %p4366_p8 = pnand %p3995_p6, %p4349_p4  ;;  %p3897_p9 = scmp.ge.s32.totalorder %s4233_s28, 1 }
  0x12   : > { %s390_s30 = scalar_lea.sflag [#allocation3], %s389_s19  ;;  %s4169_s27 = sshra.s32 %s400_s15, 4  ;;  %s4170_s27 = int_to_ptr.hbm [resolvable:$true] %s4169_s27 }
  0x13   : > { %s4171_s12 = scalar_lea.hbm %s4170_s27, 32  ;;  %p4173_p11 = pneg %p4366_p8 }
  0x14   : > { %p4172_p10 = scmp.ne.s32.totalorder %s4170_s27, %s4171_s12  ;;  %s4176_s22 = scalar_lea.hbm %s6025_s0, 64 }
  0x15   : > { %p4177_p0 = scmp.lt.s32.totalorder %s4170_s27, %s6025_s0  ;;  %p4178_p1 = scmp.lt.s32.totalorder %s4176_s22, %s4171_s12 }
  0x16   : > { %p4174_p12 = pnand %p4173_p11, %p4172_p10 }
  0x17   : > { %p4179_p2 = por %p4178_p1, %p4177_p0 }
  0x18   : > { %p4175_p13 = pneg %p4174_p12 }
  0x1a   : > { %p4180_p3 = pnand %p4179_p2, %p4175_p13 }
  0x1c   : > { %4183 = shalt.err (!%p4180_p3)
}
  0x1d   : > { %s4235_s19 = smov 128   ;;  %s4236_s24 = smov 8  }
  0x1e   : > { %3994 = dma.hbm_to_vmem [thread:$0]  (!%p4366_p8), %s400_s15, 512, %s402_s14, %s390_s30, %s4235_s19, %s4235_s19, %s4236_s24  }
  0x1f   : > { %p409_p4 = scmp.lt.s32.totalorder %s4233_s28, 3 }
  0x21   : > { %p410_p5 = pnand %p3897_p9, %p409_p4 }
  0x22   : > { %s415_s25 = sand.u32 (!%p410_p5), 1, %s4225_s26  }
  0x23   : > { %413 = sbr.rel (%p410_p5) target bundleno = 1359 (0x54f), region = 64  ;;  %s3898_s20 = sshll.u32 (!%p410_p5), %s415_s25, 5 }
  0x24   : > { %s416_s27 = scalar_lea.sflag (!%p410_p5), [#allocation3], %s415_s25  ;;  %s419_s12 = scalar_lea.vmem (!%p410_p5), [#allocation2], %s3898_s20 }
  0x28   : > { %4216 = dma.done.wait (%p4355_p7), %s416_s27, 512  }
  0x29   : > { %4218 = vsyncadd (%p4355_p7), %s416_s27, 4294966784  ;;  %v3980_v0 = vld [vmem:[%s6028_s3 + $0x8] sm:$0xff]  ;;  %v3979_v2 = vld [vmem:[%s6028_s3] sm:$0xff]  ;;  %vm532_vm0 = vcmask 261120   ;;  %s4237_s28 = smov 104   ;;  %s4238_s14 = smov 120  }
  0x2a   : > { %v3982_v1 = vld [vmem:[%s6029_s4 + $0x8] sm:$0xff]  ;;  %v3981_v3 = vld [vmem:[%s6029_s4] sm:$0xff]  ;;  %545 = vmatpush.bf16.msra.mxu0 %v3980_v0  ;;  %v492_v8 = vld [vmem:[%s419_s12 + $0x10] sm:$0xff]  ;;  %s4239_s15 = smov 112   ;;  %v4240_v51 = vmov 1983009808  }
  0x2b   : > { %v490_v4 = vld [vmem:[%s419_s12] sm:$0xff]  ;;  %v491_v5 = vld [vmem:[%s419_s12 + $0x8] sm:$0xff]  ;;  %584 = vmatpush.bf16.msra.mxu1 %v3982_v1  ;;  %v493_v9 = vld [vmem:[%s419_s12 + $0x18] sm:$0xff]  ;;  %v682_v52 = vunpack.c.l.s4 %v4240_v51  ;;  %vm677_vm1 = vcmask 1047556   ;;  %v4241_v1 = vmov 1934713408  }
  0x2c   : > { %v4098_v6 = vld [vmem:[%s6026_s1] ss:$0 sm:$0xff]  ;;  %v3984_v14 = vld [vmem:[%s6030_s5 + $0x8] sm:$0xff]  ;;  %vm2109_vm2 = vcmask 64512   ;;  %vm2849_vm3 = vcmask 1043456   ;;  %s3902_s23 = sshll.u32 %s4334_s29, 4 }
  0x2d   : > { %v4099_v7 = vld [vmem:[%s6027_s2] ss:$0 sm:$0xff]  ;;  %v498_v10 = vmul.f32 %v4098_v6, %v490_v4  ;;  %v499_v11 = vmul.f32 %v4098_v6, %v491_v5  ;;  %v500_v12 = vmul.f32 %v4098_v6, %v492_v8  ;;  %v501_v13 = vmul.f32 %v4098_v6, %v493_v9  ;;  %623 = vmatpush.bf16.msra.mxu2 %v3984_v14  ;;  %p484_p6 = scmp.lt.s32.totalorder %s3902_s23, 31  ;;  %s4242_s12 = smov 16  }
  0x2e   : > { %546 = vmatpush.bf16.msra.mxu0 %v3979_v2  ;;  %v3983_v17 = vld [vmem:[%s6030_s5] sm:$0xff]  ;;  %3987 = vmatpush.bf16.msra.mxu3 %v3984_v14  ;;  %v4511_v55 = vunpack.c.0.s8 %v682_v52  ;;  %v706_v2 = vunpack.c.l.s4 %v4241_v1  ;;  %s4243_s22 = smov 8   ;;  %s4244_s30 = smov 24  }
  0x2f   : > { %585 = vmatpush.bf16.msra.mxu1 %v3981_v3  ;;  %v4410_v15 = vadd.f32 %v4099_v7, %v498_v10  ;;  %v4412_v16 = vadd.f32 %v4099_v7, %v499_v11  ;;  %v4419_v19 = vadd.f32 %v4099_v7, %v500_v12  ;;  %v4421_v20 = vadd.f32 %v4099_v7, %v501_v13  ;;  %v4100_v22 = vld [vmem:[%s6031_s6] ss:$0 sm:$0xff]  ;;  %s6072_s23 = smov (!%p484_p6, %s3902_s23), 31  ;;  %s3899_s17 = sshll.u32 %s4334_s29, 2 }
  0x30   : > { %v4101_v23 = vld [vmem:[%s6032_s7] ss:$0 sm:$0xff]  ;;  %s3903_s19 = sshll.u32 %s6072_s23, 3  ;;  %p474_p7 = scmp.lt.s32.totalorder %s3899_s17, 7 }
  0x31   : > { %v510_v18 = vpack.c.bf16 %v4412_v16, %v4410_v15  ;;  %624 = vmatpush.bf16.msra.mxu2 %v3983_v17  ;;  %v511_v21 = vpack.c.bf16 %v4421_v20, %v4419_v19  ;;  %v4102_v43 = vld [vmem:[%s6033_s8] ss:$0 sm:$0xff]  ;;  %s5253_s20 = scalar_lea.vmem %s6038_s13, %s3903_s19  ;;  %p479_p8 = scmp.lt.s32.totalorder %s4334_s29, 1 }
  0x32   : > { %3988 = vmatpush.bf16.msra.mxu3 %v3983_v17  ;;  %s6074_s17 = smov (!%p474_p7, %s3899_s17), 7 }
  0x33   : > { %3912 = vmatmul.msk.bf16.vlgmr.msra.gmra.mxu0 %vm532_vm0, %v510_v18  ;;  %3922 = vmatmul.msk.bf16.vlgmr.msra.gmra.mxu1 %vm532_vm0, %v510_v18  ;;  %s3900_s19 = sshll.u32 %s6074_s17, 3  ;;  %s6076_s29 = smov (!%p479_p8, %s4334_s29), 1 }
  0x34   : > { %3932 = vmatmul.msk.bf16.vlgmr.msra.gmra.mxu2 %vm532_vm0, %v510_v18  ;;  %v4533_v18 = vunpack.c.0.s8 %v706_v2  ;;  %s3901_s27 = sshll.u32 %s6076_s29, 1 }
  0x35   : > { %3933 = vmatmul.msk.bf16.vlgmr.msra.gmra.mxu3 %vm532_vm0, %v511_v21 }
  0x43   : > { %3913 = vmatmul.msk.bf16.gmra.mxu0 %vm532_vm0, %v511_v21  ;;  %3923 = vmatmul.msk.bf16.gmra.mxu1 %vm532_vm0, %v511_v21 }
  0xb0   : > { %v548_v24 = vpop.f32.mrf.mxu0  ;;  %v587_v25 = vpop.f32.mrf.mxu1 }
  0xb1   : > { %v549_v26 = vadd.f32 %v4100_v22, %v548_v24  ;;  %v4437_v27 = vadd.f32 %v4101_v23, %v587_v25 }
  0xb3   : > { %1145 = vrot.lane.b32.xlu1 %v4437_v27, %s4237_s28  ;;  %1121 = vrot.lane.b32.xlu0 %v4437_v27, %s4238_s14  ;;  %v679_v54 = vrot.slane %v549_v26, 4  ;;  %v1159_v6 = vrot.slane %v4437_v27, 4 }
  0xb4   : > { %652 = vrot.lane.b32.xlu2 %v549_v26, %s4239_s15 }
  0xb7   : > { %v626_v42 = vpop.f32.mrf.mxu2 }
  0xb8   : > { %v550_v28 = vpop.f32.mrf.mxu0  ;;  %v589_v29 = vpop.f32.mrf.mxu1  ;;  %v4497_v44 = vadd.f32 %v4102_v43, %v626_v42 }
  0xb9   : > { %v4448_v30 = vadd.f32 %v4100_v22, %v550_v28  ;;  %v4450_v31 = vadd.f32 %v4101_v23, %v589_v29 }
  0xbb   : > { %1133 = vrot.lane.b32.xlu0 %v4437_v27, %s4239_s15  ;;  %640 = vrot.lane.b32.xlu1 %v549_v26, %s4238_s14  ;;  %v4038_v32 = vpack.i.bf16 %v4448_v30, %v4450_v31  ;;  %v1215_v7 = vrot.slane %v4450_v31, 4  ;;  %v735_v8 = vrot.slane %v4448_v30, 4 }
  0xbc   : > { %664 = vrot.lane.b32.xlu2 %v549_v26, %s4237_s28 }
  0xbf   : > { %v628_v45 = vpop.f32.mrf.mxu2 }
  0xc0   : > { %v553_v33 = vpop.f32.mrf.mxu0  ;;  %v592_v34 = vpop.f32.mrf.mxu1  ;;  %v4499_v46 = vadd.f32 %v4102_v43, %v628_v45 }
  0xc1   : > { %v4459_v35 = vadd.f32 %v4100_v22, %v553_v33  ;;  %v4461_v36 = vadd.f32 %v4101_v23, %v592_v34 }
  0xc2   : > { %v4503_v48 = vpack.i.bf16 %v4499_v46, %v4497_v44 }
  0xc3   : > { %4039 = vrot.lane.b32.xlu0 %v4038_v32, %s4238_s14  ;;  %1135 = vrot.lane.b32.xlu1 %v4450_v31, %s4239_s15  ;;  %v4043_v37 = vpack.i.bf16 %v4459_v35, %v4461_v36  ;;  %v791_v9 = vrot.slane %v4459_v35, 4  ;;  %v1271_v12 = vrot.slane %v4461_v36, 4 }
  0xc4   : > { %1147 = vrot.lane.b32.xlu2 %v4450_v31, %s4237_s28 }
  0xc8   : > { %v594_v38 = vpop.f32.mrf.mxu1  ;;  %v555_v40 = vpop.f32.mrf.mxu0 }
  0xc9   : > { %v4476_v39 = vadd.f32 %v4101_v23, %v594_v38  ;;  %v4484_v41 = vadd.f32 %v4100_v22, %v555_v40 }
  0xcb   : > { %654 = vrot.lane.b32.xlu0 %v4448_v30, %s4239_s15  ;;  %666 = vrot.lane.b32.xlu1 %v4448_v30, %s4237_s28  ;;  %v1327_v10 = vrot.slane %v4476_v39, 4  ;;  %v847_v11 = vrot.slane %v4484_v41, 4 }
  0xcc   : > { %4044 = vrot.lane.b32.xlu2 %v4043_v37, %s4238_s14 }
  0xd3   : > { %1137 = vrot.lane.b32.xlu0 %v4461_v36, %s4239_s15  ;;  %1149 = vrot.lane.b32.xlu1 %v4461_v36, %s4237_s28 }
  0xd4   : > { %656 = vrot.lane.b32.xlu2 %v4459_v35, %s4239_s15 }
  0xdb   : > { %668 = vrot.lane.b32.xlu0 %v4459_v35, %s4237_s28  ;;  %1127 = vrot.lane.b32.xlu1 %v4476_v39, %s4238_s14 }
  0xdc   : > { %1139 = vrot.lane.b32.xlu2 %v4476_v39, %s4239_s15 }
  0xe3   : > { %1151 = vrot.lane.b32.xlu0 %v4476_v39, %s4237_s28  ;;  %646 = vrot.lane.b32.xlu1 %v4484_v41, %s4238_s14 }
  0xe4   : > { %658 = vrot.lane.b32.xlu2 %v4484_v41, %s4239_s15 }
  0xeb   : > { %670 = vrot.lane.b32.xlu0 %v4484_v41, %s4237_s28  ;;  %4054 = vrot.lane.b32.xlu1 %v4503_v48, %s4239_s15 }
  0xec   : > { %4059 = vrot.lane.b32.xlu2 %v4503_v48, %s4237_s28 }
  0xf3   : > { %4049 = vrot.lane.b32.xlu0 %v4503_v48, %s4238_s14 }
 0x10e   : > { %v653_v47 = vpop.permute.xlu2 %652 }
 0x10f   : > { %v676_v53 = vrot.slane %v653_v47, 4  ;;  %v680_v56 = vsel %vm677_vm1, %v653_v47, %v679_v54 }
 0x110   : > { %v4518_v63 = vperm.slane %v680_v56, %v4511_v55 }
 0x111   : > { %v678_v59 = vsel %vm677_vm1, %v676_v53, %v549_v26 }
 0x112   : > { %v684_v3 = vperm.slane %v678_v59, %v4511_v55  ;;  %v715_v13 = vrot.slane %v4518_v63, 4 }
 0x114   : > { %v703_v21 = vrot.slane %v684_v3, 4 }
 0x116   : > { %v665_v49 = vpop.permute.xlu2 %664 }
 0x117   : > { %v689_v14 = vrot.slane %v665_v49, 4 }
 0x11e   : > { %v4509_v50 = vpop.permute.xlu2 %1147 }
 0x11f   : > { %v1225_v22 = vrot.slane %v4509_v50, 4 }
 0x125   : > { %v1146_v57 = vpop.permute.xlu1 %1145  ;;  %v1122_v58 = vpop.permute.xlu0 %1121 }
 0x126   : > { %v1169_v60 = vrot.slane %v1146_v57, 4  ;;  %v1171_v61 = vrot.slane %v1122_v58, 4  ;;  %v4515_v62 = vpop.permute.xlu2 %4044 }
 0x127   : > { %v4047_v24 = vunpack.i.h.bf16 %v4515_v62  ;;  %v4046_v45 = vunpack.i.l.bf16 %v4515_v62 }
 0x128   : > { %v1172_v0 = vsel %vm677_vm1, %v1146_v57, %v1171_v61  ;;  %v1170_v4 = vsel %vm677_vm1, %v1169_v60, %v1122_v58 }
 0x129   : > { %v1180_v5 = vperm.slane %v1172_v0, %v4511_v55  ;;  %v1176_v17 = vperm.slane %v1170_v4, %v4511_v55  ;;  %v4552_v57 = vrot.slane %v4047_v24, 4 }
 0x12b   : > { %v1193_v23 = vrot.slane %v1180_v5, 4  ;;  %v1181_v43 = vrot.slane %v1176_v17, 4 }
 0x12d   : > { %v1134_v25 = vpop.permute.xlu0 %1133  ;;  %v641_v26 = vpop.permute.xlu1 %640 }
 0x12e   : > { %v1157_v28 = vrot.slane %v1134_v25, 4  ;;  %v1160_v29 = vsel %vm677_vm1, %v1134_v25, %v1159_v6  ;;  %v657_v32 = vpop.permute.xlu2 %656  ;;  %v690_v33 = vsel %vm677_vm1, %v689_v14, %v641_v26  ;;  %v691_v34 = vrot.slane %v641_v26, 4 }
 0x12f   : > { %v1168_v37 = vperm.slane %v1160_v29, %v4511_v55  ;;  %v789_v38 = vrot.slane %v657_v32, 4  ;;  %v792_v40 = vsel %vm677_vm1, %v657_v32, %v791_v9  ;;  %v696_v42 = vperm.slane %v690_v33, %v4511_v55 }
 0x130   : > { %v1158_v47 = vsel %vm677_vm1, %v1157_v28, %v4437_v27  ;;  %v692_v51 = vsel %vm677_vm1, %v665_v49, %v691_v34  ;;  %v4556_v59 = vperm.slane %v792_v40, %v4511_v55 }
 0x131   : > { %v1164_v52 = vperm.slane %v1158_v47, %v4511_v55  ;;  %v1194_v53 = vsel %vm677_vm1, %v1193_v23, %v1168_v37  ;;  %v1195_v54 = vrot.slane %v1168_v37, 4  ;;  %v790_v56 = vsel %vm677_vm1, %v789_v38, %v4459_v35 }
 0x132   : > { %v1200_v58 = vperm.slane %v1194_v53, %v4533_v18  ;;  %v700_v27 = vperm.slane %v692_v51, %v4511_v55  ;;  %v701_v0 = vrot.slane %v696_v42, 4  ;;  %v4563_v35 = vrot.slane %v4046_v45, 4 }
 0x133   : > { %v1182_v49 = vsel %vm677_vm1, %v1181_v43, %v1164_v52  ;;  %v1183_v60 = vrot.slane %v1164_v52, 4  ;;  %v1196_v61 = vsel %vm677_vm1, %v1180_v5, %v1195_v54  ;;  %v4570_v4 = vperm.slane %v790_v56, %v4511_v55 }
 0x134   : > { %v4566_v1 = vperm.slane %v1182_v49, %v4533_v18  ;;  %v1204_v2 = vperm.slane %v1196_v61, %v4533_v18  ;;  %v702_v9 = vsel %vm677_vm1, %v701_v0, %v684_v3  ;;  %v704_v14 = vsel %vm677_vm1, %v696_v42, %v703_v21 }
 0x135   : > { %v1184_v6 = vsel %vm677_vm1, %v1176_v17, %v1183_v60  ;;  %v713_v5 = vrot.slane %v700_v27, 4  ;;  %v1209_v25 = vrot.slane %v1200_v58, 4  ;;  %v827_v28 = vrot.slane %v4556_v59, 4  ;;  %v4582_v34 = vpop.permute.xlu0 %4039  ;;  %v1136_v51 = vpop.permute.xlu1 %1135 }
 0x136   : > { %v1192_v23 = vperm.slane %v1184_v6, %v4533_v18  ;;  %v1211_v26 = vrot.slane %v1204_v2, 4  ;;  %v708_v29 = vperm.slane %v702_v9, %v4533_v18  ;;  %v712_v32 = vperm.slane %v704_v14, %v4533_v18 }
 0x137   : > { %v714_v33 = vsel %vm677_vm1, %v713_v5, %v4518_v63  ;;  %v716_v17 = vsel %vm677_vm1, %v700_v27, %v715_v13  ;;  %v1205_v40 = vrot.slane %v4566_v1, 4  ;;  %v815_v42 = vrot.slane %v4570_v4, 4  ;;  %v1140_v63 = vpop.permute.xlu2 %1139 }
 0x138   : > { %v4584_v3 = vrot.slane %v1192_v23, 4  ;;  %v1212_v21 = vsel %vm677_vm1, 0.0, %v1211_v26  ;;  %v1392_v37 = vsel %vm677_vm1, %v1211_v26, %v1200_v58  ;;  %v720_v38 = vperm.slane %v714_v33, %v4533_v18 }
 0x139   : > { %v724_v43 = vperm.slane %v716_v17, %v4533_v18  ;;  %v725_v47 = vrot.slane %v708_v29, 4  ;;  %v1397_v52 = vrot.slane %v1212_v21, 4  ;;  %v727_v53 = vrot.slane %v712_v32, 4 }
 0x13a   : > { %v4594_v13 = vsel %vm677_vm1, 0.0, %v4584_v3  ;;  %v729_v54 = vrot.slane %v720_v38, 4  ;;  %v1210_v56 = vsel %vm677_vm1, 0.0, %v1209_v25  ;;  %v4598_v58 = vperm.slane %v1392_v37, %v4511_v55 }
 0x13b   : > { %v731_v27 = vrot.slane %v724_v43, 4  ;;  %v4042_v49 = vunpack.i.h.bf16 %v4582_v34  ;;  %v1386_v60 = vrot.slane %v4594_v13, 4  ;;  %v726_v61 = vsel %vm677_vm1, 0.0, %v725_v47 }
 0x13c   : > { %v728_v0 = vsel %vm677_vm1, 0.0, %v727_v53  ;;  %v901_v2 = vsel %vm677_vm1, %v727_v53, %v708_v29  ;;  %v4611_v23 = vsel %vm677_vm1, %v1397_v52, %v1210_v56  ;;  %v730_v25 = vsel %vm677_vm1, 0.0, %v729_v54 }
 0x13d   : > { %v732_v6 = vsel %vm677_vm1, 0.0, %v731_v27  ;;  %v4607_v9 = vperm.slane %v901_v2, %v4511_v55  ;;  %v906_v14 = vrot.slane %v728_v0, 4  ;;  %v912_v5 = vsel %vm677_vm1, %v731_v27, %v720_v38  ;;  %v655_v27 = vpop.permute.xlu0 %654 }
 0x13e   : > { %v4041_v26 = vunpack.i.l.bf16 %v4582_v34  ;;  %v1325_v32 = vrot.slane %v1140_v63, 4  ;;  %v4617_v29 = vperm.slane %v912_v5, %v4511_v55  ;;  %v4621_v17 = vrot.slane %v4042_v49, 4  ;;  %v667_v5 = vpop.permute.xlu1 %666 }
 0x13f   : > { %v907_v33 = vsel %vm677_vm1, %v906_v14, %v726_v61  ;;  %v1213_v21 = vrot.slane %v1136_v51, 4  ;;  %v917_v37 = vrot.slane %v732_v6, 4  ;;  %v1328_v47 = vsel %vm677_vm1, %v1140_v63, %v1327_v10  ;;  %v659_v14 = vpop.permute.xlu2 %658 }
 0x140   : > { %v1226_v38 = vsel %vm677_vm1, %v1225_v22, %v4041_v26  ;;  %v1227_v43 = vrot.slane %v4041_v26, 4  ;;  %v925_v52 = vrot.slane %v4607_v9, 4  ;;  %v1326_v54 = vsel %vm677_vm1, %v1325_v32, %v4476_v39 }
 0x141   : > { %v1232_v53 = vperm.slane %v1226_v38, %v4511_v55  ;;  %v1214_v56 = vsel %vm677_vm1, %v1213_v21, %v4450_v31  ;;  %v4636_v61 = vperm.slane %v907_v33, %v4511_v55  ;;  %v1216_v10 = vsel %vm677_vm1, %v1136_v51, %v1215_v7 }
 0x142   : > { %v1228_v22 = vsel %vm677_vm1, %v4509_v50, %v1227_v43  ;;  %v1220_v63 = vperm.slane %v1214_v56, %v4511_v55  ;;  %v4646_v39 = vperm.slane %v1328_v47, %v4511_v55  ;;  %v1224_v6 = vperm.slane %v1216_v10, %v4511_v55 }
 0x143   : > { %v1236_v0 = vperm.slane %v1228_v22, %v4511_v55  ;;  %v1237_v2 = vrot.slane %v1232_v53, 4  ;;  %v4650_v26 = vperm.slane %v1326_v54, %v4511_v55  ;;  %v733_v32 = vrot.slane %v655_v27, 4 }
 0x144   : > { %v1239_v50 = vrot.slane %v1220_v63, 4  ;;  %v736_v31 = vsel %vm677_vm1, %v655_v27, %v735_v8  ;;  %v1251_v33 = vrot.slane %v1224_v6, 4  ;;  %v845_v54 = vrot.slane %v659_v14, 4 }
 0x145   : > { %v1249_v7 = vrot.slane %v1236_v0, 4  ;;  %v1238_v51 = vsel %vm677_vm1, %v1237_v2, %v1220_v63  ;;  %v744_v21 = vperm.slane %v736_v31, %v4511_v55  ;;  %v734_v47 = vsel %vm677_vm1, %v733_v32, %v4448_v30 }
 0x146   : > { %v1240_v38 = vsel %vm677_vm1, %v1232_v53, %v1239_v50  ;;  %v1244_v43 = vperm.slane %v1238_v51, %v4533_v18  ;;  %v1252_v8 = vsel %vm677_vm1, %v1236_v0, %v1251_v33  ;;  %v740_v27 = vperm.slane %v734_v47, %v4511_v55  ;;  %v1138_v47 = vpop.permute.xlu0 %1137 }
 0x147   : > { %v1248_v56 = vperm.slane %v1240_v38, %v4533_v18  ;;  %v1250_v22 = vsel %vm677_vm1, %v1249_v7, %v1224_v6  ;;  %v4666_v10 = vsel %vm677_vm1, %v917_v37, %v730_v25  ;;  %v1260_v53 = vperm.slane %v1252_v8, %v4533_v18 }
 0x148   : > { %v1256_v63 = vperm.slane %v1250_v22, %v4533_v18  ;;  %v1261_v2 = vrot.slane %v1244_v43, 4  ;;  %v846_v32 = vsel %vm677_vm1, %v845_v54, %v4484_v41  ;;  %v848_v0 = vsel %vm677_vm1, %v659_v14, %v847_v11 }
 0x149   : > { %v1263_v30 = vrot.slane %v1248_v56, 4  ;;  %v1351_v6 = vrot.slane %v4650_v26, 4  ;;  %v1267_v25 = vrot.slane %v1260_v53, 4  ;;  %v771_v37 = vrot.slane %v744_v21, 4 }
 0x14a   : > { %v1265_v31 = vrot.slane %v1256_v63, 4  ;;  %v759_v51 = vrot.slane %v740_v27, 4  ;;  %v4681_v33 = vperm.slane %v846_v32, %v4511_v55  ;;  %v745_v38 = vrot.slane %v667_v5, 4  ;;  %v1150_v32 = vpop.permute.xlu1 %1149 }
 0x14b   : > { %v4678_v7 = vsel %vm677_vm1, 0.0, %v1263_v30  ;;  %v4684_v54 = vsel %vm677_vm1, 0.0, %v1261_v2  ;;  %v1268_v41 = vsel %vm677_vm1, 0.0, %v1267_v25  ;;  %v1446_v11 = vsel %vm677_vm1, %v1267_v25, %v1256_v63 }
 0x14c   : > { %v4689_v14 = vperm.slane %v848_v0, %v4511_v55  ;;  %v1266_v56 = vsel %vm677_vm1, 0.0, %v1265_v31  ;;  %v4693_v22 = vsel %vm677_vm1, %v1263_v30, %v1244_v43  ;;  %v1440_v8 = vrot.slane %v4678_v7, 4 }
 0x14d   : > { %v1451_v53 = vrot.slane %v1268_v41, 4  ;;  %v4697_v50 = vperm.slane %v1446_v11, %v4511_v55  ;;  %v746_v2 = vsel %vm677_vm1, %v745_v38, %v4042_v49  ;;  %v748_v63 = vsel %vm677_vm1, %v667_v5, %v4621_v17 }
 0x14e   : > { %v1269_v0 = vrot.slane %v1138_v47, 4  ;;  %v752_v43 = vperm.slane %v746_v2, %v4511_v55  ;;  %v756_v30 = vperm.slane %v748_v63, %v4511_v55  ;;  %v1272_v25 = vsel %vm677_vm1, %v1138_v47, %v1271_v12 }
 0x14f   : > { %v1452_v41 = vsel %vm677_vm1, %v1451_v53, %v1266_v56  ;;  %v1281_v38 = vrot.slane %v1150_v32, 4  ;;  %v1280_v47 = vperm.slane %v1272_v25, %v4511_v55 }
 0x150   : > { %v1270_v49 = vsel %vm677_vm1, %v1269_v0, %v4461_v36  ;;  %v757_v17 = vrot.slane %v752_v43, 4  ;;  %v760_v5 = vsel %vm677_vm1, %v752_v43, %v759_v51  ;;  %v769_v11 = vrot.slane %v756_v30, 4 }
 0x151   : > { %v772_v2 = vsel %vm677_vm1, %v756_v30, %v771_v37  ;;  %v768_v63 = vperm.slane %v760_v5, %v4533_v18  ;;  %v1276_v12 = vperm.slane %v1270_v49, %v4511_v55  ;;  %v1282_v36 = vsel %vm677_vm1, %v1281_v38, %v4046_v45 }
 0x152   : > { %v780_v31 = vperm.slane %v772_v2, %v4533_v18  ;;  %v758_v56 = vsel %vm677_vm1, %v757_v17, %v740_v27  ;;  %v770_v53 = vsel %vm677_vm1, %v769_v11, %v744_v21  ;;  %v1284_v51 = vsel %vm677_vm1, %v1150_v32, %v4563_v35  ;;  %v1128_v48 = vpop.permute.xlu1 %1127 }
 0x153   : > { %v764_v37 = vperm.slane %v758_v56, %v4533_v18  ;;  %v776_v0 = vperm.slane %v770_v53, %v4533_v18  ;;  %v783_v43 = vrot.slane %v768_v63, 4  ;;  %v1471_v49 = vrot.slane %v4697_v50, 4 }
 0x154   : > { %v787_v30 = vrot.slane %v780_v31, 4  ;;  %v1295_v25 = vrot.slane %v1276_v12, 4  ;;  %v1288_v27 = vperm.slane %v1282_v36, %v4511_v55  ;;  %v1292_v21 = vperm.slane %v1284_v51, %v4511_v55 }
 0x155   : > { %v4733_v17 = vperm.slane %v1452_v41, %v4511_v55  ;;  %v784_v45 = vsel %vm677_vm1, 0.0, %v783_v43  ;;  %v785_v38 = vrot.slane %v776_v0, 4  ;;  %v1307_v11 = vrot.slane %v1280_v47, 4 }
 0x156   : > { %v788_v35 = vsel %vm677_vm1, 0.0, %v787_v30  ;;  %v966_v32 = vsel %vm677_vm1, %v787_v30, %v776_v0  ;;  %v1206_v31 = vsel %vm677_vm1, 0.0, %v1205_v40  ;;  %v781_v2 = vrot.slane %v764_v37, 4 }
 0x157   : > { %v971_v5 = vrot.slane %v788_v35, 4  ;;  %v786_v63 = vsel %vm677_vm1, 0.0, %v785_v38  ;;  %v4743_v56 = vsel %vm677_vm1, %v783_v43, %v764_v37  ;;  %v1293_v41 = vrot.slane %v1288_v27, 4 }
 0x158   : > { %v960_v53 = vrot.slane %v784_v45, 4  ;;  %v1296_v51 = vsel %vm677_vm1, %v1288_v27, %v1295_v25  ;;  %v1305_v34 = vrot.slane %v1292_v21, 4  ;;  %v4748_v0 = vperm.slane %v966_v32, %v4511_v55 }
 0x159   : > { %v972_v36 = vsel %vm677_vm1, %v971_v5, %v786_v63  ;;  %v1294_v40 = vsel %vm677_vm1, %v1293_v41, %v1276_v12  ;;  %v1304_v38 = vperm.slane %v1296_v51, %v4533_v18  ;;  %v1308_v45 = vsel %vm677_vm1, %v1292_v21, %v1307_v11 }
 0x15a   : > { %v4751_v30 = vperm.slane %v972_v36, %v4511_v55  ;;  %v1300_v37 = vperm.slane %v1294_v40, %v4533_v18  ;;  %v1306_v43 = vsel %vm677_vm1, %v1305_v34, %v1280_v47  ;;  %v1381_v25 = vsel %vm677_vm1, %v4584_v3, %v4566_v1  ;;  %v669_v40 = vpop.permute.xlu0 %668 }
 0x15b   : > { %v782_v27 = vsel %vm677_vm1, 0.0, %v781_v2  ;;  %v1312_v35 = vperm.slane %v1306_v43, %v4533_v18  ;;  %v1316_v32 = vperm.slane %v1308_v45, %v4533_v18  ;;  %v1319_v5 = vrot.slane %v1304_v38, 4 }
 0x15c   : > { %v4765_v12 = vsel %vm677_vm1, %v960_v53, %v782_v27  ;;  %v1317_v63 = vrot.slane %v1300_v37, 4  ;;  %v1385_v41 = vperm.slane %v1381_v25, %v4511_v55  ;;  %v1387_v34 = vsel %vm677_vm1, %v1386_v60, %v1206_v31 }
 0x15d   : > { %v991_v47 = vrot.slane %v4748_v0, 4  ;;  %v4773_v1 = vsel %vm677_vm1, 0.0, %v1319_v5  ;;  %v1323_v3 = vrot.slane %v1316_v32, 4  ;;  %v1402_v21 = vperm.slane %v4611_v23, %v4511_v55 }
 0x15e   : > { %v989_v11 = vrot.slane %v4751_v30, 4  ;;  %v1321_v2 = vrot.slane %v1312_v35, 4  ;;  %v1391_v53 = vperm.slane %v1387_v34, %v4511_v55  ;;  %v1405_v36 = vrot.slane %v1385_v41, 4 }
 0x15f   : > { %v1324_v51 = vsel %vm677_vm1, 0.0, %v1323_v3  ;;  %v4781_v13 = vsel %vm677_vm1, %v1319_v5, %v1300_v37  ;;  %v1500_v60 = vsel %vm677_vm1, %v1323_v3, %v1312_v35  ;;  %v1417_v31 = vrot.slane %v4598_v58, 4 }
 0x160   : > { %v4786_v38 = vsel %vm677_vm1, 0.0, %v1317_v63  ;;  %v1505_v43 = vrot.slane %v1324_v51, 4  ;;  %v1406_v45 = vsel %vm677_vm1, %v1391_v53, %v1405_v36  ;;  %v1403_v32 = vrot.slane %v1391_v53, 4 }
 0x161   : > { %v1414_v25 = vperm.slane %v1406_v45, %v4533_v18  ;;  %v1418_v27 = vsel %vm677_vm1, %v1402_v21, %v1417_v31  ;;  %v1415_v37 = vrot.slane %v1402_v21, 4  ;;  %v1322_v5 = vsel %vm677_vm1, 0.0, %v1321_v2 }
 0x162   : > { %v4794_v35 = vperm.slane %v1500_v60, %v4511_v55  ;;  %v1426_v34 = vperm.slane %v1418_v27, %v4533_v18  ;;  %v801_v63 = vrot.slane %v669_v40, 4  ;;  %v1404_v3 = vsel %vm677_vm1, %v1403_v32, %v1385_v41 }
 0x163   : > { %v1416_v36 = vsel %vm677_vm1, %v1415_v37, %v4598_v58  ;;  %v1433_v51 = vrot.slane %v1414_v25, 4  ;;  %v1410_v31 = vperm.slane %v1404_v3, %v4533_v18  ;;  %v1506_v53 = vsel %vm677_vm1, %v1505_v43, %v1322_v5 }
 0x164   : > { %v1431_v45 = vrot.slane %v1426_v34, 4  ;;  %v1422_v21 = vperm.slane %v1416_v36, %v4533_v18  ;;  %v802_v2 = vsel %vm677_vm1, %v801_v63, %v4047_v24  ;;  %v804_v41 = vsel %vm677_vm1, %v669_v40, %v4552_v57 }
 0x165   : > { %v1434_v60 = vsel %vm677_vm1, %v1426_v34, %v1433_v51  ;;  %v808_v27 = vperm.slane %v802_v2, %v4511_v55  ;;  %v1429_v37 = vrot.slane %v1410_v31, 4  ;;  %v812_v36 = vperm.slane %v804_v41, %v4511_v55 }
 0x166   : > { %v1432_v58 = vsel %vm677_vm1, %v1431_v45, %v1414_v25  ;;  %v1427_v32 = vrot.slane %v1422_v21, 4  ;;  %v2096_v3 = vpack.c.bf16 %v1434_v60, %v1434_v60 }
 0x167   : > { %v2095_v23 = vpack.c.bf16 %v1432_v58, %v1432_v58  ;;  %v813_v62 = vrot.slane %v808_v27, 4  ;;  %v816_v24 = vsel %vm677_vm1, %v808_v27, %v815_v42  ;;  %v1430_v57 = vsel %vm677_vm1, %v1422_v21, %v1429_v37 }
 0x168   : > { %v1428_v43 = vsel %vm677_vm1, %v1427_v32, %v1410_v31  ;;  %v2171_v5 = vsel %vm2109_vm2, %v2096_v3, 0  ;;  %v824_v40 = vperm.slane %v816_v24, %v4533_v18  ;;  %v2094_v63 = vpack.c.bf16 %v1430_v57, %v1430_v57 }
 0x169   : > { %v2152_v25 = vsel %vm2109_vm2, %v2095_v23, 0  ;;  %v2093_v34 = vpack.c.bf16 %v1428_v43, %v1428_v43  ;;  %2180 = vmatpush.bf16.xpose.msrb.mxu1 %v2171_v5  ;;  %v814_v51 = vsel %vm677_vm1, %v813_v62, %v4570_v4  ;;  %v825_v42 = vrot.slane %v812_v36, 4 }
 0x16a   : > { %2161 = vmatpush.bf16.xpose.msrb.mxu0 %v2152_v25  ;;  %v820_v45 = vperm.slane %v814_v51, %v4533_v18  ;;  %v828_v31 = vsel %vm677_vm1, %v812_v36, %v827_v28  ;;  %v839_v2 = vrot.slane %v824_v40, 4  ;;  %v2133_v60 = vsel %vm2109_vm2, %v2094_v63, 0 }
 0x16b   : > { %v2114_v21 = vsel %vm2109_vm2, %v2093_v34, 0  ;;  %v836_v23 = vperm.slane %v828_v31, %v4533_v18  ;;  %v826_v41 = vsel %vm677_vm1, %v825_v42, %v4556_v59  ;;  %v922_v59 = vperm.slane %v4666_v10, %v4511_v55 }
 0x16c   : > { %2123 = vmatpush.bf16.xpose.msrb.mxu3 %v2114_v21  ;;  %v837_v4 = vrot.slane %v820_v45, 4  ;;  %v840_v27 = vsel %vm677_vm1, 0.0, %v839_v2  ;;  %v1009_v58 = vsel %vm677_vm1, %v839_v2, %v820_v45  ;;  %v832_v32 = vperm.slane %v826_v41, %v4533_v18 }
 0x16d   : > { %v843_v28 = vrot.slane %v836_v23, 4  ;;  %v4835_v37 = vperm.slane %v1009_v58, %v4511_v55  ;;  %v1014_v3 = vrot.slane %v840_v27, 4  ;;  %v926_v62 = vsel %vm677_vm1, %v4636_v61, %v925_v52 }
 0x16e   : > { %v838_v36 = vsel %vm677_vm1, 0.0, %v837_v4  ;;  %v937_v24 = vrot.slane %v4617_v29, 4  ;;  %v841_v43 = vrot.slane %v832_v32, 4  ;;  %v4851_v25 = vperm.slane %v1506_v53, %v4511_v55 }
 0x16f   : > { %v844_v5 = vsel %vm677_vm1, 0.0, %v843_v28  ;;  %v1015_v57 = vsel %vm677_vm1, %v1014_v3, %v838_v36  ;;  %v1020_v40 = vsel %vm677_vm1, %v843_v28, %v832_v32  ;;  %v1525_v10 = vrot.slane %v4794_v35, 4 }
 0x170   : > { %v4855_v34 = vperm.slane %v1020_v40, %v4511_v55  ;;  %v1025_v63 = vrot.slane %v844_v5, 4  ;;  %v842_v52 = vsel %vm677_vm1, 0.0, %v841_v43  ;;  %v934_v51 = vperm.slane %v926_v62, %v4533_v18 }
 0x171   : > { %v938_v45 = vsel %vm677_vm1, %v922_v59, %v937_v24  ;;  %v923_v42 = vrot.slane %v4636_v61, 4  ;;  %v4862_v31 = vperm.slane %v1015_v57, %v4511_v55  ;;  %v1339_v2 = vrot.slane %v1128_v48, 4  ;;  %v1152_v24 = vpop.permute.xlu0 %1151 }
 0x172   : > { %v946_v53 = vperm.slane %v938_v45, %v4533_v18  ;;  %v935_v21 = vrot.slane %v922_v59, 4  ;;  %v1033_v23 = vrot.slane %v4835_v37, 4  ;;  %v953_v41 = vrot.slane %v934_v51, 4 }
 0x173   : > { %v1439_v4 = vperm.slane %v4693_v22, %v4511_v55  ;;  %v924_v58 = vsel %vm677_vm1, %v923_v42, %v4607_v9  ;;  %v1441_v32 = vsel %vm677_vm1, %v1440_v8, %v4684_v54  ;;  %v1045_v28 = vrot.slane %v4855_v34, 4 }
 0x174   : > { %2142 = vmatpush.bf16.xpose.msra.mxu3 %v2133_v60  ;;  %v1026_v60 = vsel %vm677_vm1, %v1025_v63, %v842_v52  ;;  %v951_v27 = vrot.slane %v946_v53, 4  ;;  %v936_v61 = vsel %vm677_vm1, %v935_v21, %v4617_v29  ;;  %v954_v36 = vsel %vm677_vm1, %v946_v53, %v953_v41 }
 0x175   : > { %v4879_v3 = vperm.slane %v936_v61, %v4533_v18  ;;  %v1445_v22 = vperm.slane %v1441_v32, %v4511_v55  ;;  %v4884_v59 = vperm.slane %v1026_v60, %v4511_v55  ;;  %v2080_v29 = vpack.c.bf16 %v954_v36, %v954_v36 }
 0x176   : > { %v952_v9 = vsel %vm677_vm1, %v951_v27, %v934_v51  ;;  %v1459_v62 = vrot.slane %v1439_v4, 4  ;;  %v4888_v54 = vperm.slane %v924_v58, %v4533_v18  ;;  %v1472_v43 = vsel %vm677_vm1, %v4733_v17, %v1471_v49 }
 0x177   : > { %v2079_v7 = vpack.c.bf16 %v952_v9, %v952_v9  ;;  %v947_v8 = vrot.slane %v4879_v3, 4  ;;  %3937 = vmatmul.msk.bf16.vlgmr.msrb.gmra.mxu1 %vm2109_vm2, %v2080_v29  ;;  %v1480_v57 = vperm.slane %v1472_v43, %v4533_v18  ;;  %v1457_v40 = vrot.slane %v1445_v22, 4 }
 0x178   : > { %v1460_v5 = vsel %vm677_vm1, %v1445_v22, %v1459_v62  ;;  %v1469_v63 = vrot.slane %v4733_v17, 4  ;;  %v1337_v45 = vrot.slane %v1152_v24, 4  ;;  %v1340_v42 = vsel %vm677_vm1, %v1152_v24, %v1339_v2 }
 0x179   : > { %3936 = vmatmul.msk.bf16.vlgmr.msrb.gmra.mxu0 %vm2109_vm2, %v2079_v7  ;;  %v948_v52 = vsel %vm677_vm1, %v947_v8, %v4888_v54  ;;  %v1468_v51 = vperm.slane %v1460_v5, %v4533_v18  ;;  %v1485_v53 = vrot.slane %v1480_v57, 4  ;;  %v1458_v21 = vsel %vm677_vm1, %v1457_v40, %v1439_v4 }
 0x17a   : > { %v2077_v49 = vpack.c.bf16 %v948_v52, %v948_v52  ;;  %v1470_v60 = vsel %vm677_vm1, %v1469_v63, %v4697_v50  ;;  %v1464_v17 = vperm.slane %v1458_v21, %v4533_v18  ;;  %v1338_v58 = vsel %vm677_vm1, %v1337_v45, %v1128_v48 }
 0x17b   : > { %v1487_v41 = vrot.slane %v1468_v51, 4  ;;  %v1476_v27 = vperm.slane %v1470_v60, %v4533_v18  ;;  %v1043_v61 = vrot.slane %v4884_v59, 4  ;;  %v1486_v2 = vsel %vm677_vm1, %v1485_v53, %v1468_v51  ;;  %v647_v51 = vpop.permute.xlu1 %646 }
 0x17c   : > { %3934 = vmatmul.msk.bf16.vlgmr.msrb.gmra.mxu3 %vm2109_vm2, %v2077_v49  ;;  %v1344_v32 = vperm.slane %v1338_v58, %v4511_v55  ;;  %v1348_v4 = vperm.slane %v1340_v42, %v4511_v55  ;;  %v2099_v36 = vpack.c.bf16 %v1486_v2, %v1486_v2  ;;  %v1483_v9 = vrot.slane %v1464_v17, 4 }
 0x17d   : > { %v1488_v50 = vsel %vm677_vm1, %v1480_v57, %v1487_v41  ;;  %v1481_v22 = vrot.slane %v1476_v27, 4  ;;  %v6049_v42 = vrot.slane %v4646_v39, 4  ;;  %v949_v58 = vrot.slane %v4888_v54, 4 }
 0x17e   : > { %v2100_v29 = vpack.c.bf16 %v1488_v50, %v1488_v50  ;;  %v1349_v62 = vrot.slane %v1344_v32, 4  ;;  %v1352_v48 = vsel %vm677_vm1, %v1344_v32, %v1351_v6  ;;  %v1361_v24 = vrot.slane %v1348_v4, 4 }
 0x17f   : > { %v2228_v7 = vsel %vm2109_vm2, %v2099_v36, 0  ;;  %v1482_v8 = vsel %vm677_vm1, %v1481_v22, %v1464_v17  ;;  %v1484_v43 = vsel %vm677_vm1, %v1476_v27, %v1483_v9  ;;  %v1360_v5 = vperm.slane %v1352_v48, %v4533_v18  ;;  %v671_v17 = vpop.permute.xlu0 %670 }
 0x180   : > { %2237 = vmatpush.bf16.xpose.msra.mxu0 %v2228_v7  ;;  %v2247_v57 = vsel %vm2109_vm2, %v2100_v29, 0  ;;  %v2097_v40 = vpack.c.bf16 %v1482_v8, %v1482_v8  ;;  %v2098_v63 = vpack.c.bf16 %v1484_v43, %v1484_v43  ;;  %v1350_v52 = vsel %vm677_vm1, %v1349_v62, %v4650_v26 }
 0x181   : > { %2256 = vmatpush.bf16.xpose.msra.mxu1 %v2247_v57  ;;  %v1356_v6 = vperm.slane %v1350_v52, %v4533_v18  ;;  %v1362_v45 = vsel %vm677_vm1, %v1361_v24, %v4646_v39  ;;  %v1364_v49 = vsel %vm677_vm1, %v1348_v4, %v6049_v42  ;;  %v1375_v53 = vrot.slane %v1360_v5, 4 }
 0x182   : > { %v2190_v21 = vsel %vm2109_vm2, %v2097_v40, 0  ;;  %v2209_v60 = vsel %vm2109_vm2, %v2098_v63, 0  ;;  %v1368_v41 = vperm.slane %v1362_v45, %v4533_v18  ;;  %v1372_v26 = vperm.slane %v1364_v49, %v4533_v18 }
 0x183   : > { %v4938_v27 = vsel %vm677_vm1, %v1043_v61, %v4855_v34  ;;  %2199 = vmatpush.bf16.xpose.msrb.mxu2 %v2190_v21  ;;  %2218 = vmatpush.bf16.xpose.msrb.mxu3 %v2209_v60  ;;  %v859_v39 = vrot.slane %v647_v51, 4  ;;  %v959_v2 = vperm.slane %v4743_v56, %v4511_v55  ;;  %v1373_v32 = vrot.slane %v1356_v6, 4 }
 0x184   : > { %v1377_v4 = vrot.slane %v1368_v41, 4  ;;  %v1379_v36 = vrot.slane %v1372_v26, 4  ;;  %v965_v50 = vperm.slane %v4765_v12, %v4511_v55  ;;  %v4946_v22 = vsel %vm677_vm1, 0.0, %v1375_v53 }
 0x185   : > { %v4949_v61 = vsel %vm677_vm1, %v1375_v53, %v1356_v6  ;;  %v990_v9 = vsel %vm677_vm1, %v989_v11, %v4748_v0  ;;  %v857_v29 = vrot.slane %v671_v17, 4  ;;  %v979_v24 = vrot.slane %v959_v2, 4 }
 0x186   : > { %v1380_v56 = vsel %vm677_vm1, 0.0, %v1379_v36  ;;  %v1554_v62 = vsel %vm677_vm1, %v1379_v36, %v1368_v41  ;;  %v977_v48 = vrot.slane %v965_v50, 4  ;;  %v4961_v8 = vperm.slane %v990_v9, %v4533_v18 }
 0x187   : > { %v4958_v12 = vperm.slane %v1554_v62, %v4511_v55  ;;  %v1559_v7 = vrot.slane %v1380_v56, 4  ;;  %v858_v43 = vsel %vm677_vm1, %v857_v29, %v647_v51  ;;  %v1378_v5 = vsel %vm677_vm1, 0.0, %v1377_v4 }
 0x188   : > { %v978_v11 = vsel %vm677_vm1, %v977_v48, %v959_v2  ;;  %v860_v57 = vsel %vm677_vm1, %v671_v17, %v859_v39  ;;  %v864_v40 = vperm.slane %v858_v43, %v4511_v55  ;;  %v4969_v63 = vsel %vm677_vm1, 0.0, %v1373_v32 }
 0x189   : > { %v1548_v52 = vrot.slane %v4946_v22, 4  ;;  %v4973_v6 = vperm.slane %v978_v11, %v4533_v18  ;;  %v1001_v45 = vrot.slane %v4961_v8, 4  ;;  %v868_v51 = vperm.slane %v860_v57, %v4511_v55 }
 0x18a   : > { %v869_v42 = vrot.slane %v864_v40, 4  ;;  %v6050_v49 = vrot.slane %v4681_v33, 4  ;;  %v980_v21 = vsel %vm677_vm1, %v965_v50, %v979_v24  ;;  %v1560_v60 = vsel %vm677_vm1, %v1559_v7, %v1378_v5 }
 0x18b   : > { %v1579_v41 = vrot.slane %v4958_v12, 4  ;;  %v1002_v26 = vsel %vm677_vm1, %v1001_v45, %v4973_v6  ;;  %v881_v32 = vrot.slane %v868_v51, 4  ;;  %v6051_v4 = vrot.slane %v4689_v14, 4 }
 0x18c   : > { %v872_v53 = vsel %vm677_vm1, %v864_v40, %v6050_v49  ;;  %v2081_v39 = vpack.c.bf16 %v1002_v26, %v1002_v26  ;;  %v870_v2 = vsel %vm677_vm1, %v869_v42, %v4681_v33  ;;  %v992_v56 = vsel %vm677_vm1, %v4751_v30, %v991_v47 }
 0x18d   : > { %v880_v17 = vperm.slane %v872_v53, %v4533_v18  ;;  %v884_v36 = vsel %vm677_vm1, %v868_v51, %v6051_v4  ;;  %v876_v50 = vperm.slane %v870_v2, %v4533_v18  ;;  %v882_v33 = vsel %vm677_vm1, %v881_v32, %v4689_v14 }
 0x18e   : > { %v892_v9 = vperm.slane %v884_v36, %v4533_v18  ;;  %3938 = vmatmul.msk.bf16.vlgmr.msrb.gmra.mxu2 %vm2109_vm2, %v2081_v39  ;;  %v988_v62 = vperm.slane %v980_v21, %v4533_v18  ;;  %v1000_v48 = vperm.slane %v992_v56, %v4533_v18  ;;  %v6052_v24 = vrot.slane %v4773_v1, 4 }
 0x18f   : > { %v895_v29 = vrot.slane %v880_v17, 4  ;;  %v888_v43 = vperm.slane %v882_v33, %v4533_v18  ;;  %v893_v0 = vrot.slane %v876_v50, 4  ;;  %v1493_v14 = vperm.slane %v4781_v13, %v4511_v55 }
 0x190   : > { %v1495_v7 = vsel %vm677_vm1, %v6052_v24, %v4786_v38  ;;  %v899_v30 = vrot.slane %v892_v9, 4  ;;  %v1005_v57 = vrot.slane %v1000_v48, 4  ;;  %v5018_v21 = vperm.slane %v1560_v60, %v4511_v55 }
 0x191   : > { %v896_v5 = vsel %vm677_vm1, 0.0, %v895_v29  ;;  %v1063_v47 = vsel %vm677_vm1, %v895_v29, %v876_v50  ;;  %v894_v40 = vsel %vm677_vm1, 0.0, %v893_v0  ;;  %v897_v45 = vrot.slane %v888_v43, 4 }
 0x192   : > { %v1068_v11 = vrot.slane %v896_v5, 4  ;;  %v900_v1 = vsel %vm677_vm1, 0.0, %v899_v30  ;;  %v1499_v38 = vperm.slane %v1495_v7, %v4511_v55  ;;  %v1074_v42 = vsel %vm677_vm1, %v899_v30, %v888_v43 }
 0x193   : > { %v1079_v49 = vrot.slane %v900_v1, 4  ;;  %v1006_v53 = vsel %vm677_vm1, %v1005_v57, %v988_v62  ;;  %v1003_v26 = vrot.slane %v4973_v6, 4  ;;  %v898_v13 = vsel %vm677_vm1, 0.0, %v897_v45 }
 0x194   : > { %v1069_v51 = vsel %vm677_vm1, %v1068_v11, %v894_v40  ;;  %v5023_v17 = vperm.slane %v1063_v47, %v4511_v55  ;;  %v2083_v2 = vpack.c.bf16 %v1006_v53, %v1006_v53  ;;  %v1513_v32 = vrot.slane %v1493_v14, 4 }
 0x195   : > { %v5026_v39 = vperm.slane %v1069_v51, %v4511_v55  ;;  %v1526_v4 = vsel %vm677_vm1, %v4851_v25, %v1525_v10  ;;  %v5033_v60 = vperm.slane %v1074_v42, %v4511_v55  ;;  %v1080_v36 = vsel %vm677_vm1, %v1079_v49, %v898_v13 }
 0x196   : > { %v1534_v50 = vperm.slane %v1526_v4, %v4533_v18  ;;  %v950_v9 = vsel %vm677_vm1, %v4879_v3, %v949_v58  ;;  %3940 = vmatmul.msk.bf16.vlgmr.msra.gmra.mxu0 %vm2109_vm2, %v2083_v2  ;;  %v1514_v29 = vsel %vm677_vm1, %v1499_v38, %v1513_v32  ;;  %v1007_v33 = vrot.slane %v988_v62, 4 }
 0x197   : > { %v2078_v56 = vpack.c.bf16 %v950_v9, %v950_v9  ;;  %v1511_v24 = vrot.slane %v1499_v38, 4  ;;  %v1087_v10 = vrot.slane %v5023_v17, 4  ;;  %v1522_v7 = vperm.slane %v1514_v29, %v4533_v18 }
 0x198   : > { %v1539_v43 = vrot.slane %v1534_v50, 4  ;;  %v1523_v0 = vrot.slane %v4851_v25, 4  ;;  %v1008_v54 = vsel %vm677_vm1, %v1000_v48, %v1007_v33  ;;  %v1031_v58 = vrot.slane %v4862_v31, 4 }
 0x199   : > { %3935 = vmatmul.msk.bf16.vlgmr.msra.gmra.mxu3 %vm2109_vm2, %v2078_v56  ;;  %v1512_v3 = vsel %vm677_vm1, %v1511_v24, %v1493_v14  ;;  %v5052_v5 = vperm.slane %v4938_v27, %v4533_v18  ;;  %v5055_v62 = vperm.slane %v1080_v36, %v4511_v55  ;;  %v2084_v47 = vpack.c.bf16 %v1008_v54, %v1008_v54 }
 0x19a   : > { %v1540_v30 = vsel %vm677_vm1, %v1539_v43, %v1522_v7  ;;  %v1518_v25 = vperm.slane %v1512_v3, %v4533_v18  ;;  %v1524_v48 = vsel %vm677_vm1, %v1523_v0, %v4794_v35  ;;  %v1541_v57 = vrot.slane %v1522_v7, 4 }
 0x19b   : > { %v2103_v11 = vpack.c.bf16 %v1540_v30, %v1540_v30  ;;  %v1032_v14 = vsel %vm677_vm1, %v1031_v58, %v4835_v37  ;;  %3941 = vmatmul.msk.bf16.vlgmr.msra.gmra.mxu1 %vm2109_vm2, %v2084_v47  ;;  %v1530_v27 = vperm.slane %v1524_v48, %v4533_v18  ;;  %v1055_v1 = vrot.slane %v5052_v5, 4 }
 0x19c   : > { %v1537_v40 = vrot.slane %v1518_v25, 4  ;;  %v5066_v45 = vperm.slane %v1032_v14, %v4533_v18  ;;  %v1542_v51 = vsel %vm677_vm1, %v1534_v50, %v1541_v57  ;;  %v1547_v35 = vperm.slane %v4949_v61, %v4511_v55 }
 0x19d   : > { %v2304_v38 = vsel %vm2109_vm2, %v2103_v11, 0  ;;  %v1549_v42 = vsel %vm677_vm1, %v1548_v52, %v4969_v63  ;;  %v1097_v49 = vrot.slane %v5055_v62, 4  ;;  %v1535_v53 = vrot.slane %v1530_v27, 4 }
 0x19e   : > { %2313 = vmatpush.bf16.xpose.msrb.mxu0 %v2304_v38  ;;  %v2104_v13 = vpack.c.bf16 %v1542_v51, %v1542_v51  ;;  %v1538_v2 = vsel %vm677_vm1, %v1530_v27, %v1537_v40  ;;  %v1056_v4 = vsel %vm677_vm1, %v1055_v1, %v5066_v45  ;;  %v1553_v36 = vperm.slane %v1549_v42, %v4511_v55 }
 0x19f   : > { %v2102_v32 = vpack.c.bf16 %v1538_v2, %v1538_v2  ;;  %v1567_v50 = vrot.slane %v1547_v35, 4  ;;  %v1536_v61 = vsel %vm677_vm1, %v1535_v53, %v1518_v25  ;;  %v1580_v63 = vsel %vm677_vm1, %v5018_v21, %v1579_v41 }
 0x1a0   : > { %v2323_v22 = vsel %vm2109_vm2, %v2104_v13, 0  ;;  %v1034_v52 = vsel %vm677_vm1, %v4862_v31, %v1033_v23  ;;  %v2101_v9 = vpack.c.bf16 %v1536_v61, %v1536_v61  ;;  %v1588_v33 = vperm.slane %v1580_v63, %v4533_v18 }
 0x1a1   : > { %2332 = vmatpush.bf16.xpose.msrb.mxu1 %v2323_v22  ;;  %v2285_v29 = vsel %vm2109_vm2, %v2102_v32, 0  ;;  %v1568_v56 = vsel %vm677_vm1, %v1553_v36, %v1567_v50  ;;  %v1042_v7 = vperm.slane %v1034_v52, %v4533_v18  ;;  %v1046_v37 = vsel %vm677_vm1, %v4884_v59, %v1045_v28 }
 0x1a2   : > { %2294 = vmatpush.bf16.xpose.msra.mxu3 %v2285_v29  ;;  %v1576_v24 = vperm.slane %v1568_v56, %v4533_v18  ;;  %v1565_v41 = vrot.slane %v1553_v36, 4  ;;  %v2266_v31 = vsel %vm2109_vm2, %v2101_v9, 0  ;;  %v1593_v23 = vrot.slane %v1588_v33, 4 }
 0x1a3   : > { %v1054_v43 = vperm.slane %v1046_v37, %v4533_v18  ;;  %v1577_v0 = vrot.slane %v5018_v21, 4  ;;  %2275 = vmatpush.bf16.xpose.msra.mxu2 %v2266_v31  ;;  %v1004_v34 = vsel %vm677_vm1, %v4961_v8, %v1003_v26  ;;  %v1061_v58 = vrot.slane %v1042_v7, 4 }
 0x1a4   : > { %v1566_v54 = vsel %vm677_vm1, %v1565_v41, %v1547_v35  ;;  %v1595_v3 = vrot.slane %v1576_v24, 4  ;;  %v1594_v28 = vsel %vm677_vm1, %v1593_v23, %v1576_v24  ;;  %v2082_v48 = vpack.c.bf16 %v1004_v34, %v1004_v34  ;;  %v4055_v41 = vpop.permute.xlu1 %4054 }
 0x1a5   : > { %v1059_v59 = vrot.slane %v1054_v43, 4  ;;  %v1572_v30 = vperm.slane %v1566_v54, %v4533_v18  ;;  %v1578_v47 = vsel %vm677_vm1, %v1577_v0, %v4958_v12  ;;  %v2107_v25 = vpack.c.bf16 %v1594_v28, %v1594_v28  ;;  %v4050_v54 = vpop.permute.xlu0 %4049 }
 0x1a6   : > { %v1584_v21 = vperm.slane %v1578_v47, %v4533_v18  ;;  %v1596_v11 = vsel %vm677_vm1, %v1588_v33, %v1595_v3  ;;  %v1062_v8 = vsel %vm677_vm1, %v1054_v43, %v1061_v58  ;;  %v1099_v14 = vrot.slane %v5033_v60, 4 }
 0x1a7   : > { %v1060_v6 = vsel %vm677_vm1, %v1059_v59, %v1042_v7  ;;  %v2108_v57 = vpack.c.bf16 %v1596_v11, %v1596_v11  ;;  %v1591_v26 = vrot.slane %v1572_v30, 4  ;;  %v2380_v27 = vsel %vm2109_vm2, %v2107_v25, 0 }
 0x1a8   : > { %v2087_v40 = vpack.c.bf16 %v1060_v6, %v1060_v6  ;;  %v1589_v1 = vrot.slane %v1584_v21, 4  ;;  %v2085_v38 = vpack.c.bf16 %v1056_v4, %v1056_v4  ;;  %2389 = vmatpush.bf16.xpose.msra.mxu0 %v2380_v27  ;;  %v2088_v42 = vpack.c.bf16 %v1062_v8, %v1062_v8 }
 0x1a9   : > { %v2399_v12 = vsel %vm2109_vm2, %v2108_v57, 0  ;;  %3939 = vmatmul.msk.bf16.vlgmr.msrb.gmra.mxu3 %vm2109_vm2, %v2082_v48  ;;  %v1592_v51 = vsel %vm677_vm1, %v1584_v21, %v1591_v26  ;;  %v1098_v13 = vsel %vm677_vm1, %v1097_v49, %v5033_v60  ;;  %v1085_v32 = vrot.slane %v5026_v39, 4 }
 0x1aa   : > { %3944 = vmatmul.msk.bf16.vlgmr.msrb.gmra.mxu0 %vm2109_vm2, %v2087_v40  ;;  %v1590_v35 = vsel %vm677_vm1, %v1589_v1, %v1572_v30  ;;  %2408 = vmatpush.bf16.xpose.msra.mxu1 %v2399_v12  ;;  %v2106_v53 = vpack.c.bf16 %v1592_v51, %v1592_v51  ;;  %v1088_v36 = vsel %vm677_vm1, %v5026_v39, %v1087_v10  ;;  %v1057_v52 = vrot.slane %v5066_v45, 4 }
 0x1ab   : > { %3942 = vmatmul.msk.bf16.vlgmr.msra.gmra.mxu2 %vm2109_vm2, %v2085_v38  ;;  %v2105_v2 = vpack.c.bf16 %v1590_v35, %v1590_v35  ;;  %3945 = vmatmul.msk.bf16.vlgmr.msrb.gmra.mxu1 %vm2109_vm2, %v2088_v42  ;;  %v1100_v50 = vsel %vm677_vm1, %v5055_v62, %v1099_v14  ;;  %v1104_v49 = vperm.slane %v1098_v13, %v4533_v18  ;;  %v4057_v31 = vunpack.i.h.bf16 %v4055_v41  ;;  %v4060_v14 = vpop.permute.xlu2 %4059 }
 0x1ac   : > { %v2361_v4 = vsel %vm2109_vm2, %v2106_v53, 0  ;;  %v1108_v60 = vperm.slane %v1100_v50, %v4533_v18  ;;  %v1086_v22 = vsel %vm677_vm1, %v1085_v32, %v5023_v17  ;;  %v1096_v63 = vperm.slane %v1088_v36, %v4533_v18 }
 0x1ad   : > { %v2342_v61 = vsel %vm2109_vm2, %v2105_v2, 0  ;;  %2370 = vmatpush.bf16.xpose.msrb.mxu3 %v2361_v4  ;;  %v1092_v39 = vperm.slane %v1086_v22, %v4533_v18  ;;  %v1109_v10 = vrot.slane %v1104_v49, 4  ;;  %v1058_v29 = vsel %vm677_vm1, %v5052_v5, %v1057_v52 }
 0x1ae   : > { %2351 = vmatpush.bf16.xpose.msrb.mxu2 %v2342_v61  ;;  %v1113_v9 = vrot.slane %v1108_v60, 4  ;;  %v1115_v62 = vrot.slane %v1096_v63, 4  ;;  %v2086_v24 = vpack.c.bf16 %v1058_v29, %v1058_v29  ;;  %v4056_v5 = vunpack.i.l.bf16 %v4055_v41 }
 0x1af   : > { %v1110_v33 = vsel %vm677_vm1, %v1109_v10, %v1092_v39  ;;  %v1639_v23 = vrot.slane %v4497_v44, 4  ;;  %v1695_v43 = vrot.slane %v4499_v46, 4  ;;  %v1111_v0 = vrot.slane %v1092_v39, 4 }
 0x1b0   : > { %v1114_v56 = vsel %vm677_vm1, %v1113_v9, %v1096_v63  ;;  %v1116_v7 = vsel %vm677_vm1, %v1108_v60, %v1115_v62  ;;  %v2089_v37 = vpack.c.bf16 %v1110_v33, %v1110_v33  ;;  %v1637_v3 = vrot.slane %v4056_v5, 4 }
 0x1b1   : > { %v2091_v17 = vpack.c.bf16 %v1114_v56, %v1114_v56  ;;  %v2092_v45 = vpack.c.bf16 %v1116_v7, %v1116_v7  ;;  %v1693_v34 = vrot.slane %v4057_v31, 4  ;;  %v4052_v58 = vunpack.i.h.bf16 %v4050_v54 }
 0x1b2   : > { %v4051_v28 = vunpack.i.l.bf16 %v4050_v54  ;;  %v1696_v59 = vsel %vm677_vm1, %v4057_v31, %v1695_v43  ;;  %v1640_v30 = vsel %vm677_vm1, %v4056_v5, %v1639_v23  ;;  %v1112_v47 = vsel %vm677_vm1, %v1104_v49, %v1111_v0 }
 0x1b3   : > { %v1638_v25 = vsel %vm677_vm1, %v1637_v3, %v4497_v44  ;;  %v1694_v21 = vsel %vm677_vm1, %v1693_v34, %v4499_v46  ;;  %v1704_v11 = vperm.slane %v1696_v59, %v4511_v55  ;;  %v1648_v48 = vperm.slane %v1640_v30, %v4511_v55 }
 0x1b4   : > { %v2090_v6 = vpack.c.bf16 %v1112_v47, %v1112_v47  ;;  %v1707_v57 = vrot.slane %v4052_v58, 4  ;;  %v1651_v8 = vrot.slane %v4051_v28, 4  ;;  %v1644_v26 = vperm.slane %v1638_v25, %v4511_v55 }
 0x1b5   : > { %v1700_v27 = vperm.slane %v1694_v21, %v4511_v55  ;;  %v4062_v40 = vunpack.i.h.bf16 %v4060_v14  ;;  %v4061_v1 = vunpack.i.l.bf16 %v4060_v14  ;;  %v1731_v44 = vrot.slane %v1704_v11, 4 }
 0x1b6   : > { %v1675_v38 = vrot.slane %v1648_v48, 4  ;;  %v1663_v42 = vrot.slane %v1644_v26, 4 }
 0x1b7   : > { %v1705_v12 = vrot.slane %v4062_v40, 4  ;;  %v1708_v46 = vsel %vm677_vm1, %v4062_v40, %v1707_v57  ;;  %v1649_v51 = vrot.slane %v4061_v1, 4  ;;  %v1652_v35 = vsel %vm677_vm1, %v4061_v1, %v1651_v8 }
 0x1b8   : > { %v1716_v53 = vperm.slane %v1708_v46, %v4511_v55  ;;  %v1660_v13 = vperm.slane %v1652_v35, %v4511_v55  ;;  %v1719_v2 = vrot.slane %v1700_v27, 4 }
 0x1b9   : > { %3943 = vmatmul.msk.bf16.vlgmr.msra.gmra.mxu3 %vm2109_vm2, %v2086_v24  ;;  %v1706_v32 = vsel %vm677_vm1, %v1705_v12, %v4052_v58  ;;  %v1650_v4 = vsel %vm677_vm1, %v1649_v51, %v4051_v28 }
 0x1ba   : > { %3948 = vmatmul.msk.bf16.vlgmr.msra.gmra.mxu0 %vm2109_vm2, %v2091_v17  ;;  %v1712_v36 = vperm.slane %v1706_v32, %v4511_v55  ;;  %v1729_v50 = vrot.slane %v1716_v53, 4  ;;  %v1656_v61 = vperm.slane %v1650_v4, %v4511_v55  ;;  %v1673_v60 = vrot.slane %v1660_v13, 4 }
 0x1bb   : > { %3946 = vmatmul.msk.bf16.vlgmr.msrb.gmra.mxu2 %vm2109_vm2, %v2089_v37  ;;  %3949 = vmatmul.msk.bf16.vlgmr.msra.gmra.mxu1 %vm2109_vm2, %v2092_v45  ;;  %v1676_v49 = vsel %vm677_vm1, %v1660_v13, %v1675_v38  ;;  %v1732_v22 = vsel %vm677_vm1, %v1716_v53, %v1731_v44 }
 0x1bc   : > { %v1717_v63 = vrot.slane %v1712_v36, 4  ;;  %v1661_v52 = vrot.slane %v1656_v61, 4  ;;  %v1664_v9 = vsel %vm677_vm1, %v1656_v61, %v1663_v42  ;;  %v1674_v39 = vsel %vm677_vm1, %v1673_v60, %v1648_v48 }
 0x1bd   : > { %v1672_v10 = vperm.slane %v1664_v9, %v4533_v18  ;;  %v1680_v62 = vperm.slane %v1674_v39, %v4533_v18  ;;  %v1684_v29 = vperm.slane %v1676_v49, %v4533_v18  ;;  %v1720_v56 = vsel %vm677_vm1, %v1712_v36, %v1719_v2 }
 0x1be   : > { %v1662_v33 = vsel %vm677_vm1, %v1661_v52, %v1644_v26  ;;  %v1718_v24 = vsel %vm677_vm1, %v1717_v63, %v1700_v27  ;;  %v1728_v7 = vperm.slane %v1720_v56, %v4533_v18  ;;  %v1730_v17 = vsel %vm677_vm1, %v1729_v50, %v1704_v11 }
 0x1bf   : > { %v1668_v37 = vperm.slane %v1662_v33, %v4533_v18  ;;  %v1687_v45 = vrot.slane %v1672_v10, 4  ;;  %v1689_v41 = vrot.slane %v1680_v62, 4  ;;  %v1691_v5 = vrot.slane %v1684_v29, 4 }
 0x1c0   : > { %v1724_v31 = vperm.slane %v1718_v24, %v4533_v18  ;;  %v1736_v23 = vperm.slane %v1730_v17, %v4533_v18  ;;  %v1740_v43 = vperm.slane %v1732_v22, %v4533_v18  ;;  %v1743_v0 = vrot.slane %v1728_v7, 4 }
 0x1c1   : > { %v1685_v54 = vrot.slane %v1668_v37, 4  ;;  %v1688_v3 = vsel %vm677_vm1, 0.0, %v1687_v45  ;;  %v1690_v34 = vsel %vm677_vm1, 0.0, %v1689_v41  ;;  %v1692_v58 = vsel %vm677_vm1, 0.0, %v1691_v5 }
 0x1c2   : > { %v1741_v28 = vrot.slane %v1724_v31, 4  ;;  %v1744_v59 = vsel %vm677_vm1, 0.0, %v1743_v0  ;;  %v1745_v30 = vrot.slane %v1736_v23, 4  ;;  %v1747_v47 = vrot.slane %v1740_v43, 4 }
 0x1c3   : > { %v1686_v25 = vsel %vm677_vm1, 0.0, %v1685_v54  ;;  %v1866_v21 = vrot.slane %v1688_v3, 4  ;;  %v1872_v11 = vsel %vm677_vm1, %v1691_v5, %v1680_v62  ;;  %v1877_v48 = vrot.slane %v1692_v58, 4 }
 0x1c4   : > { %v1746_v57 = vsel %vm677_vm1, 0.0, %v1745_v30  ;;  %v1748_v8 = vsel %vm677_vm1, 0.0, %v1747_v47  ;;  %v1920_v26 = vrot.slane %v1744_v59, 4  ;;  %v1926_v27 = vsel %vm677_vm1, %v1747_v47, %v1736_v23 }
 0x1c5   : > { %v1878_v14 = vsel %vm677_vm1, %v1877_v48, %v1690_v34  ;;  %v1931_v40 = vrot.slane %v1748_v8, 4  ;;  %v1861_v1 = vsel %vm677_vm1, %v1687_v45, %v1668_v37  ;;  %v1867_v38 = vsel %vm677_vm1, %v1866_v21, %v1686_v25 }
 0x1c6   : > { %v1865_v44 = vperm.slane %v1861_v1, %v4511_v55  ;;  %v1876_v12 = vperm.slane %v1872_v11, %v4511_v55  ;;  %v1882_v46 = vperm.slane %v1878_v14, %v4511_v55  ;;  %v1871_v35 = vperm.slane %v1867_v38, %v4511_v55 }
 0x1c7   : > { %v1932_v51 = vsel %vm677_vm1, %v1931_v40, %v1746_v57  ;;  %v1915_v42 = vsel %vm677_vm1, %v1743_v0, %v1724_v31  ;;  %v1930_v4 = vperm.slane %v1926_v27, %v4511_v55 }
 0x1c8   : > { %v1895_v13 = vrot.slane %v1882_v46, 4  ;;  %v1919_v2 = vperm.slane %v1915_v42, %v4511_v55  ;;  %v1883_v36 = vrot.slane %v1871_v35, 4  ;;  %v1936_v50 = vperm.slane %v1932_v51, %v4511_v55 }
 0x1c9   : > { %3947 = vmatmul.msk.bf16.vlgmr.msrb.gmra.mxu3 %vm2109_vm2, %v2090_v6  ;;  %v1742_v6 = vsel %vm677_vm1, 0.0, %v1741_v28  ;;  %v1885_v61 = vrot.slane %v1865_v44, 4  ;;  %v1897_v60 = vrot.slane %v1876_v12, 4  ;;  %v1951_v52 = vrot.slane %v1930_v4, 4 }
 0x1ca   : > { %v1921_v53 = vsel %vm677_vm1, %v1920_v26, %v1742_v6  ;;  %v1896_v49 = vsel %vm677_vm1, %v1895_v13, %v1876_v12  ;;  %v1939_v63 = vrot.slane %v1919_v2, 4  ;;  %v1884_v9 = vsel %vm677_vm1, %v1883_v36, %v1865_v44 }
 0x1cb   : > { %v1925_v32 = vperm.slane %v1921_v53, %v4511_v55  ;;  %v1902_v39 = vperm.slane %v1896_v49, %v4533_v18  ;;  %v1949_v10 = vrot.slane %v1936_v50, 4  ;;  %v1886_v62 = vsel %vm677_vm1, %v1871_v35, %v1885_v61 }
 0x1cc   : > { %v1890_v29 = vperm.slane %v1884_v9, %v4533_v18  ;;  %v1894_v33 = vperm.slane %v1886_v62, %v4533_v18  ;;  %v1898_v24 = vsel %vm677_vm1, %v1882_v46, %v1897_v60  ;;  %v1952_v23 = vsel %vm677_vm1, %v1936_v50, %v1951_v52 }
 0x1cd   : > { %v1937_v22 = vrot.slane %v1925_v32, 4  ;;  %v1907_v7 = vrot.slane %v1902_v39, 4  ;;  %v1950_v37 = vsel %vm677_vm1, %v1949_v10, %v1930_v4  ;;  %v1906_v45 = vperm.slane %v1898_v24, %v4533_v18 }
 0x1ce   : > { %v1956_v41 = vperm.slane %v1950_v37, %v4533_v18  ;;  %v1909_v5 = vrot.slane %v1890_v29, 4  ;;  %v1940_v31 = vsel %vm677_vm1, %v1925_v32, %v1939_v63  ;;  %v1960_v59 = vperm.slane %v1952_v23, %v4533_v18  ;;  %v5248_v32 = vpop.f32.mrf.mxu3 }
 0x1cf   : > { %v1938_v56 = vsel %vm677_vm1, %v1937_v22, %v1919_v2  ;;  %v1908_v43 = vsel %vm677_vm1, %v1907_v7, %v1890_v29  ;;  %v1911_v0 = vrot.slane %v1906_v45, 4  ;;  %v1948_v3 = vperm.slane %v1940_v31, %v4533_v18 }
 0x1d0   : > { %v1944_v17 = vperm.slane %v1938_v56, %v4533_v18  ;;  %v2830_v34 = vpack.c.bf16 %v1908_v43, %v1908_v43  ;;  %v1961_v58 = vrot.slane %v1956_v41, 4  ;;  %v1910_v28 = vsel %vm677_vm1, %v1902_v39, %v1909_v5 }
 0x1d1   : > { %v2831_v30 = vpack.c.bf16 %v1910_v28, %v1910_v28  ;;  %v1912_v47 = vsel %vm677_vm1, %v1911_v0, %v1894_v33  ;;  %v1913_v21 = vrot.slane %v1894_v33, 4  ;;  %v1965_v14 = vrot.slane %v1960_v59, 4 }
 0x1d2   : > { %v1963_v54 = vrot.slane %v1944_v17, 4  ;;  %v2851_v11 = vsel %vm2849_vm3, %v2830_v34, 0  ;;  %v1962_v48 = vsel %vm677_vm1, %v1961_v58, %v1944_v17  ;;  %v2832_v6 = vpack.c.bf16 %v1912_v47, %v1912_v47 }
 0x1d3   : > { %2860 = vmatpush.bf16.msra.mxu2 %v2851_v11  ;;  %v2834_v8 = vpack.c.bf16 %v1962_v48, %v1962_v48  ;;  %v2870_v26 = vsel %vm2849_vm3, %v2831_v30, 0  ;;  %v1914_v27 = vsel %vm677_vm1, %v1906_v45, %v1913_v21  ;;  %v1967_v38 = vrot.slane %v1948_v3, 4 }
 0x1d4   : > { %v1964_v25 = vsel %vm677_vm1, %v1956_v41, %v1963_v54  ;;  %2879 = vmatpush.bf16.msra.mxu3 %v2870_v26  ;;  %v2889_v40 = vsel %vm2849_vm3, %v2832_v6, 0  ;;  %v2833_v44 = vpack.c.bf16 %v1914_v27, %v1914_v27  ;;  %v1966_v46 = vsel %vm677_vm1, %v1965_v14, %v1948_v3 }
 0x1d5   : > { %v2835_v57 = vpack.c.bf16 %v1964_v25, %v1964_v25  ;;  %v2927_v12 = vsel %vm2849_vm3, %v2834_v8, 0  ;;  %2898 = vmatpush.bf16.msrb.mxu0 %v2889_v40  ;;  %v2836_v51 = vpack.c.bf16 %v1966_v46, %v1966_v46  ;;  %v1968_v42 = vsel %vm677_vm1, %v1960_v59, %v1967_v38 }
 0x1d6   : > { %v2908_v35 = vsel %vm2849_vm3, %v2833_v44, 0  ;;  %v2837_v53 = vpack.c.bf16 %v1968_v42, %v1968_v42  ;;  %v5257_v61 = vpop.f32.mrf.mxu3 }
 0x1d7   : > { %v2946_v1 = vsel %vm2849_vm3, %v2835_v57, 0  ;;  %2936 = vmatpush.bf16.msrb.mxu2 %v2927_v12  ;;  %2917 = vmatpush.bf16.msrb.mxu1 %v2908_v35  ;;  %v2965_v13 = vsel %vm2849_vm3, %v2836_v51, 0 }
 0x1d8   : > { %2955 = vmatpush.bf16.msrb.mxu3 %v2946_v1  ;;  %v2984_v2 = vsel %vm2849_vm3, %v2837_v53, 0 }
 0x1d9   : > { %2974 = vmatpush.bf16.msra.mxu0 %v2965_v13 }
 0x1db   : > { %2993 = vmatpush.bf16.msra.mxu1 %v2984_v2 }
 0x1f4   : > { %v2182_v4 = vpop.f32.mrf.mxu1 }
 0x1f5   : > { %v5255_v50 = vmul.f32 0.35355338, %v2182_v4 }
 0x1f6   : > { %v2163_v36 = vpop.f32.mrf.mxu0 }
 0x1f7   : > { %v5259_v60 = vmul.f32 0.35355338, %v2163_v36  ;;  %3745 = vst.msk [vmem:[%s5253_s20 + $0x18] sm:$0xff] %vm2109_vm2, %v5255_v50  ;;  %v2439_v49 = vsel %vm2109_vm2, %v5255_v50, -inf }
 0x1f8   : > { %2440 = vmax.xlane.f32.xlu2 %v2439_v49 }
 0x1f9   : > { %3744 = vst.msk [vmem:[%s5253_s20 + $0x10] sm:$0xff] %vm2109_vm2, %v5259_v60  ;;  %v2436_v22 = vsel %vm2109_vm2, %v5259_v60, -inf }
 0x1fa   : > { %2437 = vmax.xlane.f32.xlu0 %v2436_v22 }
 0x1fc   : > { %v2184_v63 = vpop.f32.mrf.mxu1 }
 0x1fe   : > { %v2165_v52 = vpop.f32.mrf.mxu0 }
 0x1ff   : > { %v2125_v9 = vpop.f32.mrf.mxu3 }
 0x200   : > { %v5271_v39 = vmul.f32 0.35355338, %v2125_v9 }
 0x202   : > { %3742 = vst.msk [vmem:[%s5253_s20] sm:$0xff] %vm2109_vm2, %v5271_v39  ;;  %v2430_v10 = vsel %vm2109_vm2, %v5271_v39, -inf }
 0x203   : > { %2431 = vmax.xlane.f32.xlu1 %v2430_v10 }
 0x207   : > { %v2127_v62 = vpop.f32.mrf.mxu3 }
 0x208   : > { %v4168_v62 = vld [vmem:[%s6033_s8] ss:$0 sm:$0xff] }
 0x211   : > { %v2201_v29 = vpop.f32.mrf.mxu2 }
 0x212   : > { %v5278_v56 = vmul.f32 0.35355338, %v2201_v29  ;;  %v5373_v29 = vadd.f32 %v4168_v62, %v5248_v32 }
 0x213   : > { %v2239_v33 = vpop.f32.mrf.mxu0 }
 0x214   : > { %v5280_v24 = vmul.f32 0.35355338, %v2239_v33  ;;  %3746 = vst.msk [vmem:[%s5253_s20 + $0x20] sm:$0xff] %vm2109_vm2, %v5278_v56  ;;  %v2442_v7 = vsel %vm2109_vm2, %v5278_v56, -inf }
 0x215   : > { %2443 = vmax.xlane.f32.xlu1 %v2442_v7 }
 0x216   : > { %3748 = vst.msk [vmem:[%s5253_s20 + $0x30] sm:$0xff] %vm2109_vm2, %v5280_v24  ;;  %v2448_v17 = vsel %vm2109_vm2, %v5280_v24, -inf }
 0x217   : > { %2449 = vmax.xlane.f32.xlu0 %v2448_v17 }
 0x218   : > { %v2258_v37 = vpop.f32.mrf.mxu1 }
 0x219   : > { %v5292_v45 = vmul.f32 0.35355338, %v2258_v37  ;;  %v2203_v41 = vpop.f32.mrf.mxu2 }
 0x21b   : > { %3749 = vst.msk [vmem:[%s5253_s20 + $0x38] sm:$0xff] %vm2109_vm2, %v5292_v45  ;;  %v2241_v31 = vpop.f32.mrf.mxu0  ;;  %v2451_v43 = vsel %vm2109_vm2, %v5292_v45, -inf }
 0x21c   : > { %v2144_v5 = vpop.f32.mrf.mxu3 }
 0x21d   : > { %v5297_v23 = vmul.f32 0.35355338, %v2144_v5  ;;  %2452 = vmax.xlane.f32.xlu1 %v2451_v43 }
 0x21f   : > { %3743 = vst.msk [vmem:[%s5253_s20 + $0x8] sm:$0xff] %vm2109_vm2, %v5297_v23  ;;  %v2433_v0 = vsel %vm2109_vm2, %v5297_v23, -inf }
 0x220   : > { %2434 = vmax.xlane.f32.xlu2 %v2433_v0  ;;  %v2260_v54 = vpop.f32.mrf.mxu1 }
 0x224   : > { %v2146_v3 = vpop.f32.mrf.mxu3 }
 0x227   : > { %v2315_v34 = vpop.f32.mrf.mxu0 }
 0x228   : > { %v5306_v58 = vmul.f32 0.35355338, %v2315_v34  ;;  %v2334_v28 = vpop.f32.mrf.mxu1 }
 0x229   : > { %v5311_v59 = vmul.f32 0.35355338, %v2334_v28 }
 0x22a   : > { %3752 = vst.msk [vmem:[%s5253_s20 + $0x50] sm:$0xff] %vm2109_vm2, %v5306_v58  ;;  %v2460_v30 = vsel %vm2109_vm2, %v5306_v58, -inf }
 0x22b   : > { %2461 = vmax.xlane.f32.xlu1 %v2460_v30  ;;  %3753 = vst.msk [vmem:[%s5253_s20 + $0x58] sm:$0xff] %vm2109_vm2, %v5311_v59  ;;  %v2463_v40 = vsel %vm2109_vm2, %v5311_v59, -inf }
 0x22c   : > { %v2220_v47 = vpop.f32.mrf.mxu3 }
 0x22d   : > { %v5318_v25 = vmul.f32 0.35355338, %v2220_v47 }
 0x22e   : > { %v2277_v21 = vpop.f32.mrf.mxu2 }
 0x22f   : > { %v5320_v11 = vmul.f32 0.35355338, %v2277_v21  ;;  %3747 = vst.msk [vmem:[%s5253_s20 + $0x28] sm:$0xff] %vm2109_vm2, %v5318_v25  ;;  %v2317_v48 = vpop.f32.mrf.mxu0  ;;  %v2445_v13 = vsel %vm2109_vm2, %v5318_v25, -inf  ;;  %v5393_v21 = vadd.f32 %v4168_v62, %v5257_v61 }
 0x230   : > { %v2336_v57 = vpop.f32.mrf.mxu1 }
 0x231   : > { %3750 = vst.msk [vmem:[%s5253_s20 + $0x40] sm:$0xff] %vm2109_vm2, %v5320_v11  ;;  %v2454_v6 = vsel %vm2109_vm2, %v5320_v11, -inf  ;;  %v4063_v57 = vpack.i.bf16 %v5393_v21, %v5373_v29 }
 0x232   : > { %2455 = vmax.xlane.f32.xlu2 %v2454_v6 }
 0x234   : > { %v2222_v8 = vpop.f32.mrf.mxu3 }
 0x236   : > { %v2279_v26 = vpop.f32.mrf.mxu2 }
 0x237   : > { %v2391_v14 = vpop.f32.mrf.mxu0 }
 0x238   : > { %v5330_v27 = vmul.f32 0.35355338, %v2391_v14  ;;  %v2410_v1 = vpop.f32.mrf.mxu1 }
 0x239   : > { %v5337_v44 = vmul.f32 0.35355338, %v2410_v1 }
 0x23a   : > { %2464 = vmax.xlane.f32.xlu2 %v2463_v40  ;;  %3756 = vst.msk [vmem:[%s5253_s20 + $0x70] sm:$0xff] %vm2109_vm2, %v5330_v27  ;;  %v2472_v49 = vsel %vm2109_vm2, %v5330_v27, -inf }
 0x23b   : > { %3757 = vst.msk [vmem:[%s5253_s20 + $0x78] sm:$0xff] %vm2109_vm2, %v5337_v44  ;;  %v2475_v38 = vsel %vm2109_vm2, %v5337_v44, -inf }
 0x23c   : > { %v2296_v12 = vpop.f32.mrf.mxu3  ;;  %2476 = vmax.xlane.f32.xlu1 %v2475_v38 }
 0x23d   : > { %v5344_v46 = vmul.f32 0.35355338, %v2296_v12 }
 0x23e   : > { %v2353_v51 = vpop.f32.mrf.mxu2 }
 0x23f   : > { %v5346_v35 = vmul.f32 0.35355338, %v2353_v51  ;;  %3751 = vst.msk [vmem:[%s5253_s20 + $0x48] sm:$0xff] %vm2109_vm2, %v5344_v46  ;;  %v2393_v42 = vpop.f32.mrf.mxu0  ;;  %v2457_v22 = vsel %vm2109_vm2, %v5344_v46, -inf }
 0x240   : > { %v2412_v2 = vpop.f32.mrf.mxu1 }
 0x241   : > { %3754 = vst.msk [vmem:[%s5253_s20 + $0x60] sm:$0xff] %vm2109_vm2, %v5346_v35  ;;  %v2466_v53 = vsel %vm2109_vm2, %v5346_v35, -inf }
 0x242   : > { %2467 = vmax.xlane.f32.xlu0 %v2466_v53  ;;  %2446 = vmax.xlane.f32.xlu2 %v2445_v13 }
 0x244   : > { %v2298_v4 = vpop.f32.mrf.mxu3 }
 0x246   : > { %v2355_v36 = vpop.f32.mrf.mxu2 }
 0x24a   : > { %2473 = vmax.xlane.f32.xlu2 %v2472_v49  ;;  %2458 = vmax.xlane.f32.xlu0 %v2457_v22 }
 0x24c   : > { %v2372_v63 = vpop.f32.mrf.mxu3 }
 0x24d   : > { %v5362_v52 = vmul.f32 0.35355338, %v2372_v63 }
 0x24f   : > { %3755 = vst.msk [vmem:[%s5253_s20 + $0x68] sm:$0xff] %vm2109_vm2, %v5362_v52  ;;  %v2469_v9 = vsel %vm2109_vm2, %v5362_v52, -inf  ;;  %s477_s20 = scalar_lea.vmem %s6036_s11, %s3900_s19 }
 0x250   : > { %2470 = vmax.xlane.f32.xlu1 %v2469_v9 }
 0x254   : > { %v2374_v10 = vpop.f32.mrf.mxu3 }
 0x25e   : > { %1629 = vrot.lane.b32.xlu0 %v5373_v29, %s4237_s28 }
 0x269   : > { %1617 = vrot.lane.b32.xlu1 %v5373_v29, %s4239_s15 }
 0x26b   : > { %v2441_v43 = vpop.xlane.xlu2 %2440 }
 0x26c   : > { %v2481_v0 = vsub.f32 %v5255_v50, %v2441_v43 }
 0x26d   : > { %v2438_v33 = vpop.xlane.xlu0 %2437 }
 0x26e   : > { %v2480_v7 = vsub.f32 %v5259_v60, %v2438_v33  ;;  %v2500_v3 = vmul.f32 1.442695, %v2481_v0 }
 0x270   : > { %v2498_v17 = vmul.f32 1.442695, %v2480_v7 }
 0x272   : > { %4104 = vpow2.f32 %v2498_v17 }
 0x276   : > { %v2432_v37 = vpop.xlane.xlu1 %2431 }
 0x277   : > { %v2478_v41 = vsub.f32 %v5271_v39, %v2432_v37 }
 0x278   : > { %v5381_v5 = vpop.eup %4104 }
 0x279   : > { %v2494_v31 = vmul.f32 1.442695, %v2478_v41  ;;  %v2532_v32 = vsel %vm2109_vm2, %v5381_v5, 0.0 }
 0x27a   : > { %2533 = vadd.xlane.f32.xlu2 %v2532_v32 }
 0x27b   : > { %4106 = vpow2.f32 %v2494_v31 }
 0x27c   : > { %4108 = vpow2.f32 %v2500_v3 }
 0x281   : > { %v5386_v54 = vpop.eup %4106 }
 0x282   : > { %v2526_v60 = vsel %vm2109_vm2, %v5386_v54, 0.0  ;;  %v5395_v50 = vpop.eup %4108 }
 0x283   : > { %v2535_v8 = vsel %vm2109_vm2, %v5395_v50, 0.0 }
 0x288   : > { %2527 = vadd.xlane.f32.xlu0 %v2526_v60  ;;  %v2444_v39 = vpop.xlane.xlu1 %2443 }
 0x289   : > { %v2482_v34 = vsub.f32 %v5278_v56, %v2444_v39 }
 0x28a   : > { %v2450_v28 = vpop.xlane.xlu0 %2449 }
 0x28b   : > { %v2484_v30 = vsub.f32 %v5280_v24, %v2450_v28  ;;  %v2502_v47 = vmul.f32 1.442695, %v2482_v34 }
 0x28d   : > { %v2506_v48 = vmul.f32 1.442695, %v2484_v30  ;;  %4110 = vpow2.f32 %v2502_v47 }
 0x28f   : > { %4112 = vpow2.f32 %v2506_v48 }
 0x290   : > { %v2453_v6 = vpop.xlane.xlu1 %2452 }
 0x291   : > { %v2485_v56 = vsub.f32 %v5292_v45, %v2453_v6 }
 0x292   : > { %4064 = vrot.lane.b32.xlu2 %v4063_v57, %s4238_s14 }
 0x293   : > { %v2435_v26 = vpop.xlane.xlu2 %2434  ;;  %2536 = vadd.xlane.f32.xlu1 %v2535_v8  ;;  %v5403_v61 = vpop.eup %4110  ;;  %v2508_v14 = vmul.f32 1.442695, %v2485_v56 }
 0x294   : > { %v2479_v24 = vsub.f32 %v5297_v23, %v2435_v26  ;;  %v2538_v40 = vsel %vm2109_vm2, %v5403_v61, 0.0 }
 0x295   : > { %4114 = vpow2.f32 %v2508_v14  ;;  %2539 = vadd.xlane.f32.xlu0 %v2538_v40  ;;  %v5408_v1 = vpop.eup %4112 }
 0x296   : > { %v2496_v38 = vmul.f32 1.442695, %v2479_v24  ;;  %v2544_v45 = vsel %vm2109_vm2, %v5408_v1, 0.0 }
 0x298   : > { %4116 = vpow2.f32 %v2496_v38  ;;  %v1751_v38 = vrot.slane %v5373_v29, 4 }
 0x29b   : > { %2545 = vadd.xlane.f32.xlu1 %v2544_v45  ;;  %v5412_v12 = vpop.eup %4114 }
 0x29c   : > { %v2547_v51 = vsel %vm2109_vm2, %v5412_v12, 0.0 }
 0x29d   : > { %2548 = vadd.xlane.f32.xlu0 %v2547_v51 }
 0x29e   : > { %v2462_v23 = vpop.xlane.xlu1 %2461  ;;  %v5417_v13 = vpop.eup %4116 }
 0x29f   : > { %v2488_v42 = vsub.f32 %v5306_v58, %v2462_v23  ;;  %v2529_v4 = vsel %vm2109_vm2, %v5417_v13, 0.0 }
 0x2a1   : > { %v2514_v53 = vmul.f32 1.442695, %v2488_v42 }
 0x2a3   : > { %4118 = vpow2.f32 %v2514_v53 }
 0x2a5   : > { %v2456_v2 = vpop.xlane.xlu2 %2455  ;;  %2530 = vadd.xlane.f32.xlu0 %v2529_v4 }
 0x2a6   : > { %v2486_v62 = vsub.f32 %v5320_v11, %v2456_v2 }
 0x2a8   : > { %v2510_v33 = vmul.f32 1.442695, %v2486_v62 }
 0x2a9   : > { %v5421_v36 = vpop.eup %4118 }
 0x2aa   : > { %v2556_v49 = vsel %vm2109_vm2, %v5421_v36, 0.0 }
 0x2ab   : > { %2557 = vadd.xlane.f32.xlu1 %v2556_v49 }
 0x2ad   : > { %v2465_v22 = vpop.xlane.xlu2 %2464 }
 0x2ae   : > { %v2489_v31 = vsub.f32 %v5311_v59, %v2465_v22 }
 0x2af   : > { %v2477_v11 = vpop.xlane.xlu1 %2476 }
 0x2b0   : > { %v2493_v48 = vsub.f32 %v5337_v44, %v2477_v11 }
 0x2b2   : > { %v2524_v57 = vmul.f32 1.442695, %v2493_v48 }
 0x2b5   : > { %v2468_v63 = vpop.xlane.xlu0 %2467  ;;  %v2447_v9 = vpop.xlane.xlu2 %2446 }
 0x2b6   : > { %v2483_v58 = vsub.f32 %v5318_v25, %v2447_v9  ;;  %v2516_v25 = vmul.f32 1.442695, %v2489_v31 }
 0x2b8   : > { %v2504_v10 = vmul.f32 1.442695, %v2483_v58 }
 0x2ba   : > { %4120 = vpow2.f32 %v2504_v10 }
 0x2bb   : > { %4122 = vpow2.f32 %v2510_v33 }
 0x2bd   : > { %v2459_v7 = vpop.xlane.xlu0 %2458  ;;  %v2474_v56 = vpop.xlane.xlu2 %2473 }
 0x2be   : > { %v2487_v17 = vsub.f32 %v5344_v46, %v2459_v7  ;;  %v2490_v46 = vsub.f32 %v5346_v35, %v2468_v63  ;;  %v2492_v49 = vsub.f32 %v5330_v27, %v2474_v56 }
 0x2c0   : > { %v2512_v37 = vmul.f32 1.442695, %v2487_v17  ;;  %v5428_v41 = vpop.eup %4120  ;;  %v2518_v60 = vmul.f32 1.442695, %v2490_v46  ;;  %v2522_v31 = vmul.f32 1.442695, %v2492_v49 }
 0x2c1   : > { %v2541_v32 = vsel %vm2109_vm2, %v5428_v41, 0.0  ;;  %v5435_v43 = vpop.eup %4122 }
 0x2c2   : > { %4124 = vpow2.f32 %v2512_v37  ;;  %2542 = vadd.xlane.f32.xlu2 %v2541_v32  ;;  %v2550_v3 = vsel %vm2109_vm2, %v5435_v43, 0.0 }
 0x2c3   : > { %4126 = vpow2.f32 %v2516_v25  ;;  %v2471_v39 = vpop.xlane.xlu1 %2470 }
 0x2c4   : > { %1631 = vrot.lane.b32.xlu1 %v5393_v21, %s4237_s28  ;;  %4128 = vpow2.f32 %v2518_v60  ;;  %v2491_v28 = vsub.f32 %v5362_v52, %v2471_v39 }
 0x2c6   : > { %v2520_v35 = vmul.f32 1.442695, %v2491_v28 }
 0x2c8   : > { %v5437_v0 = vpop.eup %4124  ;;  %4130 = vpow2.f32 %v2520_v35 }
 0x2c9   : > { %v2553_v59 = vsel %vm2109_vm2, %v5437_v0, 0.0  ;;  %v5444_v34 = vpop.eup %4126  ;;  %4132 = vpow2.f32 %v2524_v57 }
 0x2ca   : > { %2554 = vadd.xlane.f32.xlu0 %v2553_v59  ;;  %2551 = vadd.xlane.f32.xlu2 %v2550_v3  ;;  %v2559_v30 = vsel %vm2109_vm2, %v5444_v34, 0.0  ;;  %v5449_v47 = vpop.eup %4128 }
 0x2cb   : > { %v2562_v6 = vsel %vm2109_vm2, %v5449_v47, 0.0 }
 0x2ce   : > { %v5454_v8 = vpop.eup %4130 }
 0x2cf   : > { %v2565_v52 = vsel %vm2109_vm2, %v5454_v8, 0.0  ;;  %v5460_v26 = vpop.eup %4132 }
 0x2d0   : > { %v2571_v44 = vsel %vm2109_vm2, %v5460_v26, 0.0  ;;  %v1630_v45 = vpop.permute.xlu0 %1629 }
 0x2d1   : > { %v1761_v22 = vrot.slane %v1630_v45, 4 }
 0x2d2   : > { %2560 = vadd.xlane.f32.xlu2 %v2559_v30 }
 0x2da   : > { %2563 = vadd.xlane.f32.xlu2 %v2562_v6 }
 0x2db   : > { %v1618_v24 = vpop.permute.xlu1 %1617 }
 0x2dc   : > { %v1749_v40 = vrot.slane %v1618_v24, 4  ;;  %v1752_v23 = vsel %vm677_vm1, %v1618_v24, %v1751_v38 }
 0x2dd   : > { %v1760_v63 = vperm.slane %v1752_v23, %v4511_v55 }
 0x2de   : > { %1619 = vrot.lane.b32.xlu0 %v5393_v21, %s4239_s15  ;;  %v1750_v51 = vsel %vm677_vm1, %v1749_v40, %v5373_v29 }
 0x2df   : > { %v1756_v53 = vperm.slane %v1750_v51, %v4511_v55  ;;  %v1787_v32 = vrot.slane %v1760_v63, 4 }
 0x2e1   : > { %v1775_v7 = vrot.slane %v1756_v53, 4 }
 0x2e2   : > { %2566 = vadd.xlane.f32.xlu2 %v2565_v52 }
 0x2ea   : > { %2572 = vadd.xlane.f32.xlu2 %v2571_v44 }
 0x2ed   : > { %v2534_v14 = vpop.xlane.xlu2 %2533 }
 0x2ee   : > { %4134 = vrcp.f32 %v2534_v14  ;;  %v2613_v10 = vand.u32 2147483647, %v2534_v14  ;;  %v2615_v62 = vand.u32 2147483648, %v2534_v14  ;;  %vm2609_vm5 = vweird.f32 %v2534_v14 }
 0x2f0   : > { %vm2614_vm7 = vcmp.eq.f32.partialorder %v2613_v10, 8.507059e+37  ;;  %v2616_v60 = vor.u32 1.1754944e-38, %v2615_v62 }
 0x2f4   : > { %v4135_v42 = vpop.eup %4134 }
 0x2f5   : > { %v2605_v2 = vmul.f32 %v4135_v42, %v2534_v14  ;;  %v5469_v4 = vpop.permute.xlu2 %4064  ;;  %vm2610_vm4 = vweird.f32 %v4135_v42 }
 0x2f6   : > { %v4066_v9 = vunpack.i.l.bf16 %v5469_v4  ;;  %vm2611_vm6 = vmor %vm2609_vm5, %vm2610_vm4 }
 0x2f7   : > { %v2606_v58 = vsub.f32 1.0, %v2605_v2 }
 0x2f8   : > { %v1762_v29 = vsel %vm677_vm1, %v1761_v22, %v4066_v9  ;;  %v1763_v33 = vrot.slane %v4066_v9, 4 }
 0x2f9   : > { %v2607_v17 = vmul.f32 %v4135_v42, %v2606_v58  ;;  %v1768_v37 = vperm.slane %v1762_v29, %v4511_v55 }
 0x2fa   : > { %v1764_v27 = vsel %vm677_vm1, %v1630_v45, %v1763_v33 }
 0x2fb   : > { %v2528_v25 = vpop.xlane.xlu0 %2527  ;;  %v2608_v11 = vadd.f32 %v4135_v42, %v2607_v17  ;;  %v1772_v46 = vperm.slane %v1764_v27, %v4511_v55  ;;  %v1773_v59 = vrot.slane %v1768_v37, 4  ;;  %v1776_v3 = vsel %vm677_vm1, %v1768_v37, %v1775_v7 }
 0x2fc   : > { %v1784_v39 = vperm.slane %v1776_v3, %v4533_v18  ;;  %4136 = vrcp.f32 %v2528_v25  ;;  %v2583_v22 = vand.u32 2147483647, %v2528_v25  ;;  %v2585_v10 = vand.u32 2147483648, %v2528_v25 }
 0x2fd   : > { %v2612_v28 = vsel %vm2611_vm6, %v4135_v42, %v2608_v11  ;;  %v1774_v30 = vsel %vm677_vm1, %v1773_v59, %v1756_v53  ;;  %v1785_v35 = vrot.slane %v1772_v46, 4  ;;  %v1788_v48 = vsel %vm677_vm1, %v1772_v46, %v1787_v32 }
 0x2fe   : > { %4138 = vpow2.f32 %v2522_v31  ;;  %v2617_v6 = vsel %vm2614_vm7, %v2616_v60, %v2612_v28  ;;  %v1796_v57 = vperm.slane %v1788_v48, %v4533_v18  ;;  %v1780_v56 = vperm.slane %v1774_v30, %v4533_v18 }
 0x2ff   : > { %v2618_v52 = vmul.f32 %v5381_v5, %v2617_v6  ;;  %v1786_v44 = vsel %vm677_vm1, %v1785_v35, %v1760_v63  ;;  %v1799_v24 = vrot.slane %v1784_v39, 4  ;;  %vm2579_vm9 = vweird.f32 %v2528_v25 }
 0x300   : > { %v1803_v14 = vrot.slane %v1796_v57, 4  ;;  %v1792_v45 = vperm.slane %v1786_v44, %v4533_v18  ;;  %v1797_v51 = vrot.slane %v1780_v56, 4  ;;  %vm2584_vm10 = vcmp.eq.f32.partialorder %v2583_v22, 8.507059e+37 }
 0x301   : > { %v2816_v40 = vpack.c.bf16 %v2618_v52, %v2618_v52  ;;  %v1800_v23 = vsel %vm677_vm1, 0.0, %v1799_v24  ;;  %v1969_v2 = vsel %vm677_vm1, %v1799_v24, %v1780_v56  ;;  %v2586_v32 = vor.u32 1.1754944e-38, %v2585_v10 }
 0x302   : > { %v4137_v38 = vpop.eup %4136  ;;  %v1804_v5 = vsel %vm677_vm1, 0.0, %v1803_v14  ;;  %v1801_v9 = vrot.slane %v1792_v45, 4  ;;  %v1974_v58 = vrot.slane %v1800_v23, 4  ;;  %v1798_v29 = vsel %vm677_vm1, 0.0, %v1797_v51 }
 0x303   : > { %v2575_v42 = vmul.f32 %v4137_v38, %v2528_v25  ;;  %3952 = vmatmul.msk.bf16.vlgmr.msrb.gmra.mxu0 %vm2109_vm2, %v2816_v40  ;;  %vm2580_vm8 = vweird.f32 %v4137_v38  ;;  %v5500_v7 = vperm.slane %v1969_v2, %v4511_v55  ;;  %v1985_v17 = vrot.slane %v1804_v5, 4 }
 0x304   : > { %v5489_v53 = vpop.eup %4138  ;;  %vm2581_vm11 = vmor %vm2579_vm9, %vm2580_vm8  ;;  %v1802_v27 = vsel %vm677_vm1, 0.0, %v1801_v9  ;;  %v1975_v11 = vsel %vm677_vm1, %v1974_v58, %v1798_v29  ;;  %v1980_v46 = vsel %vm677_vm1, %v1803_v14, %v1792_v45 }
 0x305   : > { %v2576_v49 = vsub.f32 1.0, %v2575_v42  ;;  %v2568_v62 = vsel %vm2109_vm2, %v5489_v53, 0.0  ;;  %v5510_v60 = vperm.slane %v1975_v11, %v4511_v55  ;;  %v5513_v39 = vperm.slane %v1980_v46, %v4511_v55 }
 0x306   : > { %v5493_v63 = vpop.xlane.xlu1 %2536  ;;  %v1986_v35 = vsel %vm677_vm1, %v1985_v17, %v1802_v27  ;;  %v1993_v48 = vrot.slane %v5500_v7, 4 }
 0x307   : > { %4140 = vrcp.f32 %v5493_v63  ;;  %v2577_v33 = vmul.f32 %v4137_v38, %v2576_v49  ;;  %v2628_v3 = vand.u32 2147483647, %v5493_v63  ;;  %v2630_v30 = vand.u32 2147483648, %v5493_v63 }
 0x308   : > { %2569 = vadd.xlane.f32.xlu0 %v2568_v62  ;;  %v5502_v37 = vpop.xlane.xlu0 %2539  ;;  %vm2624_vm12 = vweird.f32 %v5493_v63  ;;  %v5527_v24 = vperm.slane %v1986_v35, %v4511_v55  ;;  %v2005_v45 = vrot.slane %v5513_v39, 4 }
 0x309   : > { %v2578_v31 = vadd.f32 %v4137_v38, %v2577_v33  ;;  %4142 = vrcp.f32 %v5502_v37  ;;  %v2643_v52 = vand.u32 2147483647, %v5502_v37  ;;  %v2645_v44 = vand.u32 2147483648, %v5502_v37 }
 0x30a   : > { %vm5532_vm13 = vcmp.eq.f32.partialorder %v2628_v3, 8.507059e+37  ;;  %v2631_v23 = vor.u32 1.1754944e-38, %v2630_v30  ;;  %vm2639_vm14 = vweird.f32 %v5502_v37  ;;  %v2006_v10 = vsel %vm677_vm1, %v5527_v24, %v2005_v45 }
 0x30b   : > { %v2582_v59 = vsel %vm2581_vm11, %v4137_v38, %v2578_v31  ;;  %vm5540_vm4 = vcmp.eq.f32.partialorder %v2643_v52, 8.507059e+37  ;;  %v2646_v9 = vor.u32 1.1754944e-38, %v2645_v44  ;;  %v2014_v33 = vperm.slane %v2006_v10, %v4533_v18 }
 0x30c   : > { %v2587_v28 = vsel %vm2584_vm10, %v2586_v32, %v2582_v59  ;;  %v1991_v3 = vrot.slane %v5510_v60, 4 }
 0x30d   : > { %v4141_v25 = vpop.eup %4140  ;;  %v2588_v6 = vmul.f32 %v5386_v54, %v2587_v28  ;;  %v1994_v54 = vsel %vm677_vm1, %v5510_v60, %v1993_v48  ;;  %v2019_v59 = vrot.slane %v2014_v33, 4 }
 0x30e   : > { %v2620_v57 = vmul.f32 %v4141_v25, %v5493_v63  ;;  %v5521_v56 = vpop.xlane.xlu1 %2545  ;;  %vm2625_vm15 = vweird.f32 %v4141_v25  ;;  %v2002_v58 = vperm.slane %v1994_v54, %v4533_v18  ;;  %v2003_v63 = vrot.slane %v5527_v24, 4 }
 0x30f   : > { %4144 = vrcp.f32 %v5521_v56  ;;  %v4143_v14 = vpop.eup %4142  ;;  %v2814_v38 = vpack.c.bf16 %v2588_v6, %v2588_v6  ;;  %vm2669_vm5 = vweird.f32 %v5521_v56  ;;  %v2673_v29 = vand.u32 2147483647, %v5521_v56  ;;  %vm2626_vm6 = vmor %vm2624_vm12, %vm2625_vm15 }
 0x310   : > { %v2621_v40 = vsub.f32 1.0, %v2620_v57  ;;  %v2635_v42 = vmul.f32 %v4143_v14, %v5502_v37  ;;  %v5538_v5 = vpop.xlane.xlu0 %2548  ;;  %vm2640_vm7 = vweird.f32 %v4143_v14  ;;  %v2675_v32 = vand.u32 2147483648, %v5521_v56 }
 0x311   : > { %4146 = vrcp.f32 %v5538_v5  ;;  %3950 = vmatmul.msk.bf16.vlgmr.msra.gmra.mxu2 %vm2109_vm2, %v2814_v38  ;;  %v2021_v27 = vrot.slane %v2002_v58, 4  ;;  %vm2641_vm8 = vmor %vm2639_vm14, %vm2640_vm7  ;;  %v2020_v52 = vsel %vm677_vm1, %v2019_v59, %v2002_v58  ;;  %v2688_v51 = vand.u32 2147483647, %v5538_v5 }
 0x312   : > { %v2622_v2 = vmul.f32 %v4141_v25, %v2621_v40  ;;  %v2636_v22 = vsub.f32 1.0, %v2635_v42  ;;  %v2840_v38 = vpack.c.bf16 %v2020_v52, %v2020_v52  ;;  %vm2674_vm12 = vcmp.eq.f32.partialorder %v2673_v29, 8.507059e+37 }
 0x313   : > { %v2022_v35 = vsel %vm677_vm1, %v2014_v33, %v2021_v27  ;;  %vm2689_vm15 = vcmp.eq.f32.partialorder %v2688_v51, 8.507059e+37 }
 0x314   : > { %v2623_v62 = vadd.f32 %v4141_v25, %v2622_v2  ;;  %v2637_v31 = vmul.f32 %v4143_v14, %v2636_v22  ;;  %v2841_v57 = vpack.c.bf16 %v2022_v35, %v2022_v35  ;;  %v3041_v49 = vsel %vm2849_vm3, %v2840_v38, 0 }
 0x315   : > { %v4145_v17 = vpop.eup %4144  ;;  %3050 = vmatpush.bf16.msrb.mxu0 %v3041_v49 }
 0x316   : > { %v2627_v11 = vsel %vm2626_vm6, %v4141_v25, %v2623_v62  ;;  %v2665_v46 = vmul.f32 %v4145_v17, %v5521_v56  ;;  %v2638_v30 = vadd.f32 %v4143_v14, %v2637_v31  ;;  %vm2670_vm9 = vweird.f32 %v4145_v17 }
 0x317   : > { %v2632_v28 = vsel %vm5532_vm13, %v2631_v23, %v2627_v11  ;;  %v4147_v48 = vpop.eup %4146  ;;  %v2690_v23 = vand.u32 2147483648, %v5538_v5  ;;  %v3060_v2 = vsel %vm2849_vm3, %v2841_v57, 0  ;;  %vm2671_vm10 = vmor %vm2669_vm5, %vm2670_vm9  ;;  %vm2684_vm13 = vweird.f32 %v5538_v5 }
 0x318   : > { %v2633_v6 = vmul.f32 %v5395_v50, %v2632_v28  ;;  %v2666_v25 = vsub.f32 1.0, %v2665_v46  ;;  %v2642_v44 = vsel %vm2641_vm8, %v4143_v14, %v2638_v30  ;;  %v2680_v60 = vmul.f32 %v4147_v48, %v5538_v5  ;;  %v5566_v40 = vpop.xlane.xlu0 %2530 }
 0x319   : > { %v2647_v24 = vsel %vm5540_vm4, %v2646_v9, %v2642_v44  ;;  %4148 = vrcp.f32 %v5566_v40  ;;  %v2676_v50 = vor.u32 1.1754944e-38, %v2675_v32  ;;  %vm2685_vm11 = vweird.f32 %v4147_v48 }
 0x31a   : > { %v2667_v54 = vmul.f32 %v4145_v17, %v2666_v25  ;;  %v2817_v45 = vpack.c.bf16 %v2633_v6, %v2633_v6  ;;  %v2681_v37 = vsub.f32 1.0, %v2680_v60  ;;  %v2648_v14 = vmul.f32 %v5403_v61, %v2647_v24  ;;  %vm2686_vm14 = vmor %vm2684_vm13, %vm2685_vm11 }
 0x31b   : > { %v1992_v9 = vsel %vm677_vm1, %v1991_v3, %v5500_v7  ;;  %v2004_v61 = vsel %vm677_vm1, %v2003_v63, %v5513_v39  ;;  %v2691_v31 = vor.u32 1.1754944e-38, %v2690_v23  ;;  %v2600_v30 = vand.u32 2147483648, %v5566_v40 }
 0x31c   : > { %v2668_v42 = vadd.f32 %v4145_v17, %v2667_v54  ;;  %3953 = vmatmul.msk.bf16.vlgmr.msrb.gmra.mxu1 %vm2109_vm2, %v2817_v45  ;;  %v2682_v22 = vmul.f32 %v4147_v48, %v2681_v37  ;;  %v2010_v62 = vperm.slane %v2004_v61, %v4533_v18  ;;  %v1998_v7 = vperm.slane %v1992_v9, %v4533_v18 }
 0x31d   : > { %3069 = vmatpush.bf16.msrb.mxu1 %v3060_v2  ;;  %v2818_v39 = vpack.c.bf16 %v2648_v14, %v2648_v14  ;;  %vm2594_vm5 = vweird.f32 %v5566_v40  ;;  %v2601_v44 = vor.u32 1.1754944e-38, %v2600_v30 }
 0x31e   : > { %v2672_v58 = vsel %vm2671_vm10, %v4145_v17, %v2668_v42  ;;  %v2558_v10 = vpop.xlane.xlu1 %2557  ;;  %v2683_v56 = vadd.f32 %v4147_v48, %v2682_v22  ;;  %v2015_v11 = vrot.slane %v2010_v62, 4  ;;  %v2017_v35 = vrot.slane %v1998_v7, 4 }
 0x31f   : > { %v2677_v33 = vsel %vm2674_vm12, %v2676_v50, %v2672_v58  ;;  %4150 = vrcp.f32 %v2558_v10  ;;  %v4149_v32 = vpop.eup %4148  ;;  %v2735_v54 = vand.u32 2147483648, %v2558_v10  ;;  %v2733_v37 = vand.u32 2147483647, %v2558_v10 }
 0x320   : > { %v2678_v27 = vmul.f32 %v5408_v1, %v2677_v33  ;;  %v2687_v17 = vsel %vm2686_vm14, %v4147_v48, %v2683_v56  ;;  %v2590_v5 = vmul.f32 %v4149_v32, %v5566_v40  ;;  %v2016_v46 = vsel %vm677_vm1, %v2015_v11, %v1998_v7 }
 0x321   : > { %v2692_v29 = vsel %vm2689_vm15, %v2691_v31, %v2687_v17  ;;  %3954 = vmatmul.msk.bf16.vlgmr.msrb.gmra.mxu2 %vm2109_vm2, %v2818_v39  ;;  %v2838_v3 = vpack.c.bf16 %v2016_v46, %v2016_v46  ;;  %vm2595_vm4 = vweird.f32 %v4149_v32  ;;  %v2598_v48 = vand.u32 2147483647, %v5566_v40 }
 0x322   : > { %v2591_v59 = vsub.f32 1.0, %v2590_v5  ;;  %v2820_v28 = vpack.c.bf16 %v2678_v27, %v2678_v27  ;;  %v2693_v1 = vmul.f32 %v5412_v12, %v2692_v29  ;;  %vm2596_vm6 = vmor %vm2594_vm5, %vm2595_vm4  ;;  %v2018_v38 = vsel %vm677_vm1, %v2010_v62, %v2017_v35 }
 0x323   : > { %v3003_v25 = vsel %vm2849_vm3, %v2838_v3, 0  ;;  %vm2599_vm7 = vcmp.eq.f32.partialorder %v2598_v48, 8.507059e+37  ;;  %v2839_v23 = vpack.c.bf16 %v2018_v38, %v2018_v38  ;;  %vm2729_vm9 = vweird.f32 %v2558_v10 }
 0x324   : > { %v2592_v6 = vmul.f32 %v4149_v32, %v2591_v59  ;;  %3956 = vmatmul.msk.bf16.vlgmr.msra.gmra.mxu0 %vm2109_vm2, %v2820_v28  ;;  %3012 = vmatpush.bf16.msra.mxu2 %v3003_v25  ;;  %v2821_v60 = vpack.c.bf16 %v2693_v1, %v2693_v1  ;;  %v2736_v40 = vor.u32 1.1754944e-38, %v2735_v54  ;;  %vm2734_vm11 = vcmp.eq.f32.partialorder %v2733_v37, 8.507059e+37 }
 0x325   : > { %v4151_v63 = vpop.eup %4150  ;;  %v3022_v22 = vsel %vm2849_vm3, %v2839_v23, 0  ;;  %v4067_v31 = vunpack.i.h.bf16 %v5469_v4 }
 0x326   : > { %v2725_v57 = vmul.f32 %v4151_v63, %v2558_v10  ;;  %v2593_v52 = vadd.f32 %v4149_v32, %v2592_v6  ;;  %vm2730_vm8 = vweird.f32 %v4151_v63 }
 0x327   : > { %vm2731_vm10 = vmor %vm2729_vm9, %vm2730_vm8  ;;  %v1819_v17 = vrot.slane %v4067_v31, 4 }
 0x328   : > { %v2726_v12 = vsub.f32 1.0, %v2725_v57  ;;  %v2597_v24 = vsel %vm2596_vm6, %v4149_v32, %v2593_v52 }
 0x329   : > { %v2602_v45 = vsel %vm2599_vm7, %v2601_v44, %v2597_v24  ;;  %v1807_v24 = vrot.slane %v5393_v21, 4 }
 0x32a   : > { %v2727_v50 = vmul.f32 %v4151_v63, %v2726_v12  ;;  %v2603_v51 = vmul.f32 %v5417_v13, %v2602_v45 }
 0x32c   : > { %v2728_v14 = vadd.f32 %v4151_v63, %v2727_v50  ;;  %3957 = vmatmul.msk.bf16.vlgmr.msra.gmra.mxu1 %vm2109_vm2, %v2821_v60  ;;  %v2815_v42 = vpack.c.bf16 %v2603_v51, %v2603_v51 }
 0x32e   : > { %v2732_v2 = vsel %vm2731_vm10, %v4151_v63, %v2728_v14  ;;  %3951 = vmatmul.msk.bf16.vlgmr.msra.gmra.mxu3 %vm2109_vm2, %v2815_v42 }
 0x32f   : > { %v2737_v49 = vsel %vm2734_vm11, %v2736_v40, %v2732_v2  ;;  %3031 = vmatpush.bf16.msra.mxu3 %v3022_v22 }
 0x330   : > { %v2738_v9 = vmul.f32 %v5421_v36, %v2737_v49 }
 0x332   : > { %v2824_v61 = vpack.c.bf16 %v2738_v9, %v2738_v9 }
 0x334   : > { %3960 = vmatmul.msk.bf16.vlgmr.msrb.gmra.mxu0 %vm2109_vm2, %v2824_v61 }
 0x335   : > { %v2543_v13 = vpop.xlane.xlu2 %2542 }
 0x336   : > { %4152 = vrcp.f32 %v2543_v13  ;;  %v2660_v32 = vand.u32 2147483648, %v2543_v13  ;;  %v2658_v36 = vand.u32 2147483647, %v2543_v13  ;;  %v1632_v7 = vpop.permute.xlu1 %1631  ;;  %vm2654_vm13 = vweird.f32 %v2543_v13 }
 0x337   : > { %v1817_v59 = vrot.slane %v1632_v7, 4  ;;  %v1820_v4 = vsel %vm677_vm1, %v1632_v7, %v1819_v17 }
 0x338   : > { %v2661_v5 = vor.u32 1.1754944e-38, %v2660_v32  ;;  %vm2659_vm15 = vcmp.eq.f32.partialorder %v2658_v36, 8.507059e+37  ;;  %v5613_v25 = vperm.slane %v1820_v4, %v4511_v55 }
 0x339   : > { %v1818_v44 = vsel %vm677_vm1, %v1817_v59, %v4067_v31 }
 0x33a   : > { %v1824_v37 = vperm.slane %v1818_v44, %v4511_v55  ;;  %v1841_v42 = vrot.slane %v5613_v25, 4 }
 0x33c   : > { %v4153_v58 = vpop.eup %4152 }
 0x33d   : > { %v5605_v10 = vpop.xlane.xlu0 %2554  ;;  %v2650_v62 = vmul.f32 %v4153_v58, %v2543_v13  ;;  %v2552_v33 = vpop.xlane.xlu2 %2551  ;;  %vm2655_vm12 = vweird.f32 %v4153_v58 }
 0x33e   : > { %4154 = vrcp.f32 %v5605_v10  ;;  %vm2656_vm14 = vmor %vm2654_vm13, %vm2655_vm12  ;;  %v2705_v57 = vand.u32 2147483648, %v2552_v33  ;;  %v2703_v60 = vand.u32 2147483647, %v2552_v33  ;;  %v2720_v45 = vand.u32 2147483648, %v5605_v10 }
 0x33f   : > { %v2651_v56 = vsub.f32 1.0, %v2650_v62  ;;  %4156 = vrcp.f32 %v2552_v33  ;;  %vm2699_vm6 = vweird.f32 %v2552_v33  ;;  %vm2714_vm7 = vweird.f32 %v5605_v10 }
 0x340   : > { %v2706_v51 = vor.u32 1.1754944e-38, %v2705_v57  ;;  %vm2704_vm10 = vcmp.eq.f32.partialorder %v2703_v60, 8.507059e+37  ;;  %v2721_v13 = vor.u32 1.1754944e-38, %v2720_v45 }
 0x341   : > { %v2652_v27 = vmul.f32 %v4153_v58, %v2651_v56 }
 0x343   : > { %v2653_v11 = vadd.f32 %v4153_v58, %v2652_v27  ;;  %v1829_v27 = vrot.slane %v1824_v37, 4 }
 0x344   : > { %v4155_v39 = vpop.eup %4154 }
 0x345   : > { %v4157_v29 = vpop.eup %4156  ;;  %v2710_v46 = vmul.f32 %v4155_v39, %v5605_v10  ;;  %v2657_v3 = vsel %vm2656_vm14, %v4153_v58, %v2653_v11  ;;  %v2561_v28 = vpop.xlane.xlu2 %2560  ;;  %vm2715_vm5 = vweird.f32 %v4155_v39 }
 0x346   : > { %v2662_v1 = vsel %vm2659_vm15, %v2661_v5, %v2657_v3  ;;  %v2695_v30 = vmul.f32 %v4157_v29, %v2552_v33  ;;  %4158 = vrcp.f32 %v2561_v28  ;;  %vm2700_vm4 = vweird.f32 %v4157_v29  ;;  %vm5624_vm9 = vmor %vm2714_vm7, %vm2715_vm5 }
 0x347   : > { %v2711_v35 = vsub.f32 1.0, %v2710_v46  ;;  %v2663_v63 = vmul.f32 %v5428_v41, %v2662_v1  ;;  %v2718_v41 = vand.u32 2147483647, %v5605_v10  ;;  %vm2701_vm8 = vmor %vm2699_vm6, %vm2700_vm4  ;;  %v2748_v61 = vand.u32 2147483647, %v2561_v28 }
 0x348   : > { %v2696_v6 = vsub.f32 1.0, %v2695_v30  ;;  %v2750_v62 = vand.u32 2147483648, %v2561_v28  ;;  %vm2744_vm13 = vweird.f32 %v2561_v28 }
 0x349   : > { %v2712_v48 = vmul.f32 %v4155_v39, %v2711_v35  ;;  %v2819_v52 = vpack.c.bf16 %v2663_v63, %v2663_v63  ;;  %vm2719_vm11 = vcmp.eq.f32.partialorder %v2718_v41, 8.507059e+37  ;;  %vm5637_vm14 = vcmp.eq.f32.partialorder %v2748_v61, 8.507059e+37 }
 0x34a   : > { %v2697_v12 = vmul.f32 %v4157_v29, %v2696_v6  ;;  %v2751_v59 = vor.u32 1.1754944e-38, %v2750_v62 }
 0x34b   : > { %v2713_v38 = vadd.f32 %v4155_v39, %v2712_v48  ;;  %3955 = vmatmul.msk.bf16.vlgmr.msrb.gmra.mxu3 %vm2109_vm2, %v2819_v52 }
 0x34c   : > { %v4159_v54 = vpop.eup %4158  ;;  %v2698_v50 = vadd.f32 %v4157_v29, %v2697_v12 }
 0x34d   : > { %v2740_v23 = vmul.f32 %v4159_v54, %v2561_v28  ;;  %v5622_v14 = vpop.xlane.xlu2 %2563  ;;  %v2717_v49 = vsel %vm5624_vm9, %v4155_v39, %v2713_v38  ;;  %vm2745_vm12 = vweird.f32 %v4159_v54 }
 0x34e   : > { %v2702_v2 = vsel %vm2701_vm8, %v4157_v29, %v2698_v50  ;;  %4160 = vrcp.f32 %v5622_v14  ;;  %v2722_v32 = vsel %vm2719_vm11, %v2721_v13, %v2717_v49  ;;  %vm2746_vm15 = vmor %vm2744_vm13, %vm2745_vm12  ;;  %v2763_v52 = vand.u32 2147483647, %v5622_v14 }
 0x34f   : > { %v2707_v22 = vsel %vm2704_vm10, %v2706_v51, %v2702_v2  ;;  %v2741_v9 = vsub.f32 1.0, %v2740_v23  ;;  %v2723_v3 = vmul.f32 %v5437_v0, %v2722_v32  ;;  %v2765_v60 = vand.u32 2147483648, %v5622_v14 }
 0x350   : > { %v2708_v58 = vmul.f32 %v5435_v43, %v2707_v22  ;;  %v1620_v10 = vpop.permute.xlu0 %1619  ;;  %vm2759_vm4 = vweird.f32 %v5622_v14  ;;  %vm5673_vm6 = vcmp.eq.f32.partialorder %v2763_v52, 8.507059e+37 }
 0x351   : > { %v1805_v33 = vrot.slane %v1620_v10, 4  ;;  %v1808_v56 = vsel %vm677_vm1, %v1620_v10, %v1807_v24  ;;  %v2742_v31 = vmul.f32 %v4159_v54, %v2741_v9  ;;  %v2766_v61 = vor.u32 1.1754944e-38, %v2765_v60 }
 0x352   : > { %v1816_v36 = vperm.slane %v1808_v56, %v4511_v55  ;;  %v2822_v7 = vpack.c.bf16 %v2708_v58, %v2708_v58 }
 0x353   : > { %v1806_v11 = vsel %vm677_vm1, %v1805_v33, %v5393_v21  ;;  %v2743_v39 = vadd.f32 %v4159_v54, %v2742_v31 }
 0x354   : > { %v5641_v43 = vpop.eup %4160  ;;  %v1812_v5 = vperm.slane %v1806_v11, %v4511_v55  ;;  %v1842_v29 = vsel %vm677_vm1, %v1841_v42, %v1816_v36  ;;  %v1843_v46 = vrot.slane %v1816_v36, 4  ;;  %3958 = vmatmul.msk.bf16.vlgmr.msra.gmra.mxu2 %vm2109_vm2, %v2822_v7 }
 0x355   : > { %v1848_v21 = vperm.slane %v1842_v29, %v4533_v18  ;;  %v2747_v28 = vsel %vm2746_vm15, %v4159_v54, %v2743_v39  ;;  %v2755_v4 = vmul.f32 %v5641_v43, %v5622_v14  ;;  %v5650_v1 = vpop.xlane.xlu2 %2566  ;;  %v2823_v54 = vpack.c.bf16 %v2723_v3, %v2723_v3 }
 0x356   : > { %v1830_v30 = vsel %vm677_vm1, %v1829_v27, %v1812_v5  ;;  %v1831_v35 = vrot.slane %v1812_v5, 4  ;;  %v1844_v63 = vsel %vm677_vm1, %v5613_v25, %v1843_v46  ;;  %v2752_v6 = vsel %vm5637_vm14, %v2751_v59, %v2747_v28 }
 0x357   : > { %v1836_v48 = vperm.slane %v1830_v30, %v4533_v18  ;;  %v1852_v0 = vperm.slane %v1844_v63, %v4533_v18  ;;  %v2753_v57 = vmul.f32 %v5444_v34, %v2752_v6  ;;  %v2756_v12 = vsub.f32 1.0, %v2755_v4 }
 0x358   : > { %v1832_v44 = vsel %vm677_vm1, %v1824_v37, %v1831_v35  ;;  %4162 = vrcp.f32 %v5650_v1  ;;  %v1857_v38 = vrot.slane %v1848_v21, 4  ;;  %vm2760_vm5 = vweird.f32 %v5641_v43 }
 0x359   : > { %v1840_v25 = vperm.slane %v1832_v44, %v4533_v18  ;;  %v1859_v24 = vrot.slane %v1852_v0, 4  ;;  %v2757_v41 = vmul.f32 %v5641_v43, %v2756_v12  ;;  %v2825_v34 = vpack.c.bf16 %v2753_v57, %v2753_v57  ;;  %vm2761_vm7 = vmor %vm2759_vm4, %vm2760_vm5 }
 0x35a   : > { %v1853_v45 = vrot.slane %v1836_v48, 4  ;;  %v1858_v22 = vsel %vm677_vm1, 0.0, %v1857_v38  ;;  %vm2774_vm8 = vweird.f32 %v5650_v1  ;;  %v2778_v36 = vand.u32 2147483647, %v5650_v1 }
 0x35b   : > { %v1855_v50 = vrot.slane %v1840_v25, 4  ;;  %v1860_v37 = vsel %vm677_vm1, 0.0, %v1859_v24  ;;  %v2034_v51 = vsel %vm677_vm1, %v1859_v24, %v1848_v21  ;;  %3959 = vmatmul.msk.bf16.vlgmr.msra.gmra.mxu3 %vm2109_vm2, %v2823_v54  ;;  %v2758_v42 = vadd.f32 %v5641_v43, %v2757_v41  ;;  %3961 = vmatmul.msk.bf16.vlgmr.msrb.gmra.mxu1 %vm2109_vm2, %v2825_v34 }
 0x35c   : > { %v2038_v23 = vperm.slane %v2034_v51, %v4511_v55  ;;  %v2039_v40 = vrot.slane %v1860_v37, 4  ;;  %v1854_v56 = vsel %vm677_vm1, 0.0, %v1853_v45  ;;  %vm5704_vm10 = vcmp.eq.f32.partialorder %v2778_v36, 8.507059e+37 }
 0x35d   : > { %v1856_v49 = vsel %vm677_vm1, 0.0, %v1855_v50  ;;  %v2023_v9 = vsel %vm677_vm1, %v1855_v50, %v1836_v48  ;;  %v5681_v13 = vpop.xlane.xlu2 %2572  ;;  %v2762_v32 = vsel %vm2761_vm7, %v5641_v43, %v2758_v42  ;;  %v2780_v43 = vand.u32 2147483648, %v5650_v1 }
 0x35e   : > { %v4163_v58 = vpop.eup %4162  ;;  %v2028_v10 = vrot.slane %v1856_v49, 4  ;;  %v2040_v62 = vsel %vm677_vm1, %v2039_v40, %v1858_v22  ;;  %v2059_v33 = vrot.slane %v2038_v23, 4  ;;  %v2027_v7 = vperm.slane %v2023_v9, %v4511_v55 }
 0x35f   : > { %v2044_v31 = vperm.slane %v2040_v62, %v4511_v55  ;;  %v2770_v27 = vmul.f32 %v4163_v58, %v5650_v1  ;;  %4164 = vrcp.f32 %v5681_v13  ;;  %v2767_v29 = vsel %vm5673_vm6, %v2766_v61, %v2762_v32 }
 0x360   : > { %v2029_v11 = vsel %vm677_vm1, %v2028_v10, %v1854_v56  ;;  %v2047_v46 = vrot.slane %v2027_v7, 4  ;;  %vm2775_vm9 = vweird.f32 %v4163_v58  ;;  %v2768_v6 = vmul.f32 %v5449_v47, %v2767_v29 }
 0x361   : > { %v2057_v14 = vrot.slane %v2044_v31, 4  ;;  %v2771_v39 = vsub.f32 1.0, %v2770_v27  ;;  %v2033_v17 = vperm.slane %v2029_v11, %v4511_v55  ;;  %v2060_v5 = vsel %vm677_vm1, %v2044_v31, %v2059_v33  ;;  %vm2776_vm11 = vmor %vm2774_vm8, %vm2775_vm9 }
 0x362   : > { %v2068_v59 = vperm.slane %v2060_v5, %v4533_v18  ;;  %v2781_v44 = vor.u32 1.1754944e-38, %v2780_v43  ;;  %v2808_v12 = vand.u32 2147483647, %v5681_v13  ;;  %v2810_v54 = vand.u32 2147483648, %v5681_v13 }
 0x363   : > { %v2772_v3 = vmul.f32 %v4163_v58, %v2771_v39  ;;  %v2045_v21 = vrot.slane %v2033_v17, 4  ;;  %v2058_v28 = vsel %vm677_vm1, %v2057_v14, %v2038_v23  ;;  %v2048_v30 = vsel %vm677_vm1, %v2033_v17, %v2047_v46 }
 0x364   : > { %v2073_v35 = vrot.slane %v2068_v59, 4  ;;  %v2064_v63 = vperm.slane %v2058_v28, %v4533_v18  ;;  %v2056_v0 = vperm.slane %v2048_v30, %v4533_v18  ;;  %v2826_v23 = vpack.c.bf16 %v2768_v6, %v2768_v6 }
 0x365   : > { %v2773_v48 = vadd.f32 %v4163_v58, %v2772_v3  ;;  %v2046_v57 = vsel %vm677_vm1, %v2045_v21, %v2027_v7  ;;  %v4165_v52 = vpop.eup %4164  ;;  %vm2804_vm13 = vweird.f32 %v5681_v13  ;;  %vm2809_vm15 = vcmp.eq.f32.partialorder %v2808_v12, 8.507059e+37 }
 0x366   : > { %v2052_v60 = vperm.slane %v2046_v57, %v4533_v18  ;;  %v2069_v25 = vrot.slane %v2064_v63, 4  ;;  %v2074_v24 = vsel %vm677_vm1, %v2073_v35, %v2056_v0  ;;  %v2800_v47 = vmul.f32 %v4165_v52, %v5681_v13 }
 0x367   : > { %v2777_v38 = vsel %vm2776_vm11, %v4163_v58, %v2773_v48  ;;  %v2844_v34 = vpack.c.bf16 %v2074_v24, %v2074_v24  ;;  %v2075_v45 = vrot.slane %v2056_v0, 4  ;;  %vm2805_vm12 = vweird.f32 %v4165_v52 }
 0x368   : > { %v2782_v41 = vsel %vm5704_vm10, %v2781_v44, %v2777_v38  ;;  %v2070_v1 = vsel %vm677_vm1, %v2069_v25, %v2052_v60  ;;  %v2801_v50 = vsub.f32 1.0, %v2800_v47  ;;  %v2071_v51 = vrot.slane %v2052_v60, 4  ;;  %vm2806_vm14 = vmor %vm2804_vm13, %vm2805_vm12 }
 0x369   : > { %v2842_v37 = vpack.c.bf16 %v2070_v1, %v2070_v1  ;;  %v2783_v40 = vmul.f32 %v5454_v8, %v2782_v41  ;;  %v3117_v42 = vsel %vm2849_vm3, %v2844_v34, 0  ;;  %v2076_v2 = vsel %vm677_vm1, %v2068_v59, %v2075_v45 }
 0x36a   : > { %3126 = vmatpush.bf16.msra.mxu0 %v3117_v42  ;;  %v2802_v49 = vmul.f32 %v4165_v52, %v2801_v50  ;;  %v2845_v9 = vpack.c.bf16 %v2076_v2, %v2076_v2  ;;  %v2072_v61 = vsel %vm677_vm1, %v2064_v63, %v2071_v51  ;;  %v2811_v8 = vor.u32 1.1754944e-38, %v2810_v54 }
 0x36b   : > { %v3079_v22 = vsel %vm2849_vm3, %v2842_v37, 0  ;;  %v2843_v58 = vpack.c.bf16 %v2072_v61, %v2072_v61  ;;  %v2827_v56 = vpack.c.bf16 %v2783_v40, %v2783_v40  ;;  %vm3648_vm7 = vcmask 195584  }
 0x36c   : > { %3088 = vmatpush.bf16.msrb.mxu2 %v3079_v22  ;;  %v2803_v10 = vadd.f32 %v4165_v52, %v2802_v49  ;;  %v3136_v62 = vsel %vm2849_vm3, %v2845_v9, 0 }
 0x36d   : > { %3145 = vmatpush.bf16.msra.mxu1 %v3136_v62  ;;  %v3098_v33 = vsel %vm2849_vm3, %v2843_v58, 0 }
 0x36e   : > { %v2807_v31 = vsel %vm2806_vm14, %v4165_v52, %v2803_v10  ;;  %3107 = vmatpush.bf16.msrb.mxu3 %v3098_v33 }
 0x36f   : > { %3962 = vmatmul.msk.bf16.vlgmr.msrb.gmra.mxu2 %vm2109_vm2, %v2826_v23  ;;  %v2812_v32 = vsel %vm2809_vm15, %v2811_v8, %v2807_v31 }
 0x370   : > { %v2813_v27 = vmul.f32 %v5460_v26, %v2812_v32 }
 0x371   : > { %3963 = vmatmul.msk.bf16.vlgmr.msrb.gmra.mxu3 %vm2109_vm2, %v2827_v56 }
 0x372   : > { %v2829_v36 = vpack.c.bf16 %v2813_v27, %v2813_v27 }
 0x374   : > { %3965 = vmatmul.msk.bf16.vlgmr.msra.gmra.mxu1 %vm2109_vm2, %v2829_v36 }
 0x37b   : > { %v2570_v13 = vpop.xlane.xlu0 %2569 }
 0x37c   : > { %4166 = vrcp.f32 %v2570_v13  ;;  %v2795_v17 = vand.u32 2147483648, %v2570_v13  ;;  %v2793_v29 = vand.u32 2147483647, %v2570_v13  ;;  %vm2789_vm4 = vweird.f32 %v2570_v13 }
 0x37e   : > { %v2796_v26 = vor.u32 1.1754944e-38, %v2795_v17  ;;  %vm2794_vm6 = vcmp.eq.f32.partialorder %v2793_v29, 8.507059e+37 }
 0x380   : > { %v2900_v7 = vpop.f32.mrf.mxu0 }
 0x381   : > { %v3151_v52 = vrot.slane %v2900_v7, 4 }
 0x382   : > { %v4167_v11 = vpop.eup %4166 }
 0x383   : > { %v2785_v14 = vmul.f32 %v4167_v11, %v2570_v13  ;;  %vm2790_vm3 = vweird.f32 %v4167_v11 }
 0x384   : > { %vm2791_vm5 = vmor %vm2789_vm4, %vm2790_vm3 }
 0x385   : > { %v2786_v39 = vsub.f32 1.0, %v2785_v14 }
 0x387   : > { %v2787_v5 = vmul.f32 %v4167_v11, %v2786_v39 }
 0x388   : > { %v2902_v43 = vpop.f32.mrf.mxu0 }
 0x389   : > { %v2788_v46 = vadd.f32 %v4167_v11, %v2787_v5 }
 0x38b   : > { %v2792_v59 = vsel %vm2791_vm5, %v4167_v11, %v2788_v46 }
 0x38c   : > { %v2797_v3 = vsel %vm2794_vm6, %v2796_v26, %v2792_v59 }
 0x38d   : > { %v2798_v21 = vmul.f32 %v5489_v53, %v2797_v3 }
 0x38f   : > { %v2828_v28 = vpack.c.bf16 %v2798_v21, %v2798_v21 }
 0x391   : > { %3964 = vmatmul.msk.bf16.vlgmr.msra.gmra.mxu0 %vm2109_vm2, %v2828_v28 }
 0x394   : > { %v2862_v4 = vpop.f32.mrf.mxu2 }
 0x395   : > { %v3153_v44 = vrot.slane %v2862_v4, 4  ;;  %v3152_v12 = vsel %vm677_vm1, %v3151_v52, %v2862_v4 }
 0x396   : > { %v3158_v25 = vperm.slane %v3152_v12, %v4511_v55 }
 0x397   : > { %v3154_v53 = vsel %vm677_vm1, %v2900_v7, %v3153_v44 }
 0x398   : > { %v3162_v47 = vperm.slane %v3154_v53, %v4511_v55  ;;  %v3177_v45 = vrot.slane %v3158_v25, 4 }
 0x399   : > { %v2919_v30 = vpop.f32.mrf.mxu1 }
 0x39a   : > { %v3163_v38 = vrot.slane %v2919_v30, 4  ;;  %v3189_v51 = vrot.slane %v3162_v47, 4 }
 0x39c   : > { %v2864_v35 = vpop.f32.mrf.mxu2 }
 0x3a1   : > { %v2921_v63 = vpop.f32.mrf.mxu1  ;;  %v5737_v6 = vpop.f32.mrf.mxu0 }
 0x3a4   : > { %v5739_v48 = vpop.f32.mrf.mxu2 }
 0x3a5   : > { %v3209_v63 = vrot.slane %v5739_v48, 4 }
 0x3a7   : > { %v3210_v53 = vsel %vm677_vm1, %v5737_v6, %v3209_v63 }
 0x3a9   : > { %v5741_v0 = vpop.f32.mrf.mxu1  ;;  %v2978_v57 = vpop.f32.mrf.mxu0 }
 0x3aa   : > { %v3207_v57 = vrot.slane %v5737_v6, 4 }
 0x3ac   : > { %v2940_v60 = vpop.f32.mrf.mxu2  ;;  %v3208_v12 = vsel %vm677_vm1, %v3207_v57, %v5739_v48 }
 0x3b1   : > { %v2997_v24 = vpop.f32.mrf.mxu1  ;;  %v5747_v54 = vpop.f32.mrf.mxu0 }
 0x3b2   : > { %v2881_v41 = vpop.f32.mrf.mxu3  ;;  %v3218_v24 = vperm.slane %v3210_v53, %v4511_v55 }
 0x3b3   : > { %v3164_v34 = vsel %vm677_vm1, %v3163_v38, %v2881_v41  ;;  %v3165_v1 = vrot.slane %v2881_v41, 4  ;;  %v3219_v38 = vrot.slane %v5741_v0, 4 }
 0x3b4   : > { %v3170_v50 = vperm.slane %v3164_v34, %v4511_v55 }
 0x3b5   : > { %v3166_v37 = vsel %vm677_vm1, %v2919_v30, %v3165_v1 }
 0x3b6   : > { %v3174_v23 = vperm.slane %v3166_v37, %v4511_v55  ;;  %v3175_v40 = vrot.slane %v3170_v50, 4  ;;  %v3178_v42 = vsel %vm677_vm1, %v3170_v50, %v3177_v45  ;;  %v3245_v50 = vrot.slane %v3218_v24, 4 }
 0x3b7   : > { %v3186_v2 = vperm.slane %v3178_v42, %v4533_v18 }
 0x3b8   : > { %v3176_v49 = vsel %vm677_vm1, %v3175_v40, %v3158_v25  ;;  %v3187_v22 = vrot.slane %v3174_v23, 4  ;;  %v3190_v9 = vsel %vm677_vm1, %v3174_v23, %v3189_v51  ;;  %v3214_v25 = vperm.slane %v3208_v12, %v4511_v55 }
 0x3b9   : > { %v3182_v61 = vperm.slane %v3176_v49, %v4533_v18  ;;  %v3198_v58 = vperm.slane %v3190_v9, %v4533_v18  ;;  %v3201_v10 = vrot.slane %v3186_v2, 4  ;;  %v3054_v8 = vpop.f32.mrf.mxu0 }
 0x3ba   : > { %v3188_v62 = vsel %vm677_vm1, %v3187_v22, %v3162_v47  ;;  %v2883_v33 = vpop.f32.mrf.mxu3  ;;  %v3233_v45 = vrot.slane %v3214_v25, 4 }
 0x3bb   : > { %v3194_v56 = vperm.slane %v3188_v62, %v4533_v18  ;;  %v3199_v31 = vrot.slane %v3182_v61, 4  ;;  %v3202_v32 = vsel %vm677_vm1, 0.0, %v3201_v10  ;;  %v3205_v27 = vrot.slane %v3198_v58, 4 }
 0x3bc   : > { %v3380_v36 = vrot.slane %v3202_v32, 4  ;;  %v3375_v29 = vsel %vm677_vm1, %v3201_v10, %v3182_v61  ;;  %v3263_v10 = vrot.slane %v5747_v54, 4 }
 0x3bd   : > { %v3200_v13 = vsel %vm677_vm1, 0.0, %v3199_v31  ;;  %v3203_v7 = vrot.slane %v3194_v56, 4  ;;  %v3206_v11 = vsel %vm677_vm1, 0.0, %v3205_v27  ;;  %v3386_v43 = vsel %vm677_vm1, %v3205_v27, %v3194_v56 }
 0x3be   : > { %v3381_v14 = vsel %vm677_vm1, %v3380_v36, %v3200_v13  ;;  %v3391_v39 = vrot.slane %v3206_v11, 4  ;;  %v3379_v3 = vperm.slane %v3375_v29, %v4511_v55  ;;  %v3390_v21 = vperm.slane %v3386_v43, %v4511_v55 }
 0x3bf   : > { %v3204_v17 = vsel %vm677_vm1, 0.0, %v3203_v7  ;;  %v3385_v5 = vperm.slane %v3381_v14, %v4511_v55 }
 0x3c0   : > { %v3392_v46 = vsel %vm677_vm1, %v3391_v39, %v3204_v17  ;;  %v3411_v1 = vrot.slane %v3390_v21, 4  ;;  %v3399_v40 = vrot.slane %v3379_v3, 4 }
 0x3c1   : > { %v3396_v26 = vperm.slane %v3392_v46, %v4511_v55  ;;  %v3397_v59 = vrot.slane %v3385_v5, 4 }
 0x3c2   : > { %v3400_v33 = vsel %vm677_vm1, %v3385_v5, %v3399_v40 }
 0x3c3   : > { %v3409_v28 = vrot.slane %v3396_v26, 4  ;;  %v3398_v4 = vsel %vm677_vm1, %v3397_v59, %v3379_v3  ;;  %v3412_v2 = vsel %vm677_vm1, %v3396_v26, %v3411_v1  ;;  %v5828_v63 = vperm.slane %v3400_v33, %v4533_v18 }
 0x3c4   : > { %v5781_v52 = vperm.slane %v3398_v4, %v4533_v18  ;;  %v5811_v56 = vperm.slane %v3412_v2, %v4533_v18 }
 0x3c5   : > { %v3410_v30 = vsel %vm677_vm1, %v3409_v28, %v3390_v21 }
 0x3c6   : > { %v5776_v35 = vperm.slane %v3410_v30, %v4533_v18 }
 0x3c8   : > { %v3421_v44 = vrot.slane %v5776_v35, 4 }
 0x3ca   : > { %v5788_v60 = vsel %vm677_vm1, %v3421_v44, %v5781_v52 }
 0x3ce   : > { %v2957_v47 = vpop.f32.mrf.mxu3 }
 0x3cf   : > { %v3220_v41 = vsel %vm677_vm1, %v3219_v38, %v2957_v47  ;;  %v3221_v34 = vrot.slane %v2957_v47, 4  ;;  %v3425_v47 = vrot.slane %v5811_v56, 4 }
 0x3d0   : > { %v3226_v48 = vperm.slane %v3220_v41, %v4511_v55 }
 0x3d1   : > { %v3222_v37 = vsel %vm677_vm1, %v5741_v0, %v3221_v34  ;;  %v3423_v34 = vrot.slane %v5781_v52, 4 }
 0x3d2   : > { %v3230_v6 = vperm.slane %v3222_v37, %v4511_v55  ;;  %v3231_v51 = vrot.slane %v3226_v48, 4  ;;  %v3234_v23 = vsel %vm677_vm1, %v3226_v48, %v3233_v45 }
 0x3d3   : > { %v3242_v42 = vperm.slane %v3234_v23, %v4533_v18 }
 0x3d4   : > { %v3232_v49 = vsel %vm677_vm1, %v3231_v51, %v3214_v25  ;;  %v3243_v22 = vrot.slane %v3230_v6, 4  ;;  %v3246_v9 = vsel %vm677_vm1, %v3230_v6, %v3245_v50 }
 0x3d5   : > { %v3238_v61 = vperm.slane %v3232_v49, %v4533_v18  ;;  %v3254_v58 = vperm.slane %v3246_v9, %v4533_v18  ;;  %v3257_v0 = vrot.slane %v3242_v42, 4 }
 0x3d6   : > { %v3244_v62 = vsel %vm677_vm1, %v3243_v22, %v3218_v24  ;;  %v2959_v8 = vpop.f32.mrf.mxu3 }
 0x3d7   : > { %v3250_v31 = vperm.slane %v3244_v62, %v4533_v18  ;;  %v3255_v32 = vrot.slane %v3238_v61, 4  ;;  %v3258_v27 = vsel %vm677_vm1, 0.0, %v3257_v0  ;;  %v3261_v36 = vrot.slane %v3254_v58, 4  ;;  %v3014_v13 = vpop.f32.mrf.mxu2 }
 0x3d8   : > { %v3429_v7 = vsel %vm677_vm1, %v3257_v0, %v3238_v61  ;;  %v3434_v11 = vrot.slane %v3258_v27, 4  ;;  %v3264_v14 = vsel %vm677_vm1, %v3263_v10, %v3014_v13  ;;  %v3265_v39 = vrot.slane %v3014_v13, 4  ;;  %v3071_v46 = vpop.f32.mrf.mxu1 }
 0x3d9   : > { %v3256_v17 = vsel %vm677_vm1, 0.0, %v3255_v32  ;;  %v3259_v29 = vrot.slane %v3250_v31, 4  ;;  %v3262_v5 = vsel %vm677_vm1, 0.0, %v3261_v36  ;;  %v3433_v43 = vperm.slane %v3429_v7, %v4511_v55 }
 0x3da   : > { %v3435_v26 = vsel %vm677_vm1, %v3434_v11, %v3256_v17  ;;  %v3440_v59 = vsel %vm677_vm1, %v3261_v36, %v3250_v31  ;;  %v3445_v3 = vrot.slane %v3262_v5, 4  ;;  %v3266_v21 = vsel %vm677_vm1, %v5747_v54, %v3265_v39 }
 0x3db   : > { %v3260_v28 = vsel %vm677_vm1, 0.0, %v3259_v29  ;;  %v3444_v4 = vperm.slane %v3440_v59, %v4511_v55  ;;  %v3270_v30 = vperm.slane %v3264_v14, %v4511_v55  ;;  %v3439_v57 = vperm.slane %v3435_v26, %v4511_v55 }
 0x3dc   : > { %v3446_v44 = vsel %vm677_vm1, %v3445_v3, %v3260_v28  ;;  %v3453_v12 = vrot.slane %v3433_v43, 4  ;;  %v3274_v53 = vperm.slane %v3266_v21, %v4511_v55  ;;  %v3275_v25 = vrot.slane %v3071_v46, 4 }
 0x3dd   : > { %v3450_v38 = vperm.slane %v3446_v44, %v4511_v55  ;;  %v3465_v54 = vrot.slane %v3444_v4, 4  ;;  %v3451_v1 = vrot.slane %v3439_v57, 4  ;;  %v3289_v45 = vrot.slane %v3270_v30, 4 }
 0x3de   : > { %v3033_v24 = vpop.f32.mrf.mxu3  ;;  %v3454_v41 = vsel %vm677_vm1, %v3439_v57, %v3453_v12  ;;  %v3301_v2 = vrot.slane %v3274_v53, 4  ;;  %v3426_v8 = vsel %vm677_vm1, %v3425_v47, %v5828_v63  ;;  %v3424_v44 = vsel %vm677_vm1, %v5776_v35, %v3423_v34 }
 0x3df   : > { %v3016_v48 = vpop.f32.mrf.mxu2  ;;  %v3276_v50 = vsel %vm677_vm1, %v3275_v25, %v3033_v24  ;;  %v3277_v37 = vrot.slane %v3033_v24, 4  ;;  %v3466_v6 = vsel %vm677_vm1, %v3450_v38, %v3465_v54  ;;  %v3452_v40 = vsel %vm677_vm1, %v3451_v1, %v3433_v43 }
 0x3e0   : > { %v3282_v51 = vperm.slane %v3276_v50, %v4511_v55  ;;  %v3474_v23 = vperm.slane %v3466_v6, %v4533_v18  ;;  %v3463_v42 = vrot.slane %v3450_v38, 4  ;;  %v3073_v22 = vpop.f32.mrf.mxu1  ;;  %v3462_v52 = vperm.slane %v3454_v41, %v4533_v18 }
 0x3e1   : > { %v3278_v49 = vsel %vm677_vm1, %v3071_v46, %v3277_v37  ;;  %v3458_v9 = vperm.slane %v3452_v40, %v4533_v18  ;;  %v3427_v34 = vrot.slane %v5828_v63, 4 }
 0x3e2   : > { %v3286_v61 = vperm.slane %v3278_v49, %v4511_v55  ;;  %v3287_v58 = vrot.slane %v3282_v51, 4  ;;  %v3290_v0 = vsel %vm677_vm1, %v3282_v51, %v3289_v45  ;;  %v3479_v10 = vrot.slane %v3474_v23, 4 }
 0x3e3   : > { %v3298_v62 = vperm.slane %v3290_v0, %v4533_v18  ;;  %v3464_v33 = vsel %vm677_vm1, %v3463_v42, %v3444_v4  ;;  %v3477_v31 = vrot.slane %v3458_v9, 4  ;;  %v3481_v54 = vrot.slane %v3462_v52, 4 }
 0x3e4   : > { %v3288_v32 = vsel %vm677_vm1, %v3287_v58, %v3270_v30  ;;  %v3299_v27 = vrot.slane %v3286_v61, 4  ;;  %v3302_v36 = vsel %vm677_vm1, %v3286_v61, %v3301_v2  ;;  %v3480_v13 = vsel %vm677_vm1, %v3479_v10, %v3462_v52 }
 0x3e5   : > { %v3294_v7 = vperm.slane %v3288_v32, %v4533_v18  ;;  %v3310_v11 = vperm.slane %v3302_v36, %v4533_v18  ;;  %v3313_v14 = vrot.slane %v3298_v62, 4  ;;  %v4073_v39 = vpack.i.bf16 %v3480_v13, %v3426_v8 }
 0x3e6   : > { %v3300_v17 = vsel %vm677_vm1, %v3299_v27, %v3274_v53  ;;  %v3035_v29 = vpop.f32.mrf.mxu3  ;;  %v3470_v5 = vperm.slane %v3464_v33, %v4533_v18  ;;  %v3482_v37 = vsel %vm677_vm1, %v3474_v23, %v3481_v54  ;;  %v3428_v40 = vsel %vm677_vm1, %v5811_v56, %v3427_v34 }
 0x3e7   : > { %v3306_v43 = vperm.slane %v3300_v17, %v4533_v18  ;;  %v3311_v46 = vrot.slane %v3294_v7, 4  ;;  %v3314_v26 = vsel %vm677_vm1, 0.0, %v3313_v14  ;;  %v3317_v59 = vrot.slane %v3310_v11, 4  ;;  %4074 = vrot.lane.b32.xlu2 %v4073_v39, %s4242_s12 }
 0x3e8   : > { %v3488_v3 = vrot.slane %v3314_v26, 4  ;;  %v3475_v21 = vrot.slane %v3470_v5, 4  ;;  %v3478_v28 = vsel %vm677_vm1, %v3470_v5, %v3477_v31  ;;  %v3483_v47 = vsel %vm677_vm1, %v3313_v14, %v3294_v7 }
 0x3e9   : > { %v3312_v4 = vsel %vm677_vm1, 0.0, %v3311_v46  ;;  %v3315_v30 = vrot.slane %v3306_v43, 4  ;;  %v3318_v57 = vsel %vm677_vm1, 0.0, %v3317_v59  ;;  %v4068_v25 = vpack.i.bf16 %v3478_v28, %v3424_v44 }
 0x3ea   : > { %v3489_v12 = vsel %vm677_vm1, %v3488_v3, %v3312_v4  ;;  %v3499_v53 = vrot.slane %v3318_v57, 4  ;;  %v3494_v41 = vsel %vm677_vm1, %v3317_v59, %v3306_v43  ;;  %v5876_v35 = vsel %vm677_vm1, %v3475_v21, %v3458_v9 }
 0x3eb   : > { %v5868_v38 = vperm.slane %v3489_v12, %v4511_v55  ;;  %v3316_v24 = vsel %vm677_vm1, 0.0, %v3315_v30  ;;  %4069 = vrot.lane.b32.xlu1 %v4068_v25, %s4243_s22  ;;  %v3487_v50 = vperm.slane %v3483_v47, %v4511_v55  ;;  %v5886_v6 = vperm.slane %v3494_v41, %v4511_v55 }
 0x3ec   : > { %v3500_v1 = vsel %vm677_vm1, %v3499_v53, %v3316_v24  ;;  %v4078_v49 = vpack.i.bf16 %v3482_v37, %v3428_v40 }
 0x3ed   : > { %v5880_v45 = vperm.slane %v3500_v1, %v4511_v55  ;;  %v3505_v48 = vrot.slane %v5868_v38, 4  ;;  %v3507_v30 = vrot.slane %v3487_v50, 4  ;;  %v3519_v40 = vrot.slane %v5886_v6, 4 }
 0x3ef   : > { %v3517_v51 = vrot.slane %v5880_v45, 4  ;;  %v3506_v42 = vsel %vm677_vm1, %v3505_v48, %v3487_v50  ;;  %v3508_v48 = vsel %vm677_vm1, %v5868_v38, %v3507_v30  ;;  %v3985_v30 = vld [vmem:[%s6034_s9] sm:$0xff] }
 0x3f0   : > { %v5899_v23 = vperm.slane %v3506_v42, %v4533_v18  ;;  %v3516_v38 = vperm.slane %v3508_v48, %v4533_v18 }
 0x3f1   : > { %v3518_v63 = vsel %vm677_vm1, %v3517_v51, %v5886_v6  ;;  %v3147_v22 = vpop.f32.mrf.mxu1 }
 0x3f2   : > { %v3090_v2 = vpop.f32.mrf.mxu2  ;;  %v5895_v52 = vperm.slane %v3518_v63, %v4533_v18  ;;  %v3331_v8 = vrot.slane %v3147_v22, 4 }
 0x3f3   : > { %4079 = vrot.lane.b32.xlu1 %v4078_v49, %s4244_s30  ;;  %v3321_v27 = vrot.slane %v3090_v2, 4 }
 0x3f4   : > { %v3529_v9 = vrot.slane %v5895_v52, 4  ;;  %v3109_v56 = vpop.f32.mrf.mxu3 }
 0x3f5   : > { %v3333_v62 = vrot.slane %v3109_v56, 4  ;;  %v3332_v31 = vsel %vm677_vm1, %v3331_v8, %v3109_v56 }
 0x3f6   : > { %v5904_v61 = vsel %vm677_vm1, %v3529_v9, %v5899_v23  ;;  %v3338_v36 = vperm.slane %v3332_v31, %v4511_v55 }
 0x3f7   : > { %v3334_v33 = vsel %vm677_vm1, %v3147_v22, %v3333_v62 }
 0x3f8   : > { %v3342_v32 = vperm.slane %v3334_v33, %v4511_v55  ;;  %v3343_v29 = vrot.slane %v3338_v36, 4 }
 0x3f9   : > { %v3149_v0 = vpop.f32.mrf.mxu1 }
 0x3fa   : > { %v3092_v58 = vpop.f32.mrf.mxu2  ;;  %v3355_v14 = vrot.slane %v3342_v32, 4  ;;  %v3520_v0 = vsel %vm677_vm1, %v5880_v45, %v3519_v40 }
 0x3fc   : > { %v3111_v10 = vpop.f32.mrf.mxu3 }
 0x40e   : > { %v3128_v13 = vpop.f32.mrf.mxu0 }
 0x40f   : > { %v3319_v7 = vrot.slane %v3128_v13, 4  ;;  %v3322_v11 = vsel %vm677_vm1, %v3128_v13, %v3321_v27  ;;  %v3535_v27 = vrot.slane %v3516_v38, 4 }
 0x410   : > { %v3330_v39 = vperm.slane %v3322_v11, %v4511_v55 }
 0x411   : > { %v3320_v17 = vsel %vm677_vm1, %v3319_v7, %v3090_v2  ;;  %v3531_v7 = vrot.slane %v5899_v23, 4 }
 0x412   : > { %v3326_v5 = vperm.slane %v3320_v17, %v4511_v55  ;;  %v3356_v43 = vsel %vm677_vm1, %v3355_v14, %v3330_v39  ;;  %v3357_v46 = vrot.slane %v3330_v39, 4 }
 0x413   : > { %v3362_v26 = vperm.slane %v3356_v43, %v4533_v18 }
 0x414   : > { %v3344_v59 = vsel %vm677_vm1, %v3343_v29, %v3326_v5  ;;  %v3345_v3 = vrot.slane %v3326_v5, 4  ;;  %v3358_v21 = vsel %vm677_vm1, %v3342_v32, %v3357_v46  ;;  %v3528_v32 = vperm.slane %v3520_v0, %v4533_v18 }
 0x415   : > { %v3350_v28 = vperm.slane %v3344_v59, %v4533_v18  ;;  %v3366_v4 = vperm.slane %v3358_v21, %v4533_v18  ;;  %v3371_v53 = vrot.slane %v3362_v26, 4 }
 0x416   : > { %v3346_v57 = vsel %vm677_vm1, %v3338_v36, %v3345_v3  ;;  %v3130_v44 = vpop.f32.mrf.mxu0  ;;  %v3536_v17 = vsel %vm677_vm1, %v3528_v32, %v3535_v27 }
 0x417   : > { %v3354_v12 = vperm.slane %v3346_v57, %v4533_v18  ;;  %v3373_v25 = vrot.slane %v3366_v4, 4  ;;  %v3367_v54 = vrot.slane %v3350_v28, 4  ;;  %v3372_v37 = vsel %vm677_vm1, 0.0, %v3371_v53 }
 0x419   : > { %v3369_v24 = vrot.slane %v3354_v12, 4  ;;  %v3374_v47 = vsel %vm677_vm1, 0.0, %v3373_v25  ;;  %v3548_v41 = vsel %vm677_vm1, %v3373_v25, %v3362_v26  ;;  %v3368_v49 = vsel %vm677_vm1, 0.0, %v3367_v54 }
 0x41a   : > { %v3552_v1 = vperm.slane %v3548_v41, %v4511_v55  ;;  %v3553_v34 = vrot.slane %v3374_v47, 4  ;;  %v3532_v26 = vsel %vm677_vm1, %v5895_v52, %v3531_v7  ;;  %v3986_v52 = vld [vmem:[%s6034_s9 + $0x8] sm:$0xff] }
 0x41b   : > { %v3370_v50 = vsel %vm677_vm1, 0.0, %v3369_v24  ;;  %v3537_v51 = vsel %vm677_vm1, %v3369_v24, %v3350_v28  ;;  %3687 = vmatpush.bf16.msra.mxu2 %v3986_v52 }
 0x41c   : > { %v3541_v42 = vperm.slane %v3537_v51, %v4511_v55  ;;  %v3542_v63 = vrot.slane %v3370_v50, 4  ;;  %v3554_v2 = vsel %vm677_vm1, %v3553_v34, %v3372_v37  ;;  %v3573_v9 = vrot.slane %v3552_v1, 4 }
 0x41d   : > { %v3558_v22 = vperm.slane %v3554_v2, %v4511_v55 }
 0x41e   : > { %v3543_v56 = vsel %vm677_vm1, %v3542_v63, %v3368_v49  ;;  %v3561_v58 = vrot.slane %v3541_v42, 4 }
 0x41f   : > { %v3547_v6 = vperm.slane %v3543_v56, %v4511_v55  ;;  %v3571_v10 = vrot.slane %v3558_v22, 4  ;;  %v3574_v8 = vsel %vm677_vm1, %v3558_v22, %v3573_v9  ;;  %3688 = vmatpush.bf16.msra.mxu2 %v3985_v30 }
 0x420   : > { %v3582_v55 = vperm.slane %v3574_v8, %v4533_v18 }
 0x421   : > { %v3562_v62 = vsel %vm677_vm1, %v3547_v6, %v3561_v58  ;;  %v3559_v33 = vrot.slane %v3547_v6, 4  ;;  %v3572_v31 = vsel %vm677_vm1, %v3571_v10, %v3552_v1 }
 0x422   : > { %v3570_v36 = vperm.slane %v3562_v62, %v4533_v18  ;;  %v3578_v13 = vperm.slane %v3572_v31, %v4533_v18  ;;  %v3587_v3 = vrot.slane %v3582_v55, 4 }
 0x423   : > { %v3560_v45 = vsel %vm677_vm1, %v3559_v33, %v3541_v42 }
 0x424   : > { %v3589_v11 = vrot.slane %v3570_v36, 4  ;;  %v3566_v14 = vperm.slane %v3560_v45, %v4533_v18  ;;  %v3583_v39 = vrot.slane %v3578_v13, 4  ;;  %v3533_v18 = vrot.slane %v3528_v32, 4 }
 0x425   : > { %v3588_v21 = vsel %vm677_vm1, %v3587_v3, %v3570_v36 }
 0x426   : > { %v3590_v29 = vsel %vm677_vm1, %v3582_v55, %v3589_v11  ;;  %v3585_v5 = vrot.slane %v3566_v14, 4  ;;  %v3584_v43 = vsel %vm677_vm1, %v3583_v39, %v3566_v14  ;;  %v3534_v28 = vsel %vm677_vm1, %v3533_v18, %v3516_v38 }
 0x427   : > { %v4093_v46 = vpack.i.bf16 %v3590_v29, %v3536_v17  ;;  %v4088_v4 = vpack.i.bf16 %v3588_v21, %v3534_v28 }
 0x428   : > { %v3586_v23 = vsel %vm677_vm1, %v3578_v13, %v3585_v5  ;;  %vm3643_vm1 = vcmask 130048  }
 0x429   : > { %4094 = vrot.lane.b32.xlu2 %v4093_v46, %s4244_s30  ;;  %v4083_v59 = vpack.i.bf16 %v3586_v23, %v3532_v26 }
 0x42b   : > { %4084 = vrot.lane.b32.xlu1 %v4083_v59, %s4243_s22  ;;  %s6065_s22 = sld [smem:[#allocation8_spill]] }
 0x431   : > { %s482_s30 = scalar_lea.vmem %s6065_s22, %s3901_s27 }
 0x433   : > { %4089 = vrot.lane.b32.xlu1 %v4088_v4, %s4242_s12 }
 0x441   : > { %v4075_v53 = vpop.permute.xlu2 %4074 }
 0x442   : > { %v4077_v24 = vunpack.i.h.bf16 %v4075_v53  ;;  %v4076_v47 = vunpack.i.l.bf16 %v4075_v53 }
 0x45d   : > { %v4070_v57 = vpop.permute.xlu1 %4069 }
 0x45e   : > { %v4072_v44 = vunpack.i.h.bf16 %v4070_v57  ;;  %v4071_v12 = vunpack.i.l.bf16 %v4070_v57 }
 0x460   : > { %v3639_v25 = vsel %vm2109_vm2, %v5788_v60, %v4071_v12  ;;  %v3640_v54 = vsel %vm2109_vm2, %v5876_v35, %v4072_v44 }
 0x461   : > { %v3644_v48 = vsel %vm3643_vm1, %v3639_v25, %v4076_v47  ;;  %v3645_v50 = vsel %vm3643_vm1, %v3640_v54, %v4077_v24 }
 0x465   : > { %v4080_v41 = vpop.permute.xlu1 %4079 }
 0x466   : > { %v4082_v1 = vunpack.i.h.bf16 %v4080_v41  ;;  %v4081_v34 = vunpack.i.l.bf16 %v4080_v41 }
 0x468   : > { %v3649_v37 = vsel %vm3648_vm7, %v3644_v48, %v4081_v34  ;;  %v3650_v51 = vsel %vm3648_vm7, %v3645_v50, %v4082_v1 }
 0x469   : > { %v3653_v40 = vpack.c.bf16 %v3650_v51, %v3649_v37 }
 0x46b   : > { %3974 = vmatmul.msk.bf16.vlgmr.msra.gmra.mxu2 %vm532_vm0, %v3653_v40 }
 0x483   : > { %v4095_v63 = vpop.permute.xlu2 %4094 }
 0x484   : > { %v4097_v9 = vunpack.i.h.bf16 %v4095_v63  ;;  %v4096_v38 = vunpack.i.l.bf16 %v4095_v63 }
 0x49d   : > { %v4085_v60 = vpop.permute.xlu1 %4084 }
 0x49e   : > { %v4087_v35 = vunpack.i.h.bf16 %v4085_v60  ;;  %v4086_v42 = vunpack.i.l.bf16 %v4085_v60 }
 0x4a0   : > { %v3641_v56 = vsel %vm2109_vm2, %v5904_v61, %v4086_v42  ;;  %v3642_v58 = vsel %vm2109_vm2, %v3584_v43, %v4087_v35  ;;  %v4103_v61 = vld [vmem:[%s6035_s10] ss:$0 sm:$0xff]  ;;  %vm3738_vm2 = vcmask 1040384  }
 0x4a5   : > { %v4090_v2 = vpop.permute.xlu1 %4089 }
 0x4a6   : > { %v4092_v49 = vunpack.i.h.bf16 %v4090_v2  ;;  %v4091_v22 = vunpack.i.l.bf16 %v4090_v2 }
 0x4a8   : > { %v3646_v0 = vsel %vm3643_vm1, %v3641_v56, %v4091_v22  ;;  %v3647_v6 = vsel %vm3643_vm1, %v3642_v58, %v4092_v49 }
 0x4a9   : > { %v3651_v10 = vsel %vm3648_vm7, %v3646_v0, %v4096_v38  ;;  %v3652_v62 = vsel %vm3648_vm7, %v3647_v6, %v4097_v9 }
 0x4aa   : > { %v3654_v8 = vpack.c.bf16 %v3652_v62, %v3651_v10 }
 0x4ac   : > { %3975 = vmatmul.msk.bf16.gmra.mxu2 %vm532_vm0, %v3654_v8 }
 0x4ee   : > { %v3690_v33 = vpop.f32.mrf.mxu2 }
 0x4ef   : > { %v3691_v31 = vadd.f32 %v4103_v61, %v3690_v33 }
 0x4f1   : > { %v3700_v32 = vadd.f32 %v3691_v31, %v4410_v15 }
 0x4f3   : > { %3704 = vst.msk [vmem:[%s477_s20] sm:$0xff] %vm532_vm0, %v3700_v32  ;;  %v3721_v14 = vmul.f32 %v3700_v32, %v3700_v32  ;;  %v3708_v29 = vsel %vm532_vm0, %v3700_v32, 0.0 }
 0x4f5   : > { %v3725_v26 = vsel %vm532_vm0, %v3721_v14, 0.0 }
 0x4f6   : > { %v3692_v27 = vpop.f32.mrf.mxu2 }
 0x4f7   : > { %v3693_v36 = vadd.f32 %v4103_v61, %v3692_v27 }
 0x4f9   : > { %v3701_v13 = vadd.f32 %v3693_v36, %v4412_v16 }
 0x4fb   : > { %3705 = vst.msk [vmem:[%s477_s20 + $0x8] sm:$0xff] %vm532_vm0, %v3701_v13  ;;  %v3722_v11 = vmul.f32 %v3701_v13, %v3701_v13  ;;  %v3709_v39 = vsel %vm532_vm0, %v3701_v13, 0.0 }
 0x4fc   : > { %v3710_v46 = vadd.f32 %v3709_v39, %v3708_v29 }
 0x4fd   : > { %v3726_v5 = vsel %vm532_vm0, %v3722_v11, 0.0 }
 0x4fe   : > { %v3727_v59 = vadd.f32 %v3726_v5, %v3725_v26 }
 0x52f   : > { %v3695_v7 = vpop.f32.mrf.mxu2 }
 0x530   : > { %v3696_v45 = vadd.f32 %v4103_v61, %v3695_v7 }
 0x532   : > { %v3702_v55 = vadd.f32 %v3696_v45, %v4419_v19 }
 0x534   : > { %3706 = vst.msk [vmem:[%s477_s20 + $0x10] sm:$0xff] %vm532_vm0, %v3702_v55  ;;  %v3723_v17 = vmul.f32 %v3702_v55, %v3702_v55  ;;  %v3711_v16 = vsel %vm532_vm0, %v3702_v55, 0.0 }
 0x535   : > { %v3712_v3 = vadd.f32 %v3711_v16, %v3710_v46 }
 0x536   : > { %v3728_v19 = vsel %vm532_vm0, %v3723_v17, 0.0 }
 0x537   : > { %v3697_v15 = vpop.f32.mrf.mxu2  ;;  %v3729_v28 = vadd.f32 %v3728_v19, %v3727_v59 }
 0x538   : > { %v3698_v43 = vadd.f32 %v4103_v61, %v3697_v15 }
 0x53a   : > { %v3703_v23 = vadd.f32 %v3698_v43, %v4421_v20 }
 0x53c   : > { %3707 = vst.msk [vmem:[%s477_s20 + $0x18] sm:$0xff] %vm532_vm0, %v3703_v23  ;;  %v3713_v18 = vsel %vm532_vm0, %v3703_v23, 0.0  ;;  %v3724_v21 = vmul.f32 %v3703_v23, %v3703_v23 }
 0x53d   : > { %v3714_v4 = vadd.f32 %v3713_v18, %v3712_v3 }
 0x53e   : > { %v3730_v52 = vsel %vm532_vm0, %v3724_v21, 0.0  ;;  %vm3740_vm0 = vcmask 254976  }
 0x53f   : > { %v3715_v30 = vrot.slane %v3714_v4, 4  ;;  %v3731_v57 = vadd.f32 %v3730_v52, %v3729_v28 }
 0x541   : > { %v3716_v44 = vadd.f32 %v3715_v30, %v3714_v4  ;;  %v3732_v12 = vrot.slane %v3731_v57, 4 }
 0x543   : > { %v3717_v53 = vrot.slane %v3716_v44, 2  ;;  %v3733_v25 = vadd.f32 %v3732_v12, %v3731_v57 }
 0x545   : > { %v3718_v20 = vadd.f32 %v3717_v53, %v3716_v44  ;;  %v3734_v54 = vrot.slane %v3733_v25, 2 }
 0x547   : > { %v3719_v24 = vrot.slane %v3718_v20, 1  ;;  %v3735_v47 = vadd.f32 %v3734_v54, %v3733_v25 }
 0x549   : > { %v3736_v41 = vrot.slane %v3735_v47, 1  ;;  %v3720_v1 = vadd.f32 %v3719_v24, %v3718_v20 }
 0x54b   : > { %v3737_v34 = vadd.f32 %v3736_v41, %v3735_v47 }
 0x54d   : > { %v3739_v48 = vsel %vm3738_vm2, %v3720_v1, %v3737_v34 }
 0x54e   : > { %3741 = vst.msk [vmem:[%s482_s30] sm:$0x3] %vm3740_vm0, %v3739_v48 }
 0x54f PF: > { %s6066_s28 = sld [smem:[#allocation6_spill]]  ;;  %s6069_s25 = smov %s4225_s26 }
 0x550   : > { %s6067_s16 = sld [smem:[#allocation5_spill]] }
 0x551   : > { %s6068_s27 = sld [smem:[#allocation7_spill]] }
 0x555   : > { %p24_p9 = scmp.ge.s32.totalorder %s6066_s28, 4  }
 0x556   : > { %s6070_s26 = smov %s6067_s16 }
 0x557   :  { %26 = sbr.rel (!%p24_p9) target bundleno = 5 (0x5), region = 128 }
 0x55c   :  { %3811 = vsyncpa [#allocation3], 1 }
 0x55d   :  { %3813 = vsyncpa [#allocation3 + $0x1], 1 }

// kernel: gatei_encoder_forward.7
= control target key start
LH: loop header
LB: loop body
LE: loop exit
PB: predicated region body
PF: predicated region fallthrough
CT: control target
= control target key end

     0   :  { %s6101_s0 = inlined_call_operand.vmem [shape: f32[32,8,8], index: 0, kind: input, shape index: {}]   ;;  %s6102_s1 = inlined_call_operand.vmem [shape: f32[8,8,32], index: 1, kind: input, shape index: {}]   ;;  %s6103_s2 = inlined_call_operand.vmem [shape: f32[1,32], index: 2, kind: input, shape index: {}]   ;;  %s6104_s3 = inlined_call_operand.vmem [shape: f32[1,32], index: 3, kind: input, shape index: {}]   ;;  %s6105_s4 = inlined_call_operand.vmem [shape: bf16[32,32], index: 4, kind: input, shape index: {}]   ;;  %s6106_s5 = inlined_call_operand.vmem [shape: bf16[32,32], index: 5, kind: input, shape index: {}]   ;;  %s6107_s6 = inlined_call_operand.vmem [shape: bf16[32,32], index: 6, kind: input, shape index: {}]   ;;  %s6108_s7 = inlined_call_operand.vmem [shape: f32[1,32], index: 7, kind: input, shape index: {}]   ;;  %s6109_s8 = inlined_call_operand.vmem [shape: f32[1,32], index: 8, kind: input, shape index: {}]   ;;  %s6110_s9 = inlined_call_operand.vmem [shape: f32[1,32], index: 9, kind: input, shape index: {}]   ;;  %s6111_s10 = inlined_call_operand.vmem [shape: bf16[32,32], index: 10, kind: input, shape index: {}]   ;;  %s6112_s11 = inlined_call_operand.vmem [shape: f32[1,32], index: 11, kind: input, shape index: {}]   ;;  %s6113_s12 = inlined_call_operand.vmem [shape: f32[8,8,32], index: 12, kind: output, shape index: {0}]   ;;  %s6114_s13 = inlined_call_operand.vmem [shape: f32[2,2,32], index: 13, kind: output, shape index: {1}]   ;;  %s6115_s14 = inlined_call_operand.hbm [shape: f32[32,8,8], index: 14, kind: output, shape index: {2}]  }
   0x1   :  { %6121 = sst [smem:[#allocation8_spill]] %s6101_s0 }
   0x2   :  { %6122 = sst [smem:[#allocation9_spill]] %s6102_s1 }
   0x3   :  { %6123 = sst [smem:[#allocation10_spill]] %s6103_s2 }
   0x4   :  { %6124 = sst [smem:[#allocation11_spill]] %s6104_s3 }
   0x5   :  { %6125 = sst [smem:[#allocation12_spill]] %s6105_s4 }
   0x6   :  { %6126 = sst [smem:[#allocation13_spill]] %s6106_s5 }
   0x7   :  { %20 = vsyncpa [#allocation3], 0 }
   0x8   :  { %22 = vsyncpa [#allocation3 + $0x1], 0  ;;  %s4398_s29 = smov 0   ;;  %s4400_s30 = smov 0  }
   0x9   :  { %s4402_s15 = smov 0   ;;  %s4404_s16 = smov 0  }
   0xa LB: > { %6127 = sst [smem:[#allocation5_spill]] %s4308_s15  ;;  %s4419_s17 = sadd.s32 4294967295, %s4312_s16   ;;  %s4312_s16 = sphi %s4404_s16, %s6151_s16   ;;  %s4308_s15 = sphi %s4402_s15, %s6153_s15   ;;  %s4304_s30 = sphi %s4400_s30, %s6155_s30   ;;  %s4300_s29 = sphi %s4398_s29, %s6154_s29  }
   0xb   : > { %s3971_s18 = sadd.s32 4294967294, %s4312_s16   ;;  %s4423_s19 = sadd.s32 1, %s4312_s16  }
   0xc   : > { %6128 = sst [smem:[#allocation6_spill]] %s4423_s19  ;;  %s349_s20 = sadd.s32 1, %s4308_s15 }
   0xd   : > { %s346_s21 = ssub.s32 %s4312_s16, %s4423_s19  ;;  %p359_p0 = scmp.ne.s32.totalorder %s4308_s15, %s4304_s30 }
   0xe   : > { %p347_p1 = scmp.eq.s32.totalorder %s346_s21, 0  ;;  %p360_p2 = scmp.eq.s32.totalorder %s4419_s17, 1 }
   0xf   : > { %p365_p3 = scmp.ne.s32.totalorder %s4304_s30, %s4300_s29  ;;  %p366_p4 = scmp.eq.s32.totalorder %s3971_s18, 1 }
  0x10   : > { %s4434_s22 = scalar_select %p347_p1, %s4308_s15, %s349_s20  }
  0x11   : > { %p4436_p5 = por %p360_p2, %p359_p0  ;;  %p4440_p6 = por %p366_p4, %p365_p3 }
  0x12   : > { %6129 = sst [smem:[#allocation7_spill]] %s4434_s22  ;;  %p3974_p7 = scmp.ge.s32.totalorder %s4312_s16, 1 }
  0x13   : > { %p432_p8 = scmp.lt.s32.totalorder %s4312_s16, 3 }
  0x15   : > { %p433_p9 = pnand %p3974_p7, %p432_p8 }
  0x16   : > { %s6132_s4 = sld [smem:[#allocation12_spill]] (!%p433_p9)  ;;  %s3978_s18 = sshll.u32 (!%p433_p9), %s4419_s17, 2 }
  0x17   : > { %436 = sbr.rel (%p433_p9) target bundleno = 1349 (0x545), region = 68  ;;  %s6133_s5 = sld [smem:[#allocation13_spill]] (!%p433_p9) }
  0x18   : > { %p499_p10 = scmp.lt.s32.totalorder (!%p433_p9), %s3978_s18, 7  ;;  %s6134_s2 = sld [smem:[#allocation10_spill]] (!%p433_p9) }
  0x19   : > { %s6135_s1 = sld [smem:[#allocation9_spill]] (!%p433_p9)  ;;  %s4314_s20 = smov (!%p433_p9), 104  }
  0x1a   : > { %s6136_s3 = sld [smem:[#allocation11_spill]] (!%p433_p9)  ;;  %s4315_s19 = smov (!%p433_p9), 120  }
  0x1b   : > { %s4316_s22 = smov (!%p433_p9), 112   ;;  %s6142_s0 = sld [smem:[#allocation8_spill]] (!%p433_p9) }
  0x1c   : > { %v4061_v0 = vld [vmem:[%s6132_s4 + $0x8] sm:$0xff]  ;;  %v4060_v2 = vld [vmem:[%s6132_s4] sm:$0xff]  ;;  %s6157_s18 = smov (!%p499_p10, %s3978_s18), 7  ;;  %vm558_vm0 = vcmask 261120   ;;  %v4317_v51 = vmov 1983009808  }
  0x1d   : > { %v4063_v1 = vld [vmem:[%s6133_s5 + $0x8] sm:$0xff]  ;;  %571 = vmatpush.bf16.msra.mxu0 %v4061_v0  ;;  %v4062_v3 = vld [vmem:[%s6133_s5] sm:$0xff]  ;;  %s6119_s15 = sshll.u32 %s6157_s18, 3  ;;  %v708_v52 = vunpack.c.l.s4 %v4317_v51  ;;  %vm703_vm1 = vcmask 1047556   ;;  %vm2135_vm2 = vcmask 64512   ;;  %vm2907_vm3 = vcmask 1043456  }
  0x1e   : > { %610 = vmatpush.bf16.msra.mxu1 %v4063_v1  ;;  %v4065_v4 = vld [vmem:[%s6107_s6 + $0x8] sm:$0xff]  ;;  %v4179_v5 = vld [vmem:[%s6134_s2] ss:$0 sm:$0xff]  ;;  %v4318_v1 = vmov 1934713408   ;;  %s3976_s4 = sshll.u32 %s4419_s17, 4 }
  0x1f   : > { %v4064_v6 = vld [vmem:[%s6107_s6] sm:$0xff]  ;;  %649 = vmatpush.bf16.msra.mxu2 %v4065_v4  ;;  %4069 = vmatpush.bf16.msra.mxu3 %v4065_v4  ;;  %s502_s21 = scalar_lea.vmem %s6135_s1, %s6119_s15  ;;  %v4577_v55 = vunpack.c.0.s8 %v708_v52  ;;  %p5306_p11 = scmp.lt.s32.totalorder %s3976_s4, 31 }
  0x20   : > { %v4180_v7 = vld [vmem:[%s6136_s3] ss:$0 sm:$0xff]  ;;  %v517_v9 = vld [vmem:[%s502_s21 + $0x8] sm:$0xff]  ;;  %v518_v10 = vld [vmem:[%s502_s21 + $0x10] sm:$0xff]  ;;  %s6120_s28 = smov 8  }
  0x21   : > { %572 = vmatpush.bf16.msra.mxu0 %v4060_v2  ;;  %v516_v8 = vld [vmem:[%s502_s21] sm:$0xff]  ;;  %v525_v12 = vmul.f32 %v4179_v5, %v517_v9  ;;  %v519_v13 = vld [vmem:[%s502_s21 + $0x18] sm:$0xff]  ;;  %v526_v14 = vmul.f32 %v4179_v5, %v518_v10  ;;  %v732_v2 = vunpack.c.l.s4 %v4318_v1  ;;  %s6159_s4 = smov (!%p5306_p11, %s3976_s4), 31  ;;  %s4321_s21 = smov 24  }
  0x22   : > { %611 = vmatpush.bf16.msra.mxu1 %v4062_v3  ;;  %v524_v11 = vmul.f32 %v4179_v5, %v516_v8  ;;  %v527_v15 = vmul.f32 %v4179_v5, %v519_v13  ;;  %v4181_v22 = vld [vmem:[%s6108_s7] ss:$0 sm:$0xff]  ;;  %s3977_s27 = sshll.u32 %s6159_s4, 3 }
  0x23   : > { %650 = vmatpush.bf16.msra.mxu2 %v4064_v6  ;;  %4070 = vmatpush.bf16.msra.mxu3 %v4064_v6  ;;  %v4481_v17 = vadd.f32 %v4180_v7, %v525_v12  ;;  %v4483_v18 = vadd.f32 %v4180_v7, %v526_v14  ;;  %v4182_v23 = vld [vmem:[%s6109_s8] ss:$0 sm:$0xff]  ;;  %s5329_s25 = scalar_lea.vmem %s6142_s0, %s3977_s27  ;;  %s4319_s27 = smov 16  }
  0x24   : > { %v4479_v16 = vadd.f32 %v4180_v7, %v524_v11  ;;  %v4485_v19 = vadd.f32 %v4180_v7, %v527_v15  ;;  %v4183_v44 = vld [vmem:[%s6110_s9] ss:$0 sm:$0xff] }
  0x26   : > { %v536_v20 = vpack.c.bf16 %v4481_v17, %v4479_v16  ;;  %v537_v21 = vpack.c.bf16 %v4485_v19, %v4483_v18 }
  0x28   : > { %3991 = vmatmul.msk.bf16.vlgmr.msra.gmra.mxu0 %vm558_vm0, %v536_v20  ;;  %4001 = vmatmul.msk.bf16.vlgmr.msra.gmra.mxu1 %vm558_vm0, %v536_v20 }
  0x29   : > { %4011 = vmatmul.msk.bf16.vlgmr.msra.gmra.mxu2 %vm558_vm0, %v536_v20  ;;  %4012 = vmatmul.msk.bf16.vlgmr.msra.gmra.mxu3 %vm558_vm0, %v537_v21  ;;  %v4599_v20 = vunpack.c.0.s8 %v732_v2 }
  0x38   : > { %3992 = vmatmul.msk.bf16.gmra.mxu0 %vm558_vm0, %v537_v21  ;;  %4002 = vmatmul.msk.bf16.gmra.mxu1 %vm558_vm0, %v537_v21 }
  0xa5   : > { %v574_v24 = vpop.f32.mrf.mxu0  ;;  %v613_v25 = vpop.f32.mrf.mxu1 }
  0xa6   : > { %v575_v26 = vadd.f32 %v4181_v22, %v574_v24  ;;  %v4503_v27 = vadd.f32 %v4182_v23, %v613_v25 }
  0xa8   : > { %1171 = vrot.lane.b32.xlu1 %v4503_v27, %s4314_s20  ;;  %1147 = vrot.lane.b32.xlu0 %v4503_v27, %s4315_s19  ;;  %v705_v54 = vrot.slane %v575_v26, 4  ;;  %v1185_v6 = vrot.slane %v4503_v27, 4 }
  0xa9   : > { %678 = vrot.lane.b32.xlu2 %v575_v26, %s4316_s22 }
  0xac   : > { %v652_v42 = vpop.f32.mrf.mxu2 }
  0xad   : > { %v576_v28 = vpop.f32.mrf.mxu0  ;;  %v615_v29 = vpop.f32.mrf.mxu1  ;;  %v4563_v46 = vadd.f32 %v4183_v44, %v652_v42 }
  0xae   : > { %v4514_v30 = vadd.f32 %v4181_v22, %v576_v28  ;;  %v4516_v31 = vadd.f32 %v4182_v23, %v615_v29 }
  0xb0   : > { %1159 = vrot.lane.b32.xlu0 %v4503_v27, %s4316_s22  ;;  %666 = vrot.lane.b32.xlu1 %v575_v26, %s4315_s19  ;;  %v4119_v32 = vpack.i.bf16 %v4514_v30, %v4516_v31  ;;  %v1241_v7 = vrot.slane %v4516_v31, 4  ;;  %v761_v8 = vrot.slane %v4514_v30, 4 }
  0xb1   : > { %690 = vrot.lane.b32.xlu2 %v575_v26, %s4314_s20 }
  0xb4   : > { %v654_v45 = vpop.f32.mrf.mxu2 }
  0xb5   : > { %v579_v33 = vpop.f32.mrf.mxu0  ;;  %v618_v34 = vpop.f32.mrf.mxu1  ;;  %v4565_v47 = vadd.f32 %v4183_v44, %v654_v45 }
  0xb6   : > { %v4525_v35 = vadd.f32 %v4181_v22, %v579_v33  ;;  %v4527_v36 = vadd.f32 %v4182_v23, %v618_v34 }
  0xb7   : > { %v4569_v49 = vpack.i.bf16 %v4565_v47, %v4563_v46 }
  0xb8   : > { %4120 = vrot.lane.b32.xlu0 %v4119_v32, %s4315_s19  ;;  %1161 = vrot.lane.b32.xlu1 %v4516_v31, %s4316_s22  ;;  %v4124_v37 = vpack.i.bf16 %v4525_v35, %v4527_v36  ;;  %v817_v9 = vrot.slane %v4525_v35, 4  ;;  %v1297_v12 = vrot.slane %v4527_v36, 4 }
  0xb9   : > { %1173 = vrot.lane.b32.xlu2 %v4516_v31, %s4314_s20 }
  0xbd   : > { %v620_v38 = vpop.f32.mrf.mxu1  ;;  %v581_v40 = vpop.f32.mrf.mxu0 }
  0xbe   : > { %v4542_v39 = vadd.f32 %v4182_v23, %v620_v38  ;;  %v4550_v41 = vadd.f32 %v4181_v22, %v581_v40 }
  0xc0   : > { %680 = vrot.lane.b32.xlu0 %v4514_v30, %s4316_s22  ;;  %692 = vrot.lane.b32.xlu1 %v4514_v30, %s4314_s20  ;;  %v1353_v10 = vrot.slane %v4542_v39, 4  ;;  %v873_v11 = vrot.slane %v4550_v41, 4 }
  0xc1   : > { %4125 = vrot.lane.b32.xlu2 %v4124_v37, %s4315_s19 }
  0xc8   : > { %1163 = vrot.lane.b32.xlu0 %v4527_v36, %s4316_s22  ;;  %1175 = vrot.lane.b32.xlu1 %v4527_v36, %s4314_s20 }
  0xc9   : > { %682 = vrot.lane.b32.xlu2 %v4525_v35, %s4316_s22 }
  0xd0   : > { %694 = vrot.lane.b32.xlu0 %v4525_v35, %s4314_s20  ;;  %1153 = vrot.lane.b32.xlu1 %v4542_v39, %s4315_s19 }
  0xd1   : > { %1165 = vrot.lane.b32.xlu2 %v4542_v39, %s4316_s22 }
  0xd8   : > { %1177 = vrot.lane.b32.xlu0 %v4542_v39, %s4314_s20  ;;  %672 = vrot.lane.b32.xlu1 %v4550_v41, %s4315_s19 }
  0xd9   : > { %684 = vrot.lane.b32.xlu2 %v4550_v41, %s4316_s22 }
  0xe0   : > { %696 = vrot.lane.b32.xlu0 %v4550_v41, %s4314_s20  ;;  %4135 = vrot.lane.b32.xlu1 %v4569_v49, %s4316_s22 }
  0xe1   : > { %4140 = vrot.lane.b32.xlu2 %v4569_v49, %s4314_s20 }
  0xe8   : > { %4130 = vrot.lane.b32.xlu0 %v4569_v49, %s4315_s19 }
 0x103   : > { %v679_v43 = vpop.permute.xlu2 %678 }
 0x104   : > { %v702_v53 = vrot.slane %v679_v43, 4  ;;  %v706_v56 = vsel %vm703_vm1, %v679_v43, %v705_v54 }
 0x105   : > { %v4584_v63 = vperm.slane %v706_v56, %v4577_v55 }
 0x106   : > { %v704_v59 = vsel %vm703_vm1, %v702_v53, %v575_v26 }
 0x107   : > { %v710_v3 = vperm.slane %v704_v59, %v4577_v55  ;;  %v741_v13 = vrot.slane %v4584_v63, 4 }
 0x109   : > { %v729_v21 = vrot.slane %v710_v3, 4 }
 0x10b   : > { %v691_v48 = vpop.permute.xlu2 %690 }
 0x10c   : > { %v715_v14 = vrot.slane %v691_v48, 4 }
 0x113   : > { %v4575_v50 = vpop.permute.xlu2 %1173 }
 0x114   : > { %v1251_v22 = vrot.slane %v4575_v50, 4 }
 0x11a   : > { %v1172_v57 = vpop.permute.xlu1 %1171  ;;  %v1148_v58 = vpop.permute.xlu0 %1147 }
 0x11b   : > { %v1195_v60 = vrot.slane %v1172_v57, 4  ;;  %v1197_v61 = vrot.slane %v1148_v58, 4  ;;  %v4581_v62 = vpop.permute.xlu2 %4125 }
 0x11c   : > { %v4128_v24 = vunpack.i.h.bf16 %v4581_v62  ;;  %v4127_v44 = vunpack.i.l.bf16 %v4581_v62 }
 0x11d   : > { %v1198_v0 = vsel %vm703_vm1, %v1172_v57, %v1197_v61  ;;  %v1196_v4 = vsel %vm703_vm1, %v1195_v60, %v1148_v58 }
 0x11e   : > { %v1206_v5 = vperm.slane %v1198_v0, %v4577_v55  ;;  %v1202_v15 = vperm.slane %v1196_v4, %v4577_v55  ;;  %v4618_v57 = vrot.slane %v4128_v24, 4 }
 0x120   : > { %v1219_v23 = vrot.slane %v1206_v5, 4  ;;  %v1207_v43 = vrot.slane %v1202_v15, 4 }
 0x122   : > { %v1160_v25 = vpop.permute.xlu0 %1159  ;;  %v667_v26 = vpop.permute.xlu1 %666 }
 0x123   : > { %v1183_v28 = vrot.slane %v1160_v25, 4  ;;  %v1186_v29 = vsel %vm703_vm1, %v1160_v25, %v1185_v6  ;;  %v683_v32 = vpop.permute.xlu2 %682  ;;  %v716_v33 = vsel %vm703_vm1, %v715_v14, %v667_v26  ;;  %v717_v34 = vrot.slane %v667_v26, 4 }
 0x124   : > { %v1194_v37 = vperm.slane %v1186_v29, %v4577_v55  ;;  %v815_v38 = vrot.slane %v683_v32, 4  ;;  %v818_v40 = vsel %vm703_vm1, %v683_v32, %v817_v9  ;;  %v722_v42 = vperm.slane %v716_v33, %v4577_v55 }
 0x125   : > { %v1184_v45 = vsel %vm703_vm1, %v1183_v28, %v4503_v27  ;;  %v718_v51 = vsel %vm703_vm1, %v691_v48, %v717_v34  ;;  %v4622_v59 = vperm.slane %v818_v40, %v4577_v55 }
 0x126   : > { %v1190_v52 = vperm.slane %v1184_v45, %v4577_v55  ;;  %v1220_v53 = vsel %vm703_vm1, %v1219_v23, %v1194_v37  ;;  %v1221_v54 = vrot.slane %v1194_v37, 4  ;;  %v816_v56 = vsel %vm703_vm1, %v815_v38, %v4525_v35 }
 0x127   : > { %v1226_v58 = vperm.slane %v1220_v53, %v4599_v20  ;;  %v726_v27 = vperm.slane %v718_v51, %v4577_v55  ;;  %v727_v0 = vrot.slane %v722_v42, 4  ;;  %v4629_v35 = vrot.slane %v4127_v44, 4 }
 0x128   : > { %v1208_v48 = vsel %vm703_vm1, %v1207_v43, %v1190_v52  ;;  %v1209_v60 = vrot.slane %v1190_v52, 4  ;;  %v1222_v61 = vsel %vm703_vm1, %v1206_v5, %v1221_v54  ;;  %v4636_v4 = vperm.slane %v816_v56, %v4577_v55 }
 0x129   : > { %v4632_v1 = vperm.slane %v1208_v48, %v4599_v20  ;;  %v1230_v2 = vperm.slane %v1222_v61, %v4599_v20  ;;  %v728_v9 = vsel %vm703_vm1, %v727_v0, %v710_v3  ;;  %v730_v14 = vsel %vm703_vm1, %v722_v42, %v729_v21 }
 0x12a   : > { %v1210_v6 = vsel %vm703_vm1, %v1202_v15, %v1209_v60  ;;  %v739_v5 = vrot.slane %v726_v27, 4  ;;  %v1235_v25 = vrot.slane %v1226_v58, 4  ;;  %v853_v28 = vrot.slane %v4622_v59, 4  ;;  %v4648_v34 = vpop.permute.xlu0 %4120  ;;  %v1162_v51 = vpop.permute.xlu1 %1161 }
 0x12b   : > { %v1218_v23 = vperm.slane %v1210_v6, %v4599_v20  ;;  %v1237_v26 = vrot.slane %v1230_v2, 4  ;;  %v734_v29 = vperm.slane %v728_v9, %v4599_v20  ;;  %v738_v32 = vperm.slane %v730_v14, %v4599_v20 }
 0x12c   : > { %v740_v33 = vsel %vm703_vm1, %v739_v5, %v4584_v63  ;;  %v742_v15 = vsel %vm703_vm1, %v726_v27, %v741_v13  ;;  %v1231_v40 = vrot.slane %v4632_v1, 4  ;;  %v841_v42 = vrot.slane %v4636_v4, 4  ;;  %v1166_v63 = vpop.permute.xlu2 %1165 }
 0x12d   : > { %v4650_v3 = vrot.slane %v1218_v23, 4  ;;  %v1238_v21 = vsel %vm703_vm1, 0.0, %v1237_v26  ;;  %v1418_v37 = vsel %vm703_vm1, %v1237_v26, %v1226_v58  ;;  %v746_v38 = vperm.slane %v740_v33, %v4599_v20 }
 0x12e   : > { %v750_v43 = vperm.slane %v742_v15, %v4599_v20  ;;  %v751_v45 = vrot.slane %v734_v29, 4  ;;  %v1423_v52 = vrot.slane %v1238_v21, 4  ;;  %v753_v53 = vrot.slane %v738_v32, 4 }
 0x12f   : > { %v4660_v13 = vsel %vm703_vm1, 0.0, %v4650_v3  ;;  %v755_v54 = vrot.slane %v746_v38, 4  ;;  %v1236_v56 = vsel %vm703_vm1, 0.0, %v1235_v25  ;;  %v4664_v58 = vperm.slane %v1418_v37, %v4577_v55 }
 0x130   : > { %v757_v27 = vrot.slane %v750_v43, 4  ;;  %v4123_v48 = vunpack.i.h.bf16 %v4648_v34  ;;  %v1412_v60 = vrot.slane %v4660_v13, 4  ;;  %v752_v61 = vsel %vm703_vm1, 0.0, %v751_v45 }
 0x131   : > { %v754_v0 = vsel %vm703_vm1, 0.0, %v753_v53  ;;  %v927_v2 = vsel %vm703_vm1, %v753_v53, %v734_v29  ;;  %v4677_v23 = vsel %vm703_vm1, %v1423_v52, %v1236_v56  ;;  %v756_v25 = vsel %vm703_vm1, 0.0, %v755_v54 }
 0x132   : > { %v758_v6 = vsel %vm703_vm1, 0.0, %v757_v27  ;;  %v4673_v9 = vperm.slane %v927_v2, %v4577_v55  ;;  %v932_v14 = vrot.slane %v754_v0, 4  ;;  %v938_v5 = vsel %vm703_vm1, %v757_v27, %v746_v38  ;;  %v681_v27 = vpop.permute.xlu0 %680 }
 0x133   : > { %v4122_v26 = vunpack.i.l.bf16 %v4648_v34  ;;  %v1351_v32 = vrot.slane %v1166_v63, 4  ;;  %v4683_v29 = vperm.slane %v938_v5, %v4577_v55  ;;  %v4687_v15 = vrot.slane %v4123_v48, 4  ;;  %v693_v5 = vpop.permute.xlu1 %692 }
 0x134   : > { %v933_v33 = vsel %vm703_vm1, %v932_v14, %v752_v61  ;;  %v1239_v21 = vrot.slane %v1162_v51, 4  ;;  %v943_v37 = vrot.slane %v758_v6, 4  ;;  %v1354_v45 = vsel %vm703_vm1, %v1166_v63, %v1353_v10  ;;  %v685_v14 = vpop.permute.xlu2 %684 }
 0x135   : > { %v1252_v38 = vsel %vm703_vm1, %v1251_v22, %v4122_v26  ;;  %v1253_v43 = vrot.slane %v4122_v26, 4  ;;  %v951_v52 = vrot.slane %v4673_v9, 4  ;;  %v1352_v54 = vsel %vm703_vm1, %v1351_v32, %v4542_v39 }
 0x136   : > { %v1258_v53 = vperm.slane %v1252_v38, %v4577_v55  ;;  %v1240_v56 = vsel %vm703_vm1, %v1239_v21, %v4516_v31  ;;  %v4702_v61 = vperm.slane %v933_v33, %v4577_v55  ;;  %v1242_v10 = vsel %vm703_vm1, %v1162_v51, %v1241_v7 }
 0x137   : > { %v1254_v22 = vsel %vm703_vm1, %v4575_v50, %v1253_v43  ;;  %v1246_v63 = vperm.slane %v1240_v56, %v4577_v55  ;;  %v4712_v39 = vperm.slane %v1354_v45, %v4577_v55  ;;  %v1250_v6 = vperm.slane %v1242_v10, %v4577_v55 }
 0x138   : > { %v1262_v0 = vperm.slane %v1254_v22, %v4577_v55  ;;  %v1263_v2 = vrot.slane %v1258_v53, 4  ;;  %v4716_v26 = vperm.slane %v1352_v54, %v4577_v55  ;;  %v759_v32 = vrot.slane %v681_v27, 4 }
 0x139   : > { %v1265_v50 = vrot.slane %v1246_v63, 4  ;;  %v762_v31 = vsel %vm703_vm1, %v681_v27, %v761_v8  ;;  %v1277_v33 = vrot.slane %v1250_v6, 4  ;;  %v871_v54 = vrot.slane %v685_v14, 4 }
 0x13a   : > { %v1275_v7 = vrot.slane %v1262_v0, 4  ;;  %v1264_v51 = vsel %vm703_vm1, %v1263_v2, %v1246_v63  ;;  %v770_v21 = vperm.slane %v762_v31, %v4577_v55  ;;  %v760_v45 = vsel %vm703_vm1, %v759_v32, %v4514_v30 }
 0x13b   : > { %v1266_v38 = vsel %vm703_vm1, %v1258_v53, %v1265_v50  ;;  %v1270_v43 = vperm.slane %v1264_v51, %v4599_v20  ;;  %v1278_v8 = vsel %vm703_vm1, %v1262_v0, %v1277_v33  ;;  %v766_v27 = vperm.slane %v760_v45, %v4577_v55  ;;  %v1164_v45 = vpop.permute.xlu0 %1163 }
 0x13c   : > { %v1274_v56 = vperm.slane %v1266_v38, %v4599_v20  ;;  %v1276_v22 = vsel %vm703_vm1, %v1275_v7, %v1250_v6  ;;  %v4732_v10 = vsel %vm703_vm1, %v943_v37, %v756_v25  ;;  %v1286_v53 = vperm.slane %v1278_v8, %v4599_v20 }
 0x13d   : > { %v1282_v63 = vperm.slane %v1276_v22, %v4599_v20  ;;  %v1287_v2 = vrot.slane %v1270_v43, 4  ;;  %v872_v32 = vsel %vm703_vm1, %v871_v54, %v4550_v41  ;;  %v874_v0 = vsel %vm703_vm1, %v685_v14, %v873_v11 }
 0x13e   : > { %v1289_v30 = vrot.slane %v1274_v56, 4  ;;  %v1377_v6 = vrot.slane %v4716_v26, 4  ;;  %v1293_v25 = vrot.slane %v1286_v53, 4  ;;  %v797_v37 = vrot.slane %v770_v21, 4 }
 0x13f   : > { %v1291_v31 = vrot.slane %v1282_v63, 4  ;;  %v785_v51 = vrot.slane %v766_v27, 4  ;;  %v4747_v33 = vperm.slane %v872_v32, %v4577_v55  ;;  %v771_v38 = vrot.slane %v693_v5, 4  ;;  %v1176_v32 = vpop.permute.xlu1 %1175 }
 0x140   : > { %v4744_v7 = vsel %vm703_vm1, 0.0, %v1289_v30  ;;  %v4750_v54 = vsel %vm703_vm1, 0.0, %v1287_v2  ;;  %v1294_v41 = vsel %vm703_vm1, 0.0, %v1293_v25  ;;  %v1472_v11 = vsel %vm703_vm1, %v1293_v25, %v1282_v63 }
 0x141   : > { %v4755_v14 = vperm.slane %v874_v0, %v4577_v55  ;;  %v1292_v56 = vsel %vm703_vm1, 0.0, %v1291_v31  ;;  %v4759_v22 = vsel %vm703_vm1, %v1289_v30, %v1270_v43  ;;  %v1466_v8 = vrot.slane %v4744_v7, 4 }
 0x142   : > { %v1477_v53 = vrot.slane %v1294_v41, 4  ;;  %v4763_v50 = vperm.slane %v1472_v11, %v4577_v55  ;;  %v772_v2 = vsel %vm703_vm1, %v771_v38, %v4123_v48  ;;  %v774_v63 = vsel %vm703_vm1, %v693_v5, %v4687_v15 }
 0x143   : > { %v1295_v0 = vrot.slane %v1164_v45, 4  ;;  %v778_v43 = vperm.slane %v772_v2, %v4577_v55  ;;  %v782_v30 = vperm.slane %v774_v63, %v4577_v55  ;;  %v1298_v25 = vsel %vm703_vm1, %v1164_v45, %v1297_v12 }
 0x144   : > { %v1478_v41 = vsel %vm703_vm1, %v1477_v53, %v1292_v56  ;;  %v1307_v38 = vrot.slane %v1176_v32, 4  ;;  %v1306_v45 = vperm.slane %v1298_v25, %v4577_v55 }
 0x145   : > { %v1296_v48 = vsel %vm703_vm1, %v1295_v0, %v4527_v36  ;;  %v783_v15 = vrot.slane %v778_v43, 4  ;;  %v786_v5 = vsel %vm703_vm1, %v778_v43, %v785_v51  ;;  %v795_v11 = vrot.slane %v782_v30, 4 }
 0x146   : > { %v798_v2 = vsel %vm703_vm1, %v782_v30, %v797_v37  ;;  %v794_v63 = vperm.slane %v786_v5, %v4599_v20  ;;  %v1302_v12 = vperm.slane %v1296_v48, %v4577_v55  ;;  %v1308_v36 = vsel %vm703_vm1, %v1307_v38, %v4127_v44 }
 0x147   : > { %v806_v31 = vperm.slane %v798_v2, %v4599_v20  ;;  %v784_v56 = vsel %vm703_vm1, %v783_v15, %v766_v27  ;;  %v796_v53 = vsel %vm703_vm1, %v795_v11, %v770_v21  ;;  %v1310_v51 = vsel %vm703_vm1, %v1176_v32, %v4629_v35 }
 0x148   : > { %v790_v37 = vperm.slane %v784_v56, %v4599_v20  ;;  %v802_v0 = vperm.slane %v796_v53, %v4599_v20  ;;  %v809_v43 = vrot.slane %v794_v63, 4  ;;  %v1497_v48 = vrot.slane %v4763_v50, 4 }
 0x149   : > { %v813_v30 = vrot.slane %v806_v31, 4  ;;  %v1321_v25 = vrot.slane %v1302_v12, 4  ;;  %v1314_v27 = vperm.slane %v1308_v36, %v4577_v55  ;;  %v1318_v21 = vperm.slane %v1310_v51, %v4577_v55 }
 0x14a   : > { %v4799_v15 = vperm.slane %v1478_v41, %v4577_v55  ;;  %v810_v44 = vsel %vm703_vm1, 0.0, %v809_v43  ;;  %v811_v38 = vrot.slane %v802_v0, 4  ;;  %v1333_v11 = vrot.slane %v1306_v45, 4 }
 0x14b   : > { %v814_v35 = vsel %vm703_vm1, 0.0, %v813_v30  ;;  %v992_v32 = vsel %vm703_vm1, %v813_v30, %v802_v0  ;;  %v1232_v31 = vsel %vm703_vm1, 0.0, %v1231_v40  ;;  %v807_v2 = vrot.slane %v790_v37, 4 }
 0x14c   : > { %v997_v5 = vrot.slane %v814_v35, 4  ;;  %v812_v63 = vsel %vm703_vm1, 0.0, %v811_v38  ;;  %v4809_v56 = vsel %vm703_vm1, %v809_v43, %v790_v37  ;;  %v1319_v41 = vrot.slane %v1314_v27, 4 }
 0x14d   : > { %v986_v53 = vrot.slane %v810_v44, 4  ;;  %v1322_v51 = vsel %vm703_vm1, %v1314_v27, %v1321_v25  ;;  %v1331_v34 = vrot.slane %v1318_v21, 4  ;;  %v4814_v0 = vperm.slane %v992_v32, %v4577_v55 }
 0x14e   : > { %v998_v36 = vsel %vm703_vm1, %v997_v5, %v812_v63  ;;  %v1320_v40 = vsel %vm703_vm1, %v1319_v41, %v1302_v12  ;;  %v1330_v38 = vperm.slane %v1322_v51, %v4599_v20  ;;  %v1334_v44 = vsel %vm703_vm1, %v1318_v21, %v1333_v11 }
 0x14f   : > { %v4817_v30 = vperm.slane %v998_v36, %v4577_v55  ;;  %v1326_v37 = vperm.slane %v1320_v40, %v4599_v20  ;;  %v1332_v43 = vsel %vm703_vm1, %v1331_v34, %v1306_v45  ;;  %v1407_v25 = vsel %vm703_vm1, %v4650_v3, %v4632_v1  ;;  %v695_v40 = vpop.permute.xlu0 %694 }
 0x150   : > { %v808_v27 = vsel %vm703_vm1, 0.0, %v807_v2  ;;  %v1338_v35 = vperm.slane %v1332_v43, %v4599_v20  ;;  %v1342_v32 = vperm.slane %v1334_v44, %v4599_v20  ;;  %v1345_v5 = vrot.slane %v1330_v38, 4 }
 0x151   : > { %v4831_v12 = vsel %vm703_vm1, %v986_v53, %v808_v27  ;;  %v1343_v63 = vrot.slane %v1326_v37, 4  ;;  %v1411_v41 = vperm.slane %v1407_v25, %v4577_v55  ;;  %v1413_v34 = vsel %vm703_vm1, %v1412_v60, %v1232_v31 }
 0x152   : > { %v1017_v45 = vrot.slane %v4814_v0, 4  ;;  %v4839_v1 = vsel %vm703_vm1, 0.0, %v1345_v5  ;;  %v1349_v3 = vrot.slane %v1342_v32, 4  ;;  %v1428_v21 = vperm.slane %v4677_v23, %v4577_v55 }
 0x153   : > { %v1015_v11 = vrot.slane %v4817_v30, 4  ;;  %v1347_v2 = vrot.slane %v1338_v35, 4  ;;  %v1417_v53 = vperm.slane %v1413_v34, %v4577_v55  ;;  %v1431_v36 = vrot.slane %v1411_v41, 4 }
 0x154   : > { %v1350_v51 = vsel %vm703_vm1, 0.0, %v1349_v3  ;;  %v4847_v13 = vsel %vm703_vm1, %v1345_v5, %v1326_v37  ;;  %v1526_v60 = vsel %vm703_vm1, %v1349_v3, %v1338_v35  ;;  %v1443_v31 = vrot.slane %v4664_v58, 4 }
 0x155   : > { %v4852_v38 = vsel %vm703_vm1, 0.0, %v1343_v63  ;;  %v1531_v43 = vrot.slane %v1350_v51, 4  ;;  %v1432_v44 = vsel %vm703_vm1, %v1417_v53, %v1431_v36  ;;  %v1429_v32 = vrot.slane %v1417_v53, 4 }
 0x156   : > { %v1440_v25 = vperm.slane %v1432_v44, %v4599_v20  ;;  %v1444_v27 = vsel %vm703_vm1, %v1428_v21, %v1443_v31  ;;  %v1441_v37 = vrot.slane %v1428_v21, 4  ;;  %v1348_v5 = vsel %vm703_vm1, 0.0, %v1347_v2 }
 0x157   : > { %v4860_v35 = vperm.slane %v1526_v60, %v4577_v55  ;;  %v1452_v34 = vperm.slane %v1444_v27, %v4599_v20  ;;  %v827_v63 = vrot.slane %v695_v40, 4  ;;  %v1430_v3 = vsel %vm703_vm1, %v1429_v32, %v1411_v41 }
 0x158   : > { %v1442_v36 = vsel %vm703_vm1, %v1441_v37, %v4664_v58  ;;  %v1459_v51 = vrot.slane %v1440_v25, 4  ;;  %v1436_v31 = vperm.slane %v1430_v3, %v4599_v20  ;;  %v1532_v53 = vsel %vm703_vm1, %v1531_v43, %v1348_v5 }
 0x159   : > { %v1457_v44 = vrot.slane %v1452_v34, 4  ;;  %v1448_v21 = vperm.slane %v1442_v36, %v4599_v20  ;;  %v828_v2 = vsel %vm703_vm1, %v827_v63, %v4128_v24  ;;  %v830_v41 = vsel %vm703_vm1, %v695_v40, %v4618_v57 }
 0x15a   : > { %v1460_v60 = vsel %vm703_vm1, %v1452_v34, %v1459_v51  ;;  %v834_v27 = vperm.slane %v828_v2, %v4577_v55  ;;  %v1455_v37 = vrot.slane %v1436_v31, 4  ;;  %v838_v36 = vperm.slane %v830_v41, %v4577_v55 }
 0x15b   : > { %v1458_v58 = vsel %vm703_vm1, %v1457_v44, %v1440_v25  ;;  %v1453_v32 = vrot.slane %v1448_v21, 4  ;;  %v2122_v3 = vpack.c.bf16 %v1460_v60, %v1460_v60  ;;  %v948_v41 = vperm.slane %v4732_v10, %v4577_v55 }
 0x15c   : > { %v2121_v23 = vpack.c.bf16 %v1458_v58, %v1458_v58  ;;  %v839_v62 = vrot.slane %v834_v27, 4  ;;  %v842_v24 = vsel %vm703_vm1, %v834_v27, %v841_v42  ;;  %v1456_v57 = vsel %vm703_vm1, %v1448_v21, %v1455_v37 }
 0x15d   : > { %v1454_v43 = vsel %vm703_vm1, %v1453_v32, %v1436_v31  ;;  %v2197_v5 = vsel %vm2135_vm2, %v2122_v3, 0  ;;  %v850_v40 = vperm.slane %v842_v24, %v4599_v20  ;;  %v2120_v63 = vpack.c.bf16 %v1456_v57, %v1456_v57 }
 0x15e   : > { %v2178_v25 = vsel %vm2135_vm2, %v2121_v23, 0  ;;  %v2119_v34 = vpack.c.bf16 %v1454_v43, %v1454_v43  ;;  %2206 = vmatpush.bf16.xpose.msrb.mxu1 %v2197_v5  ;;  %v840_v51 = vsel %vm703_vm1, %v839_v62, %v4636_v4  ;;  %v851_v42 = vrot.slane %v838_v36, 4 }
 0x15f   : > { %2187 = vmatpush.bf16.xpose.msrb.mxu0 %v2178_v25  ;;  %v846_v44 = vperm.slane %v840_v51, %v4599_v20  ;;  %v854_v31 = vsel %vm703_vm1, %v838_v36, %v853_v28  ;;  %v865_v2 = vrot.slane %v850_v40, 4  ;;  %v2159_v60 = vsel %vm2135_vm2, %v2120_v63, 0  ;;  %v1154_v40 = vpop.permute.xlu1 %1153 }
 0x160   : > { %v2140_v21 = vsel %vm2135_vm2, %v2119_v34, 0  ;;  %v862_v23 = vperm.slane %v854_v31, %v4599_v20  ;;  %v852_v4 = vsel %vm703_vm1, %v851_v42, %v4622_v59  ;;  %v952_v59 = vsel %vm703_vm1, %v4702_v61, %v951_v52 }
 0x161   : > { %2149 = vmatpush.bf16.xpose.msrb.mxu3 %v2140_v21  ;;  %v863_v27 = vrot.slane %v846_v44, 4  ;;  %v866_v58 = vsel %vm703_vm1, 0.0, %v865_v2  ;;  %v1035_v32 = vsel %vm703_vm1, %v865_v2, %v846_v44  ;;  %v858_v28 = vperm.slane %v852_v4, %v4599_v20 }
 0x162   : > { %v869_v37 = vrot.slane %v862_v23, 4  ;;  %v4903_v3 = vperm.slane %v1035_v32, %v4577_v55  ;;  %v1040_v36 = vrot.slane %v866_v58, 4  ;;  %v963_v10 = vrot.slane %v4683_v29, 4 }
 0x163   : > { %v864_v62 = vsel %vm703_vm1, 0.0, %v863_v27  ;;  %v867_v24 = vrot.slane %v858_v28, 4  ;;  %v4915_v25 = vperm.slane %v1532_v53, %v4577_v55  ;;  %v1551_v34 = vrot.slane %v4860_v35, 4 }
 0x164   : > { %v870_v43 = vsel %vm703_vm1, 0.0, %v869_v37  ;;  %v1041_v5 = vsel %vm703_vm1, %v1040_v36, %v864_v62  ;;  %v1046_v57 = vsel %vm703_vm1, %v869_v37, %v858_v28  ;;  %v960_v44 = vperm.slane %v952_v59, %v4599_v20 }
 0x165   : > { %v4919_v63 = vperm.slane %v1046_v57, %v4577_v55  ;;  %v1051_v51 = vrot.slane %v870_v43, 4  ;;  %v868_v52 = vsel %vm703_vm1, 0.0, %v867_v24  ;;  %v964_v42 = vsel %vm703_vm1, %v948_v41, %v963_v10  ;;  %v1178_v10 = vpop.permute.xlu0 %1177 }
 0x166   : > { %v949_v31 = vrot.slane %v4702_v61, 4  ;;  %v4928_v53 = vperm.slane %v1041_v5, %v4577_v55  ;;  %v1365_v2 = vrot.slane %v1154_v40, 4  ;;  %v972_v21 = vperm.slane %v964_v42, %v4599_v20 }
 0x167   : > { %v1052_v23 = vsel %vm703_vm1, %v1051_v51, %v868_v52  ;;  %v1059_v4 = vrot.slane %v4903_v3, 4  ;;  %v979_v49 = vrot.slane %v960_v44, 4  ;;  %v1465_v27 = vperm.slane %v4759_v22, %v4577_v55 }
 0x168   : > { %v977_v58 = vrot.slane %v972_v21, 4  ;;  %v950_v32 = vsel %vm703_vm1, %v949_v31, %v4673_v9  ;;  %v1071_v28 = vrot.slane %v4919_v63, 4  ;;  %v4950_v62 = vperm.slane %v1052_v23, %v4577_v55 }
 0x169   : > { %2168 = vmatpush.bf16.xpose.msra.mxu3 %v2159_v60  ;;  %v961_v60 = vrot.slane %v948_v41, 4  ;;  %v1467_v41 = vsel %vm703_vm1, %v1466_v8, %v4750_v54  ;;  %v980_v36 = vsel %vm703_vm1, %v972_v21, %v979_v49  ;;  %v1485_v59 = vrot.slane %v1465_v27, 4 }
 0x16a   : > { %v1471_v22 = vperm.slane %v1467_v41, %v4577_v55  ;;  %v978_v9 = vsel %vm703_vm1, %v977_v58, %v960_v44  ;;  %v4954_v54 = vperm.slane %v950_v32, %v4599_v20  ;;  %v1498_v24 = vsel %vm703_vm1, %v4799_v15, %v1497_v48 }
 0x16b   : > { %v962_v61 = vsel %vm703_vm1, %v961_v60, %v4683_v29  ;;  %v2106_v29 = vpack.c.bf16 %v980_v36, %v980_v36  ;;  %v2105_v7 = vpack.c.bf16 %v978_v9, %v978_v9  ;;  %v1506_v5 = vperm.slane %v1498_v24, %v4599_v20 }
 0x16c   : > { %v4945_v37 = vperm.slane %v962_v61, %v4599_v20  ;;  %v1486_v43 = vsel %vm703_vm1, %v1471_v22, %v1485_v59  ;;  %v1483_v57 = vrot.slane %v1471_v22, 4  ;;  %v1495_v51 = vrot.slane %v4799_v15, 4 }
 0x16d   : > { %4016 = vmatmul.msk.bf16.vlgmr.msrb.gmra.mxu1 %vm2135_vm2, %v2106_v29  ;;  %4015 = vmatmul.msk.bf16.vlgmr.msrb.gmra.mxu0 %vm2135_vm2, %v2105_v7  ;;  %v1494_v44 = vperm.slane %v1486_v43, %v4599_v20  ;;  %v1363_v42 = vrot.slane %v1178_v10, 4  ;;  %v1366_v31 = vsel %vm703_vm1, %v1178_v10, %v1365_v2  ;;  %v1511_v21 = vrot.slane %v1506_v5, 4 }
 0x16e   : > { %v973_v8 = vrot.slane %v4945_v37, 4  ;;  %v1484_v60 = vsel %vm703_vm1, %v1483_v57, %v1465_v27  ;;  %v1496_v23 = vsel %vm703_vm1, %v1495_v51, %v4763_v50  ;;  %v1069_v61 = vrot.slane %v4950_v62, 4 }
 0x16f   : > { %v1513_v49 = vrot.slane %v1494_v44, 4  ;;  %v1490_v15 = vperm.slane %v1484_v60, %v4599_v20  ;;  %v1502_v58 = vperm.slane %v1496_v23, %v4599_v20  ;;  %v1364_v32 = vsel %vm703_vm1, %v1363_v42, %v1154_v40 }
 0x170   : > { %v974_v52 = vsel %vm703_vm1, %v973_v8, %v4954_v54  ;;  %v1512_v2 = vsel %vm703_vm1, %v1511_v21, %v1494_v44  ;;  %v1370_v41 = vperm.slane %v1364_v32, %v4577_v55  ;;  %v1374_v27 = vperm.slane %v1366_v31, %v4577_v55  ;;  %v673_v44 = vpop.permute.xlu1 %672 }
 0x171   : > { %v2103_v48 = vpack.c.bf16 %v974_v52, %v974_v52  ;;  %v2125_v36 = vpack.c.bf16 %v1512_v2, %v1512_v2  ;;  %v1514_v50 = vsel %vm703_vm1, %v1506_v5, %v1513_v49  ;;  %v1507_v22 = vrot.slane %v1502_v58, 4 }
 0x172   : > { %v1509_v9 = vrot.slane %v1490_v15, 4  ;;  %v2126_v29 = vpack.c.bf16 %v1514_v50, %v1514_v50  ;;  %v1375_v59 = vrot.slane %v1370_v41, 4  ;;  %v1378_v40 = vsel %vm703_vm1, %v1370_v41, %v1377_v6 }
 0x173   : > { %4013 = vmatmul.msk.bf16.vlgmr.msrb.gmra.mxu3 %vm2135_vm2, %v2103_v48  ;;  %v1387_v10 = vrot.slane %v1374_v27, 4  ;;  %v2254_v7 = vsel %vm2135_vm2, %v2125_v36, 0  ;;  %v1508_v8 = vsel %vm703_vm1, %v1507_v22, %v1490_v15  ;;  %v1386_v43 = vperm.slane %v1378_v40, %v4599_v20  ;;  %v697_v15 = vpop.permute.xlu0 %696 }
 0x174   : > { %v1510_v24 = vsel %vm703_vm1, %v1502_v58, %v1509_v9  ;;  %2263 = vmatpush.bf16.xpose.msra.mxu0 %v2254_v7  ;;  %v2273_v5 = vsel %vm2135_vm2, %v2126_v29, 0  ;;  %v2123_v57 = vpack.c.bf16 %v1508_v8, %v1508_v8  ;;  %v1376_v52 = vsel %vm703_vm1, %v1375_v59, %v4716_v26 }
 0x175   : > { %v2124_v51 = vpack.c.bf16 %v1510_v24, %v1510_v24  ;;  %2282 = vmatpush.bf16.xpose.msra.mxu1 %v2273_v5  ;;  %v1382_v6 = vperm.slane %v1376_v52, %v4599_v20  ;;  %v1388_v42 = vsel %vm703_vm1, %v1387_v10, %v4712_v39  ;;  %v6137_v31 = vrot.slane %v4712_v39, 4 }
 0x176   : > { %v1401_v21 = vrot.slane %v1386_v43, 4  ;;  %v2216_v60 = vsel %vm2135_vm2, %v2123_v57, 0  ;;  %v1394_v49 = vperm.slane %v1388_v42, %v4599_v20  ;;  %v5004_v58 = vsel %vm703_vm1, %v1069_v61, %v4919_v63 }
 0x177   : > { %v1390_v48 = vsel %vm703_vm1, %v1374_v27, %v6137_v31  ;;  %v2235_v23 = vsel %vm2135_vm2, %v2124_v51, 0  ;;  %v975_v32 = vrot.slane %v4954_v54, 4  ;;  %2225 = vmatpush.bf16.xpose.msrb.mxu2 %v2216_v60  ;;  %v885_v39 = vrot.slane %v673_v44, 4 }
 0x178   : > { %v1398_v26 = vperm.slane %v1390_v48, %v4599_v20  ;;  %2244 = vmatpush.bf16.xpose.msrb.mxu3 %v2235_v23  ;;  %v985_v2 = vperm.slane %v4809_v56, %v4577_v55  ;;  %v1399_v41 = vrot.slane %v1382_v6, 4  ;;  %v1403_v27 = vrot.slane %v1394_v49, 4 }
 0x179   : > { %v991_v50 = vperm.slane %v4831_v12, %v4577_v55  ;;  %v5012_v22 = vsel %vm703_vm1, 0.0, %v1401_v21  ;;  %v5015_v61 = vsel %vm703_vm1, %v1401_v21, %v1382_v6  ;;  %v1016_v9 = vsel %vm703_vm1, %v1015_v11, %v4814_v0 }
 0x17a   : > { %v1405_v36 = vrot.slane %v1398_v26, 4  ;;  %v883_v29 = vrot.slane %v697_v15, 4  ;;  %v1005_v10 = vrot.slane %v985_v2, 4  ;;  %v5027_v8 = vperm.slane %v1016_v9, %v4599_v20 }
 0x17b   : > { %v1003_v40 = vrot.slane %v991_v50, 4  ;;  %v1404_v43 = vsel %vm703_vm1, 0.0, %v1403_v27  ;;  %v886_v5 = vsel %vm703_vm1, %v697_v15, %v885_v39  ;;  %v5035_v51 = vsel %vm703_vm1, 0.0, %v1399_v41 }
 0x17c   : > { %v1406_v56 = vsel %vm703_vm1, 0.0, %v1405_v36  ;;  %v1580_v59 = vsel %vm703_vm1, %v1405_v36, %v1394_v49  ;;  %v884_v24 = vsel %vm703_vm1, %v883_v29, %v673_v44  ;;  %v1574_v52 = vrot.slane %v5012_v22, 4 }
 0x17d   : > { %v5024_v12 = vperm.slane %v1580_v59, %v4577_v55  ;;  %v1585_v7 = vrot.slane %v1406_v56, 4  ;;  %v1004_v11 = vsel %vm703_vm1, %v1003_v40, %v985_v2  ;;  %v890_v57 = vperm.slane %v884_v24, %v4577_v55 }
 0x17e   : > { %v5039_v6 = vperm.slane %v1004_v11, %v4599_v20  ;;  %v1027_v42 = vrot.slane %v5027_v8, 4  ;;  %v894_v44 = vperm.slane %v886_v5, %v4577_v55  ;;  %v6138_v48 = vrot.slane %v4747_v33, 4 }
 0x17f   : > { %v895_v31 = vrot.slane %v890_v57, 4  ;;  %v1006_v60 = vsel %vm703_vm1, %v991_v50, %v1005_v10  ;;  %v1586_v23 = vsel %vm703_vm1, %v1585_v7, %v1404_v43  ;;  %v1605_v49 = vrot.slane %v5024_v12, 4 }
 0x180   : > { %v898_v21 = vsel %vm703_vm1, %v890_v57, %v6138_v48  ;;  %v1028_v26 = vsel %vm703_vm1, %v1027_v42, %v5039_v6  ;;  %v907_v41 = vrot.slane %v894_v44, 4  ;;  %v6139_v27 = vrot.slane %v4755_v14, 4 }
 0x181   : > { %v906_v15 = vperm.slane %v898_v21, %v4599_v20  ;;  %v2107_v39 = vpack.c.bf16 %v1028_v26, %v1028_v26  ;;  %v896_v2 = vsel %vm703_vm1, %v895_v31, %v4747_v33  ;;  %v1018_v56 = vsel %vm703_vm1, %v4817_v30, %v1017_v45 }
 0x182   : > { %v910_v36 = vsel %vm703_vm1, %v894_v44, %v6139_v27  ;;  %v902_v50 = vperm.slane %v896_v2, %v4599_v20  ;;  %v908_v33 = vsel %vm703_vm1, %v907_v41, %v4755_v14  ;;  %v1014_v59 = vperm.slane %v1006_v60, %v4599_v20 }
 0x183   : > { %v918_v9 = vperm.slane %v910_v36, %v4599_v20  ;;  %v921_v29 = vrot.slane %v906_v15, 4  ;;  %4017 = vmatmul.msk.bf16.vlgmr.msrb.gmra.mxu2 %vm2135_vm2, %v2107_v39  ;;  %v1026_v40 = vperm.slane %v1018_v56, %v4599_v20  ;;  %v6140_v10 = vrot.slane %v4839_v1, 4 }
 0x184   : > { %v914_v24 = vperm.slane %v908_v33, %v4599_v20  ;;  %v919_v0 = vrot.slane %v902_v50, 4  ;;  %v1519_v14 = vperm.slane %v4847_v13, %v4577_v55  ;;  %v5084_v60 = vperm.slane %v1586_v23, %v4577_v55 }
 0x185   : > { %v1521_v7 = vsel %vm703_vm1, %v6140_v10, %v4852_v38  ;;  %v922_v43 = vsel %vm703_vm1, 0.0, %v921_v29  ;;  %v925_v30 = vrot.slane %v918_v9, 4  ;;  %v1089_v45 = vsel %vm703_vm1, %v921_v29, %v902_v50 }
 0x186   : > { %v1094_v11 = vrot.slane %v922_v43, 4  ;;  %v1031_v5 = vrot.slane %v1026_v40, 4  ;;  %v920_v57 = vsel %vm703_vm1, 0.0, %v919_v0  ;;  %v923_v42 = vrot.slane %v914_v24, 4 }
 0x187   : > { %v926_v1 = vsel %vm703_vm1, 0.0, %v925_v30  ;;  %v1525_v38 = vperm.slane %v1521_v7, %v4577_v55  ;;  %v1100_v31 = vsel %vm703_vm1, %v925_v30, %v914_v24  ;;  %v1029_v26 = vrot.slane %v5039_v6, 4 }
 0x188   : > { %v1095_v44 = vsel %vm703_vm1, %v1094_v11, %v920_v57  ;;  %v1105_v48 = vrot.slane %v926_v1, 4  ;;  %v1032_v21 = vsel %vm703_vm1, %v1031_v5, %v1014_v59  ;;  %v924_v13 = vsel %vm703_vm1, 0.0, %v923_v42 }
 0x189   : > { %v5089_v15 = vperm.slane %v1089_v45, %v4577_v55  ;;  %v5092_v39 = vperm.slane %v1095_v44, %v4577_v55  ;;  %v2109_v2 = vpack.c.bf16 %v1032_v21, %v1032_v21  ;;  %v1539_v41 = vrot.slane %v1519_v14, 4 }
 0x18a   : > { %v1552_v27 = vsel %vm703_vm1, %v4915_v25, %v1551_v34  ;;  %v5099_v23 = vperm.slane %v1100_v31, %v4577_v55  ;;  %v1106_v36 = vsel %vm703_vm1, %v1105_v48, %v924_v13  ;;  %v976_v9 = vsel %vm703_vm1, %v4945_v37, %v975_v32 }
 0x18b   : > { %v1560_v50 = vperm.slane %v1552_v27, %v4599_v20  ;;  %4019 = vmatmul.msk.bf16.vlgmr.msra.gmra.mxu0 %vm2135_vm2, %v2109_v2  ;;  %v1540_v29 = vsel %vm703_vm1, %v1525_v38, %v1539_v41  ;;  %v2104_v56 = vpack.c.bf16 %v976_v9, %v976_v9  ;;  %v1033_v33 = vrot.slane %v1014_v59, 4 }
 0x18c   : > { %v1537_v10 = vrot.slane %v1525_v38, 4  ;;  %v1113_v34 = vrot.slane %v5089_v15, 4  ;;  %v1548_v7 = vperm.slane %v1540_v29, %v4599_v20  ;;  %v1549_v0 = vrot.slane %v4915_v25, 4 }
 0x18d   : > { %v1565_v24 = vrot.slane %v1560_v50, 4  ;;  %4014 = vmatmul.msk.bf16.vlgmr.msra.gmra.mxu3 %vm2135_vm2, %v2104_v56  ;;  %v1034_v54 = vsel %vm703_vm1, %v1026_v40, %v1033_v33  ;;  %v1057_v32 = vrot.slane %v4928_v53, 4  ;;  %v5118_v43 = vperm.slane %v5004_v58, %v4599_v20 }
 0x18e   : > { %v1538_v37 = vsel %vm703_vm1, %v1537_v10, %v1519_v14  ;;  %v5121_v59 = vperm.slane %v1106_v36, %v4577_v55  ;;  %v2110_v45 = vpack.c.bf16 %v1034_v54, %v1034_v54  ;;  %v1550_v40 = vsel %vm703_vm1, %v1549_v0, %v4860_v35 }
 0x18f   : > { %v1566_v30 = vsel %vm703_vm1, %v1565_v24, %v1548_v7  ;;  %v1544_v25 = vperm.slane %v1538_v37, %v4599_v20  ;;  %v1567_v5 = vrot.slane %v1548_v7, 4  ;;  %v1058_v14 = vsel %vm703_vm1, %v1057_v32, %v4903_v3 }
 0x190   : > { %v2129_v11 = vpack.c.bf16 %v1566_v30, %v1566_v30  ;;  %4020 = vmatmul.msk.bf16.vlgmr.msra.gmra.mxu1 %vm2135_vm2, %v2110_v45  ;;  %v1556_v58 = vperm.slane %v1550_v40, %v4599_v20  ;;  %v5132_v42 = vperm.slane %v1058_v14, %v4599_v20  ;;  %v1081_v1 = vrot.slane %v5118_v43, 4 }
 0x191   : > { %v1563_v57 = vrot.slane %v1544_v25, 4  ;;  %v1568_v44 = vsel %vm703_vm1, %v1560_v50, %v1567_v5  ;;  %v1573_v35 = vperm.slane %v5015_v61, %v4577_v55  ;;  %v1575_v31 = vsel %vm703_vm1, %v1574_v52, %v5035_v51 }
 0x192   : > { %v2330_v38 = vsel %vm2135_vm2, %v2129_v11, 0  ;;  %v1123_v48 = vrot.slane %v5121_v59, 4  ;;  %v1561_v21 = vrot.slane %v1556_v58, 4  ;;  %v2130_v13 = vpack.c.bf16 %v1568_v44, %v1568_v44 }
 0x193   : > { %2339 = vmatpush.bf16.xpose.msrb.mxu0 %v2330_v38  ;;  %v1564_v2 = vsel %vm703_vm1, %v1556_v58, %v1563_v57  ;;  %v1082_v27 = vsel %vm703_vm1, %v1081_v1, %v5132_v42  ;;  %v1579_v36 = vperm.slane %v1575_v31, %v4577_v55  ;;  %v1593_v50 = vrot.slane %v1573_v35, 4 }
 0x194   : > { %v2128_v41 = vpack.c.bf16 %v1564_v2, %v1564_v2  ;;  %v1562_v61 = vsel %vm703_vm1, %v1561_v21, %v1544_v25  ;;  %v2349_v22 = vsel %vm2135_vm2, %v2130_v13, 0  ;;  %v1606_v51 = vsel %vm703_vm1, %v5084_v60, %v1605_v49 }
 0x195   : > { %v1060_v52 = vsel %vm703_vm1, %v4928_v53, %v1059_v4  ;;  %v2127_v9 = vpack.c.bf16 %v1562_v61, %v1562_v61  ;;  %2358 = vmatpush.bf16.xpose.msrb.mxu1 %v2349_v22  ;;  %v1594_v56 = vsel %vm703_vm1, %v1579_v36, %v1593_v50  ;;  %v1614_v33 = vperm.slane %v1606_v51, %v4599_v20 }
 0x196   : > { %v2311_v29 = vsel %vm2135_vm2, %v2128_v41, 0  ;;  %v1602_v10 = vperm.slane %v1594_v56, %v4599_v20  ;;  %v1068_v7 = vperm.slane %v1060_v52, %v4599_v20  ;;  %v1072_v3 = vsel %vm703_vm1, %v4950_v62, %v1071_v28 }
 0x197   : > { %2320 = vmatpush.bf16.xpose.msra.mxu3 %v2311_v29  ;;  %v1591_v49 = vrot.slane %v1579_v36, 4  ;;  %v2292_v53 = vsel %vm2135_vm2, %v2127_v9, 0  ;;  %v1619_v4 = vrot.slane %v1614_v33, 4  ;;  %v1080_v24 = vperm.slane %v1072_v3, %v4599_v20 }
 0x198   : > { %v1603_v0 = vrot.slane %v5084_v60, 4  ;;  %2301 = vmatpush.bf16.xpose.msra.mxu2 %v2292_v53  ;;  %v1621_v37 = vrot.slane %v1602_v10, 4  ;;  %v1030_v63 = vsel %vm703_vm1, %v5027_v8, %v1029_v26  ;;  %v1087_v32 = vrot.slane %v1068_v7, 4 }
 0x199   : > { %v1592_v54 = vsel %vm703_vm1, %v1591_v49, %v1573_v35  ;;  %v1620_v28 = vsel %vm703_vm1, %v1619_v4, %v1602_v10  ;;  %v1085_v62 = vrot.slane %v1080_v24, 4  ;;  %v2108_v40 = vpack.c.bf16 %v1030_v63, %v1030_v63  ;;  %v4136_v49 = vpop.permute.xlu1 %4135 }
 0x19a   : > { %v1598_v30 = vperm.slane %v1592_v54, %v4599_v20  ;;  %v1604_v45 = vsel %vm703_vm1, %v1603_v0, %v5024_v12  ;;  %v2133_v25 = vpack.c.bf16 %v1620_v28, %v1620_v28  ;;  %v1622_v11 = vsel %vm703_vm1, %v1614_v33, %v1621_v37  ;;  %v4131_v54 = vpop.permute.xlu0 %4130 }
 0x19b   : > { %v1610_v60 = vperm.slane %v1604_v45, %v4599_v20  ;;  %v1086_v6 = vsel %vm703_vm1, %v1085_v62, %v1068_v7  ;;  %v2134_v5 = vpack.c.bf16 %v1622_v11, %v1622_v11  ;;  %v1088_v8 = vsel %vm703_vm1, %v1080_v24, %v1087_v32 }
 0x19c   : > { %v1617_v26 = vrot.slane %v1598_v30, 4  ;;  %v1125_v14 = vrot.slane %v5099_v23, 4  ;;  %v2406_v58 = vsel %vm2135_vm2, %v2133_v25, 0  ;;  %v2113_v57 = vpack.c.bf16 %v1086_v6, %v1086_v6 }
 0x19d   : > { %v1615_v1 = vrot.slane %v1610_v60, 4  ;;  %v2111_v38 = vpack.c.bf16 %v1082_v27, %v1082_v27  ;;  %2415 = vmatpush.bf16.xpose.msra.mxu0 %v2406_v58  ;;  %v2425_v12 = vsel %vm2135_vm2, %v2134_v5, 0  ;;  %4018 = vmatmul.msk.bf16.vlgmr.msrb.gmra.mxu3 %vm2135_vm2, %v2108_v40  ;;  %v2114_v31 = vpack.c.bf16 %v1088_v8, %v1088_v8 }
 0x19e   : > { %v1618_v44 = vsel %vm703_vm1, %v1610_v60, %v1617_v26  ;;  %4023 = vmatmul.msk.bf16.vlgmr.msrb.gmra.mxu0 %vm2135_vm2, %v2113_v57  ;;  %2434 = vmatpush.bf16.xpose.msra.mxu1 %v2425_v12  ;;  %v1124_v13 = vsel %vm703_vm1, %v1123_v48, %v5099_v23  ;;  %v1111_v41 = vrot.slane %v5092_v39, 4  ;;  %v1114_v36 = vsel %vm703_vm1, %v5092_v39, %v1113_v34 }
 0x19f   : > { %v1616_v35 = vsel %vm703_vm1, %v1615_v1, %v1598_v30  ;;  %v2132_v21 = vpack.c.bf16 %v1618_v44, %v1618_v44  ;;  %4021 = vmatmul.msk.bf16.vlgmr.msra.gmra.mxu2 %vm2135_vm2, %v2111_v38  ;;  %v1126_v50 = vsel %vm703_vm1, %v5121_v59, %v1125_v14  ;;  %v1130_v48 = vperm.slane %v1124_v13, %v4599_v20  ;;  %v4141_v14 = vpop.permute.xlu2 %4140 }
 0x1a0   : > { %v2131_v2 = vpack.c.bf16 %v1616_v35, %v1616_v35  ;;  %4024 = vmatmul.msk.bf16.vlgmr.msrb.gmra.mxu1 %vm2135_vm2, %v2114_v31  ;;  %v1134_v23 = vperm.slane %v1126_v50, %v4599_v20  ;;  %v1112_v22 = vsel %vm703_vm1, %v1111_v41, %v5089_v15  ;;  %v1122_v51 = vperm.slane %v1114_v36, %v4599_v20 }
 0x1a1   : > { %v2387_v27 = vsel %vm2135_vm2, %v2132_v21, 0  ;;  %v1083_v52 = vrot.slane %v5132_v42, 4  ;;  %v1118_v39 = vperm.slane %v1112_v22, %v4599_v20  ;;  %v1135_v34 = vrot.slane %v1130_v48, 4 }
 0x1a2   : > { %v2368_v61 = vsel %vm2135_vm2, %v2131_v2, 0  ;;  %2396 = vmatpush.bf16.xpose.msrb.mxu3 %v2387_v27  ;;  %v1139_v9 = vrot.slane %v1134_v23, 4  ;;  %v1141_v59 = vrot.slane %v1122_v51, 4  ;;  %v4137_v53 = vunpack.i.l.bf16 %v4136_v49 }
 0x1a3   : > { %2377 = vmatpush.bf16.xpose.msrb.mxu2 %v2368_v61  ;;  %v1084_v29 = vsel %vm703_vm1, %v5118_v43, %v1083_v52  ;;  %v1136_v33 = vsel %vm703_vm1, %v1135_v34, %v1118_v39  ;;  %v1137_v43 = vrot.slane %v1118_v39, 4  ;;  %v4138_v4 = vunpack.i.h.bf16 %v4136_v49 }
 0x1a4   : > { %v1140_v56 = vsel %vm703_vm1, %v1139_v9, %v1122_v51  ;;  %v2112_v10 = vpack.c.bf16 %v1084_v29, %v1084_v29  ;;  %v1142_v7 = vsel %vm703_vm1, %v1134_v23, %v1141_v59  ;;  %v2115_v3 = vpack.c.bf16 %v1136_v33, %v1136_v33 }
 0x1a5   : > { %v2117_v15 = vpack.c.bf16 %v1140_v56, %v1140_v56  ;;  %v2118_v42 = vpack.c.bf16 %v1142_v7, %v1142_v7  ;;  %v1665_v24 = vrot.slane %v4563_v46, 4  ;;  %v1721_v0 = vrot.slane %v4565_v47, 4 }
 0x1a6   : > { %v1138_v37 = vsel %vm703_vm1, %v1130_v48, %v1137_v43  ;;  %v1663_v63 = vrot.slane %v4137_v53, 4  ;;  %v1719_v32 = vrot.slane %v4138_v4, 4  ;;  %v4133_v28 = vunpack.i.h.bf16 %v4131_v54 }
 0x1a7   : > { %v4132_v62 = vunpack.i.l.bf16 %v4131_v54  ;;  %v1722_v30 = vsel %vm703_vm1, %v4138_v4, %v1721_v0  ;;  %v1666_v45 = vsel %vm703_vm1, %v4137_v53, %v1665_v24  ;;  %v2116_v25 = vpack.c.bf16 %v1138_v37, %v1138_v37 }
 0x1a8   : > { %v1664_v60 = vsel %vm703_vm1, %v1663_v63, %v4563_v46  ;;  %v1720_v11 = vsel %vm703_vm1, %v1719_v32, %v4565_v47  ;;  %v1730_v40 = vperm.slane %v1722_v30, %v4577_v55  ;;  %v1674_v6 = vperm.slane %v1666_v45, %v4577_v55 }
 0x1a9   : > { %v1733_v5 = vrot.slane %v4133_v28, 4  ;;  %v1677_v8 = vrot.slane %v4132_v62, 4  ;;  %v1670_v26 = vperm.slane %v1664_v60, %v4577_v55  ;;  %v1726_v58 = vperm.slane %v1720_v11, %v4577_v55 }
 0x1aa   : > { %v4143_v57 = vunpack.i.h.bf16 %v4141_v14  ;;  %v4142_v1 = vunpack.i.l.bf16 %v4141_v14  ;;  %v1757_v38 = vrot.slane %v1730_v40, 4  ;;  %v1701_v46 = vrot.slane %v1674_v6, 4 }
 0x1ab   : > { %v1689_v31 = vrot.slane %v1670_v26, 4  ;;  %v1745_v2 = vrot.slane %v1726_v58, 4 }
 0x1ac   : > { %v1731_v12 = vrot.slane %v4143_v57, 4  ;;  %v1734_v44 = vsel %vm703_vm1, %v4143_v57, %v1733_v5  ;;  %v1675_v35 = vrot.slane %v4142_v1, 4  ;;  %v1678_v47 = vsel %vm703_vm1, %v4142_v1, %v1677_v8 }
 0x1ad   : > { %4022 = vmatmul.msk.bf16.vlgmr.msra.gmra.mxu3 %vm2135_vm2, %v2112_v10  ;;  %v1742_v21 = vperm.slane %v1734_v44, %v4577_v55  ;;  %v1686_v13 = vperm.slane %v1678_v47, %v4577_v55 }
 0x1ae   : > { %4027 = vmatmul.msk.bf16.vlgmr.msra.gmra.mxu0 %vm2135_vm2, %v2117_v15  ;;  %v1732_v41 = vsel %vm703_vm1, %v1731_v12, %v4133_v28  ;;  %v1676_v27 = vsel %vm703_vm1, %v1675_v35, %v4132_v62 }
 0x1af   : > { %4025 = vmatmul.msk.bf16.vlgmr.msrb.gmra.mxu2 %vm2135_vm2, %v2115_v3  ;;  %v1738_v36 = vperm.slane %v1732_v41, %v4577_v55  ;;  %v1755_v50 = vrot.slane %v1742_v21, 4  ;;  %v1682_v61 = vperm.slane %v1676_v27, %v4577_v55  ;;  %v1699_v23 = vrot.slane %v1686_v13, 4 }
 0x1b0   : > { %4028 = vmatmul.msk.bf16.vlgmr.msra.gmra.mxu1 %vm2135_vm2, %v2118_v42  ;;  %v1702_v48 = vsel %vm703_vm1, %v1686_v13, %v1701_v46  ;;  %v1758_v22 = vsel %vm703_vm1, %v1742_v21, %v1757_v38 }
 0x1b1   : > { %v1743_v51 = vrot.slane %v1738_v36, 4  ;;  %v1687_v52 = vrot.slane %v1682_v61, 4  ;;  %v1690_v9 = vsel %vm703_vm1, %v1682_v61, %v1689_v31  ;;  %v1700_v39 = vsel %vm703_vm1, %v1699_v23, %v1674_v6 }
 0x1b2   : > { %v1698_v34 = vperm.slane %v1690_v9, %v4599_v20  ;;  %v1706_v59 = vperm.slane %v1700_v39, %v4599_v20  ;;  %v1710_v29 = vperm.slane %v1702_v48, %v4599_v20  ;;  %v1746_v56 = vsel %vm703_vm1, %v1738_v36, %v1745_v2 }
 0x1b3   : > { %v1688_v33 = vsel %vm703_vm1, %v1687_v52, %v1670_v26  ;;  %v1744_v10 = vsel %vm703_vm1, %v1743_v51, %v1726_v58  ;;  %v1754_v7 = vperm.slane %v1746_v56, %v4599_v20  ;;  %v1756_v15 = vsel %vm703_vm1, %v1755_v50, %v1730_v40 }
 0x1b4   : > { %v1694_v3 = vperm.slane %v1688_v33, %v4599_v20  ;;  %v1713_v42 = vrot.slane %v1698_v34, 4  ;;  %v1715_v49 = vrot.slane %v1706_v59, 4  ;;  %v1717_v43 = vrot.slane %v1710_v29, 4 }
 0x1b5   : > { %v1750_v53 = vperm.slane %v1744_v10, %v4599_v20  ;;  %v1762_v4 = vperm.slane %v1756_v15, %v4599_v20  ;;  %v1766_v24 = vperm.slane %v1758_v22, %v4599_v20  ;;  %v1769_v0 = vrot.slane %v1754_v7, 4 }
 0x1b6   : > { %v1711_v54 = vrot.slane %v1694_v3, 4  ;;  %v1714_v37 = vsel %vm703_vm1, 0.0, %v1713_v42  ;;  %v1716_v63 = vsel %vm703_vm1, 0.0, %v1715_v49  ;;  %v1718_v32 = vsel %vm703_vm1, 0.0, %v1717_v43 }
 0x1b7   : > { %v1767_v28 = vrot.slane %v1750_v53, 4  ;;  %v1770_v62 = vsel %vm703_vm1, 0.0, %v1769_v0  ;;  %v1771_v30 = vrot.slane %v1762_v4, 4  ;;  %v1773_v45 = vrot.slane %v1766_v24, 4 }
 0x1b8   : > { %v1892_v60 = vrot.slane %v1714_v37, 4  ;;  %v1898_v11 = vsel %vm703_vm1, %v1717_v43, %v1706_v59  ;;  %v1903_v40 = vrot.slane %v1718_v32, 4  ;;  %v1946_v26 = vrot.slane %v1770_v62, 4 }
 0x1b9   : > { %v1768_v6 = vsel %vm703_vm1, 0.0, %v1767_v28  ;;  %v1772_v5 = vsel %vm703_vm1, 0.0, %v1771_v30  ;;  %v1774_v8 = vsel %vm703_vm1, 0.0, %v1773_v45  ;;  %v1952_v58 = vsel %vm703_vm1, %v1773_v45, %v1762_v4 }
 0x1ba   : > { %v1904_v14 = vsel %vm703_vm1, %v1903_v40, %v1716_v63  ;;  %v1957_v57 = vrot.slane %v1774_v8, 4  ;;  %v1887_v1 = vsel %vm703_vm1, %v1713_v42, %v1694_v3  ;;  %v1902_v12 = vperm.slane %v1898_v11, %v4577_v55 }
 0x1bb   : > { %v1891_v38 = vperm.slane %v1887_v1, %v4577_v55  ;;  %v1908_v44 = vperm.slane %v1904_v14, %v4577_v55  ;;  %v1941_v31 = vsel %vm703_vm1, %v1769_v0, %v1750_v53  ;;  %v1947_v21 = vsel %vm703_vm1, %v1946_v26, %v1768_v6 }
 0x1bc   : > { %v1958_v35 = vsel %vm703_vm1, %v1957_v57, %v1772_v5  ;;  %v1945_v2 = vperm.slane %v1941_v31, %v4577_v55  ;;  %v1951_v41 = vperm.slane %v1947_v21, %v4577_v55  ;;  %v1956_v27 = vperm.slane %v1952_v58, %v4577_v55  ;;  %v5322_v21 = vpop.f32.mrf.mxu3 }
 0x1bd   : > { %4026 = vmatmul.msk.bf16.vlgmr.msrb.gmra.mxu3 %vm2135_vm2, %v2116_v25  ;;  %v1712_v25 = vsel %vm703_vm1, 0.0, %v1711_v54  ;;  %v1921_v13 = vrot.slane %v1908_v44, 4  ;;  %v1962_v50 = vperm.slane %v1958_v35, %v4577_v55  ;;  %v1911_v61 = vrot.slane %v1891_v38, 4 }
 0x1be   : > { %v1893_v46 = vsel %vm703_vm1, %v1892_v60, %v1712_v25  ;;  %v1923_v23 = vrot.slane %v1902_v12, 4  ;;  %v1963_v22 = vrot.slane %v1951_v41, 4  ;;  %v1965_v51 = vrot.slane %v1945_v2, 4 }
 0x1bf   : > { %v1897_v47 = vperm.slane %v1893_v46, %v4577_v55  ;;  %v1922_v48 = vsel %vm703_vm1, %v1921_v13, %v1902_v12  ;;  %v1977_v52 = vrot.slane %v1956_v27, 4  ;;  %v1975_v34 = vrot.slane %v1962_v50, 4 }
 0x1c0   : > { %v1928_v39 = vperm.slane %v1922_v48, %v4599_v20  ;;  %v1964_v56 = vsel %vm703_vm1, %v1963_v22, %v1945_v2  ;;  %v1924_v10 = vsel %vm703_vm1, %v1908_v44, %v1923_v23  ;;  %v1966_v53 = vsel %vm703_vm1, %v1951_v41, %v1965_v51  ;;  %v2458_v23 = vld [vmem:[%s5329_s25 + $0x10] sm:$0xff] }
 0x1c1   : > { %v1909_v36 = vrot.slane %v1897_v47, 4  ;;  %v1912_v59 = vsel %vm703_vm1, %v1897_v47, %v1911_v61  ;;  %v1970_v15 = vperm.slane %v1964_v56, %v4599_v20  ;;  %v1976_v3 = vsel %vm703_vm1, %v1975_v34, %v1956_v27  ;;  %v2456_v56 = vld [vmem:[%s5329_s25] sm:$0xff] }
 0x1c2   : > { %v1920_v33 = vperm.slane %v1912_v59, %v4599_v20  ;;  %v1933_v7 = vrot.slane %v1928_v39, 4  ;;  %v1932_v42 = vperm.slane %v1924_v10, %v4599_v20  ;;  %v1982_v49 = vperm.slane %v1976_v3, %v4599_v20 }
 0x1c3   : > { %v1910_v9 = vsel %vm703_vm1, %v1909_v36, %v1891_v38  ;;  %v1978_v4 = vsel %vm703_vm1, %v1962_v50, %v1977_v52  ;;  %v1989_v54 = vrot.slane %v1970_v15, 4  ;;  %v1974_v37 = vperm.slane %v1966_v53, %v4599_v20  ;;  %v2459_v36 = vld [vmem:[%s5329_s25 + $0x18] sm:$0xff]  ;;  %v2462_v53 = vld [vmem:[%s5329_s25 + $0x30] sm:$0xff] }
 0x1c4   : > { %v1916_v29 = vperm.slane %v1910_v9, %v4599_v20  ;;  %v1937_v0 = vrot.slane %v1932_v42, 4  ;;  %v1987_v32 = vrot.slane %v1982_v49, 4  ;;  %v1986_v62 = vperm.slane %v1978_v4, %v4599_v20  ;;  %v5333_v48 = vpop.f32.mrf.mxu3 }
 0x1c5   : > { %v1990_v25 = vsel %vm703_vm1, %v1982_v49, %v1989_v54  ;;  %v1939_v60 = vrot.slane %v1920_v33, 4  ;;  %v1993_v46 = vrot.slane %v1974_v37, 4 }
 0x1c6   : > { %v1935_v43 = vrot.slane %v1916_v29, 4  ;;  %v1934_v24 = vsel %vm703_vm1, %v1933_v7, %v1916_v29  ;;  %v1938_v45 = vsel %vm703_vm1, %v1937_v0, %v1920_v33  ;;  %v1988_v40 = vsel %vm703_vm1, %v1987_v32, %v1970_v15  ;;  %v2463_v32 = vld [vmem:[%s5329_s25 + $0x38] sm:$0xff] }
 0x1c7   : > { %v2888_v63 = vpack.c.bf16 %v1934_v24, %v1934_v24  ;;  %v2890_v6 = vpack.c.bf16 %v1938_v45, %v1938_v45  ;;  %v2893_v5 = vpack.c.bf16 %v1990_v25, %v1990_v25  ;;  %v2892_v8 = vpack.c.bf16 %v1988_v40, %v1988_v40  ;;  %v2457_v25 = vld [vmem:[%s5329_s25 + $0x8] sm:$0xff] }
 0x1c8   : > { %v1936_v28 = vsel %vm703_vm1, %v1928_v39, %v1935_v43  ;;  %v1991_v14 = vrot.slane %v1986_v62, 4  ;;  %v1940_v58 = vsel %vm703_vm1, %v1932_v42, %v1939_v60  ;;  %v1994_v31 = vsel %vm703_vm1, %v1986_v62, %v1993_v46  ;;  %v2460_v42 = vld [vmem:[%s5329_s25 + $0x20] sm:$0xff] }
 0x1c9   : > { %v2889_v30 = vpack.c.bf16 %v1936_v28, %v1936_v28  ;;  %v2909_v11 = vsel %vm2907_vm3, %v2888_v63, 0  ;;  %v2947_v57 = vsel %vm2907_vm3, %v2890_v6, 0  ;;  %v3004_v1 = vsel %vm2907_vm3, %v2893_v5, 0 }
 0x1ca   : > { %2918 = vmatpush.bf16.msra.mxu2 %v2909_v11  ;;  %v2891_v38 = vpack.c.bf16 %v1940_v58, %v1940_v58  ;;  %v2985_v12 = vsel %vm2907_vm3, %v2892_v8, 0  ;;  %2956 = vmatpush.bf16.msrb.mxu0 %v2947_v57  ;;  %v1992_v44 = vsel %vm703_vm1, %v1991_v14, %v1974_v37  ;;  %v2895_v13 = vpack.c.bf16 %v1994_v31, %v1994_v31  ;;  %v2466_v58 = vld [vmem:[%s5329_s25 + $0x50] sm:$0xff] }
 0x1cb   : > { %v2928_v26 = vsel %vm2907_vm3, %v2889_v30, 0  ;;  %v2894_v35 = vpack.c.bf16 %v1992_v44, %v1992_v44 }
 0x1cc   : > { %2937 = vmatpush.bf16.msra.mxu3 %v2928_v26  ;;  %v2966_v47 = vsel %vm2907_vm3, %v2891_v38, 0  ;;  %v3042_v41 = vsel %vm2907_vm3, %v2895_v13, 0 }
 0x1cd   : > { %2975 = vmatpush.bf16.msrb.mxu1 %v2966_v47  ;;  %v3023_v2 = vsel %vm2907_vm3, %v2894_v35, 0  ;;  %v2464_v35 = vld [vmem:[%s5329_s25 + $0x40] sm:$0xff] }
 0x1ce   : > { %2994 = vmatpush.bf16.msrb.mxu2 %v2985_v12  ;;  %3032 = vmatpush.bf16.msra.mxu0 %v3023_v2 }
 0x1d0   : > { %3013 = vmatpush.bf16.msrb.mxu3 %v3004_v1 }
 0x1d1   : > { %3051 = vmatpush.bf16.msra.mxu1 %v3042_v41 }
 0x1ea   : > { %v2208_v27 = vpop.f32.mrf.mxu1  ;;  %v2189_v50 = vpop.f32.mrf.mxu0 }
 0x1eb   : > { %v2443_v61 = vmul.f32 0.35355338, %v2208_v27  ;;  %v2442_v22 = vmul.f32 0.35355338, %v2189_v50  ;;  %v2467_v50 = vld [vmem:[%s5329_s25 + $0x58] sm:$0xff] }
 0x1ed   : > { %v5335_v51 = vadd.f32 %v2459_v36, %v2443_v61  ;;  %v5337_v52 = vadd.f32 %v2458_v23, %v2442_v22 }
 0x1ef   : > { %v2497_v9 = vsel %vm2135_vm2, %v5335_v51, -inf  ;;  %v2494_v39 = vsel %vm2135_vm2, %v5337_v52, -inf }
 0x1f0   : > { %2498 = vmax.xlane.f32.xlu2 %v2497_v9  ;;  %2495 = vmax.xlane.f32.xlu0 %v2494_v39  ;;  %v2471_v39 = vld [vmem:[%s5329_s25 + $0x78] sm:$0xff] }
 0x1f2   : > { %v2210_v34 = vpop.f32.mrf.mxu1  ;;  %v2191_v59 = vpop.f32.mrf.mxu0 }
 0x1f6   : > { %v2151_v29 = vpop.f32.mrf.mxu3 }
 0x1f7   : > { %v2440_v33 = vmul.f32 0.35355338, %v2151_v29 }
 0x1f9   : > { %v5344_v10 = vadd.f32 %v2456_v56, %v2440_v33  ;;  %v2461_v33 = vld [vmem:[%s5329_s25 + $0x28] sm:$0xff] }
 0x1fb   : > { %v2488_v7 = vsel %vm2135_vm2, %v5344_v10, -inf }
 0x1fc   : > { %2489 = vmax.xlane.f32.xlu1 %v2488_v7 }
 0x1fe   : > { %v2153_v15 = vpop.f32.mrf.mxu3 }
 0x206   : > { %v2227_v3 = vpop.f32.mrf.mxu2 }
 0x207   : > { %v2444_v49 = vmul.f32 0.35355338, %v2227_v3  ;;  %v2468_v3 = vld [vmem:[%s5329_s25 + $0x60] sm:$0xff] }
 0x208   : > { %v2265_v43 = vpop.f32.mrf.mxu0 }
 0x209   : > { %v2446_v4 = vmul.f32 0.35355338, %v2265_v43  ;;  %v5350_v24 = vadd.f32 %v2460_v42, %v2444_v49 }
 0x20b   : > { %v5352_v0 = vadd.f32 %v2462_v53, %v2446_v4  ;;  %v2500_v54 = vsel %vm2135_vm2, %v5350_v24, -inf }
 0x20c   : > { %2501 = vmax.xlane.f32.xlu1 %v2500_v54 }
 0x20d   : > { %v2284_v37 = vpop.f32.mrf.mxu1  ;;  %v2506_v63 = vsel %vm2135_vm2, %v5352_v0, -inf }
 0x20e   : > { %v2447_v28 = vmul.f32 0.35355338, %v2284_v37  ;;  %2507 = vmax.xlane.f32.xlu0 %v2506_v63  ;;  %v2229_v62 = vpop.f32.mrf.mxu2 }
 0x210   : > { %v2170_v30 = vpop.f32.mrf.mxu3  ;;  %v2267_v45 = vpop.f32.mrf.mxu0  ;;  %v5360_v60 = vadd.f32 %v2463_v32, %v2447_v28 }
 0x211   : > { %v2441_v11 = vmul.f32 0.35355338, %v2170_v30  ;;  %v2465_v30 = vld [vmem:[%s5329_s25 + $0x48] sm:$0xff]  ;;  %v2470_v45 = vld [vmem:[%s5329_s25 + $0x70] sm:$0xff] }
 0x212   : > { %v2509_v6 = vsel %vm2135_vm2, %v5360_v60, -inf }
 0x213   : > { %v5362_v40 = vadd.f32 %v2457_v25, %v2441_v11 }
 0x214   : > { %2510 = vmax.xlane.f32.xlu1 %v2509_v6 }
 0x215   : > { %v2286_v5 = vpop.f32.mrf.mxu1  ;;  %v2491_v8 = vsel %vm2135_vm2, %v5362_v40, -inf }
 0x216   : > { %2492 = vmax.xlane.f32.xlu2 %v2491_v8 }
 0x218   : > { %v2172_v26 = vpop.f32.mrf.mxu3 }
 0x21b   : > { %v2341_v14 = vpop.f32.mrf.mxu0 }
 0x21c   : > { %v2450_v57 = vmul.f32 0.35355338, %v2341_v14  ;;  %v2469_v14 = vld [vmem:[%s5329_s25 + $0x68] sm:$0xff] }
 0x21d   : > { %v2360_v1 = vpop.f32.mrf.mxu1 }
 0x21e   : > { %v5369_v38 = vadd.f32 %v2466_v58, %v2450_v57  ;;  %v2451_v41 = vmul.f32 0.35355338, %v2360_v1 }
 0x220   : > { %v2246_v46 = vpop.f32.mrf.mxu3  ;;  %v2518_v12 = vsel %vm2135_vm2, %v5369_v38, -inf  ;;  %v5379_v22 = vadd.f32 %v2467_v50, %v2451_v41 }
 0x221   : > { %2519 = vmax.xlane.f32.xlu1 %v2518_v12  ;;  %v2445_v59 = vmul.f32 0.35355338, %v2246_v46  ;;  %v4249_v12 = vld [vmem:[%s6110_s9] ss:$0 sm:$0xff] }
 0x222   : > { %v2303_v44 = vpop.f32.mrf.mxu2  ;;  %v2521_v29 = vsel %vm2135_vm2, %v5379_v22, -inf }
 0x223   : > { %v2448_v47 = vmul.f32 0.35355338, %v2303_v44  ;;  %v2343_v31 = vpop.f32.mrf.mxu0  ;;  %v5390_v53 = vadd.f32 %v2461_v33, %v2445_v59  ;;  %v5417_v44 = vadd.f32 %v4249_v12, %v5322_v21 }
 0x225   : > { %v5374_v13 = vadd.f32 %v2464_v35, %v2448_v47  ;;  %v2362_v2 = vpop.f32.mrf.mxu1  ;;  %v2503_v28 = vsel %vm2135_vm2, %v5390_v53, -inf }
 0x227   : > { %v2512_v27 = vsel %vm2135_vm2, %v5374_v13, -inf }
 0x228   : > { %2513 = vmax.xlane.f32.xlu2 %v2512_v27  ;;  %v2248_v36 = vpop.f32.mrf.mxu3 }
 0x22a   : > { %v2305_v61 = vpop.f32.mrf.mxu2 }
 0x22b   : > { %v2417_v23 = vpop.f32.mrf.mxu0 }
 0x22c   : > { %v2454_v37 = vmul.f32 0.35355338, %v2417_v23 }
 0x22d   : > { %v2436_v9 = vpop.f32.mrf.mxu1 }
 0x22e   : > { %v2455_v34 = vmul.f32 0.35355338, %v2436_v9  ;;  %v5402_v6 = vadd.f32 %v2470_v45, %v2454_v37 }
 0x230   : > { %2522 = vmax.xlane.f32.xlu2 %v2521_v29  ;;  %v2322_v56 = vpop.f32.mrf.mxu3  ;;  %v5385_v7 = vadd.f32 %v2471_v39, %v2455_v34  ;;  %v2530_v8 = vsel %vm2135_vm2, %v5402_v6, -inf }
 0x231   : > { %v2449_v63 = vmul.f32 0.35355338, %v2322_v56  ;;  %v5437_v56 = vadd.f32 %v4249_v12, %v5333_v48 }
 0x232   : > { %v2379_v15 = vpop.f32.mrf.mxu2  ;;  %v2533_v42 = vsel %vm2135_vm2, %v5385_v7, -inf }
 0x233   : > { %v2452_v49 = vmul.f32 0.35355338, %v2379_v15  ;;  %v2419_v43 = vpop.f32.mrf.mxu0  ;;  %2534 = vmax.xlane.f32.xlu1 %v2533_v42  ;;  %v5400_v11 = vadd.f32 %v2465_v30, %v2449_v63 }
 0x235   : > { %v5392_v4 = vadd.f32 %v2468_v3, %v2452_v49  ;;  %v2438_v54 = vpop.f32.mrf.mxu1  ;;  %v2515_v5 = vsel %vm2135_vm2, %v5400_v11, -inf  ;;  %v4144_v3 = vpack.i.bf16 %v5437_v56, %v5417_v44 }
 0x237   : > { %v2524_v32 = vsel %vm2135_vm2, %v5392_v4, -inf }
 0x238   : > { %2525 = vmax.xlane.f32.xlu0 %v2524_v32  ;;  %2504 = vmax.xlane.f32.xlu2 %v2503_v28  ;;  %v2324_v62 = vpop.f32.mrf.mxu3 }
 0x23a   : > { %v2381_v25 = vpop.f32.mrf.mxu2 }
 0x240   : > { %2516 = vmax.xlane.f32.xlu0 %v2515_v5  ;;  %2531 = vmax.xlane.f32.xlu2 %v2530_v8  ;;  %v2398_v26 = vpop.f32.mrf.mxu3 }
 0x241   : > { %v2453_v58 = vmul.f32 0.35355338, %v2398_v26 }
 0x243   : > { %v5409_v57 = vadd.f32 %v2469_v14, %v2453_v58 }
 0x245   : > { %v2527_v1 = vsel %vm2135_vm2, %v5409_v57, -inf }
 0x246   : > { %2528 = vmax.xlane.f32.xlu1 %v2527_v1 }
 0x248   : > { %v2400_v46 = vpop.f32.mrf.mxu3 }
 0x254   : > { %1655 = vrot.lane.b32.xlu0 %v5417_v44, %s4314_s20 }
 0x25f   : > { %1643 = vrot.lane.b32.xlu1 %v5417_v44, %s4316_s22 }
 0x263   : > { %v2496_v35 = vpop.xlane.xlu0 %2495  ;;  %v2499_v50 = vpop.xlane.xlu2 %2498 }
 0x264   : > { %v2538_v47 = vsub.f32 %v5337_v52, %v2496_v35  ;;  %v2539_v61 = vsub.f32 %v5335_v51, %v2499_v50 }
 0x266   : > { %v2556_v31 = vmul.f32 1.442695, %v2538_v47  ;;  %v2558_v9 = vmul.f32 1.442695, %v2539_v61 }
 0x268   : > { %4185 = vpow2.f32 %v2556_v31 }
 0x26e   : > { %v5425_v27 = vpop.eup %4185 }
 0x26f   : > { %v2490_v2 = vpop.xlane.xlu1 %2489  ;;  %v2590_v21 = vsel %vm2135_vm2, %v5425_v27, 0.0 }
 0x270   : > { %v2536_v41 = vsub.f32 %v5344_v10, %v2490_v2  ;;  %2591 = vadd.xlane.f32.xlu2 %v2590_v21 }
 0x272   : > { %v2552_v36 = vmul.f32 1.442695, %v2536_v41 }
 0x274   : > { %4187 = vpow2.f32 %v2552_v36 }
 0x275   : > { %4189 = vpow2.f32 %v2558_v9 }
 0x27a   : > { %v5430_v23 = vpop.eup %4187 }
 0x27b   : > { %v2584_v52 = vsel %vm2135_vm2, %v5430_v23, 0.0  ;;  %v5439_v51 = vpop.eup %4189 }
 0x27c   : > { %v2593_v42 = vsel %vm2135_vm2, %v5439_v51, 0.0 }
 0x27e   : > { %2585 = vadd.xlane.f32.xlu0 %v2584_v52 }
 0x27f   : > { %v2502_v10 = vpop.xlane.xlu1 %2501 }
 0x280   : > { %v2540_v39 = vsub.f32 %v5350_v24, %v2502_v10 }
 0x281   : > { %v2508_v34 = vpop.xlane.xlu0 %2507 }
 0x282   : > { %v2542_v59 = vsub.f32 %v5352_v0, %v2508_v34  ;;  %v2560_v29 = vmul.f32 1.442695, %v2540_v39 }
 0x284   : > { %v2564_v33 = vmul.f32 1.442695, %v2542_v59  ;;  %4191 = vpow2.f32 %v2560_v29 }
 0x286   : > { %4193 = vpow2.f32 %v2564_v33 }
 0x287   : > { %v2511_v15 = vpop.xlane.xlu1 %2510 }
 0x288   : > { %v2543_v24 = vsub.f32 %v5360_v60, %v2511_v15  ;;  %4145 = vrot.lane.b32.xlu2 %v4144_v3, %s4315_s19 }
 0x289   : > { %v2493_v49 = vpop.xlane.xlu2 %2492  ;;  %2594 = vadd.xlane.f32.xlu1 %v2593_v42 }
 0x28a   : > { %v5447_v48 = vpop.eup %4191  ;;  %v2537_v0 = vsub.f32 %v5362_v40, %v2493_v49  ;;  %v2566_v43 = vmul.f32 1.442695, %v2543_v24 }
 0x28b   : > { %v2596_v54 = vsel %vm2135_vm2, %v5447_v48, 0.0 }
 0x28c   : > { %4195 = vpow2.f32 %v2566_v43  ;;  %2597 = vadd.xlane.f32.xlu0 %v2596_v54  ;;  %v5452_v37 = vpop.eup %4193  ;;  %v2554_v63 = vmul.f32 1.442695, %v2537_v0 }
 0x28d   : > { %v2602_v60 = vsel %vm2135_vm2, %v5452_v37, 0.0 }
 0x28e   : > { %4197 = vpow2.f32 %v2554_v63  ;;  %v1777_v63 = vrot.slane %v5417_v44, 4 }
 0x291   : > { %2603 = vadd.xlane.f32.xlu1 %v2602_v60 }
 0x292   : > { %v5456_v32 = vpop.eup %4195 }
 0x293   : > { %v2605_v28 = vsel %vm2135_vm2, %v5456_v32, 0.0 }
 0x294   : > { %v2520_v40 = vpop.xlane.xlu1 %2519  ;;  %2606 = vadd.xlane.f32.xlu0 %v2605_v28  ;;  %v5461_v45 = vpop.eup %4197 }
 0x295   : > { %v2546_v62 = vsub.f32 %v5369_v38, %v2520_v40  ;;  %v2587_v5 = vsel %vm2135_vm2, %v5461_v45, 0.0 }
 0x297   : > { %v2572_v30 = vmul.f32 1.442695, %v2546_v62 }
 0x299   : > { %4199 = vpow2.f32 %v2572_v30 }
 0x29b   : > { %v2514_v25 = vpop.xlane.xlu2 %2513 }
 0x29c   : > { %2588 = vadd.xlane.f32.xlu0 %v2587_v5  ;;  %v2544_v12 = vsub.f32 %v5374_v13, %v2514_v25 }
 0x29e   : > { %v2568_v35 = vmul.f32 1.442695, %v2544_v12 }
 0x29f   : > { %v5465_v8 = vpop.eup %4199 }
 0x2a0   : > { %v2614_v26 = vsel %vm2135_vm2, %v5465_v8, 0.0 }
 0x2a1   : > { %2615 = vadd.xlane.f32.xlu1 %v2614_v26 }
 0x2a3   : > { %v2523_v14 = vpop.xlane.xlu2 %2522 }
 0x2a4   : > { %v2547_v36 = vsub.f32 %v5379_v22, %v2523_v14 }
 0x2a6   : > { %v2574_v13 = vmul.f32 1.442695, %v2547_v36 }
 0x2ab   : > { %v2526_v58 = vpop.xlane.xlu0 %2525  ;;  %v2505_v1 = vpop.xlane.xlu2 %2504 }
 0x2ac   : > { %v2541_v38 = vsub.f32 %v5390_v53, %v2505_v1  ;;  %v2535_v53 = vpop.xlane.xlu1 %2534 }
 0x2ad   : > { %v2551_v33 = vsub.f32 %v5385_v7, %v2535_v53 }
 0x2ae   : > { %v2562_v46 = vmul.f32 1.442695, %v2541_v38 }
 0x2af   : > { %v2582_v3 = vmul.f32 1.442695, %v2551_v33 }
 0x2b0   : > { %4201 = vpow2.f32 %v2562_v46 }
 0x2b1   : > { %4203 = vpow2.f32 %v2568_v35 }
 0x2b3   : > { %v2517_v47 = vpop.xlane.xlu0 %2516  ;;  %v2532_v24 = vpop.xlane.xlu2 %2531 }
 0x2b4   : > { %v2545_v31 = vsub.f32 %v5400_v11, %v2517_v47  ;;  %v2548_v11 = vsub.f32 %v5392_v4, %v2526_v58  ;;  %v2550_v60 = vsub.f32 %v5402_v6, %v2532_v24 }
 0x2b6   : > { %v2570_v2 = vmul.f32 1.442695, %v2545_v31  ;;  %v5472_v41 = vpop.eup %4201  ;;  %v2576_v52 = vmul.f32 1.442695, %v2548_v11  ;;  %v2580_v14 = vmul.f32 1.442695, %v2550_v60 }
 0x2b7   : > { %v2599_v21 = vsel %vm2135_vm2, %v5472_v41, 0.0  ;;  %v5479_v50 = vpop.eup %4203 }
 0x2b8   : > { %4205 = vpow2.f32 %v2570_v2  ;;  %2600 = vadd.xlane.f32.xlu2 %v2599_v21  ;;  %v2608_v9 = vsel %vm2135_vm2, %v5479_v50, 0.0 }
 0x2b9   : > { %4207 = vpow2.f32 %v2574_v13  ;;  %v2529_v10 = vpop.xlane.xlu1 %2528 }
 0x2ba   : > { %1657 = vrot.lane.b32.xlu1 %v5437_v56, %s4314_s20  ;;  %4209 = vpow2.f32 %v2576_v52  ;;  %v2549_v34 = vsub.f32 %v5409_v57, %v2529_v10  ;;  %s489_s20 = sand.u32 1, %s4304_s30  }
 0x2bb   : > { %s3975_s19 = sshll.u32 %s489_s20, 7  ;;  %s3826_s15 = scalar_lea.sflag [#allocation3], %s489_s20 }
 0x2bc   : > { %v2578_v4 = vmul.f32 1.442695, %v2549_v34 }
 0x2be   : > { %v5481_v61 = vpop.eup %4205  ;;  %4211 = vpow2.f32 %v2578_v4 }
 0x2bf   : > { %v2611_v22 = vsel %vm2135_vm2, %v5481_v61, 0.0  ;;  %v5488_v39 = vpop.eup %4207  ;;  %4213 = vpow2.f32 %v2582_v3 }
 0x2c0   : > { %2612 = vadd.xlane.f32.xlu0 %v2611_v22  ;;  %2609 = vadd.xlane.f32.xlu2 %v2608_v9  ;;  %v2617_v59 = vsel %vm2135_vm2, %v5488_v39, 0.0  ;;  %v5493_v29 = vpop.eup %4209 }
 0x2c1   : > { %v2620_v15 = vsel %vm2135_vm2, %v5493_v29, 0.0 }
 0x2c4   : > { %v5500_v42 = vpop.eup %4211 }
 0x2c5   : > { %v2623_v57 = vsel %vm2135_vm2, %v5500_v42, 0.0  ;;  %v5504_v49 = vpop.eup %4213 }
 0x2c6   : > { %v2629_v7 = vsel %vm2135_vm2, %v5504_v49, 0.0  ;;  %v1656_v28 = vpop.permute.xlu0 %1655 }
 0x2c7   : > { %v1787_v58 = vrot.slane %v1656_v28, 4 }
 0x2c8   : > { %2618 = vadd.xlane.f32.xlu2 %v2617_v59 }
 0x2d0   : > { %2621 = vadd.xlane.f32.xlu2 %v2620_v15 }
 0x2d1   : > { %v1644_v0 = vpop.permute.xlu1 %1643 }
 0x2d2   : > { %v1775_v54 = vrot.slane %v1644_v0, 4  ;;  %v1778_v62 = vsel %vm703_vm1, %v1644_v0, %v1777_v63 }
 0x2d3   : > { %v1786_v1 = vperm.slane %v1778_v62, %v4577_v55 }
 0x2d4   : > { %1645 = vrot.lane.b32.xlu0 %v5437_v56, %s4316_s22  ;;  %v1776_v40 = vsel %vm703_vm1, %v1775_v54, %v5417_v44  ;;  %s5535_s22 = scalar_lea.vmem [#allocation2], %s3975_s19 }
 0x2d5   : > { %v1782_v25 = vperm.slane %v1776_v40, %v4577_v55  ;;  %v1813_v36 = vrot.slane %v1786_v1, 4 }
 0x2d7   : > { %v1801_v47 = vrot.slane %v1782_v25, 4 }
 0x2d8   : > { %2624 = vadd.xlane.f32.xlu2 %v2623_v57 }
 0x2e0   : > { %2630 = vadd.xlane.f32.xlu2 %v2629_v7 }
 0x2e3   : > { %v2592_v43 = vpop.xlane.xlu2 %2591 }
 0x2e4   : > { %4215 = vrcp.f32 %v2592_v43  ;;  %v2671_v46 = vand.u32 2147483647, %v2592_v43  ;;  %v2673_v12 = vand.u32 2147483648, %v2592_v43  ;;  %vm2667_vm5 = vweird.f32 %v2592_v43 }
 0x2e5   : > { %4217 = vpow2.f32 %v2580_v14 }
 0x2e6   : > { %vm2672_vm7 = vcmp.eq.f32.partialorder %v2671_v46, 8.507059e+37  ;;  %v2674_v52 = vor.u32 1.1754944e-38, %v2673_v12 }
 0x2ea   : > { %v4216_v30 = vpop.eup %4215 }
 0x2eb   : > { %v2663_v5 = vmul.f32 %v4216_v30, %v2592_v43  ;;  %v5514_v26 = vpop.permute.xlu2 %4145  ;;  %vm2668_vm4 = vweird.f32 %v4216_v30  ;;  %v5532_v0 = vpop.eup %4217 }
 0x2ec   : > { %v4147_v38 = vunpack.i.l.bf16 %v5514_v26  ;;  %vm2669_vm6 = vmor %vm2667_vm5, %vm2668_vm4 }
 0x2ed   : > { %v2664_v6 = vsub.f32 1.0, %v2663_v5 }
 0x2ee   : > { %v1788_v44 = vsel %vm703_vm1, %v1787_v58, %v4147_v38  ;;  %v1789_v35 = vrot.slane %v4147_v38, 4 }
 0x2ef   : > { %v2665_v31 = vmul.f32 %v4216_v30, %v2664_v6  ;;  %v1794_v2 = vperm.slane %v1788_v44, %v4577_v55 }
 0x2f0   : > { %v1790_v21 = vsel %vm703_vm1, %v1656_v28, %v1789_v35 }
 0x2f1   : > { %v2586_v13 = vpop.xlane.xlu0 %2585  ;;  %v2666_v53 = vadd.f32 %v4216_v30, %v2665_v31  ;;  %v1798_v11 = vperm.slane %v1790_v21, %v4577_v55  ;;  %v1799_v22 = vrot.slane %v1794_v2, 4  ;;  %v1802_v9 = vsel %vm703_vm1, %v1794_v2, %v1801_v47 }
 0x2f2   : > { %v1810_v10 = vperm.slane %v1802_v9, %v4599_v20  ;;  %4219 = vrcp.f32 %v2586_v13  ;;  %v2641_v58 = vand.u32 2147483647, %v2586_v13  ;;  %v2643_v46 = vand.u32 2147483648, %v2586_v13 }
 0x2f3   : > { %v2670_v34 = vsel %vm2669_vm6, %v4216_v30, %v2666_v53  ;;  %v1800_v59 = vsel %vm703_vm1, %v1799_v22, %v1782_v25  ;;  %v1811_v4 = vrot.slane %v1798_v11, 4  ;;  %v1814_v33 = vsel %vm703_vm1, %v1798_v11, %v1813_v36 }
 0x2f4   : > { %v2675_v15 = vsel %vm2672_vm7, %v2674_v52, %v2670_v34  ;;  %v1806_v3 = vperm.slane %v1800_v59, %v4599_v20  ;;  %v1822_v57 = vperm.slane %v1814_v33, %v4599_v20  ;;  %v1825_v7 = vrot.slane %v1810_v10, 4 }
 0x2f5   : > { %v2676_v24 = vmul.f32 %v5425_v27, %v2675_v15  ;;  %v1812_v43 = vsel %vm703_vm1, %v1811_v4, %v1786_v1  ;;  %v2626_v25 = vsel %vm2135_vm2, %v5532_v0, 0.0  ;;  %vm2637_vm9 = vweird.f32 %v2586_v13 }
 0x2f6   : > { %v1829_v54 = vrot.slane %v1822_v57, 4  ;;  %v1823_v28 = vrot.slane %v1806_v3, 4  ;;  %v1818_v40 = vperm.slane %v1812_v43, %v4599_v20  ;;  %v1826_v62 = vsel %vm703_vm1, 0.0, %v1825_v7 }
 0x2f7   : > { %3802 = vst.msk [vmem:[%s5535_s22 + $0x10] sm:$0xff] %vm2135_vm2, %v2676_v24  ;;  %v2874_v63 = vpack.c.bf16 %v2676_v24, %v2676_v24  ;;  %v1995_v27 = vsel %vm703_vm1, %v1825_v7, %v1806_v3  ;;  %v2000_v6 = vrot.slane %v1826_v62, 4  ;;  %vm2642_vm10 = vcmp.eq.f32.partialorder %v2641_v58, 8.507059e+37 }
 0x2f8   : > { %v4220_v60 = vpop.eup %4219  ;;  %v1830_v5 = vsel %vm703_vm1, 0.0, %v1829_v54  ;;  %v1824_v38 = vsel %vm703_vm1, 0.0, %v1823_v28  ;;  %v1827_v12 = vrot.slane %v1818_v40, 4  ;;  %v5548_v44 = vperm.slane %v1995_v27, %v4577_v55 }
 0x2f9   : > { %v2633_v30 = vmul.f32 %v4220_v60, %v2586_v13  ;;  %4031 = vmatmul.msk.bf16.vlgmr.msrb.gmra.mxu0 %vm2135_vm2, %v2874_v63  ;;  %vm2638_vm8 = vweird.f32 %v4220_v60  ;;  %v2011_v47 = vrot.slane %v1830_v5, 4  ;;  %v2644_v36 = vor.u32 1.1754944e-38, %v2643_v46 }
 0x2fa   : > { %vm2639_vm11 = vmor %vm2637_vm9, %vm2638_vm8  ;;  %v2001_v53 = vsel %vm703_vm1, %v2000_v6, %v1824_v38  ;;  %v2006_v11 = vsel %vm703_vm1, %v1829_v54, %v1818_v40  ;;  %v1828_v9 = vsel %vm703_vm1, 0.0, %v1827_v12  ;;  %v2019_v10 = vrot.slane %v5548_v44, 4 }
 0x2fb   : > { %v2634_v14 = vsub.f32 1.0, %v2633_v30  ;;  %v5557_v52 = vperm.slane %v2001_v53, %v4577_v55  ;;  %v5561_v4 = vperm.slane %v2006_v11, %v4577_v55  ;;  %v2012_v33 = vsel %vm703_vm1, %v2011_v47, %v1828_v9 }
 0x2fc   : > { %v2595_v1 = vpop.xlane.xlu1 %2594  ;;  %v5571_v43 = vperm.slane %v2012_v33, %v4577_v55 }
 0x2fd   : > { %4221 = vrcp.f32 %v2595_v1  ;;  %v2635_v35 = vmul.f32 %v4220_v60, %v2634_v14  ;;  %v2686_v21 = vand.u32 2147483647, %v2595_v1  ;;  %v2688_v59 = vand.u32 2147483648, %v2595_v1 }
 0x2fe   : > { %2627 = vadd.xlane.f32.xlu0 %v2626_v25  ;;  %v2031_v28 = vrot.slane %v5561_v4, 4  ;;  %vm2682_vm12 = vweird.f32 %v2595_v1  ;;  %v2017_v9 = vrot.slane %v5557_v52, 4 }
 0x2ff   : > { %v5550_v31 = vpop.xlane.xlu0 %2597  ;;  %v2636_v2 = vadd.f32 %v4220_v60, %v2635_v35  ;;  %vm5578_vm13 = vcmp.eq.f32.partialorder %v2686_v21, 8.507059e+37  ;;  %v2689_v62 = vor.u32 1.1754944e-38, %v2688_v59 }
 0x300   : > { %4223 = vrcp.f32 %v5550_v31  ;;  %v2701_v24 = vand.u32 2147483647, %v5550_v31  ;;  %v2703_v7 = vand.u32 2147483648, %v5550_v31  ;;  %vm2697_vm15 = vweird.f32 %v5550_v31 }
 0x301   : > { %v2640_v22 = vsel %vm2639_vm11, %v4220_v60, %v2636_v2  ;;  %v2032_v38 = vsel %vm703_vm1, %v5571_v43, %v2031_v28 }
 0x302   : > { %v2645_v34 = vsel %vm2642_vm10, %v2644_v36, %v2640_v22  ;;  %vm5588_vm4 = vcmp.eq.f32.partialorder %v2701_v24, 8.507059e+37  ;;  %v2704_v46 = vor.u32 1.1754944e-38, %v2703_v7  ;;  %v2040_v35 = vperm.slane %v2032_v38, %v4599_v20 }
 0x303   : > { %v4222_v13 = vpop.eup %4221  ;;  %v2646_v15 = vmul.f32 %v5430_v23, %v2645_v34  ;;  %v2020_v23 = vsel %vm703_vm1, %v5557_v52, %v2019_v10 }
 0x304   : > { %v2678_v3 = vmul.f32 %v4222_v13, %v2595_v1  ;;  %v5565_v57 = vpop.xlane.xlu1 %2603  ;;  %vm2683_vm14 = vweird.f32 %v4222_v13  ;;  %v2028_v58 = vperm.slane %v2020_v23, %v4599_v20  ;;  %v2045_v22 = vrot.slane %v2040_v35, 4 }
 0x305   : > { %4225 = vrcp.f32 %v5565_v57  ;;  %3800 = vst.msk [vmem:[%s5535_s22] sm:$0xff] %vm2135_vm2, %v2646_v15  ;;  %v2872_v60 = vpack.c.bf16 %v2646_v15, %v2646_v15  ;;  %v2731_v12 = vand.u32 2147483647, %v5565_v57  ;;  %vm2684_vm5 = vmor %vm2682_vm12, %vm2683_vm14  ;;  %v2733_v36 = vand.u32 2147483648, %v5565_v57 }
 0x306   : > { %v4224_v54 = vpop.eup %4223  ;;  %v2679_v63 = vsub.f32 1.0, %v2678_v3  ;;  %v2047_v21 = vrot.slane %v2028_v58, 4  ;;  %v2029_v1 = vrot.slane %v5571_v43, 4  ;;  %v2046_v24 = vsel %vm703_vm1, %v2045_v22, %v2028_v58 }
 0x307   : > { %v2693_v30 = vmul.f32 %v4224_v54, %v5550_v31  ;;  %v5583_v27 = vpop.xlane.xlu0 %2606  ;;  %4029 = vmatmul.msk.bf16.vlgmr.msra.gmra.mxu2 %vm2135_vm2, %v2872_v60  ;;  %vm2698_vm6 = vweird.f32 %v4224_v54  ;;  %v2898_v60 = vpack.c.bf16 %v2046_v24, %v2046_v24  ;;  %vm2727_vm9 = vweird.f32 %v5565_v57 }
 0x308   : > { %v2680_v25 = vmul.f32 %v4222_v13, %v2679_v63  ;;  %4227 = vrcp.f32 %v5583_v27  ;;  %v2048_v59 = vsel %vm703_vm1, %v2040_v35, %v2047_v21  ;;  %vm2699_vm7 = vmor %vm2697_vm15, %vm2698_vm6  ;;  %v2748_v28 = vand.u32 2147483648, %v5583_v27 }
 0x309   : > { %v2694_v5 = vsub.f32 1.0, %v2693_v30  ;;  %v2899_v3 = vpack.c.bf16 %v2048_v59, %v2048_v59  ;;  %vm2732_vm12 = vcmp.eq.f32.partialorder %v2731_v12, 8.507059e+37  ;;  %v2030_v38 = vsel %vm703_vm1, %v2029_v1, %v5561_v4 }
 0x30a   : > { %v2681_v6 = vadd.f32 %v4222_v13, %v2680_v25  ;;  %v3099_v25 = vsel %vm2907_vm3, %v2898_v60, 0  ;;  %v2749_v35 = vor.u32 1.1754944e-38, %v2748_v28  ;;  %v2036_v12 = vperm.slane %v2030_v38, %v4599_v20 }
 0x30b   : > { %v4226_v47 = vpop.eup %4225  ;;  %v2695_v2 = vmul.f32 %v4224_v54, %v2694_v5  ;;  %v3118_v30 = vsel %vm2907_vm3, %v2899_v3, 0  ;;  %3108 = vmatpush.bf16.msrb.mxu0 %v3099_v25 }
 0x30c   : > { %v2685_v53 = vsel %vm2684_vm5, %v4222_v13, %v2681_v6  ;;  %v2723_v11 = vmul.f32 %v4226_v47, %v5565_v57  ;;  %vm2728_vm8 = vweird.f32 %v4226_v47  ;;  %v2018_v57 = vsel %vm703_vm1, %v2017_v9, %v5548_v44 }
 0x30d   : > { %v2690_v10 = vsel %vm5578_vm13, %v2689_v62, %v2685_v53  ;;  %v2696_v34 = vadd.f32 %v4224_v54, %v2695_v2  ;;  %v2734_v62 = vor.u32 1.1754944e-38, %v2733_v36  ;;  %vm2729_vm10 = vmor %vm2727_vm9, %vm2728_vm8  ;;  %vm2742_vm13 = vweird.f32 %v5583_v27 }
 0x30e   : > { %v4228_v33 = vpop.eup %4227  ;;  %v2691_v15 = vmul.f32 %v5439_v51, %v2690_v10  ;;  %v2724_v13 = vsub.f32 1.0, %v2723_v11  ;;  %v2024_v44 = vperm.slane %v2018_v57, %v4599_v20  ;;  %v2041_v53 = vrot.slane %v2036_v12, 4 }
 0x30f   : > { %v2700_v52 = vsel %vm2699_vm7, %v4224_v54, %v2696_v34  ;;  %v2738_v7 = vmul.f32 %v4228_v33, %v5583_v27  ;;  %v5610_v63 = vpop.xlane.xlu0 %2588  ;;  %vm2743_vm11 = vweird.f32 %v4228_v33 }
 0x310   : > { %3803 = vst.msk [vmem:[%s5535_s22 + $0x18] sm:$0xff] %vm2135_vm2, %v2691_v15  ;;  %v2705_v51 = vsel %vm5588_vm4, %v2704_v46, %v2700_v52  ;;  %v2725_v43 = vmul.f32 %v4226_v47, %v2724_v13  ;;  %v2875_v31 = vpack.c.bf16 %v2691_v15, %v2691_v15  ;;  %4229 = vrcp.f32 %v5610_v63  ;;  %vm2744_vm14 = vmor %vm2742_vm13, %vm2743_vm11 }
 0x311   : > { %v2706_v23 = vmul.f32 %v5447_v48, %v2705_v51  ;;  %v2739_v54 = vsub.f32 1.0, %v2738_v7  ;;  %v2746_v48 = vand.u32 2147483647, %v5583_v27  ;;  %v2658_v9 = vand.u32 2147483648, %v5610_v63 }
 0x312   : > { %v2726_v40 = vadd.f32 %v4226_v47, %v2725_v43  ;;  %4032 = vmatmul.msk.bf16.vlgmr.msrb.gmra.mxu1 %vm2135_vm2, %v2875_v31  ;;  %v2042_v10 = vsel %vm703_vm1, %v2041_v53, %v2024_v44  ;;  %v2043_v34 = vrot.slane %v2024_v44, 4  ;;  %vm2652_vm5 = vweird.f32 %v5610_v63 }
 0x313   : > { %3804 = vst.msk [vmem:[%s5535_s22 + $0x20] sm:$0xff] %vm2135_vm2, %v2706_v23  ;;  %v2740_v5 = vmul.f32 %v4228_v33, %v2739_v54  ;;  %3127 = vmatpush.bf16.msrb.mxu1 %v3118_v30  ;;  %v2876_v27 = vpack.c.bf16 %v2706_v23, %v2706_v23  ;;  %vm2747_vm15 = vcmp.eq.f32.partialorder %v2746_v48, 8.507059e+37  ;;  %v2896_v15 = vpack.c.bf16 %v2042_v10, %v2042_v10 }
 0x314   : > { %v2730_v14 = vsel %vm2729_vm10, %v4226_v47, %v2726_v40  ;;  %v2616_v58 = vpop.xlane.xlu1 %2615  ;;  %v2659_v24 = vor.u32 1.1754944e-38, %v2658_v9  ;;  %v2044_v60 = vsel %vm703_vm1, %v2036_v12, %v2043_v34 }
 0x315   : > { %v2735_v6 = vsel %vm2732_vm12, %v2734_v62, %v2730_v14  ;;  %v2741_v46 = vadd.f32 %v4228_v33, %v2740_v5  ;;  %4231 = vrcp.f32 %v2616_v58  ;;  %v2793_v43 = vand.u32 2147483648, %v2616_v58 }
 0x316   : > { %v4230_v2 = vpop.eup %4229  ;;  %v2736_v36 = vmul.f32 %v5452_v37, %v2735_v6  ;;  %v2791_v54 = vand.u32 2147483647, %v2616_v58  ;;  %vm2787_vm9 = vweird.f32 %v2616_v58 }
 0x317   : > { %v2745_v47 = vsel %vm2744_vm14, %v4228_v33, %v2741_v46  ;;  %v2648_v21 = vmul.f32 %v4230_v2, %v5610_v63  ;;  %4033 = vmatmul.msk.bf16.vlgmr.msrb.gmra.mxu2 %vm2135_vm2, %v2876_v27  ;;  %vm2653_vm4 = vweird.f32 %v4230_v2  ;;  %v2656_v33 = vand.u32 2147483647, %v5610_v63 }
 0x318   : > { %3806 = vst.msk [vmem:[%s5535_s22 + $0x30] sm:$0xff] %vm2135_vm2, %v2736_v36  ;;  %v2750_v4 = vsel %vm2747_vm15, %v2749_v35, %v2745_v47  ;;  %v2878_v22 = vpack.c.bf16 %v2736_v36, %v2736_v36  ;;  %vm2654_vm6 = vmor %vm2652_vm5, %vm2653_vm4  ;;  %v2897_v63 = vpack.c.bf16 %v2044_v60, %v2044_v60  ;;  %v2794_v62 = vor.u32 1.1754944e-38, %v2793_v43 }
 0x319   : > { %v2751_v37 = vmul.f32 %v5456_v32, %v2750_v4  ;;  %v2649_v11 = vsub.f32 1.0, %v2648_v21  ;;  %v3061_v32 = vsel %vm2907_vm3, %v2896_v15, 0  ;;  %vm2657_vm7 = vcmp.eq.f32.partialorder %v2656_v33, 8.507059e+37 }
 0x31a   : > { %4035 = vmatmul.msk.bf16.vlgmr.msra.gmra.mxu0 %vm2135_vm2, %v2878_v22  ;;  %3070 = vmatpush.bf16.msra.mxu2 %v3061_v32  ;;  %vm2792_vm11 = vcmp.eq.f32.partialorder %v2791_v54, 8.507059e+37  ;;  %v3080_v48 = vsel %vm2907_vm3, %v2897_v63, 0  ;;  %v1833_v60 = vrot.slane %v5437_v56, 4 }
 0x31b   : > { %v4232_v59 = vpop.eup %4231  ;;  %3807 = vst.msk [vmem:[%s5535_s22 + $0x38] sm:$0xff] %vm2135_vm2, %v2751_v37  ;;  %v2650_v1 = vmul.f32 %v4230_v2, %v2649_v11  ;;  %v2879_v7 = vpack.c.bf16 %v2751_v37, %v2751_v37 }
 0x31c   : > { %v2783_v13 = vmul.f32 %v4232_v59, %v2616_v58  ;;  %vm2788_vm8 = vweird.f32 %v4232_v59 }
 0x31d   : > { %v2651_v3 = vadd.f32 %v4230_v2, %v2650_v1  ;;  %vm2789_vm10 = vmor %vm2787_vm9, %vm2788_vm8 }
 0x31e   : > { %v2784_v52 = vsub.f32 1.0, %v2783_v13 }
 0x31f   : > { %v2655_v51 = vsel %vm2654_vm6, %v4230_v2, %v2651_v3  ;;  %v4148_v2 = vunpack.i.h.bf16 %v5514_v26 }
 0x320   : > { %v2660_v31 = vsel %vm2657_vm7, %v2659_v24, %v2655_v51  ;;  %v2785_v23 = vmul.f32 %v4232_v59, %v2784_v52 }
 0x321   : > { %v2661_v28 = vmul.f32 %v5461_v45, %v2660_v31  ;;  %v1845_v53 = vrot.slane %v4148_v2, 4 }
 0x322   : > { %v2786_v40 = vadd.f32 %v4232_v59, %v2785_v23  ;;  %4036 = vmatmul.msk.bf16.vlgmr.msra.gmra.mxu1 %vm2135_vm2, %v2879_v7 }
 0x323   : > { %3801 = vst.msk [vmem:[%s5535_s22 + $0x8] sm:$0xff] %vm2135_vm2, %v2661_v28  ;;  %v2873_v30 = vpack.c.bf16 %v2661_v28, %v2661_v28 }
 0x324   : > { %v2790_v25 = vsel %vm2789_vm10, %v4232_v59, %v2786_v40 }
 0x325   : > { %v2795_v5 = vsel %vm2792_vm11, %v2794_v62, %v2790_v25  ;;  %4030 = vmatmul.msk.bf16.vlgmr.msra.gmra.mxu3 %vm2135_vm2, %v2873_v30 }
 0x326   : > { %v2796_v45 = vmul.f32 %v5465_v8, %v2795_v5  ;;  %3089 = vmatpush.bf16.msra.mxu3 %v3080_v48 }
 0x328   : > { %3810 = vst.msk [vmem:[%s5535_s22 + $0x50] sm:$0xff] %vm2135_vm2, %v2796_v45  ;;  %v2882_v57 = vpack.c.bf16 %v2796_v45, %v2796_v45 }
 0x32a   : > { %4039 = vmatmul.msk.bf16.vlgmr.msrb.gmra.mxu0 %vm2135_vm2, %v2882_v57 }
 0x32b   : > { %v2601_v14 = vpop.xlane.xlu2 %2600 }
 0x32c   : > { %4233 = vrcp.f32 %v2601_v14  ;;  %v2718_v36 = vand.u32 2147483648, %v2601_v14  ;;  %v1658_v44 = vpop.permute.xlu1 %1657  ;;  %v2716_v12 = vand.u32 2147483647, %v2601_v14  ;;  %vm2712_vm13 = vweird.f32 %v2601_v14 }
 0x32d   : > { %v1843_v37 = vrot.slane %v1658_v44, 4  ;;  %v1846_v32 = vsel %vm703_vm1, %v1658_v44, %v1845_v53 }
 0x32e   : > { %v2719_v11 = vor.u32 1.1754944e-38, %v2718_v36  ;;  %vm2717_vm15 = vcmp.eq.f32.partialorder %v2716_v12, 8.507059e+37  ;;  %v1854_v28 = vperm.slane %v1846_v32, %v4577_v55 }
 0x32f   : > { %v1844_v31 = vsel %vm703_vm1, %v1843_v37, %v4148_v2 }
 0x330   : > { %v1850_v48 = vperm.slane %v1844_v31, %v4577_v55 }
 0x332   : > { %v4234_v58 = vpop.eup %4233 }
 0x333   : > { %v2613_v38 = vpop.xlane.xlu0 %2612  ;;  %v2610_v6 = vpop.xlane.xlu2 %2609  ;;  %v2708_v46 = vmul.f32 %v4234_v58, %v2601_v14  ;;  %vm2713_vm12 = vweird.f32 %v4234_v58 }
 0x334   : > { %4235 = vrcp.f32 %v2613_v38  ;;  %vm2714_vm14 = vmor %vm2712_vm13, %vm2713_vm12  ;;  %v2776_v26 = vand.u32 2147483647, %v2613_v38  ;;  %v2778_v59 = vand.u32 2147483648, %v2613_v38  ;;  %v2763_v3 = vand.u32 2147483648, %v2610_v6 }
 0x335   : > { %4237 = vrcp.f32 %v2610_v6  ;;  %v2709_v35 = vsub.f32 1.0, %v2708_v46  ;;  %v2761_v52 = vand.u32 2147483647, %v2610_v6  ;;  %vm2772_vm6 = vweird.f32 %v2613_v38 }
 0x336   : > { %v2779_v43 = vor.u32 1.1754944e-38, %v2778_v59  ;;  %vm2757_vm8 = vweird.f32 %v2610_v6  ;;  %vm2777_vm9 = vcmp.eq.f32.partialorder %v2776_v26, 8.507059e+37  ;;  %v2764_v63 = vor.u32 1.1754944e-38, %v2763_v3 }
 0x337   : > { %v2710_v8 = vmul.f32 %v4234_v58, %v2709_v35  ;;  %vm2762_vm11 = vcmp.eq.f32.partialorder %v2761_v52, 8.507059e+37  ;;  %v1867_v35 = vrot.slane %v1854_v28, 4 }
 0x339   : > { %v2711_v4 = vadd.f32 %v4234_v58, %v2710_v8 }
 0x33a   : > { %v4236_v27 = vpop.eup %4235 }
 0x33b   : > { %v4238_v47 = vpop.eup %4237  ;;  %v2768_v21 = vmul.f32 %v4236_v27, %v2613_v38  ;;  %v5661_v9 = vpop.xlane.xlu2 %2618  ;;  %v2715_v34 = vsel %vm2714_vm14, %v4234_v58, %v2711_v4  ;;  %vm2773_vm4 = vweird.f32 %v4236_v27 }
 0x33c   : > { %v2753_v22 = vmul.f32 %v4238_v47, %v2610_v6  ;;  %4239 = vrcp.f32 %v5661_v9  ;;  %v2720_v1 = vsel %vm2717_vm15, %v2719_v11, %v2715_v34  ;;  %vm2758_vm5 = vweird.f32 %v4238_v47  ;;  %vm2774_vm7 = vmor %vm2772_vm6, %vm2773_vm4 }
 0x33d   : > { %v2769_v10 = vsub.f32 1.0, %v2768_v21  ;;  %v2721_v13 = vmul.f32 %v5472_v41, %v2720_v1  ;;  %vm2759_vm10 = vmor %vm2757_vm8, %vm2758_vm5  ;;  %v2806_v46 = vand.u32 2147483647, %v5661_v9  ;;  %vm2802_vm13 = vweird.f32 %v5661_v9 }
 0x33e   : > { %v2754_v33 = vsub.f32 1.0, %v2753_v22 }
 0x33f   : > { %v2770_v15 = vmul.f32 %v4236_v27, %v2769_v10  ;;  %3805 = vst.msk [vmem:[%s5535_s22 + $0x28] sm:$0xff] %vm2135_vm2, %v2721_v13  ;;  %v2877_v51 = vpack.c.bf16 %v2721_v13, %v2721_v13  ;;  %vm2807_vm15 = vcmp.eq.f32.partialorder %v2806_v46, 8.507059e+37 }
 0x340   : > { %v2755_v24 = vmul.f32 %v4238_v47, %v2754_v33 }
 0x341   : > { %v2771_v7 = vadd.f32 %v4236_v27, %v2770_v15  ;;  %4034 = vmatmul.msk.bf16.vlgmr.msrb.gmra.mxu3 %vm2135_vm2, %v2877_v51 }
 0x342   : > { %v2756_v23 = vadd.f32 %v4238_v47, %v2755_v24  ;;  %v4240_v41 = vpop.eup %4239 }
 0x343   : > { %v2775_v54 = vsel %vm2774_vm7, %v4236_v27, %v2771_v7  ;;  %v2798_v30 = vmul.f32 %v4240_v41, %v5661_v9  ;;  %v5674_v25 = vpop.xlane.xlu2 %2621  ;;  %vm2803_vm12 = vweird.f32 %v4240_v41 }
 0x344   : > { %v2780_v40 = vsel %vm2777_vm9, %v2779_v43, %v2775_v54  ;;  %v2760_v62 = vsel %vm2759_vm10, %v4238_v47, %v2756_v23  ;;  %4241 = vrcp.f32 %v5674_v25  ;;  %vm2804_vm14 = vmor %vm2802_vm13, %vm2803_vm12  ;;  %v2823_v11 = vand.u32 2147483648, %v5674_v25 }
 0x345   : > { %v5677_v5 = vmul.f32 %v5481_v61, %v2780_v40  ;;  %v2765_v45 = vsel %vm2762_vm11, %v2764_v63, %v2760_v62  ;;  %v2799_v58 = vsub.f32 1.0, %v2798_v30  ;;  %v2808_v61 = vand.u32 2147483648, %v5661_v9 }
 0x346   : > { %v2766_v57 = vmul.f32 %v5479_v50, %v2765_v45  ;;  %v1646_v14 = vpop.permute.xlu0 %1645  ;;  %v1855_v50 = vrot.slane %v1850_v48, 4  ;;  %vm2817_vm4 = vweird.f32 %v5674_v25  ;;  %v2821_v52 = vand.u32 2147483647, %v5674_v25 }
 0x347   : > { %3809 = vst.msk [vmem:[%s5535_s22 + $0x48] sm:$0xff] %vm2135_vm2, %v5677_v5  ;;  %v1831_v38 = vrot.slane %v1646_v14, 4  ;;  %v1834_v6 = vsel %vm703_vm1, %v1646_v14, %v1833_v60  ;;  %v2800_v36 = vmul.f32 %v4240_v41, %v2799_v58  ;;  %v2809_v37 = vor.u32 1.1754944e-38, %v2808_v61 }
 0x348   : > { %3808 = vst.msk [vmem:[%s5535_s22 + $0x40] sm:$0xff] %vm2135_vm2, %v2766_v57  ;;  %v1842_v2 = vperm.slane %v1834_v6, %v4577_v55  ;;  %v2880_v8 = vpack.c.bf16 %v2766_v57, %v2766_v57  ;;  %v2881_v7 = vpack.c.bf16 %v5677_v5, %v5677_v5  ;;  %v2824_v51 = vor.u32 1.1754944e-38, %v2823_v11 }
 0x349   : > { %v1832_v44 = vsel %vm703_vm1, %v1831_v38, %v5437_v56  ;;  %v2801_v21 = vadd.f32 %v4240_v41, %v2800_v36  ;;  %vm2822_vm7 = vcmp.eq.f32.partialorder %v2821_v52, 8.507059e+37 }
 0x34a   : > { %v1838_v12 = vperm.slane %v1832_v44, %v4577_v55  ;;  %v1868_v27 = vsel %vm703_vm1, %v1867_v35, %v1842_v2  ;;  %v1869_v47 = vrot.slane %v1842_v2, 4  ;;  %v4242_v4 = vpop.eup %4241  ;;  %4037 = vmatmul.msk.bf16.vlgmr.msra.gmra.mxu2 %vm2135_vm2, %v2880_v8 }
 0x34b   : > { %v1874_v53 = vperm.slane %v1868_v27, %v4599_v20  ;;  %v2805_v10 = vsel %vm2804_vm14, %v4240_v41, %v2801_v21  ;;  %v5701_v34 = vpop.xlane.xlu2 %2624  ;;  %v2813_v3 = vmul.f32 %v4242_v4, %v5674_v25  ;;  %vm2818_vm5 = vweird.f32 %v4242_v4 }
 0x34c   : > { %v1856_v56 = vsel %vm703_vm1, %v1855_v50, %v1838_v12  ;;  %v1857_v22 = vrot.slane %v1838_v12, 4  ;;  %v1870_v9 = vsel %vm703_vm1, %v1854_v28, %v1869_v47  ;;  %v2810_v1 = vsel %vm2807_vm15, %v2809_v37, %v2805_v10  ;;  %vm2819_vm6 = vmor %vm2817_vm4, %vm2818_vm5 }
 0x34d   : > { %v1862_v26 = vperm.slane %v1856_v56, %v4599_v20  ;;  %v1878_v59 = vperm.slane %v1870_v9, %v4599_v20  ;;  %v1883_v15 = vrot.slane %v1874_v53, 4  ;;  %v2811_v13 = vmul.f32 %v5488_v39, %v2810_v1 }
 0x34e   : > { %v1858_v33 = vsel %vm703_vm1, %v1850_v48, %v1857_v22  ;;  %v2814_v60 = vsub.f32 1.0, %v2813_v3  ;;  %4243 = vrcp.f32 %v5701_v34  ;;  %v2836_v30 = vand.u32 2147483647, %v5701_v34 }
 0x34f   : > { %v1866_v32 = vperm.slane %v1858_v33, %v4599_v20  ;;  %v1885_v24 = vrot.slane %v1878_v59, 4  ;;  %3811 = vst.msk [vmem:[%s5535_s22 + $0x58] sm:$0xff] %vm2135_vm2, %v2811_v13  ;;  %v1879_v43 = vrot.slane %v1862_v26, 4  ;;  %v1884_v41 = vsel %vm703_vm1, 0.0, %v1883_v15 }
 0x350   : > { %v2815_v63 = vmul.f32 %v4242_v4, %v2814_v60  ;;  %v2883_v5 = vpack.c.bf16 %v2811_v13, %v2811_v13  ;;  %v2838_v2 = vand.u32 2147483648, %v5701_v34  ;;  %vm2832_vm8 = vweird.f32 %v5701_v34 }
 0x351   : > { %v1881_v31 = vrot.slane %v1866_v32, 4  ;;  %v1886_v39 = vsel %vm703_vm1, 0.0, %v1885_v24  ;;  %v2060_v23 = vsel %vm703_vm1, %v1885_v24, %v1874_v53  ;;  %4038 = vmatmul.msk.bf16.vlgmr.msra.gmra.mxu3 %vm2135_vm2, %v2881_v7  ;;  %v1880_v38 = vsel %vm703_vm1, 0.0, %v1879_v43 }
 0x352   : > { %v2064_v54 = vperm.slane %v2060_v23, %v4577_v55  ;;  %v2065_v28 = vrot.slane %v1886_v39, 4  ;;  %v2816_v14 = vadd.f32 %v4242_v4, %v2815_v63  ;;  %4040 = vmatmul.msk.bf16.vlgmr.msrb.gmra.mxu1 %vm2135_vm2, %v2883_v5  ;;  %vm5744_vm9 = vcmp.eq.f32.partialorder %v2836_v30, 8.507059e+37 }
 0x353   : > { %v1882_v40 = vsel %vm703_vm1, 0.0, %v1881_v31  ;;  %v2049_v62 = vsel %vm703_vm1, %v1881_v31, %v1862_v26  ;;  %v5725_v58 = vpop.xlane.xlu2 %2630  ;;  %v2839_v37 = vor.u32 1.1754944e-38, %v2838_v2 }
 0x354   : > { %v2054_v48 = vrot.slane %v1882_v40, 4  ;;  %v2066_v45 = vsel %vm703_vm1, %v2065_v28, %v1884_v41  ;;  %v2085_v57 = vrot.slane %v2064_v54, 4  ;;  %v2053_v46 = vperm.slane %v2049_v62, %v4577_v55  ;;  %v4244_v61 = vpop.eup %4243 }
 0x355   : > { %v2070_v6 = vperm.slane %v2066_v45, %v4577_v55  ;;  %4245 = vrcp.f32 %v5725_v58  ;;  %v2820_v35 = vsel %vm2819_vm6, %v4242_v4, %v2816_v14  ;;  %v2828_v8 = vmul.f32 %v4244_v61, %v5701_v34 }
 0x356   : > { %v2055_v36 = vsel %vm703_vm1, %v2054_v48, %v1880_v38  ;;  %v2825_v44 = vsel %vm2822_vm7, %v2824_v51, %v2820_v35  ;;  %v2073_v27 = vrot.slane %v2053_v46, 4  ;;  %vm2833_vm10 = vweird.f32 %v4244_v61 }
 0x357   : > { %v2083_v50 = vrot.slane %v2070_v6, 4  ;;  %v5739_v25 = vmul.f32 %v5493_v29, %v2825_v44  ;;  %v2059_v12 = vperm.slane %v2055_v36, %v4577_v55  ;;  %v2086_v47 = vsel %vm703_vm1, %v2070_v6, %v2085_v57  ;;  %vm2834_vm11 = vmor %vm2832_vm8, %vm2833_vm10 }
 0x358   : > { %v2829_v21 = vsub.f32 1.0, %v2828_v8  ;;  %v2094_v53 = vperm.slane %v2086_v47, %v4599_v20  ;;  %v2866_v1 = vand.u32 2147483647, %v5725_v58  ;;  %v2868_v60 = vand.u32 2147483648, %v5725_v58 }
 0x359   : > { %3812 = vst.msk [vmem:[%s5535_s22 + $0x60] sm:$0xff] %vm2135_vm2, %v5739_v25  ;;  %v2074_v29 = vsel %vm703_vm1, %v2059_v12, %v2073_v27  ;;  %v2071_v11 = vrot.slane %v2059_v12, 4  ;;  %v2084_v56 = vsel %vm703_vm1, %v2083_v50, %v2064_v54  ;;  %vm2862_vm13 = vweird.f32 %v5725_v58 }
 0x35a   : > { %v2830_v9 = vmul.f32 %v4244_v61, %v2829_v21  ;;  %v2082_v10 = vperm.slane %v2074_v29, %v4599_v20  ;;  %v2099_v26 = vrot.slane %v2094_v53, 4  ;;  %v2090_v15 = vperm.slane %v2084_v56, %v4599_v20 }
 0x35b   : > { %v4246_v22 = vpop.eup %4245  ;;  %v2072_v33 = vsel %vm703_vm1, %v2071_v11, %v2053_v46  ;;  %v2869_v48 = vor.u32 1.1754944e-38, %v2868_v60  ;;  %vm2867_vm15 = vcmp.eq.f32.partialorder %v2866_v1, 8.507059e+37  ;;  %vm3706_vm7 = vcmask 195584  }
 0x35c   : > { %v2858_v59 = vmul.f32 %v4246_v22, %v5725_v58  ;;  %v2831_v13 = vadd.f32 %v4244_v61, %v2830_v9  ;;  %v2100_v3 = vsel %vm703_vm1, %v2099_v26, %v2082_v10  ;;  %v2078_v32 = vperm.slane %v2072_v33, %v4599_v20 }
 0x35d   : > { %v2101_v24 = vrot.slane %v2082_v10, 4  ;;  %v2902_v52 = vpack.c.bf16 %v2100_v3, %v2100_v3  ;;  %v2095_v51 = vrot.slane %v2090_v15, 4  ;;  %vm2863_vm12 = vweird.f32 %v4246_v22 }
 0x35e   : > { %v2859_v7 = vsub.f32 1.0, %v2858_v59  ;;  %v2835_v43 = vsel %vm2834_vm11, %v4244_v61, %v2831_v13  ;;  %v2097_v39 = vrot.slane %v2078_v32, 4  ;;  %vm2864_vm14 = vmor %vm2862_vm13, %vm2863_vm12 }
 0x35f   : > { %v2102_v31 = vsel %vm703_vm1, %v2094_v53, %v2101_v24  ;;  %v2840_v23 = vsel %vm5744_vm9, %v2839_v37, %v2835_v43  ;;  %v3175_v41 = vsel %vm2907_vm3, %v2902_v52, 0  ;;  %v2096_v34 = vsel %vm703_vm1, %v2095_v51, %v2078_v32 }
 0x360   : > { %v2860_v54 = vmul.f32 %v4246_v22, %v2859_v7  ;;  %v2841_v28 = vmul.f32 %v5500_v42, %v2840_v23  ;;  %3184 = vmatpush.bf16.msra.mxu0 %v3175_v41  ;;  %v2900_v63 = vpack.c.bf16 %v2096_v34, %v2096_v34  ;;  %v2903_v40 = vpack.c.bf16 %v2102_v31, %v2102_v31 }
 0x361   : > { %v2098_v62 = vsel %vm703_vm1, %v2090_v15, %v2097_v39  ;;  %v2884_v42 = vpack.c.bf16 %v5739_v25, %v5739_v25 }
 0x362   : > { %v2861_v30 = vadd.f32 %v4246_v22, %v2860_v54  ;;  %v2901_v5 = vpack.c.bf16 %v2098_v62, %v2098_v62  ;;  %3813 = vst.msk [vmem:[%s5535_s22 + $0x68] sm:$0xff] %vm2135_vm2, %v2841_v28  ;;  %v3137_v45 = vsel %vm2907_vm3, %v2900_v63, 0  ;;  %v3194_v57 = vsel %vm2907_vm3, %v2903_v40, 0 }
 0x363   : > { %3146 = vmatpush.bf16.msrb.mxu2 %v3137_v45  ;;  %3203 = vmatpush.bf16.msra.mxu1 %v3194_v57  ;;  %v2885_v38 = vpack.c.bf16 %v2841_v28, %v2841_v28 }
 0x364   : > { %v2865_v14 = vsel %vm2864_vm14, %v4246_v22, %v2861_v30  ;;  %v3156_v58 = vsel %vm2907_vm3, %v2901_v5, 0 }
 0x365   : > { %v2870_v6 = vsel %vm2867_vm15, %v2869_v48, %v2865_v14  ;;  %3165 = vmatpush.bf16.msrb.mxu3 %v3156_v58 }
 0x366   : > { %v2871_v46 = vmul.f32 %v5504_v49, %v2870_v6  ;;  %4041 = vmatmul.msk.bf16.vlgmr.msrb.gmra.mxu2 %vm2135_vm2, %v2884_v42 }
 0x368   : > { %3815 = vst.msk [vmem:[%s5535_s22 + $0x78] sm:$0xff] %vm2135_vm2, %v2871_v46  ;;  %4042 = vmatmul.msk.bf16.vlgmr.msrb.gmra.mxu3 %vm2135_vm2, %v2885_v38  ;;  %v2887_v61 = vpack.c.bf16 %v2871_v46, %v2871_v46 }
 0x36a   : > { %4044 = vmatmul.msk.bf16.vlgmr.msra.gmra.mxu1 %vm2135_vm2, %v2887_v61 }
 0x371   : > { %v2628_v35 = vpop.xlane.xlu0 %2627 }
 0x372   : > { %4247 = vrcp.f32 %v2628_v35  ;;  %v2853_v8 = vand.u32 2147483648, %v2628_v35  ;;  %v2851_v49 = vand.u32 2147483647, %v2628_v35  ;;  %vm2847_vm4 = vweird.f32 %v2628_v35 }
 0x374   : > { %v2854_v47 = vor.u32 1.1754944e-38, %v2853_v8  ;;  %vm2852_vm6 = vcmp.eq.f32.partialorder %v2851_v49, 8.507059e+37 }
 0x376   : > { %v2958_v2 = vpop.f32.mrf.mxu0 }
 0x377   : > { %v3209_v1 = vrot.slane %v2958_v2, 4 }
 0x378   : > { %v4248_v36 = vpop.eup %4247 }
 0x379   : > { %v2843_v50 = vmul.f32 %v4248_v36, %v2628_v35  ;;  %vm2848_vm3 = vweird.f32 %v4248_v36 }
 0x37a   : > { %vm2849_vm5 = vmor %vm2847_vm4, %vm2848_vm3 }
 0x37b   : > { %v2844_v44 = vsub.f32 1.0, %v2843_v50 }
 0x37d   : > { %v2845_v25 = vmul.f32 %v4248_v36, %v2844_v44 }
 0x37e   : > { %v2960_v27 = vpop.f32.mrf.mxu0 }
 0x37f   : > { %v2846_v12 = vadd.f32 %v4248_v36, %v2845_v25 }
 0x381   : > { %v2850_v21 = vsel %vm2849_vm5, %v4248_v36, %v2846_v12 }
 0x382   : > { %v2855_v4 = vsel %vm2852_vm6, %v2854_v47, %v2850_v21 }
 0x383   : > { %v2856_v53 = vmul.f32 %v5532_v0, %v2855_v4 }
 0x385   : > { %v2886_v37 = vpack.c.bf16 %v2856_v53, %v2856_v53  ;;  %3814 = vst.msk [vmem:[%s5535_s22 + $0x70] sm:$0xff] %vm2135_vm2, %v2856_v53 }
 0x387   : > { %4043 = vmatmul.msk.bf16.vlgmr.msra.gmra.mxu0 %vm2135_vm2, %v2886_v37 }
 0x38a   : > { %v2920_v29 = vpop.f32.mrf.mxu2 }
 0x38b   : > { %v3211_v33 = vrot.slane %v2920_v29, 4  ;;  %v3210_v0 = vsel %vm703_vm1, %v3209_v1, %v2920_v29 }
 0x38c   : > { %v3216_v3 = vperm.slane %v3210_v0, %v4577_v55 }
 0x38d   : > { %v3212_v13 = vsel %vm703_vm1, %v2958_v2, %v3211_v33 }
 0x38e   : > { %v3220_v52 = vperm.slane %v3212_v13, %v4577_v55  ;;  %v3235_v31 = vrot.slane %v3216_v3, 4 }
 0x38f   : > { %v2977_v11 = vpop.f32.mrf.mxu1 }
 0x390   : > { %v3221_v32 = vrot.slane %v2977_v11, 4  ;;  %v3247_v41 = vrot.slane %v3220_v52, 4 }
 0x392   : > { %v2922_v56 = vpop.f32.mrf.mxu2 }
 0x397   : > { %v2979_v22 = vpop.f32.mrf.mxu1  ;;  %v5790_v9 = vpop.f32.mrf.mxu0 }
 0x398   : > { %v3265_v33 = vrot.slane %v5790_v9, 4 }
 0x39a   : > { %v5792_v10 = vpop.f32.mrf.mxu2 }
 0x39b   : > { %v3267_v22 = vrot.slane %v5792_v10, 4 }
 0x39d   : > { %v3268_v13 = vsel %vm703_vm1, %v5790_v9, %v3267_v22 }
 0x39f   : > { %v5794_v26 = vpop.f32.mrf.mxu1  ;;  %v3036_v59 = vpop.f32.mrf.mxu0 }
 0x3a2   : > { %v2998_v15 = vpop.f32.mrf.mxu2 }
 0x3a3   : > { %v3266_v15 = vsel %vm703_vm1, %v3265_v33, %v5792_v10 }
 0x3a7   : > { %v3055_v24 = vpop.f32.mrf.mxu1  ;;  %v5800_v7 = vpop.f32.mrf.mxu0 }
 0x3a8   : > { %v2939_v60 = vpop.f32.mrf.mxu3  ;;  %v3276_v24 = vperm.slane %v3268_v13, %v4577_v55 }
 0x3a9   : > { %v3222_v51 = vsel %vm703_vm1, %v3221_v32, %v2939_v60  ;;  %v3223_v43 = vrot.slane %v2939_v60, 4  ;;  %v3277_v32 = vrot.slane %v5794_v26, 4 }
 0x3aa   : > { %v3228_v39 = vperm.slane %v3222_v51, %v4577_v55 }
 0x3ab   : > { %v3224_v23 = vsel %vm703_vm1, %v2977_v11, %v3223_v43 }
 0x3ac   : > { %v3232_v54 = vperm.slane %v3224_v23, %v4577_v55  ;;  %v3233_v34 = vrot.slane %v3228_v39, 4  ;;  %v3236_v28 = vsel %vm703_vm1, %v3228_v39, %v3235_v31  ;;  %v3303_v23 = vrot.slane %v3276_v24, 4 }
 0x3ad   : > { %v3244_v63 = vperm.slane %v3236_v28, %v4599_v20 }
 0x3ae   : > { %v3234_v40 = vsel %vm703_vm1, %v3233_v34, %v3216_v3  ;;  %v3245_v62 = vrot.slane %v3232_v54, 4  ;;  %v3248_v30 = vsel %vm703_vm1, %v3232_v54, %v3247_v41  ;;  %v3272_v3 = vperm.slane %v3266_v15, %v4577_v55 }
 0x3af   : > { %v3240_v5 = vperm.slane %v3234_v40, %v4599_v20  ;;  %v3256_v48 = vperm.slane %v3248_v30, %v4599_v20  ;;  %v3259_v45 = vrot.slane %v3244_v63, 4  ;;  %v3112_v42 = vpop.f32.mrf.mxu0 }
 0x3b0   : > { %v3246_v57 = vsel %vm703_vm1, %v3245_v62, %v3220_v52  ;;  %v2941_v14 = vpop.f32.mrf.mxu3  ;;  %v3291_v31 = vrot.slane %v3272_v3, 4 }
 0x3b1   : > { %v3252_v58 = vperm.slane %v3246_v57, %v4599_v20  ;;  %v3257_v38 = vrot.slane %v3240_v5, 4  ;;  %v3260_v6 = vsel %vm703_vm1, 0.0, %v3259_v45  ;;  %v3263_v46 = vrot.slane %v3256_v48, 4 }
 0x3b2   : > { %v3438_v61 = vrot.slane %v3260_v6, 4  ;;  %v3433_v49 = vsel %vm703_vm1, %v3259_v45, %v3240_v5  ;;  %v3321_v45 = vrot.slane %v5800_v7, 4 }
 0x3b3   : > { %v3258_v35 = vsel %vm703_vm1, 0.0, %v3257_v38  ;;  %v3261_v2 = vrot.slane %v3252_v58, 4  ;;  %v3264_v36 = vsel %vm703_vm1, 0.0, %v3263_v46  ;;  %v3444_v12 = vsel %vm703_vm1, %v3263_v46, %v3252_v58 }
 0x3b4   : > { %v3439_v50 = vsel %vm703_vm1, %v3438_v61, %v3258_v35  ;;  %v3449_v44 = vrot.slane %v3264_v36, 4  ;;  %v3437_v4 = vperm.slane %v3433_v49, %v4577_v55  ;;  %v3448_v53 = vperm.slane %v3444_v12, %v4577_v55 }
 0x3b5   : > { %v3262_v8 = vsel %vm703_vm1, 0.0, %v3261_v2  ;;  %v3443_v25 = vperm.slane %v3439_v50, %v4577_v55 }
 0x3b6   : > { %v3450_v27 = vsel %vm703_vm1, %v3449_v44, %v3262_v8  ;;  %v3469_v43 = vrot.slane %v3448_v53, 4  ;;  %v3457_v34 = vrot.slane %v3437_v4, 4 }
 0x3b7   : > { %v3454_v47 = vperm.slane %v3450_v27, %v4577_v55  ;;  %v3455_v21 = vrot.slane %v3443_v25, 4 }
 0x3b8   : > { %v3458_v58 = vsel %vm703_vm1, %v3443_v25, %v3457_v34 }
 0x3b9   : > { %v3467_v37 = vrot.slane %v3454_v47, 4  ;;  %v3456_v29 = vsel %vm703_vm1, %v3455_v21, %v3437_v4  ;;  %v3470_v63 = vsel %vm703_vm1, %v3454_v47, %v3469_v43  ;;  %v5881_v22 = vperm.slane %v3458_v58, %v4599_v20 }
 0x3ba   : > { %v5833_v59 = vperm.slane %v3456_v29, %v4599_v20  ;;  %v5864_v38 = vperm.slane %v3470_v63, %v4599_v20 }
 0x3bb   : > { %v3468_v11 = vsel %vm703_vm1, %v3467_v37, %v3448_v53 }
 0x3bc   : > { %v5829_v56 = vperm.slane %v3468_v11, %v4599_v20  ;;  %v3481_v43 = vrot.slane %v5833_v59, 4 }
 0x3be   : > { %v3479_v1 = vrot.slane %v5829_v56, 4 }
 0x3c0   : > { %v5839_v0 = vsel %vm703_vm1, %v3479_v1, %v5833_v59 }
 0x3c4   : > { %v3015_v52 = vpop.f32.mrf.mxu3 }
 0x3c5   : > { %v3278_v60 = vsel %vm703_vm1, %v3277_v32, %v3015_v52  ;;  %v3279_v51 = vrot.slane %v3015_v52, 4 }
 0x3c6   : > { %v3284_v39 = vperm.slane %v3278_v60, %v4577_v55  ;;  %v3483_v60 = vrot.slane %v5864_v38, 4 }
 0x3c7   : > { %v3280_v10 = vsel %vm703_vm1, %v5794_v26, %v3279_v51 }
 0x3c8   : > { %v3288_v9 = vperm.slane %v3280_v10, %v4577_v55  ;;  %v3289_v41 = vrot.slane %v3284_v39, 4  ;;  %v3292_v54 = vsel %vm703_vm1, %v3284_v39, %v3291_v31 }
 0x3c9   : > { %v3300_v28 = vperm.slane %v3292_v54, %v4599_v20 }
 0x3ca   : > { %v3290_v40 = vsel %vm703_vm1, %v3289_v41, %v3272_v3  ;;  %v3301_v62 = vrot.slane %v3288_v9, 4  ;;  %v3304_v30 = vsel %vm703_vm1, %v3288_v9, %v3303_v23 }
 0x3cb   : > { %v3296_v5 = vperm.slane %v3290_v40, %v4599_v20  ;;  %v3312_v48 = vperm.slane %v3304_v30, %v4599_v20  ;;  %v3315_v26 = vrot.slane %v3300_v28, 4 }
 0x3cc   : > { %v3302_v57 = vsel %vm703_vm1, %v3301_v62, %v3276_v24  ;;  %v3017_v42 = vpop.f32.mrf.mxu3 }
 0x3cd   : > { %v3072_v14 = vpop.f32.mrf.mxu2  ;;  %v3308_v6 = vperm.slane %v3302_v57, %v4599_v20  ;;  %v3313_v46 = vrot.slane %v3296_v5, 4  ;;  %v3316_v61 = vsel %vm703_vm1, 0.0, %v3315_v26  ;;  %v3319_v35 = vrot.slane %v3312_v48, 4 }
 0x3ce   : > { %v3487_v2 = vsel %vm703_vm1, %v3315_v26, %v3296_v5  ;;  %v3492_v36 = vrot.slane %v3316_v61, 4  ;;  %v3322_v50 = vsel %vm703_vm1, %v3321_v45, %v3072_v14  ;;  %v3323_v44 = vrot.slane %v3072_v14, 4 }
 0x3cf   : > { %v3314_v8 = vsel %vm703_vm1, 0.0, %v3313_v46  ;;  %v3317_v49 = vrot.slane %v3308_v6, 4  ;;  %v3320_v25 = vsel %vm703_vm1, 0.0, %v3319_v35  ;;  %v3491_v12 = vperm.slane %v3487_v2, %v4577_v55  ;;  %v3129_v53 = vpop.f32.mrf.mxu1 }
 0x3d0   : > { %v3493_v27 = vsel %vm703_vm1, %v3492_v36, %v3314_v8  ;;  %v3498_v47 = vsel %vm703_vm1, %v3319_v35, %v3308_v6  ;;  %v3503_v21 = vrot.slane %v3320_v25, 4  ;;  %v3324_v4 = vsel %vm703_vm1, %v5800_v7, %v3323_v44 }
 0x3d1   : > { %v3318_v37 = vsel %vm703_vm1, 0.0, %v3317_v49  ;;  %v3502_v29 = vperm.slane %v3498_v47, %v4577_v55  ;;  %v3328_v11 = vperm.slane %v3322_v50, %v4577_v55  ;;  %v3497_v1 = vperm.slane %v3493_v27, %v4577_v55 }
 0x3d2   : > { %v3504_v33 = vsel %vm703_vm1, %v3503_v21, %v3318_v37  ;;  %v3511_v15 = vrot.slane %v3491_v12, 4  ;;  %v3332_v13 = vperm.slane %v3324_v4, %v4577_v55  ;;  %v3333_v3 = vrot.slane %v3129_v53, 4 }
 0x3d3   : > { %v3508_v7 = vperm.slane %v3504_v33, %v4577_v55  ;;  %v3523_v32 = vrot.slane %v3502_v29, 4  ;;  %v3509_v31 = vrot.slane %v3497_v1, 4  ;;  %v3347_v39 = vrot.slane %v3328_v11, 4 }
 0x3d4   : > { %v3091_v52 = vpop.f32.mrf.mxu3  ;;  %v3512_v51 = vsel %vm703_vm1, %v3497_v1, %v3511_v15  ;;  %v3359_v63 = vrot.slane %v3332_v13, 4  ;;  %v3484_v42 = vsel %vm703_vm1, %v3483_v60, %v5881_v22  ;;  %v3482_v33 = vsel %vm703_vm1, %v5829_v56, %v3481_v43 }
 0x3d5   : > { %v3074_v24 = vpop.f32.mrf.mxu2  ;;  %v3334_v23 = vsel %vm703_vm1, %v3333_v3, %v3091_v52  ;;  %v3335_v10 = vrot.slane %v3091_v52, 4  ;;  %v3524_v9 = vsel %vm703_vm1, %v3508_v7, %v3523_v32  ;;  %v3510_v34 = vsel %vm703_vm1, %v3509_v31, %v3491_v12 }
 0x3d6   : > { %v3340_v41 = vperm.slane %v3334_v23, %v4577_v55  ;;  %v3532_v54 = vperm.slane %v3524_v9, %v4599_v20  ;;  %v3521_v28 = vrot.slane %v3508_v7, 4  ;;  %v3520_v62 = vperm.slane %v3512_v51, %v4599_v20 }
 0x3d7   : > { %v3336_v40 = vsel %vm703_vm1, %v3129_v53, %v3335_v10  ;;  %v3516_v59 = vperm.slane %v3510_v34, %v4599_v20  ;;  %v3131_v26 = vpop.f32.mrf.mxu1  ;;  %v3485_v43 = vrot.slane %v5881_v22, 4 }
 0x3d8   : > { %v3344_v30 = vperm.slane %v3336_v40, %v4577_v55  ;;  %v3345_v5 = vrot.slane %v3340_v41, 4  ;;  %v3348_v48 = vsel %vm703_vm1, %v3340_v41, %v3347_v39  ;;  %v3537_v45 = vrot.slane %v3532_v54, 4 }
 0x3d9   : > { %v3356_v57 = vperm.slane %v3348_v48, %v4599_v20  ;;  %v3522_v14 = vsel %vm703_vm1, %v3521_v28, %v3502_v29  ;;  %v3535_v58 = vrot.slane %v3516_v59, 4  ;;  %v3539_v32 = vrot.slane %v3520_v62, 4 }
 0x3da   : > { %v3346_v6 = vsel %vm703_vm1, %v3345_v5, %v3328_v11  ;;  %v3357_v46 = vrot.slane %v3344_v30, 4  ;;  %v3360_v61 = vsel %vm703_vm1, %v3344_v30, %v3359_v63  ;;  %v3538_v35 = vsel %vm703_vm1, %v3537_v45, %v3520_v62 }
 0x3db   : > { %v3352_v2 = vperm.slane %v3346_v6, %v4599_v20  ;;  %v3368_v36 = vperm.slane %v3360_v61, %v4599_v20  ;;  %v3371_v50 = vrot.slane %v3356_v57, 4  ;;  %v4154_v44 = vpack.i.bf16 %v3538_v35, %v3484_v42 }
 0x3dc   : > { %v3358_v8 = vsel %vm703_vm1, %v3357_v46, %v3332_v13  ;;  %v3093_v49 = vpop.f32.mrf.mxu3  ;;  %v3528_v25 = vperm.slane %v3522_v14, %v4599_v20  ;;  %v3540_v10 = vsel %vm703_vm1, %v3532_v54, %v3539_v32  ;;  %v3486_v28 = vsel %vm703_vm1, %v5864_v38, %v3485_v43 }
 0x3dd   : > { %v3364_v12 = vperm.slane %v3358_v8, %v4599_v20  ;;  %v3369_v27 = vrot.slane %v3352_v2, 4  ;;  %v3372_v47 = vsel %vm703_vm1, 0.0, %v3371_v50  ;;  %v3375_v21 = vrot.slane %v3368_v36, 4  ;;  %4155 = vrot.lane.b32.xlu2 %v4154_v44, %s4319_s27 }
 0x3de   : > { %v3546_v4 = vrot.slane %v3372_v47, 4  ;;  %v3533_v53 = vrot.slane %v3528_v25, 4  ;;  %v3536_v37 = vsel %vm703_vm1, %v3528_v25, %v3535_v58  ;;  %v3541_v52 = vsel %vm703_vm1, %v3371_v50, %v3352_v2 }
 0x3df   : > { %v3370_v29 = vsel %vm703_vm1, 0.0, %v3369_v27  ;;  %v3373_v11 = vrot.slane %v3364_v12, 4  ;;  %v3376_v1 = vsel %vm703_vm1, 0.0, %v3375_v21  ;;  %v4149_v3 = vpack.i.bf16 %v3536_v37, %v3482_v33 }
 0x3e0   : > { %v3547_v15 = vsel %vm703_vm1, %v3546_v4, %v3370_v29  ;;  %v3557_v13 = vrot.slane %v3376_v1, 4  ;;  %v3552_v60 = vsel %vm703_vm1, %v3375_v21, %v3364_v12  ;;  %v5929_v56 = vsel %vm703_vm1, %v3533_v53, %v3516_v59 }
 0x3e1   : > { %v5921_v7 = vperm.slane %v3547_v15, %v4577_v55  ;;  %v3374_v24 = vsel %vm703_vm1, 0.0, %v3373_v11  ;;  %4150 = vrot.lane.b32.xlu1 %v4149_v3, %s6120_s28  ;;  %v3545_v23 = vperm.slane %v3541_v52, %v4577_v55  ;;  %v5939_v41 = vperm.slane %v3552_v60, %v4577_v55 }
 0x3e2   : > { %v3558_v51 = vsel %vm703_vm1, %v3557_v13, %v3374_v24  ;;  %v4159_v62 = vpack.i.bf16 %v3540_v10, %v3486_v28 }
 0x3e3   : > { %v5933_v31 = vperm.slane %v3558_v51, %v4577_v55  ;;  %v3563_v39 = vrot.slane %v5921_v7, 4  ;;  %v3565_v11 = vrot.slane %v3545_v23, 4 }
 0x3e5   : > { %v3575_v34 = vrot.slane %v5933_v31, 4  ;;  %v3564_v22 = vsel %vm703_vm1, %v3563_v39, %v3545_v23  ;;  %v3566_v39 = vsel %vm703_vm1, %v5921_v7, %v3565_v11  ;;  %v4066_v11 = vld [vmem:[%s6111_s10] sm:$0xff] }
 0x3e6   : > { %v5952_v30 = vperm.slane %v3564_v22, %v4599_v20  ;;  %v3574_v7 = vperm.slane %v3566_v39, %v4599_v20 }
 0x3e7   : > { %v3205_v9 = vpop.f32.mrf.mxu1  ;;  %v3576_v63 = vsel %vm703_vm1, %v3575_v34, %v5939_v41  ;;  %v3577_v34 = vrot.slane %v5939_v41, 4 }
 0x3e8   : > { %v5948_v59 = vperm.slane %v3576_v63, %v4599_v20  ;;  %v3389_v42 = vrot.slane %v3205_v9, 4 }
 0x3e9   : > { %v3148_v40 = vpop.f32.mrf.mxu2  ;;  %4160 = vrot.lane.b32.xlu1 %v4159_v62, %s4321_s21 }
 0x3ea   : > { %v3587_v5 = vrot.slane %v5948_v59, 4  ;;  %v3379_v46 = vrot.slane %v3148_v40, 4 }
 0x3eb   : > { %v3167_v54 = vpop.f32.mrf.mxu3 }
 0x3ec   : > { %v5957_v38 = vsel %vm703_vm1, %v3587_v5, %v5952_v30  ;;  %v3391_v57 = vrot.slane %v3167_v54, 4  ;;  %v3390_v58 = vsel %vm703_vm1, %v3389_v42, %v3167_v54 }
 0x3ed   : > { %v3396_v61 = vperm.slane %v3390_v58, %v4577_v55 }
 0x3ee   : > { %v3392_v14 = vsel %vm703_vm1, %v3205_v9, %v3391_v57 }
 0x3ef   : > { %v3207_v48 = vpop.f32.mrf.mxu1  ;;  %v3400_v6 = vperm.slane %v3392_v14, %v4577_v55  ;;  %v3401_v49 = vrot.slane %v3396_v61, 4 }
 0x3f1   : > { %v3150_v26 = vpop.f32.mrf.mxu2  ;;  %v3413_v50 = vrot.slane %v3400_v6, 4 }
 0x3f2   : > { %v3578_v26 = vsel %vm703_vm1, %v5933_v31, %v3577_v34 }
 0x3f3   : > { %v3169_v45 = vpop.f32.mrf.mxu3 }
 0x404   : > { %v3186_v35 = vpop.f32.mrf.mxu0 }
 0x405   : > { %v3377_v2 = vrot.slane %v3186_v35, 4  ;;  %v3380_v36 = vsel %vm703_vm1, %v3186_v35, %v3379_v46  ;;  %v3593_v46 = vrot.slane %v3574_v7, 4 }
 0x406   : > { %v3388_v44 = vperm.slane %v3380_v36, %v4577_v55 }
 0x407   : > { %v3378_v8 = vsel %vm703_vm1, %v3377_v2, %v3148_v40  ;;  %v3589_v2 = vrot.slane %v5952_v30, 4 }
 0x408   : > { %v3384_v25 = vperm.slane %v3378_v8, %v4577_v55  ;;  %v3414_v12 = vsel %vm703_vm1, %v3413_v50, %v3388_v44  ;;  %v3415_v27 = vrot.slane %v3388_v44, 4 }
 0x409   : > { %v3420_v47 = vperm.slane %v3414_v12, %v4599_v20 }
 0x40a   : > { %v3402_v21 = vsel %vm703_vm1, %v3401_v49, %v3384_v25  ;;  %v3403_v4 = vrot.slane %v3384_v25, 4  ;;  %v3416_v53 = vsel %vm703_vm1, %v3400_v6, %v3415_v27  ;;  %v3586_v6 = vperm.slane %v3578_v26, %v4599_v20 }
 0x40b   : > { %v3408_v37 = vperm.slane %v3402_v21, %v4599_v20  ;;  %v3424_v29 = vperm.slane %v3416_v53, %v4599_v20  ;;  %v3429_v13 = vrot.slane %v3420_v47, 4 }
 0x40c   : > { %v3404_v1 = vsel %vm703_vm1, %v3396_v61, %v3403_v4  ;;  %v3188_v33 = vpop.f32.mrf.mxu0  ;;  %v3594_v8 = vsel %vm703_vm1, %v3586_v6, %v3593_v46 }
 0x40d   : > { %v3412_v15 = vperm.slane %v3404_v1, %v4599_v20  ;;  %v3431_v3 = vrot.slane %v3424_v29, 4  ;;  %v3425_v32 = vrot.slane %v3408_v37, 4  ;;  %v3430_v10 = vsel %vm703_vm1, 0.0, %v3429_v13 }
 0x40f   : > { %v3427_v24 = vrot.slane %v3412_v15, 4  ;;  %v3432_v52 = vsel %vm703_vm1, 0.0, %v3431_v3  ;;  %v3606_v60 = vsel %vm703_vm1, %v3431_v3, %v3420_v47  ;;  %v3426_v40 = vsel %vm703_vm1, 0.0, %v3425_v32 }
 0x410   : > { %v3610_v51 = vperm.slane %v3606_v60, %v4577_v55  ;;  %v3611_v43 = vrot.slane %v3432_v52, 4  ;;  %v3590_v47 = vsel %vm703_vm1, %v5948_v59, %v3589_v2  ;;  %v4067_v59 = vld [vmem:[%s6111_s10 + $0x8] sm:$0xff] }
 0x411   : > { %v3428_v23 = vsel %vm703_vm1, 0.0, %v3427_v24  ;;  %v3595_v9 = vsel %vm703_vm1, %v3427_v24, %v3408_v37  ;;  %3745 = vmatpush.bf16.msra.mxu2 %v4067_v59 }
 0x412   : > { %v3599_v28 = vperm.slane %v3595_v9, %v4577_v55  ;;  %v3600_v22 = vrot.slane %v3428_v23, 4  ;;  %v3612_v63 = vsel %vm703_vm1, %v3611_v43, %v3430_v10  ;;  %v3631_v54 = vrot.slane %v3610_v51, 4 }
 0x413   : > { %v3616_v62 = vperm.slane %v3612_v63, %v4577_v55 }
 0x414   : > { %v3601_v5 = vsel %vm703_vm1, %v3600_v22, %v3426_v40  ;;  %v3619_v48 = vrot.slane %v3599_v28, 4 }
 0x415   : > { %v3605_v41 = vperm.slane %v3601_v5, %v4577_v55  ;;  %v3629_v45 = vrot.slane %v3616_v62, 4  ;;  %v3632_v42 = vsel %vm703_vm1, %v3616_v62, %v3631_v54  ;;  %3746 = vmatpush.bf16.msra.mxu2 %v4066_v11 }
 0x416   : > { %v3640_v55 = vperm.slane %v3632_v42, %v4599_v20 }
 0x417   : > { %v3620_v57 = vsel %vm703_vm1, %v3605_v41, %v3619_v48  ;;  %v3617_v14 = vrot.slane %v3605_v41, 4  ;;  %v3630_v58 = vsel %vm703_vm1, %v3629_v45, %v3610_v51 }
 0x418   : > { %v3628_v61 = vperm.slane %v3620_v57, %v4599_v20  ;;  %v3636_v35 = vperm.slane %v3630_v58, %v4599_v20  ;;  %v3645_v4 = vrot.slane %v3640_v55, 4 }
 0x419   : > { %v3618_v31 = vsel %vm703_vm1, %v3617_v14, %v3599_v28 }
 0x41a   : > { %v3647_v36 = vrot.slane %v3628_v61, 4  ;;  %v3624_v50 = vperm.slane %v3618_v31, %v4599_v20  ;;  %v3641_v44 = vrot.slane %v3636_v35, 4  ;;  %v3591_v20 = vrot.slane %v3586_v6, 4 }
 0x41b   : > { %v3646_v53 = vsel %vm703_vm1, %v3645_v4, %v3628_v61 }
 0x41c   : > { %v3648_v49 = vsel %vm703_vm1, %v3640_v55, %v3647_v36  ;;  %v3643_v25 = vrot.slane %v3624_v50, 4  ;;  %v3642_v12 = vsel %vm703_vm1, %v3641_v44, %v3624_v50  ;;  %v3592_v37 = vsel %vm703_vm1, %v3591_v20, %v3574_v7 }
 0x41d   : > { %v4174_v27 = vpack.i.bf16 %v3648_v49, %v3594_v8  ;;  %v4169_v29 = vpack.i.bf16 %v3646_v53, %v3592_v37 }
 0x41e   : > { %v3644_v30 = vsel %vm703_vm1, %v3636_v35, %v3643_v25  ;;  %vm3701_vm1 = vcmask 130048  }
 0x41f   : > { %4175 = vrot.lane.b32.xlu2 %v4174_v27, %s4321_s21  ;;  %v4164_v21 = vpack.i.bf16 %v3644_v30, %v3590_v47  ;;  %s3845_s21 = sshll.u32 %s5535_s22, 4  ;;  %s4270_s22 = scalar_lea.hbm %s6115_s14, 256  ;;  %s3846_s21 = int_to_ptr.vmem [resolvable:$true] %s3845_s21 }
 0x421   : > { %4165 = vrot.lane.b32.xlu1 %v4164_v21, %s6120_s28 }
 0x429   : > { %4170 = vrot.lane.b32.xlu1 %v4169_v29, %s4319_s27  ;;  %s4068_s27 = sshll.u32 %s4419_s17, 7 }
 0x42a   : > { %s3844_s26 = scalar_lea.hbm %s6115_s14, %s4068_s27 }
 0x42b   : > { %s3847_s19 = sshll.u32 %s3844_s26, 4  ;;  %s3848_s19 = int_to_ptr.hbm [resolvable:$true] %s3847_s19 }
 0x42c   : > { %s4264_s28 = sshra.s32 %s3848_s19, 4  ;;  %s4265_s28 = int_to_ptr.hbm [resolvable:$true] %s4264_s28 }
 0x42d   : > { %s4266_s0 = scalar_lea.hbm %s4265_s28, 128  ;;  %p4271_p1 = scmp.lt.s32.totalorder %s4265_s28, %s6115_s14 }
 0x42e   : > { %p4267_p12 = scmp.ne.s32.totalorder %s4265_s28, %s4266_s0  ;;  %p4272_p2 = scmp.lt.s32.totalorder %s4270_s22, %s4266_s0 }
 0x430   : > { %p4268_p13 = pnand %p4267_p12, %p4436_p5  ;;  %p4273_p3 = por %p4272_p2, %p4271_p1 }
 0x432   : > { %p4269_p0 = pneg %p4268_p13 }
 0x434   : > { %p4274_p4 = pnand %p4273_p3, %p4269_p0 }
 0x437   : > { %v4156_v13 = vpop.permute.xlu2 %4155 }
 0x438   : > { %v4158_v24 = vunpack.i.h.bf16 %v4156_v13  ;;  %v4157_v52 = vunpack.i.l.bf16 %v4156_v13 }
 0x453   : > { %v4151_v1 = vpop.permute.xlu1 %4150 }
 0x454   : > { %v4153_v33 = vunpack.i.h.bf16 %v4151_v1  ;;  %v4152_v15 = vunpack.i.l.bf16 %v4151_v1 }
 0x456   : > { %v3698_v3 = vsel %vm2135_vm2, %v5929_v56, %v4153_v33  ;;  %v3697_v32 = vsel %vm2135_vm2, %v5839_v0, %v4152_v15 }
 0x457   : > { %v3702_v39 = vsel %vm3701_vm1, %v3697_v32, %v4157_v52  ;;  %v3703_v23 = vsel %vm3701_vm1, %v3698_v3, %v4158_v24 }
 0x45b   : > { %v4161_v60 = vpop.permute.xlu1 %4160 }
 0x45c   : > { %v4163_v51 = vunpack.i.h.bf16 %v4161_v60  ;;  %v4162_v43 = vunpack.i.l.bf16 %v4161_v60 }
 0x45e   : > { %v3707_v10 = vsel %vm3706_vm7, %v3702_v39, %v4162_v43  ;;  %v3708_v9 = vsel %vm3706_vm7, %v3703_v23, %v4163_v51 }
 0x45f   : > { %v3711_v34 = vpack.c.bf16 %v3708_v9, %v3707_v10 }
 0x461   : > { %4053 = vmatmul.msk.bf16.vlgmr.msra.gmra.mxu2 %vm558_vm0, %v3711_v34 }
 0x479   : > { %v4176_v22 = vpop.permute.xlu2 %4175 }
 0x47a   : > { %v4178_v54 = vunpack.i.h.bf16 %v4176_v22  ;;  %v4177_v7 = vunpack.i.l.bf16 %v4176_v22 }
 0x493   : > { %v4166_v56 = vpop.permute.xlu1 %4165 }
 0x494   : > { %v4168_v0 = vunpack.i.h.bf16 %v4166_v56  ;;  %v4167_v28 = vunpack.i.l.bf16 %v4166_v56 }
 0x496   : > { %v3700_v5 = vsel %vm2135_vm2, %v3642_v12, %v4168_v0  ;;  %v3699_v48 = vsel %vm2135_vm2, %v5957_v38, %v4167_v28 }
 0x49b   : > { %v4171_v63 = vpop.permute.xlu1 %4170 }
 0x49c   : > { %v4173_v40 = vunpack.i.h.bf16 %v4171_v63  ;;  %v4172_v62 = vunpack.i.l.bf16 %v4171_v63 }
 0x49e   : > { %v3704_v26 = vsel %vm3701_vm1, %v3699_v48, %v4172_v62  ;;  %v3705_v41 = vsel %vm3701_vm1, %v3700_v5, %v4173_v40 }
 0x49f   : > { %v3709_v45 = vsel %vm3706_vm7, %v3704_v26, %v4177_v7  ;;  %v3710_v57 = vsel %vm3706_vm7, %v3705_v41, %v4178_v54 }
 0x4a0   : > { %v3712_v42 = vpack.c.bf16 %v3710_v57, %v3709_v45 }
 0x4a2   : > { %4054 = vmatmul.msk.bf16.gmra.mxu2 %vm558_vm0, %v3712_v42 }
 0x4a3   : > { %4277 = shalt.err (!%p4274_p4)
}
 0x4a4   : > { %s4322_s20 = smov 128   ;;  %s6149_s27 = smov 8   ;;  %v4184_v38 = vld [vmem:[%s6112_s11] ss:$0 sm:$0xff]  ;;  %vm3796_vm2 = vcmask 1040384  }
 0x4a5   : > { %4071 = dma.vmem_to_hbm [thread:$0]  (%p4436_p5), %s3846_s21, 2048, %s3848_s19, %s3826_s15, %s4322_s20, %s4322_s20, %s6149_s27  }
 0x4a6   : > { %s6150_s1 = sshll.u32 %s6157_s18, 3  ;;  %p510_p5 = scmp.lt.s32.totalorder %s4419_s17, 1 }
 0x4a7   : > { %s508_s0 = scalar_lea.vmem %s6113_s12, %s6150_s1 }
 0x4a8   : > { %s6161_s17 = smov (!%p510_p5, %s4419_s17), 1 }
 0x4a9   : > { %s3982_s5 = sshll.u32 %s6161_s17, 1 }
 0x4aa   : > { %s513_s15 = scalar_lea.vmem %s6114_s13, %s3982_s5 }
 0x4e4   : > { %v3748_v14 = vpop.f32.mrf.mxu2 }
 0x4e5   : > { %v3749_v58 = vadd.f32 %v4184_v38, %v3748_v14 }
 0x4e7   : > { %v3758_v6 = vadd.f32 %v3749_v58, %v4479_v16 }
 0x4e9   : > { %3762 = vst.msk [vmem:[%s508_s0] sm:$0xff] %vm558_vm0, %v3758_v6  ;;  %v3779_v50 = vmul.f32 %v3758_v6, %v3758_v6  ;;  %v3766_v49 = vsel %vm558_vm0, %v3758_v6, 0.0 }
 0x4eb   : > { %v3783_v47 = vsel %vm558_vm0, %v3779_v50, 0.0 }
 0x4ec   : > { %v3750_v46 = vpop.f32.mrf.mxu2 }
 0x4ed   : > { %v3751_v61 = vadd.f32 %v4184_v38, %v3750_v46 }
 0x4ef   : > { %v3759_v35 = vadd.f32 %v3751_v61, %v4481_v17 }
 0x4f1   : > { %3763 = vst.msk [vmem:[%s508_s0 + $0x8] sm:$0xff] %vm558_vm0, %v3759_v35  ;;  %v3780_v36 = vmul.f32 %v3759_v35, %v3759_v35  ;;  %v3767_v44 = vsel %vm558_vm0, %v3759_v35, 0.0 }
 0x4f2   : > { %v3768_v27 = vadd.f32 %v3767_v44, %v3766_v49 }
 0x4f3   : > { %v3784_v25 = vsel %vm558_vm0, %v3780_v36, 0.0 }
 0x4f4   : > { %v3785_v21 = vadd.f32 %v3784_v25, %v3783_v47 }
 0x525   : > { %v3753_v2 = vpop.f32.mrf.mxu2 }
 0x526   : > { %v3754_v31 = vadd.f32 %v4184_v38, %v3753_v2 }
 0x528   : > { %v3760_v55 = vadd.f32 %v3754_v31, %v4483_v18 }
 0x52a   : > { %3764 = vst.msk [vmem:[%s508_s0 + $0x10] sm:$0xff] %vm558_vm0, %v3760_v55  ;;  %v3781_v8 = vmul.f32 %v3760_v55, %v3760_v55  ;;  %v3769_v17 = vsel %vm558_vm0, %v3760_v55, 0.0 }
 0x52b   : > { %v3770_v4 = vadd.f32 %v3769_v17, %v3768_v27 }
 0x52c   : > { %v3786_v18 = vsel %vm558_vm0, %v3781_v8, 0.0 }
 0x52d   : > { %v3755_v16 = vpop.f32.mrf.mxu2  ;;  %v3787_v37 = vadd.f32 %v3786_v18, %v3785_v21 }
 0x52e   : > { %v3756_v12 = vadd.f32 %v4184_v38, %v3755_v16 }
 0x530   : > { %v3761_v30 = vadd.f32 %v3756_v12, %v4485_v19 }
 0x532   : > { %3765 = vst.msk [vmem:[%s508_s0 + $0x18] sm:$0xff] %vm558_vm0, %v3761_v30  ;;  %v3771_v20 = vsel %vm558_vm0, %v3761_v30, 0.0  ;;  %v3782_v53 = vmul.f32 %v3761_v30, %v3761_v30 }
 0x533   : > { %v3772_v29 = vadd.f32 %v3771_v20, %v3770_v4 }
 0x534   : > { %v3788_v59 = vsel %vm558_vm0, %v3782_v53, 0.0  ;;  %vm3798_vm0 = vcmask 254976  }
 0x535   : > { %v3773_v11 = vrot.slane %v3772_v29, 4  ;;  %v3789_v1 = vadd.f32 %v3788_v59, %v3787_v37 }
 0x537   : > { %v3774_v33 = vadd.f32 %v3773_v11, %v3772_v29  ;;  %v3790_v15 = vrot.slane %v3789_v1, 4 }
 0x539   : > { %v3775_v13 = vrot.slane %v3774_v33, 2  ;;  %v3791_v3 = vadd.f32 %v3790_v15, %v3789_v1 }
 0x53b   : > { %v3776_v19 = vadd.f32 %v3775_v13, %v3774_v33  ;;  %v3792_v32 = vrot.slane %v3791_v3, 2 }
 0x53d   : > { %v3777_v24 = vrot.slane %v3776_v19, 1  ;;  %v3793_v52 = vadd.f32 %v3792_v32, %v3791_v3 }
 0x53f   : > { %v3794_v60 = vrot.slane %v3793_v52, 1  ;;  %v3778_v51 = vadd.f32 %v3777_v24, %v3776_v19 }
 0x541   : > { %v3795_v43 = vadd.f32 %v3794_v60, %v3793_v52 }
 0x543   : > { %v3797_v39 = vsel %vm3796_vm2, %v3778_v51, %v3795_v43 }
 0x544   : > { %3799 = vst.msk [vmem:[%s513_s15] sm:$0x3] %vm3798_vm0, %v3797_v39 }
 0x545 PF: > { %p4077_p7 = scmp.ge.s32.totalorder %s4312_s16, 2  ;;  %s3877_s28 = sand.u32 1, %s4300_s29  }
 0x546   : > { %s3878_s17 = scalar_lea.sflag [#allocation3], %s3877_s28 }
 0x547   : > { %p4074_p8 = pnand %p4077_p7, %p4440_p6 }
 0x549   : > { %p4075_p9 = pneg %p4074_p8 }
 0x54b   : > { %4295 = dma.done.wait (%p4075_p9), %s3878_s17, 2048  }
 0x54c   : > { %4297 = vsyncadd (%p4075_p9), %s3878_s17, 4294965248  ;;  %s6151_s16 = sld [smem:[#allocation6_spill]]  ;;  %s6154_s29 = smov %s4304_s30 }
 0x54d   : > { %s6152_s21 = sld [smem:[#allocation5_spill]] }
 0x54e   : > { %s6153_s15 = sld [smem:[#allocation7_spill]] }
 0x552   : > { %p25_p10 = scmp.ge.s32.totalorder %s6151_s16, 4  }
 0x553   : > { %s6155_s30 = smov %s6152_s21 }
 0x554   :  { %27 = sbr.rel (!%p25_p10) target bundleno = 10 (0xa), region = 130 }
 0x559   :  { %3884 = vsyncpa [#allocation3], 1 }
 0x55a   :  { %3886 = vsyncpa [#allocation3 + $0x1], 1 }

</bundles_post_ra>
